<compile_context>
chip_gen: v6e
topology: v6e:2x2x1
jax: 0.10.0
libtpu: 0.0.40
codegen_flags: <defaults>
</compile_context>

<pallas_src>
import functools

import jax
import jax.numpy as jnp
from jax.experimental import pallas as pl
from jax.experimental.pallas import tpu as pltpu


NEG_SLOPE = 0.2
_PAD_MAP = {96: 128}  # lane-dense channel padding (zeros; semantics preserving)

# (Cin, Cout, k, stride, pad) for the 9 convs of `main`
_CONV_SPECS = [
    (3,   96, 3, 1, 1),
    (96,  96, 3, 1, 1),
    (96,  96, 3, 2, 1),
    (96, 192, 3, 1, 1),
    (192, 192, 3, 1, 1),
    (192, 192, 3, 2, 1),
    (192, 192, 3, 1, 0),
    (192, 192, 1, 1, 0),   # fused into the tail kernel
    (192, 192, 1, 1, 0),   # fused into the tail kernel
]


# ---------------------------------------------------------------------------
# Pallas kernels
# ---------------------------------------------------------------------------
def _mm_leaky_kernel(x_ref, w_ref, o_ref, *, neg_slope, apply_act):
    # (tm, K) @ (K, N) on the MXU with f32 accumulation, fused LeakyReLU(0.2).
    acc = jnp.dot(x_ref[...], w_ref[...], preferred_element_type=jnp.float32)
    if apply_act:
        acc = jnp.where(acc > 0, acc, neg_slope * acc)
    o_ref[...] = acc.astype(o_ref.dtype)


def _pick_tm(m, target=256):
    """Largest M-tile <= target that divides M (falls back to a single block)."""
    if m <= target:
        return m
    for t in (256, 128, 64, 32, 16, 8):
        if m % t == 0:
            return t
    return m


def matmul_act(x, w, *, neg_slope=NEG_SLOPE, apply_act=True, out_dtype=None):
    """Tiled, pipelined Pallas matmul with fused LeakyReLU.

    Only M is tiled (the K-resident weight stays in VMEM -- ample at these
    channel counts); the M axis is "parallel" so v7x can shard row-tiles across
    its two TensorCores, and BlockSpec double-buffering overlaps the HBM DMA of
    the im2col slab with MXU compute.
    """
    m, k = x.shape
    k2, n_out = w.shape
    assert k == k2
    out_dtype = out_dtype or x.dtype
    tm = _pick_tm(m)
    grid = (m // tm,)

    kernel = functools.partial(
        _mm_leaky_kernel, neg_slope=neg_slope, apply_act=apply_act)
    bytes_accessed = int(
        m * k * x.dtype.itemsize
        + k * n_out * w.dtype.itemsize
        + m * n_out * jnp.dtype(out_dtype).itemsize)
    return pl.pallas_call(
        kernel,
        out_shape=jax.ShapeDtypeStruct((m, n_out), out_dtype),
        grid=grid,
        in_specs=[
            pl.BlockSpec((tm, k), lambda i: (i, 0)),
            pl.BlockSpec((k, n_out), lambda i: (0, 0)),  # weight resident
        ],
        out_specs=pl.BlockSpec((tm, n_out), lambda i: (i, 0)),
        compiler_params=pltpu.CompilerParams(
            dimension_semantics=("parallel",)),
        cost_estimate=pl.CostEstimate(
            flops=2 * m * k * n_out, transcendentals=0,
            bytes_accessed=bytes_accessed),
    )(x, w)


def _tail_kernel(x_ref, w8_ref, w9_ref, wl_ref, p_ref, feat_ref, logit_ref, *,
                 neg_slope):
    # Fused: 1x1 conv + LeakyReLU + 1x1 conv + LeakyReLU + global-avg-pool
    #        (block-diagonal pooling matmul) + weight-normed Linear head.
    a = jnp.dot(x_ref[...], w8_ref[...], preferred_element_type=jnp.float32)
    a = jnp.where(a > 0, a, neg_slope * a).astype(x_ref.dtype)
    b = jnp.dot(a, w9_ref[...], preferred_element_type=jnp.float32)
    b = jnp.where(b > 0, b, neg_slope * b)                       # (N*hw, C) f32
    pooled = jnp.dot(p_ref[...], b, preferred_element_type=jnp.float32)
    feat_ref[...] = pooled.astype(feat_ref.dtype)                # (N, C)
    logit_ref[...] = jnp.dot(
        pooled, wl_ref[...], preferred_element_type=jnp.float32
    ).astype(logit_ref.dtype)


def tail_head(x2d, w8, w9, w_lin, pool_mat, *, neg_slope=NEG_SLOPE):
    m, c = x2d.shape
    n_img, m2 = pool_mat.shape
    assert m2 == m
    nc = w_lin.shape[1]
    kernel = functools.partial(_tail_kernel, neg_slope=neg_slope)
    return pl.pallas_call(
        kernel,
        out_shape=(jax.ShapeDtypeStruct((n_img, c), jnp.float32),
                   jax.ShapeDtypeStruct((n_img, nc), jnp.float32)),
        grid=(1,),
        in_specs=[
            pl.BlockSpec((m, c), lambda i: (0, 0)),
            pl.BlockSpec((c, c), lambda i: (0, 0)),
            pl.BlockSpec((c, c), lambda i: (0, 0)),
            pl.BlockSpec((c, nc), lambda i: (0, 0)),
            pl.BlockSpec((n_img, m), lambda i: (0, 0)),
        ],
        out_specs=(
            pl.BlockSpec((n_img, c), lambda i: (0, 0)),
            pl.BlockSpec((n_img, nc), lambda i: (0, 0)),
        ),
        compiler_params=pltpu.CompilerParams(
            dimension_semantics=("arbitrary",)),
    )(x2d, w8, w9, w_lin, pool_mat)


# ---------------------------------------------------------------------------
# Glue: weight-norm, im2col, layer wrappers
# ---------------------------------------------------------------------------
def _weight_norm_conv(v, g):
    # v: (Cout, Cin, kh, kw), g: (Cout,)  -> w = g * v / ||v||
    norm = jnp.sqrt(jnp.sum(v * v, axis=(1, 2, 3), keepdims=True))
    return v * (g.reshape(-1, 1, 1, 1) / norm)


def _weight_norm_linear(v, g):
    norm = jnp.sqrt(jnp.sum(v * v, axis=1, keepdims=True))
    return v * (g.reshape(-1, 1) / norm)


def prepare_params(params):
    """Hoisted once-per-parameter-set weight prep: weight-norm, (kh,kw,Cin,Cout)
    reshape, lane-dense channel padding (96->128) and bf16 cast."""
    conv_mats = []
    for (cin, cout, ks, _, _), p in zip(_CONV_SPECS, params["convs"]):
        w = _weight_norm_conv(p["v"], p["g"])            # (cout, cin, ks, ks)
        cin_p = _PAD_MAP.get(cin, cin)
        cout_p = _PAD_MAP.get(cout, cout)
        w = jnp.pad(w, ((0, cout_p - cout), (0, cin_p - cin), (0, 0), (0, 0)))
        w_mat = jnp.transpose(w, (2, 3, 1, 0)).reshape(ks * ks * cin_p, cout_p)
        conv_mats.append(w_mat.astype(jnp.bfloat16))
    w_lin = _weight_norm_linear(params["linear"]["v"], params["linear"]["g"])
    return {
        "conv_mats": conv_mats[:7],
        "w8": conv_mats[7],
        "w9": conv_mats[8],
        "w_lin": jnp.transpose(w_lin, (1, 0)).astype(jnp.float32),  # (192, nc)
    }


def conv2d_im2col_leaky(x_nhwc, w_mat, *, ksize, stride, pad):
    """Weight-normed Conv2d (bias=False) + LeakyReLU via im2col + Pallas matmul."""
    nb, h, w_dim, cin = x_nhwc.shape
    k_tot, cout = w_mat.shape
    assert k_tot == ksize * ksize * cin
    xp = jnp.pad(x_nhwc, ((0, 0), (pad, pad), (pad, pad), (0, 0)))
    hp, wp = h + 2 * pad, w_dim + 2 * pad
    hout = (hp - ksize) // stride + 1
    wout = (wp - ksize) // stride + 1

    cols = []
    for i in range(ksize):
        for j in range(ksize):
            cols.append(
                xp[:, i: i + stride * (hout - 1) + 1: stride,
                      j: j + stride * (wout - 1) + 1: stride, :])
    patches = jnp.concatenate(cols, axis=-1)        # (N, Hout, Wout, K)
    x2d = patches.reshape(nb * hout * wout, k_tot)
    # TODO(synk): move the kh*kw tap loop into the Pallas kernel (grid axis over
    # taps accumulating into a VMEM scratch) to avoid materializing this
    # K-inflated patch slab in HBM at larger batch / resolution.
    y2d = matmul_act(x2d, w_mat, apply_act=True)
    return y2d.reshape(nb, hout, wout, cout)


# ---------------------------------------------------------------------------
# Model definition (_D)
# ---------------------------------------------------------------------------
def init_params(key, num_classes):
    params = {"convs": []}
    keys = jax.random.split(key, len(_CONV_SPECS) + 1)
    for k, (cin, cout, ks, _, _) in zip(keys[:-1], _CONV_SPECS):
        std = (2.0 / (cin * ks * ks)) ** 0.5
        v = jax.random.normal(k, (cout, cin, ks, ks), dtype=jnp.float32) * std
        # PyTorch weight_norm init: g = ||v|| per output channel
        g = jnp.sqrt(jnp.sum(v * v, axis=(1, 2, 3)))
        params["convs"].append({"v": v, "g": g})
    kl = keys[-1]
    std = (1.0 / 192.0) ** 0.5
    v_lin = jax.random.normal(kl, (num_classes, 192), dtype=jnp.float32) * std
    g_lin = jnp.sqrt(jnp.sum(v_lin * v_lin, axis=1))
    params["linear"] = {"v": v_lin, "g": g_lin}
    return params


@functools.partial(jax.jit, static_argnames=("feature",))
def discriminator_forward(prepped, x_nchw, feature=False):
    # NCHW (PyTorch convention) -> NHWC; bf16 activations, f32 accumulation.
    x = jnp.transpose(x_nchw, (0, 2, 3, 1)).astype(jnp.bfloat16)

    # Dropout2d(p=0.2 / 0.5): identity at inference time.
    for (cin, cout, ks, stride, pad), w_mat in zip(_CONV_SPECS[:7],
                                                   prepped["conv_mats"]):
        x = conv2d_im2col_leaky(x, w_mat, ksize=ks, stride=stride, pad=pad)

    n_img, hc, wc, c = x.shape               # (N, 2, 2, 192) at 16x16 input
    x2d = x.reshape(n_img * hc * wc, c)
    pool_mat = jnp.repeat(jnp.eye(n_img, dtype=jnp.float32),
                          hc * wc, axis=1) / float(hc * wc)

    feat, logits = tail_head(x2d, prepped["w8"], prepped["w9"],
                             prepped["w_lin"], pool_mat)
    if feature:
        # match PyTorch shape (N, 192, 1, 1)
        return feat[:, :, None, None]
    return jnp.squeeze(logits)


# ---------------------------------------------------------------------------
if __name__ == "__main__":
    num_classes = 10
    key = jax.random.PRNGKey(0)
    k_param, k_x = jax.random.split(key)

    params = init_params(k_param, num_classes)
    prepped = prepare_params(params)          # hoisted weight prep (runs once)
    x = jax.random.normal(k_x, (2, 3, 16, 16), dtype=jnp.float32)  # NCHW

    out = discriminator_forward(prepped, x)
    out = jax.block_until_ready(out)
    assert out.shape == (2, num_classes), out.shape
    assert bool(jnp.all(jnp.isfinite(out)))
    print("KERNEL_OK")
</pallas_src>

<mosaic_0001>
module attributes {stable_mosaic.version = 11 : i64} {
  func.func @_mm_leaky_kernel(%arg0: i32, %arg1: memref<256x27xbf16, #tpu.memory_space<vmem>>, %arg2: memref<27x128xbf16, #tpu.memory_space<vmem>>, %arg3: memref<256x128xbf16, #tpu.memory_space<vmem>>) attributes {dimension_semantics = [#tpu.dimension_semantics<parallel>], iteration_bounds = array<i64: 2>, scalar_prefetch = 0 : i64, scratch_operands = 0 : i64, tpu.core_type = #tpu.core_type<tc>, window_params = [{transform_indices = @transform_0, window_bounds = array<i64: 256, 27>}, {pipeline_mode = #tpu.pipeline_mode<synchronous>, transform_indices = @transform_1, window_bounds = array<i64: 27, 128>}, {transform_indices = @transform_2, window_bounds = array<i64: 256, 128>}]} {
    %c0 = arith.constant 0 : index
    %c0_0 = arith.constant 0 : index
    %0 = vector.load %arg1[%c0, %c0_0] : memref<256x27xbf16, #tpu.memory_space<vmem>>, vector<256x27xbf16>
    %c0_1 = arith.constant 0 : index
    %c0_2 = arith.constant 0 : index
    %1 = vector.load %arg2[%c0_1, %c0_2] : memref<27x128xbf16, #tpu.memory_space<vmem>>, vector<27x128xbf16>
    %cst = arith.constant dense<0.000000e+00> : vector<256x128xf32>
    %2 = tpu.matmul %0, %1, %cst {dimension_numbers = #tpu.dot_dimension_numbers<[1], [0], [0], [1], [0, 0, 1, 1], [], []>} : vector<256x27xbf16>, vector<27x128xbf16>, vector<256x128xf32> -> vector<256x128xf32>
    %cst_3 = arith.constant 0.000000e+00 : f32
    %3 = vector.broadcast %cst_3 : f32 to vector<256x128xf32>
    %4 = arith.cmpf ogt, %2, %3 : vector<256x128xf32>
    %cst_4 = arith.constant 2.000000e-01 : f32
    %5 = vector.broadcast %cst_4 : f32 to vector<256x128xf32>
    %6 = arith.mulf %5, %2 : vector<256x128xf32>
    %7 = arith.select %4, %2, %6 : vector<256x128xi1>, vector<256x128xf32>
    %8 = arith.truncf %7 : vector<256x128xf32> to vector<256x128xbf16>
    %c0_5 = arith.constant 0 : index
    %c0_6 = arith.constant 0 : index
    %9 = vector.load %arg3[%c0_5, %c0_6] : memref<256x128xbf16, #tpu.memory_space<vmem>>, vector<256x128xbf16>
    tpu.vector_store %arg3[%c0_5, %c0_6], %8 {strides = array<i32>} : memref<256x128xbf16, #tpu.memory_space<vmem>>, vector<256x128xbf16>,
    return
  }
  func.func @transform_0(%arg0: i32) -> (i32, i32) {
    %c0_i32 = arith.constant 0 : i32
    %c0_i32_0 = arith.constant 0 : i32
    return %arg0, %c0_i32 : i32, i32
  }
  func.func @transform_1(%arg0: i32) -> (i32, i32) {
    %c0_i32 = arith.constant 0 : i32
    %c0_i32_0 = arith.constant 0 : i32
    %c0_i32_1 = arith.constant 0 : i32
    return %c0_i32, %c0_i32_0 : i32, i32
  }
  func.func @transform_2(%arg0: i32) -> (i32, i32) {
    %c0_i32 = arith.constant 0 : i32
    %c0_i32_0 = arith.constant 0 : i32
    return %arg0, %c0_i32 : i32, i32
  }
}

module attributes {stable_mosaic.version = 11 : i64} {
  func.func @_mm_leaky_kernel(%arg0: i32, %arg1: memref<256x1152xbf16, #tpu.memory_space<vmem>>, %arg2: memref<1152x128xbf16, #tpu.memory_space<vmem>>, %arg3: memref<256x128xbf16, #tpu.memory_space<vmem>>) attributes {dimension_semantics = [#tpu.dimension_semantics<parallel>], iteration_bounds = array<i64: 2>, scalar_prefetch = 0 : i64, scratch_operands = 0 : i64, tpu.core_type = #tpu.core_type<tc>, window_params = [{transform_indices = @transform_0, window_bounds = array<i64: 256, 1152>}, {pipeline_mode = #tpu.pipeline_mode<synchronous>, transform_indices = @transform_1, window_bounds = array<i64: 1152, 128>}, {transform_indices = @transform_2, window_bounds = array<i64: 256, 128>}]} {
    %c0 = arith.constant 0 : index
    %c0_0 = arith.constant 0 : index
    %0 = vector.load %arg1[%c0, %c0_0] : memref<256x1152xbf16, #tpu.memory_space<vmem>>, vector<256x1152xbf16>
    %c0_1 = arith.constant 0 : index
    %c0_2 = arith.constant 0 : index
    %1 = vector.load %arg2[%c0_1, %c0_2] : memref<1152x128xbf16, #tpu.memory_space<vmem>>, vector<1152x128xbf16>
    %cst = arith.constant dense<0.000000e+00> : vector<256x128xf32>
    %2 = tpu.matmul %0, %1, %cst {dimension_numbers = #tpu.dot_dimension_numbers<[1], [0], [0], [1], [0, 0, 1, 1], [], []>} : vector<256x1152xbf16>, vector<1152x128xbf16>, vector<256x128xf32> -> vector<256x128xf32>
    %cst_3 = arith.constant 0.000000e+00 : f32
    %3 = vector.broadcast %cst_3 : f32 to vector<256x128xf32>
    %4 = arith.cmpf ogt, %2, %3 : vector<256x128xf32>
    %cst_4 = arith.constant 2.000000e-01 : f32
    %5 = vector.broadcast %cst_4 : f32 to vector<256x128xf32>
    %6 = arith.mulf %5, %2 : vector<256x128xf32>
    %7 = arith.select %4, %2, %6 : vector<256x128xi1>, vector<256x128xf32>
    %8 = arith.truncf %7 : vector<256x128xf32> to vector<256x128xbf16>
    %c0_5 = arith.constant 0 : index
    %c0_6 = arith.constant 0 : index
    %9 = vector.load %arg3[%c0_5, %c0_6] : memref<256x128xbf16, #tpu.memory_space<vmem>>, vector<256x128xbf16>
    tpu.vector_store %arg3[%c0_5, %c0_6], %8 {strides = array<i32>} : memref<256x128xbf16, #tpu.memory_space<vmem>>, vector<256x128xbf16>,
    return
  }
  func.func @transform_0(%arg0: i32) -> (i32, i32) {
    %c0_i32 = arith.constant 0 : i32
    %c0_i32_0 = arith.constant 0 : i32
    return %arg0, %c0_i32 : i32, i32
  }
  func.func @transform_1(%arg0: i32) -> (i32, i32) {
    %c0_i32 = arith.constant 0 : i32
    %c0_i32_0 = arith.constant 0 : i32
    %c0_i32_1 = arith.constant 0 : i32
    return %c0_i32, %c0_i32_0 : i32, i32
  }
  func.func @transform_2(%arg0: i32) -> (i32, i32) {
    %c0_i32 = arith.constant 0 : i32
    %c0_i32_0 = arith.constant 0 : i32
    return %arg0, %c0_i32 : i32, i32
  }
}

module attributes {stable_mosaic.version = 11 : i64} {
  func.func @_mm_leaky_kernel(%arg0: i32, %arg1: memref<128x1152xbf16, #tpu.memory_space<vmem>>, %arg2: memref<1152x128xbf16, #tpu.memory_space<vmem>>, %arg3: memref<128x128xbf16, #tpu.memory_space<vmem>>) attributes {dimension_semantics = [#tpu.dimension_semantics<parallel>], iteration_bounds = array<i64: 1>, scalar_prefetch = 0 : i64, scratch_operands = 0 : i64, tpu.core_type = #tpu.core_type<tc>, window_params = [{transform_indices = @transform_0, window_bounds = array<i64: 128, 1152>}, {pipeline_mode = #tpu.pipeline_mode<synchronous>, transform_indices = @transform_1, window_bounds = array<i64: 1152, 128>}, {transform_indices = @transform_2, window_bounds = array<i64: 128, 128>}]} {
    %c0 = arith.constant 0 : index
    %c0_0 = arith.constant 0 : index
    %0 = vector.load %arg1[%c0, %c0_0] : memref<128x1152xbf16, #tpu.memory_space<vmem>>, vector<128x1152xbf16>
    %c0_1 = arith.constant 0 : index
    %c0_2 = arith.constant 0 : index
    %1 = vector.load %arg2[%c0_1, %c0_2] : memref<1152x128xbf16, #tpu.memory_space<vmem>>, vector<1152x128xbf16>
    %cst = arith.constant dense<0.000000e+00> : vector<128x128xf32>
    %2 = tpu.matmul %0, %1, %cst {dimension_numbers = #tpu.dot_dimension_numbers<[1], [0], [0], [1], [0, 0, 1, 1], [], []>} : vector<128x1152xbf16>, vector<1152x128xbf16>, vector<128x128xf32> -> vector<128x128xf32>
    %cst_3 = arith.constant 0.000000e+00 : f32
    %3 = vector.broadcast %cst_3 : f32 to vector<128x128xf32>
    %4 = arith.cmpf ogt, %2, %3 : vector<128x128xf32>
    %cst_4 = arith.constant 2.000000e-01 : f32
    %5 = vector.broadcast %cst_4 : f32 to vector<128x128xf32>
    %6 = arith.mulf %5, %2 : vector<128x128xf32>
    %7 = arith.select %4, %2, %6 : vector<128x128xi1>, vector<128x128xf32>
    %8 = arith.truncf %7 : vector<128x128xf32> to vector<128x128xbf16>
    %c0_5 = arith.constant 0 : index
    %c0_6 = arith.constant 0 : index
    %9 = vector.load %arg3[%c0_5, %c0_6] : memref<128x128xbf16, #tpu.memory_space<vmem>>, vector<128x128xbf16>
    tpu.vector_store %arg3[%c0_5, %c0_6], %8 {strides = array<i32>} : memref<128x128xbf16, #tpu.memory_space<vmem>>, vector<128x128xbf16>,
    return
  }
  func.func @transform_0(%arg0: i32) -> (i32, i32) {
    %c0_i32 = arith.constant 0 : i32
    %c0_i32_0 = arith.constant 0 : i32
    return %arg0, %c0_i32 : i32, i32
  }
  func.func @transform_1(%arg0: i32) -> (i32, i32) {
    %c0_i32 = arith.constant 0 : i32
    %c0_i32_0 = arith.constant 0 : i32
    %c0_i32_1 = arith.constant 0 : i32
    return %c0_i32, %c0_i32_0 : i32, i32
  }
  func.func @transform_2(%arg0: i32) -> (i32, i32) {
    %c0_i32 = arith.constant 0 : i32
    %c0_i32_0 = arith.constant 0 : i32
    return %arg0, %c0_i32 : i32, i32
  }
}

module attributes {stable_mosaic.version = 11 : i64} {
  func.func @_mm_leaky_kernel(%arg0: i32, %arg1: memref<128x1152xbf16, #tpu.memory_space<vmem>>, %arg2: memref<1152x192xbf16, #tpu.memory_space<vmem>>, %arg3: memref<128x192xbf16, #tpu.memory_space<vmem>>) attributes {dimension_semantics = [#tpu.dimension_semantics<parallel>], iteration_bounds = array<i64: 1>, scalar_prefetch = 0 : i64, scratch_operands = 0 : i64, tpu.core_type = #tpu.core_type<tc>, window_params = [{transform_indices = @transform_0, window_bounds = array<i64: 128, 1152>}, {pipeline_mode = #tpu.pipeline_mode<synchronous>, transform_indices = @transform_1, window_bounds = array<i64: 1152, 192>}, {transform_indices = @transform_2, window_bounds = array<i64: 128, 192>}]} {
    %c0 = arith.constant 0 : index
    %c0_0 = arith.constant 0 : index
    %0 = vector.load %arg1[%c0, %c0_0] : memref<128x1152xbf16, #tpu.memory_space<vmem>>, vector<128x1152xbf16>
    %c0_1 = arith.constant 0 : index
    %c0_2 = arith.constant 0 : index
    %1 = vector.load %arg2[%c0_1, %c0_2] : memref<1152x192xbf16, #tpu.memory_space<vmem>>, vector<1152x192xbf16>
    %cst = arith.constant dense<0.000000e+00> : vector<128x192xf32>
    %2 = tpu.matmul %0, %1, %cst {dimension_numbers = #tpu.dot_dimension_numbers<[1], [0], [0], [1], [0, 0, 1, 1], [], []>} : vector<128x1152xbf16>, vector<1152x192xbf16>, vector<128x192xf32> -> vector<128x192xf32>
    %cst_3 = arith.constant 0.000000e+00 : f32
    %3 = vector.broadcast %cst_3 : f32 to vector<128x192xf32>
    %4 = arith.cmpf ogt, %2, %3 : vector<128x192xf32>
    %cst_4 = arith.constant 2.000000e-01 : f32
    %5 = vector.broadcast %cst_4 : f32 to vector<128x192xf32>
    %6 = arith.mulf %5, %2 : vector<128x192xf32>
    %7 = arith.select %4, %2, %6 : vector<128x192xi1>, vector<128x192xf32>
    %8 = arith.truncf %7 : vector<128x192xf32> to vector<128x192xbf16>
    %c0_5 = arith.constant 0 : index
    %c0_6 = arith.constant 0 : index
    %9 = vector.load %arg3[%c0_5, %c0_6] : memref<128x192xbf16, #tpu.memory_space<vmem>>, vector<128x192xbf16>
    tpu.vector_store %arg3[%c0_5, %c0_6], %8 {strides = array<i32>} : memref<128x192xbf16, #tpu.memory_space<vmem>>, vector<128x192xbf16>,
    return
  }
  func.func @transform_0(%arg0: i32) -> (i32, i32) {
    %c0_i32 = arith.constant 0 : i32
    %c0_i32_0 = arith.constant 0 : i32
    return %arg0, %c0_i32 : i32, i32
  }
  func.func @transform_1(%arg0: i32) -> (i32, i32) {
    %c0_i32 = arith.constant 0 : i32
    %c0_i32_0 = arith.constant 0 : i32
    %c0_i32_1 = arith.constant 0 : i32
    return %c0_i32, %c0_i32_0 : i32, i32
  }
  func.func @transform_2(%arg0: i32) -> (i32, i32) {
    %c0_i32 = arith.constant 0 : i32
    %c0_i32_0 = arith.constant 0 : i32
    return %arg0, %c0_i32 : i32, i32
  }
}

module attributes {stable_mosaic.version = 11 : i64} {
  func.func @_mm_leaky_kernel(%arg0: i32, %arg1: memref<128x1728xbf16, #tpu.memory_space<vmem>>, %arg2: memref<1728x192xbf16, #tpu.memory_space<vmem>>, %arg3: memref<128x192xbf16, #tpu.memory_space<vmem>>) attributes {dimension_semantics = [#tpu.dimension_semantics<parallel>], iteration_bounds = array<i64: 1>, scalar_prefetch = 0 : i64, scratch_operands = 0 : i64, tpu.core_type = #tpu.core_type<tc>, window_params = [{transform_indices = @transform_0, window_bounds = array<i64: 128, 1728>}, {pipeline_mode = #tpu.pipeline_mode<synchronous>, transform_indices = @transform_1, window_bounds = array<i64: 1728, 192>}, {transform_indices = @transform_2, window_bounds = array<i64: 128, 192>}]} {
    %c0 = arith.constant 0 : index
    %c0_0 = arith.constant 0 : index
    %0 = vector.load %arg1[%c0, %c0_0] : memref<128x1728xbf16, #tpu.memory_space<vmem>>, vector<128x1728xbf16>
    %c0_1 = arith.constant 0 : index
    %c0_2 = arith.constant 0 : index
    %1 = vector.load %arg2[%c0_1, %c0_2] : memref<1728x192xbf16, #tpu.memory_space<vmem>>, vector<1728x192xbf16>
    %cst = arith.constant dense<0.000000e+00> : vector<128x192xf32>
    %2 = tpu.matmul %0, %1, %cst {dimension_numbers = #tpu.dot_dimension_numbers<[1], [0], [0], [1], [0, 0, 1, 1], [], []>} : vector<128x1728xbf16>, vector<1728x192xbf16>, vector<128x192xf32> -> vector<128x192xf32>
    %cst_3 = arith.constant 0.000000e+00 : f32
    %3 = vector.broadcast %cst_3 : f32 to vector<128x192xf32>
    %4 = arith.cmpf ogt, %2, %3 : vector<128x192xf32>
    %cst_4 = arith.constant 2.000000e-01 : f32
    %5 = vector.broadcast %cst_4 : f32 to vector<128x192xf32>
    %6 = arith.mulf %5, %2 : vector<128x192xf32>
    %7 = arith.select %4, %2, %6 : vector<128x192xi1>, vector<128x192xf32>
    %8 = arith.truncf %7 : vector<128x192xf32> to vector<128x192xbf16>
    %c0_5 = arith.constant 0 : index
    %c0_6 = arith.constant 0 : index
    %9 = vector.load %arg3[%c0_5, %c0_6] : memref<128x192xbf16, #tpu.memory_space<vmem>>, vector<128x192xbf16>
    tpu.vector_store %arg3[%c0_5, %c0_6], %8 {strides = array<i32>} : memref<128x192xbf16, #tpu.memory_space<vmem>>, vector<128x192xbf16>,
    return
  }
  func.func @transform_0(%arg0: i32) -> (i32, i32) {
    %c0_i32 = arith.constant 0 : i32
    %c0_i32_0 = arith.constant 0 : i32
    return %arg0, %c0_i32 : i32, i32
  }
  func.func @transform_1(%arg0: i32) -> (i32, i32) {
    %c0_i32 = arith.constant 0 : i32
    %c0_i32_0 = arith.constant 0 : i32
    %c0_i32_1 = arith.constant 0 : i32
    return %c0_i32, %c0_i32_0 : i32, i32
  }
  func.func @transform_2(%arg0: i32) -> (i32, i32) {
    %c0_i32 = arith.constant 0 : i32
    %c0_i32_0 = arith.constant 0 : i32
    return %arg0, %c0_i32 : i32, i32
  }
}

module attributes {stable_mosaic.version = 11 : i64} {
  func.func @_mm_leaky_kernel(%arg0: i32, %arg1: memref<32x1728xbf16, #tpu.memory_space<vmem>>, %arg2: memref<1728x192xbf16, #tpu.memory_space<vmem>>, %arg3: memref<32x192xbf16, #tpu.memory_space<vmem>>) attributes {dimension_semantics = [#tpu.dimension_semantics<parallel>], iteration_bounds = array<i64: 1>, scalar_prefetch = 0 : i64, scratch_operands = 0 : i64, tpu.core_type = #tpu.core_type<tc>, window_params = [{transform_indices = @transform_0, window_bounds = array<i64: 32, 1728>}, {pipeline_mode = #tpu.pipeline_mode<synchronous>, transform_indices = @transform_1, window_bounds = array<i64: 1728, 192>}, {transform_indices = @transform_2, window_bounds = array<i64: 32, 192>}]} {
    %c0 = arith.constant 0 : index
    %c0_0 = arith.constant 0 : index
    %0 = vector.load %arg1[%c0, %c0_0] : memref<32x1728xbf16, #tpu.memory_space<vmem>>, vector<32x1728xbf16>
    %c0_1 = arith.constant 0 : index
    %c0_2 = arith.constant 0 : index
    %1 = vector.load %arg2[%c0_1, %c0_2] : memref<1728x192xbf16, #tpu.memory_space<vmem>>, vector<1728x192xbf16>
    %cst = arith.constant dense<0.000000e+00> : vector<32x192xf32>
    %2 = tpu.matmul %0, %1, %cst {dimension_numbers = #tpu.dot_dimension_numbers<[1], [0], [0], [1], [0, 0, 1, 1], [], []>} : vector<32x1728xbf16>, vector<1728x192xbf16>, vector<32x192xf32> -> vector<32x192xf32>
    %cst_3 = arith.constant 0.000000e+00 : f32
    %3 = vector.broadcast %cst_3 : f32 to vector<32x192xf32>
    %4 = arith.cmpf ogt, %2, %3 : vector<32x192xf32>
    %cst_4 = arith.constant 2.000000e-01 : f32
    %5 = vector.broadcast %cst_4 : f32 to vector<32x192xf32>
    %6 = arith.mulf %5, %2 : vector<32x192xf32>
    %7 = arith.select %4, %2, %6 : vector<32x192xi1>, vector<32x192xf32>
    %8 = arith.truncf %7 : vector<32x192xf32> to vector<32x192xbf16>
    %c0_5 = arith.constant 0 : index
    %c0_6 = arith.constant 0 : index
    %9 = vector.load %arg3[%c0_5, %c0_6] : memref<32x192xbf16, #tpu.memory_space<vmem>>, vector<32x192xbf16>
    tpu.vector_store %arg3[%c0_5, %c0_6], %8 {strides = array<i32>} : memref<32x192xbf16, #tpu.memory_space<vmem>>, vector<32x192xbf16>,
    return
  }
  func.func @transform_0(%arg0: i32) -> (i32, i32) {
    %c0_i32 = arith.constant 0 : i32
    %c0_i32_0 = arith.constant 0 : i32
    return %arg0, %c0_i32 : i32, i32
  }
  func.func @transform_1(%arg0: i32) -> (i32, i32) {
    %c0_i32 = arith.constant 0 : i32
    %c0_i32_0 = arith.constant 0 : i32
    %c0_i32_1 = arith.constant 0 : i32
    return %c0_i32, %c0_i32_0 : i32, i32
  }
  func.func @transform_2(%arg0: i32) -> (i32, i32) {
    %c0_i32 = arith.constant 0 : i32
    %c0_i32_0 = arith.constant 0 : i32
    return %arg0, %c0_i32 : i32, i32
  }
}

module attributes {stable_mosaic.version = 11 : i64} {
  func.func @_mm_leaky_kernel(%arg0: i32, %arg1: memref<8x1728xbf16, #tpu.memory_space<vmem>>, %arg2: memref<1728x192xbf16, #tpu.memory_space<vmem>>, %arg3: memref<8x192xbf16, #tpu.memory_space<vmem>>) attributes {dimension_semantics = [#tpu.dimension_semantics<parallel>], iteration_bounds = array<i64: 1>, scalar_prefetch = 0 : i64, scratch_operands = 0 : i64, tpu.core_type = #tpu.core_type<tc>, window_params = [{transform_indices = @transform_0, window_bounds = array<i64: 8, 1728>}, {pipeline_mode = #tpu.pipeline_mode<synchronous>, transform_indices = @transform_1, window_bounds = array<i64: 1728, 192>}, {transform_indices = @transform_2, window_bounds = array<i64: 8, 192>}]} {
    %c0 = arith.constant 0 : index
    %c0_0 = arith.constant 0 : index
    %0 = vector.load %arg1[%c0, %c0_0] : memref<8x1728xbf16, #tpu.memory_space<vmem>>, vector<8x1728xbf16>
    %c0_1 = arith.constant 0 : index
    %c0_2 = arith.constant 0 : index
    %1 = vector.load %arg2[%c0_1, %c0_2] : memref<1728x192xbf16, #tpu.memory_space<vmem>>, vector<1728x192xbf16>
    %cst = arith.constant dense<0.000000e+00> : vector<8x192xf32>
    %2 = tpu.matmul %0, %1, %cst {dimension_numbers = #tpu.dot_dimension_numbers<[1], [0], [0], [1], [0, 0, 1, 1], [], []>} : vector<8x1728xbf16>, vector<1728x192xbf16>, vector<8x192xf32> -> vector<8x192xf32>
    %cst_3 = arith.constant 0.000000e+00 : f32
    %3 = vector.broadcast %cst_3 : f32 to vector<8x192xf32>
    %4 = arith.cmpf ogt, %2, %3 : vector<8x192xf32>
    %cst_4 = arith.constant 2.000000e-01 : f32
    %5 = vector.broadcast %cst_4 : f32 to vector<8x192xf32>
    %6 = arith.mulf %5, %2 : vector<8x192xf32>
    %7 = arith.select %4, %2, %6 : vector<8x192xi1>, vector<8x192xf32>
    %8 = arith.truncf %7 : vector<8x192xf32> to vector<8x192xbf16>
    %c0_5 = arith.constant 0 : index
    %c0_6 = arith.constant 0 : index
    %9 = vector.load %arg3[%c0_5, %c0_6] : memref<8x192xbf16, #tpu.memory_space<vmem>>, vector<8x192xbf16>
    tpu.vector_store %arg3[%c0_5, %c0_6], %8 {strides = array<i32>} : memref<8x192xbf16, #tpu.memory_space<vmem>>, vector<8x192xbf16>,
    return
  }
  func.func @transform_0(%arg0: i32) -> (i32, i32) {
    %c0_i32 = arith.constant 0 : i32
    %c0_i32_0 = arith.constant 0 : i32
    return %arg0, %c0_i32 : i32, i32
  }
  func.func @transform_1(%arg0: i32) -> (i32, i32) {
    %c0_i32 = arith.constant 0 : i32
    %c0_i32_0 = arith.constant 0 : i32
    %c0_i32_1 = arith.constant 0 : i32
    return %c0_i32, %c0_i32_0 : i32, i32
  }
  func.func @transform_2(%arg0: i32) -> (i32, i32) {
    %c0_i32 = arith.constant 0 : i32
    %c0_i32_0 = arith.constant 0 : i32
    return %arg0, %c0_i32 : i32, i32
  }
}

module attributes {stable_mosaic.version = 11 : i64} {
  func.func @_tail_kernel(%arg0: i32, %arg1: memref<8x192xbf16, #tpu.memory_space<vmem>>, %arg2: memref<192x192xbf16, #tpu.memory_space<vmem>>, %arg3: memref<192x192xbf16, #tpu.memory_space<vmem>>, %arg4: memref<192x10xf32, #tpu.memory_space<vmem>>, %arg5: memref<2x8xf32, #tpu.memory_space<vmem>>, %arg6: memref<2x192xf32, #tpu.memory_space<vmem>>, %arg7: memref<2x10xf32, #tpu.memory_space<vmem>>) attributes {dimension_semantics = [#tpu.dimension_semantics<arbitrary>], iteration_bounds = array<i64: 1>, scalar_prefetch = 0 : i64, scratch_operands = 0 : i64, tpu.core_type = #tpu.core_type<tc>, window_params = [{pipeline_mode = #tpu.pipeline_mode<synchronous>, transform_indices = @transform_0, window_bounds = array<i64: 8, 192>}, {pipeline_mode = #tpu.pipeline_mode<synchronous>, transform_indices = @transform_1, window_bounds = array<i64: 192, 192>}, {pipeline_mode = #tpu.pipeline_mode<synchronous>, transform_indices = @transform_2, window_bounds = array<i64: 192, 192>}, {pipeline_mode = #tpu.pipeline_mode<synchronous>, transform_indices = @transform_3, window_bounds = array<i64: 192, 10>}, {pipeline_mode = #tpu.pipeline_mode<synchronous>, transform_indices = @transform_4, window_bounds = array<i64: 2, 8>}, {pipeline_mode = #tpu.pipeline_mode<synchronous>, transform_indices = @transform_5, window_bounds = array<i64: 2, 192>}, {pipeline_mode = #tpu.pipeline_mode<synchronous>, transform_indices = @transform_6, window_bounds = array<i64: 2, 10>}]} {
    %c0 = arith.constant 0 : index
    %c0_0 = arith.constant 0 : index
    %0 = vector.load %arg1[%c0, %c0_0] : memref<8x192xbf16, #tpu.memory_space<vmem>>, vector<8x192xbf16>
    %c0_1 = arith.constant 0 : index
    %c0_2 = arith.constant 0 : index
    %1 = vector.load %arg2[%c0_1, %c0_2] : memref<192x192xbf16, #tpu.memory_space<vmem>>, vector<192x192xbf16>
    %cst = arith.constant dense<0.000000e+00> : vector<8x192xf32>
    %2 = tpu.matmul %0, %1, %cst {dimension_numbers = #tpu.dot_dimension_numbers<[1], [0], [0], [1], [0, 0, 1, 1], [], []>} : vector<8x192xbf16>, vector<192x192xbf16>, vector<8x192xf32> -> vector<8x192xf32>
    %cst_3 = arith.constant 0.000000e+00 : f32
    %3 = vector.broadcast %cst_3 : f32 to vector<8x192xf32>
    %4 = arith.cmpf ogt, %2, %3 : vector<8x192xf32>
    %cst_4 = arith.constant 2.000000e-01 : f32
    %5 = vector.broadcast %cst_4 : f32 to vector<8x192xf32>
    %6 = arith.mulf %5, %2 : vector<8x192xf32>
    %7 = arith.select %4, %2, %6 : vector<8x192xi1>, vector<8x192xf32>
    %8 = arith.truncf %7 : vector<8x192xf32> to vector<8x192xbf16>
    %c0_5 = arith.constant 0 : index
    %c0_6 = arith.constant 0 : index
    %9 = vector.load %arg3[%c0_5, %c0_6] : memref<192x192xbf16, #tpu.memory_space<vmem>>, vector<192x192xbf16>
    %cst_7 = arith.constant dense<0.000000e+00> : vector<8x192xf32>
    %10 = tpu.matmul %8, %9, %cst_7 {dimension_numbers = #tpu.dot_dimension_numbers<[1], [0], [0], [1], [0, 0, 1, 1], [], []>} : vector<8x192xbf16>, vector<192x192xbf16>, vector<8x192xf32> -> vector<8x192xf32>
    %cst_8 = arith.constant 0.000000e+00 : f32
    %11 = vector.broadcast %cst_8 : f32 to vector<8x192xf32>
    %12 = arith.cmpf ogt, %10, %11 : vector<8x192xf32>
    %cst_9 = arith.constant 2.000000e-01 : f32
    %13 = vector.broadcast %cst_9 : f32 to vector<8x192xf32>
    %14 = arith.mulf %13, %10 : vector<8x192xf32>
    %15 = arith.select %12, %10, %14 : vector<8x192xi1>, vector<8x192xf32>
    %c0_10 = arith.constant 0 : index
    %c0_11 = arith.constant 0 : index
    %16 = vector.load %arg5[%c0_10, %c0_11] : memref<2x8xf32, #tpu.memory_space<vmem>>, vector<2x8xf32>
    %cst_12 = arith.constant dense<0.000000e+00> : vector<2x192xf32>
    %17 = tpu.matmul %16, %15, %cst_12 {dimension_numbers = #tpu.dot_dimension_numbers<[1], [0], [0], [1], [0, 0, 1, 1], [], []>} : vector<2x8xf32>, vector<8x192xf32>, vector<2x192xf32> -> vector<2x192xf32>
    %c0_13 = arith.constant 0 : index
    %c0_14 = arith.constant 0 : index
    %18 = vector.load %arg6[%c0_13, %c0_14] : memref<2x192xf32, #tpu.memory_space<vmem>>, vector<2x192xf32>
    tpu.vector_store %arg6[%c0_13, %c0_14], %17 {strides = array<i32>} : memref<2x192xf32, #tpu.memory_space<vmem>>, vector<2x192xf32>,
    %c0_15 = arith.constant 0 : index
    %c0_16 = arith.constant 0 : index
    %19 = vector.load %arg4[%c0_15, %c0_16] : memref<192x10xf32, #tpu.memory_space<vmem>>, vector<192x10xf32>
    %cst_17 = arith.constant dense<0.000000e+00> : vector<2x10xf32>
    %20 = tpu.matmul %17, %19, %cst_17 {dimension_numbers = #tpu.dot_dimension_numbers<[1], [0], [0], [1], [0, 0, 1, 1], [], []>} : vector<2x192xf32>, vector<192x10xf32>, vector<2x10xf32> -> vector<2x10xf32>
    %c0_18 = arith.constant 0 : index
    %c0_19 = arith.constant 0 : index
    %21 = vector.load %arg7[%c0_18, %c0_19] : memref<2x10xf32, #tpu.memory_space<vmem>>, vector<2x10xf32>
    tpu.vector_store %arg7[%c0_18, %c0_19], %20 {strides = array<i32>} : memref<2x10xf32, #tpu.memory_space<vmem>>, vector<2x10xf32>,
    return
  }
  func.func @transform_0(%arg0: i32) -> (i32, i32) {
    %c0_i32 = arith.constant 0 : i32
    %c0_i32_0 = arith.constant 0 : i32
    %c0_i32_1 = arith.constant 0 : i32
    return %c0_i32, %c0_i32_0 : i32, i32
  }
  func.func @transform_1(%arg0: i32) -> (i32, i32) {
    %c0_i32 = arith.constant 0 : i32
    %c0_i32_0 = arith.constant 0 : i32
    %c0_i32_1 = arith.constant 0 : i32
    return %c0_i32, %c0_i32_0 : i32, i32
  }
  func.func @transform_2(%arg0: i32) -> (i32, i32) {
    %c0_i32 = arith.constant 0 : i32
    %c0_i32_0 = arith.constant 0 : i32
    %c0_i32_1 = arith.constant 0 : i32
    return %c0_i32, %c0_i32_0 : i32, i32
  }
  func.func @transform_3(%arg0: i32) -> (i32, i32) {
    %c0_i32 = arith.constant 0 : i32
    %c0_i32_0 = arith.constant 0 : i32
    %c0_i32_1 = arith.constant 0 : i32
    return %c0_i32, %c0_i32_0 : i32, i32
  }
  func.func @transform_4(%arg0: i32) -> (i32, i32) {
    %c0_i32 = arith.constant 0 : i32
    %c0_i32_0 = arith.constant 0 : i32
    %c0_i32_1 = arith.constant 0 : i32
    return %c0_i32, %c0_i32_0 : i32, i32
  }
  func.func @transform_5(%arg0: i32) -> (i32, i32) {
    %c0_i32 = arith.constant 0 : i32
    %c0_i32_0 = arith.constant 0 : i32
    %c0_i32_1 = arith.constant 0 : i32
    return %c0_i32, %c0_i32_0 : i32, i32
  }
  func.func @transform_6(%arg0: i32) -> (i32, i32) {
    %c0_i32 = arith.constant 0 : i32
    %c0_i32_0 = arith.constant 0 : i32
    %c0_i32_1 = arith.constant 0 : i32
    return %c0_i32, %c0_i32_0 : i32, i32
  }
}

</mosaic_0001>

<bundles_post_ra>
// kernel: discriminator_forward.8
= control target key start
LH: loop header
LB: loop body
LE: loop exit
PB: predicated region body
PF: predicated region fallthrough
CT: control target
= control target key end

     0   :  { %7 = vsyncpa [#allocation3], 0  ;;  %s1192_s9 = smov 0   ;;  %s1294_s0 = inlined_call_operand.vmem [shape: bf16[512,27], index: 0, kind: input, shape index: {}]   ;;  %s1295_s1 = inlined_call_operand.hbm [shape: bf16[27,128], index: 1, kind: input, shape index: {}]   ;;  %s1296_s2 = inlined_call_operand.vmem [shape: bf16[512,128], index: 2, kind: output, shape index: {}]  }
   0x1 LB: > { %s831_s10 = sadd.s32 4294967295, %s1171_s9   ;;  %p833_p0 = scmp.ge.s32.totalorder %s1171_s9, 1  ;;  %s1171_s9 = sphi %s1192_s9, %s13_s9  }
   0x2   : > { %p91_p1 = scmp.lt.s32.totalorder %s1171_s9, 3  ;;  %s1173_s11 = smov [#allocation2]  }
   0x3   : > { %s103_s12 = sshll.u32 %s1173_s11, 4  ;;  %p1204_p3 = scmp.eq.s32.totalorder %s831_s10, 0  ;;  %s104_s12 = int_to_ptr.vmem [resolvable:$true] %s103_s12 }
   0x4   : > { %p1200_p2 = pnand %p833_p0, %p91_p1  ;;  %s1146_s15 = scalar_lea.vmem %s104_s12, 256 }
   0x5   : > { %p1147_p7 = scmp.ne.s32.totalorder %s104_s12, %s1146_s15  ;;  %p1154_p10 = scmp.lt.s32.totalorder %s104_s12, %s104_s12 }
   0x6   : > { %p1099_p4 = pneg %p1200_p2  ;;  %p1155_p11 = scmp.lt.s32.totalorder %s1146_s15, %s1146_s15 }
   0x8   : > { %p1100_p5 = pnand %p1204_p3, %p1099_p4  ;;  %p1156_p12 = por %p1155_p11, %p1154_p10 }
   0xa   : > { %p1137_p6 = pneg %p1100_p5 }
   0xc   : > { %p1149_p8 = pnand %p1147_p7, %p1137_p6 }
   0xe   : > { %p1150_p9 = pneg %p1149_p8 }
  0x10   : > { %p1157_p13 = pnand %p1156_p12, %p1150_p9 }
  0x12   : > { %1160 = shalt.err (!%p1157_p13)
}
  0x13   : > { %s1174_s16 = smov 64   ;;  %s1175_s17 = smov 4  }
  0x14   : > { %1102 = dma.hbm_to_vmem [thread:$0]  (!%p1100_p5), %s1295_s1, 256, %s104_s12, [#allocation3], %s1174_s16, %s1174_s16, %s1175_s17  }
  0x15   : > { %128 = sbr.rel (%p1200_p2) target bundleno = 270 (0x10e), region = 28 }
  0x1a   : > { %1166 = dma.done.wait (%p1204_p3), [#allocation3], 256  }
  0x1b   : > { %1168 = vsyncadd (%p1204_p3), [#allocation3], 4294967040  ;;  %vm339_vm0 = vcmask 1044480   ;;  %s838_s20 = sshll.u32 %s831_s10, 5  ;;  %vm340_vm1 = vcmask 1045504   ;;  %v1176_v0 = vmov 65535  }
  0x1c   : > { %p151_p0 = scmp.lt.s32.totalorder %s838_s20, 63  ;;  %v341_v1 = vsel %vm339_vm0, 4294967295, %v1176_v0  ;;  %v1117_v3 = vld [vmem:[#allocation2 + $0x8] sm:$0x3f]   ;;  %v1118_v4 = vld [vmem:[#allocation2] sm:$0xff]   ;;  %vm290_vm2 = vcmask 220160  }
  0x1d   : > { %v342_v2 = vsel %vm340_vm1, %v341_v1, 0 }
  0x1e   : > { %s1300_s20 = smov (!%p151_p0, %s838_s20), 63  ;;  %v344_v5 = vand.u32 %v1117_v3, %v342_v2 }
  0x1f   : > { %s839_s21 = sshll.u32 %s1300_s20, 2 }
  0x20   : > { %s1229_s24 = scalar_lea.vmem %s1294_s0, %s839_s21  ;;  %1055 = vmatprep.subr.bf16.mxu0 %v344_v5  ;;  %1091 = vmatprep.subr.bf16.mxu1 %v344_v5  ;;  %s1268_s27 = scalar_lea.vmem %s1296_s2, %s839_s21 }
  0x21   : > { %v1119_v6 = vld [vmem:[%s1229_s24] sm:$0xff]   ;;  %1056 = vmatpush3.bf16.msra.mxu0 %v344_v5  ;;  %1093 = vmatpush3.bf16.msra.mxu1 %v344_v5  ;;  %v1121_v8 = vld [vmem:[%s1229_s24 + $0x8] sm:$0xff]   ;;  %v1123_v10 = vld [vmem:[%s1229_s24 + $0x10] sm:$0xff]  }
  0x22   : > { %v1120_v7 = vld [vmem:[%s1229_s24 + $0x40] sm:$0xff]   ;;  %1057 = vmatprep.subr.bf16.mxu0 %v1118_v4  ;;  %1092 = vmatprep.subr.bf16.mxu1 %v1118_v4  ;;  %v1122_v9 = vld [vmem:[%s1229_s24 + $0x48] sm:$0xff]   ;;  %v1124_v11 = vld [vmem:[%s1229_s24 + $0x50] sm:$0xff]  }
  0x23   : > { %1059 = vmatprep.mubr.msk.bf16.mxu0 %vm290_vm2, %v1119_v6  ;;  %1075 = vmatprep.mubr.msk.bf16.mxu1 %vm290_vm2, %v1120_v7  ;;  %v1125_v12 = vld [vmem:[%s1229_s24 + $0x18] sm:$0xff]   ;;  %v1127_v14 = vld [vmem:[%s1229_s24 + $0x20] sm:$0xff]   ;;  %v1129_v16 = vld [vmem:[%s1229_s24 + $0x28] sm:$0xff]  }
  0x24   : > { %v1126_v13 = vld [vmem:[%s1229_s24 + $0x58] sm:$0xff]   ;;  %v1128_v15 = vld [vmem:[%s1229_s24 + $0x60] sm:$0xff]   ;;  %v1130_v17 = vld [vmem:[%s1229_s24 + $0x68] sm:$0xff]  }
  0x25   : > { %1058 = vmatpush3.bf16.msra.mxu0 %v1118_v4  ;;  %1094 = vmatpush3.bf16.msra.mxu1 %v1118_v4  ;;  %v1131_v18 = vld [vmem:[%s1229_s24 + $0x30] sm:$0xff]   ;;  %v1133_v20 = vld [vmem:[%s1229_s24 + $0x38] sm:$0xff]  }
  0x26   : > { %v1132_v19 = vld [vmem:[%s1229_s24 + $0x70] sm:$0xff]   ;;  %v1134_v21 = vld [vmem:[%s1229_s24 + $0x78] sm:$0xff]  }
  0x28   : > { %1060 = vmatmul.mubr.msk.bf16.vlgmr.msra.gmra.mxu0 %vm290_vm2, %v1121_v8  ;;  %1076 = vmatmul.mubr.msk.bf16.vlgmr.msra.gmra.mxu1 %vm290_vm2, %v1122_v9 }
  0x29   : > { %1063 = vmatprep.mubr.msk.bf16.mxu0 %vm290_vm2, %v1123_v10  ;;  %1079 = vmatprep.mubr.msk.bf16.mxu1 %vm290_vm2, %v1124_v11 }
  0x30   : > { %1064 = vmatmul.mubr.msk.bf16.gmra.mxu0 %vm290_vm2, %v1125_v12  ;;  %1080 = vmatmul.mubr.msk.bf16.gmra.mxu1 %vm290_vm2, %v1126_v13 }
  0x31   : > { %1067 = vmatprep.mubr.msk.bf16.mxu0 %vm290_vm2, %v1127_v14  ;;  %1083 = vmatprep.mubr.msk.bf16.mxu1 %vm290_vm2, %v1128_v15 }
  0x38   : > { %1068 = vmatmul.mubr.msk.bf16.gmra.mxu0 %vm290_vm2, %v1129_v16  ;;  %1084 = vmatmul.mubr.msk.bf16.gmra.mxu1 %vm290_vm2, %v1130_v17 }
  0x39   : > { %1071 = vmatprep.mubr.msk.bf16.mxu0 %vm290_vm2, %v1131_v18  ;;  %1087 = vmatprep.mubr.msk.bf16.mxu1 %vm290_vm2, %v1132_v19 }
  0x40   : > { %1072 = vmatmul.mubr.msk.bf16.gmra.mxu0 %vm290_vm2, %v1133_v20  ;;  %1088 = vmatmul.mubr.msk.bf16.gmra.mxu1 %vm290_vm2, %v1134_v21 }
  0xe8   : > { %v1061_v22 = vpop.f32.mrf.mxu0  ;;  %v1077_v23 = vpop.f32.mrf.mxu1 }
  0xe9   : > { %vm509_vm3 = vcmp.gt.f32.partialorder %v1061_v22, 0.0  ;;  %v541_v24 = vmul.f32 0.2, %v1061_v22  ;;  %v557_v25 = vmul.f32 0.2, %v1077_v23  ;;  %vm525_vm4 = vcmp.gt.f32.partialorder %v1077_v23, 0.0 }
  0xea   : > { %v380_v26 = vpop.f32.mrf.mxu0  ;;  %v444_v27 = vpop.f32.mrf.mxu1 }
  0xeb   : > { %v573_v28 = vsel %vm509_vm3, %v1061_v22, %v541_v24  ;;  %v539_v29 = vmul.f32 0.2, %v380_v26  ;;  %vm507_vm5 = vcmp.gt.f32.partialorder %v380_v26, 0.0  ;;  %v589_v33 = vsel %vm525_vm4, %v1077_v23, %v557_v25 }
  0xec   : > { %v1062_v30 = vpop.f32.mrf.mxu0  ;;  %v1078_v31 = vpop.f32.mrf.mxu1  ;;  %vm523_vm8 = vcmp.gt.f32.partialorder %v444_v27, 0.0  ;;  %v555_v34 = vmul.f32 0.2, %v444_v27 }
  0xed   : > { %vm510_vm6 = vcmp.gt.f32.partialorder %v1062_v30, 0.0  ;;  %v542_v32 = vmul.f32 0.2, %v1062_v30  ;;  %vm526_vm7 = vcmp.gt.f32.partialorder %v1078_v31, 0.0  ;;  %v558_v35 = vmul.f32 0.2, %v1078_v31 }
  0xee   : > { %v383_v36 = vpop.f32.mrf.mxu0  ;;  %v447_v37 = vpop.f32.mrf.mxu1  ;;  %v571_v40 = vsel %vm507_vm5, %v380_v26, %v539_v29  ;;  %v587_v49 = vsel %vm523_vm8, %v444_v27, %v555_v34 }
  0xef   : > { %v574_v38 = vsel %vm510_vm6, %v1062_v30, %v542_v32  ;;  %vm508_vm9 = vcmp.gt.f32.partialorder %v383_v36, 0.0  ;;  %v540_v39 = vmul.f32 0.2, %v383_v36  ;;  %vm524_vm10 = vcmp.gt.f32.partialorder %v447_v37, 0.0 }
  0xf0   : > { %v950_v41 = vpack.c.bf16 %v574_v38, %v573_v28  ;;  %v590_v42 = vsel %vm526_vm7, %v1078_v31, %v558_v35  ;;  %v556_v43 = vmul.f32 0.2, %v447_v37  ;;  %v1065_v44 = vpop.f32.mrf.mxu0  ;;  %v1081_v45 = vpop.f32.mrf.mxu1 }
  0xf1   : > { %v990_v46 = vpack.c.bf16 %v590_v42, %v589_v33  ;;  %v572_v47 = vsel %vm508_vm9, %v383_v36, %v540_v39  ;;  %vm513_vm11 = vcmp.gt.f32.partialorder %v1065_v44, 0.0  ;;  %v545_v48 = vmul.f32 0.2, %v1065_v44 }
  0xf2   : > { %1022 = vst [vmem:[%s1268_s27 + $0x8] sm:$0xff] %v950_v41   ;;  %v945_v50 = vpack.c.bf16 %v572_v47, %v571_v40  ;;  %v588_v51 = vsel %vm524_vm10, %v447_v37, %v556_v43  ;;  %v561_v52 = vmul.f32 0.2, %v1081_v45  ;;  %v396_v53 = vpop.f32.mrf.mxu0  ;;  %v460_v54 = vpop.f32.mrf.mxu1  ;;  %vm529_vm12 = vcmp.gt.f32.partialorder %v1081_v45, 0.0 }
  0xf3   : > { %1030 = vst [vmem:[%s1268_s27 + $0x48] sm:$0xff] %v990_v46   ;;  %v985_v55 = vpack.c.bf16 %v588_v51, %v587_v49  ;;  %v577_v56 = vsel %vm513_vm11, %v1065_v44, %v545_v48  ;;  %v543_v57 = vmul.f32 0.2, %v396_v53  ;;  %vm511_vm13 = vcmp.gt.f32.partialorder %v396_v53, 0.0 }
  0xf4   : > { %946 = vst [vmem:[%s1268_s27] sm:$0xff] %v945_v50   ;;  %v1066_v58 = vpop.f32.mrf.mxu0  ;;  %v1082_v59 = vpop.f32.mrf.mxu1  ;;  %v593_v61 = vsel %vm529_vm12, %v1081_v45, %v561_v52  ;;  %vm527_vm0 = vcmp.gt.f32.partialorder %v460_v54, 0.0  ;;  %v559_v62 = vmul.f32 0.2, %v460_v54 }
  0xf5   : > { %1029 = vst [vmem:[%s1268_s27 + $0x40] sm:$0xff] %v985_v55   ;;  %vm514_vm14 = vcmp.gt.f32.partialorder %v1066_v58, 0.0  ;;  %v546_v60 = vmul.f32 0.2, %v1066_v58  ;;  %vm530_vm15 = vcmp.gt.f32.partialorder %v1082_v59, 0.0  ;;  %v575_v4 = vsel %vm511_vm13, %v396_v53, %v543_v57 }
  0xf6   : > { %v562_v63 = vmul.f32 0.2, %v1082_v59  ;;  %v399_v0 = vpop.f32.mrf.mxu0  ;;  %v463_v1 = vpop.f32.mrf.mxu1  ;;  %v591_v13 = vsel %vm527_vm0, %v460_v54, %v559_v62 }
  0xf7   : > { %v578_v2 = vsel %vm514_vm14, %v1066_v58, %v546_v60  ;;  %vm512_vm1 = vcmp.gt.f32.partialorder %v399_v0, 0.0  ;;  %v544_v3 = vmul.f32 0.2, %v399_v0  ;;  %vm528_vm2 = vcmp.gt.f32.partialorder %v463_v1, 0.0 }
  0xf8   : > { %v960_v5 = vpack.c.bf16 %v578_v2, %v577_v56  ;;  %v594_v6 = vsel %vm530_vm15, %v1082_v59, %v562_v63  ;;  %v560_v7 = vmul.f32 0.2, %v463_v1  ;;  %v1069_v8 = vpop.f32.mrf.mxu0  ;;  %v1085_v9 = vpop.f32.mrf.mxu1 }
  0xf9   : > { %v1000_v10 = vpack.c.bf16 %v594_v6, %v593_v61  ;;  %v576_v11 = vsel %vm512_vm1, %v399_v0, %v544_v3  ;;  %vm517_vm3 = vcmp.gt.f32.partialorder %v1069_v8, 0.0  ;;  %v549_v12 = vmul.f32 0.2, %v1069_v8 }
  0xfa   : > { %1024 = vst [vmem:[%s1268_s27 + $0x18] sm:$0xff] %v960_v5   ;;  %v955_v14 = vpack.c.bf16 %v576_v11, %v575_v4  ;;  %v592_v15 = vsel %vm528_vm2, %v463_v1, %v560_v7  ;;  %v565_v16 = vmul.f32 0.2, %v1085_v9  ;;  %v412_v17 = vpop.f32.mrf.mxu0  ;;  %v476_v18 = vpop.f32.mrf.mxu1  ;;  %vm533_vm4 = vcmp.gt.f32.partialorder %v1085_v9, 0.0 }
  0xfb   : > { %1032 = vst [vmem:[%s1268_s27 + $0x58] sm:$0xff] %v1000_v10   ;;  %v995_v19 = vpack.c.bf16 %v592_v15, %v591_v13  ;;  %v581_v20 = vsel %vm517_vm3, %v1069_v8, %v549_v12  ;;  %v547_v21 = vmul.f32 0.2, %v412_v17  ;;  %vm515_vm5 = vcmp.gt.f32.partialorder %v412_v17, 0.0 }
  0xfc   : > { %1023 = vst [vmem:[%s1268_s27 + $0x10] sm:$0xff] %v955_v14   ;;  %v1070_v22 = vpop.f32.mrf.mxu0  ;;  %v1086_v23 = vpop.f32.mrf.mxu1  ;;  %v597_v25 = vsel %vm533_vm4, %v1085_v9, %v565_v16  ;;  %vm531_vm8 = vcmp.gt.f32.partialorder %v476_v18, 0.0  ;;  %v563_v26 = vmul.f32 0.2, %v476_v18 }
  0xfd   : > { %1031 = vst [vmem:[%s1268_s27 + $0x50] sm:$0xff] %v995_v19   ;;  %vm518_vm6 = vcmp.gt.f32.partialorder %v1070_v22, 0.0  ;;  %v550_v24 = vmul.f32 0.2, %v1070_v22  ;;  %vm534_vm7 = vcmp.gt.f32.partialorder %v1086_v23, 0.0  ;;  %v579_v32 = vsel %vm515_vm5, %v412_v17, %v547_v21 }
  0xfe   : > { %v566_v27 = vmul.f32 0.2, %v1086_v23  ;;  %v415_v28 = vpop.f32.mrf.mxu0  ;;  %v479_v29 = vpop.f32.mrf.mxu1  ;;  %v595_v41 = vsel %vm531_vm8, %v476_v18, %v563_v26 }
  0xff   : > { %v582_v30 = vsel %vm518_vm6, %v1070_v22, %v550_v24  ;;  %vm516_vm9 = vcmp.gt.f32.partialorder %v415_v28, 0.0  ;;  %v548_v31 = vmul.f32 0.2, %v415_v28  ;;  %vm532_vm10 = vcmp.gt.f32.partialorder %v479_v29, 0.0 }
 0x100   : > { %v970_v33 = vpack.c.bf16 %v582_v30, %v581_v20  ;;  %v598_v34 = vsel %vm534_vm7, %v1086_v23, %v566_v27  ;;  %v564_v35 = vmul.f32 0.2, %v479_v29  ;;  %v1073_v36 = vpop.f32.mrf.mxu0  ;;  %v1089_v37 = vpop.f32.mrf.mxu1 }
 0x101   : > { %v1010_v38 = vpack.c.bf16 %v598_v34, %v597_v25  ;;  %v580_v39 = vsel %vm516_vm9, %v415_v28, %v548_v31  ;;  %vm521_vm11 = vcmp.gt.f32.partialorder %v1073_v36, 0.0  ;;  %v553_v40 = vmul.f32 0.2, %v1073_v36 }
 0x102   : > { %1026 = vst [vmem:[%s1268_s27 + $0x28] sm:$0xff] %v970_v33   ;;  %v965_v42 = vpack.c.bf16 %v580_v39, %v579_v32  ;;  %v596_v43 = vsel %vm532_vm10, %v479_v29, %v564_v35  ;;  %v428_v44 = vpop.f32.mrf.mxu0  ;;  %v492_v45 = vpop.f32.mrf.mxu1  ;;  %vm537_vm12 = vcmp.gt.f32.partialorder %v1089_v37, 0.0  ;;  %v569_v48 = vmul.f32 0.2, %v1089_v37 }
 0x103   : > { %1034 = vst [vmem:[%s1268_s27 + $0x68] sm:$0xff] %v1010_v38   ;;  %v1005_v46 = vpack.c.bf16 %v596_v43, %v595_v41  ;;  %v585_v47 = vsel %vm521_vm11, %v1073_v36, %v553_v40  ;;  %v551_v51 = vmul.f32 0.2, %v428_v44  ;;  %vm519_vm15 = vcmp.gt.f32.partialorder %v428_v44, 0.0 }
 0x104   : > { %1025 = vst [vmem:[%s1268_s27 + $0x20] sm:$0xff] %v965_v42   ;;  %v1074_v49 = vpop.f32.mrf.mxu0  ;;  %v1090_v50 = vpop.f32.mrf.mxu1  ;;  %vm535_vm0 = vcmp.gt.f32.partialorder %v492_v45, 0.0  ;;  %v567_v53 = vmul.f32 0.2, %v492_v45  ;;  %v601_v59 = vsel %vm537_vm12, %v1089_v37, %v569_v48 }
 0x105   : > { %1033 = vst [vmem:[%s1268_s27 + $0x60] sm:$0xff] %v1005_v46   ;;  %vm522_vm13 = vcmp.gt.f32.partialorder %v1074_v49, 0.0  ;;  %v554_v52 = vmul.f32 0.2, %v1074_v49  ;;  %vm538_vm14 = vcmp.gt.f32.partialorder %v1090_v50, 0.0  ;;  %v583_v63 = vsel %vm519_vm15, %v428_v44, %v551_v51 }
 0x106   : > { %v570_v54 = vmul.f32 0.2, %v1090_v50  ;;  %v431_v55 = vpop.f32.mrf.mxu0  ;;  %v495_v56 = vpop.f32.mrf.mxu1  ;;  %v599_v2 = vsel %vm535_vm0, %v492_v45, %v567_v53 }
 0x107   : > { %v586_v57 = vsel %vm522_vm13, %v1074_v49, %v554_v52  ;;  %vm520_vm1 = vcmp.gt.f32.partialorder %v431_v55, 0.0  ;;  %v552_v58 = vmul.f32 0.2, %v431_v55  ;;  %vm536_vm2 = vcmp.gt.f32.partialorder %v495_v56, 0.0 }
 0x108   : > { %v980_v60 = vpack.c.bf16 %v586_v57, %v585_v47  ;;  %v602_v61 = vsel %vm538_vm14, %v1090_v50, %v570_v54  ;;  %v568_v62 = vmul.f32 0.2, %v495_v56 }
 0x109   : > { %v1020_v0 = vpack.c.bf16 %v602_v61, %v601_v59  ;;  %v584_v1 = vsel %vm520_vm1, %v431_v55, %v552_v58 }
 0x10a   : > { %1028 = vst [vmem:[%s1268_s27 + $0x38] sm:$0xff] %v980_v60   ;;  %v975_v3 = vpack.c.bf16 %v584_v1, %v583_v63  ;;  %v600_v4 = vsel %vm536_vm2, %v495_v56, %v568_v62 }
 0x10b   : > { %1036 = vst [vmem:[%s1268_s27 + $0x78] sm:$0xff] %v1020_v0   ;;  %v1015_v5 = vpack.c.bf16 %v600_v4, %v599_v2 }
 0x10c   : > { %1027 = vst [vmem:[%s1268_s27 + $0x30] sm:$0xff] %v975_v3  }
 0x10d   : > { %1035 = vst [vmem:[%s1268_s27 + $0x70] sm:$0xff] %v1015_v5  }
 0x10e PF: > { %s13_s9 = sadd.s32 1, %s1171_s9  }
 0x10f   : > { %p10_p1 = scmp.ge.s32.totalorder %s13_s9, 4  }
 0x111   :  { %12 = sbr.rel (!%p10_p1) target bundleno = 1 (0x1), region = 63 }
 0x116   :  { %785 = vsyncpa [#allocation3], 1 }
 0x117   :  { %787 = vsyncpa [#allocation3 + $0x1], 1 }

// kernel: discriminator_forward.10
= control target key start
LH: loop header
LB: loop body
LE: loop exit
PB: predicated region body
PF: predicated region fallthrough
CT: control target
= control target key end

     0   :  { %s2941_s1 = inlined_call_operand.vmem [shape: bf16[1152,128], index: 1, kind: input, shape index: {}]   ;;  %s2942_s0 = inlined_call_operand.vmem [shape: bf16[128,1152], index: 0, kind: input, shape index: {}]   ;;  %s2943_s2 = inlined_call_operand.vmem [shape: bf16[128,128], index: 2, kind: output, shape index: {}]  }
   0x1   :  { %v2196_v0 = vld [vmem:[%s2941_s1 + $0x78] sm:$0xff]   ;;  %v2200_v4 = vld [vmem:[%s2941_s1 + $0x70] sm:$0xff]   ;;  %v2204_v8 = vld [vmem:[%s2941_s1 + $0x68] sm:$0xff]  }
   0x2   :  { %v2197_v1 = vld [vmem:[%s2941_s1 + $0xf8] sm:$0xff]   ;;  %1876 = vmatprep.subr.bf16.mxu0 %v2196_v0  ;;  %v2201_v5 = vld [vmem:[%s2941_s1 + $0xf0] sm:$0xff]   ;;  %v2205_v9 = vld [vmem:[%s2941_s1 + $0xe8] sm:$0xff]  }
   0x3   :  { %v2198_v2 = vld [vmem:[%s2941_s1 + $0x38] sm:$0xff]   ;;  %1940 = vmatprep.subr.bf16.mxu1 %v2197_v1  ;;  %v2202_v6 = vld [vmem:[%s2941_s1 + $0x30] sm:$0xff]   ;;  %v2206_v10 = vld [vmem:[%s2941_s1 + $0x28] sm:$0xff]  }
   0x4   :  { %v2199_v3 = vld [vmem:[%s2941_s1 + $0xb8] sm:$0xff]   ;;  %1877 = vmatpush3.bf16.msra.mxu0 %v2198_v2  ;;  %v2203_v7 = vld [vmem:[%s2941_s1 + $0xb0] sm:$0xff]   ;;  %v2207_v11 = vld [vmem:[%s2941_s1 + $0xa8] sm:$0xff]  }
   0x5   :  { %1941 = vmatpush3.bf16.msra.mxu1 %v2199_v3  ;;  %1878 = vmatprep.subr.bf16.mxu0 %v2200_v4  ;;  %v2208_v12 = vld [vmem:[%s2941_s1 + $0x60] sm:$0xff]   ;;  %v2212_v16 = vld [vmem:[%s2941_s1 + $0x58] sm:$0xff]   ;;  %v2216_v20 = vld [vmem:[%s2941_s1 + $0x50] sm:$0xff]  }
   0x6   :  { %1942 = vmatprep.subr.bf16.mxu1 %v2201_v5  ;;  %v2209_v13 = vld [vmem:[%s2941_s1 + $0xe0] sm:$0xff]   ;;  %v2213_v17 = vld [vmem:[%s2941_s1 + $0xd8] sm:$0xff]   ;;  %v2217_v21 = vld [vmem:[%s2941_s1 + $0xd0] sm:$0xff]  }
   0x7   :  { %v2210_v14 = vld [vmem:[%s2941_s1 + $0x20] sm:$0xff]   ;;  %v2214_v18 = vld [vmem:[%s2941_s1 + $0x18] sm:$0xff]   ;;  %v2218_v22 = vld [vmem:[%s2941_s1 + $0x10] sm:$0xff]  }
   0x8   :  { %1879 = vmatpush3.bf16.msra.mxu0 %v2202_v6  ;;  %v2211_v15 = vld [vmem:[%s2941_s1 + $0xa0] sm:$0xff]   ;;  %v2215_v19 = vld [vmem:[%s2941_s1 + $0x98] sm:$0xff]   ;;  %v2219_v23 = vld [vmem:[%s2941_s1 + $0x90] sm:$0xff]  }
   0x9   :  { %1943 = vmatpush3.bf16.msra.mxu1 %v2203_v7  ;;  %1880 = vmatprep.subr.bf16.mxu0 %v2204_v8  ;;  %v2220_v24 = vld [vmem:[%s2941_s1 + $0x48] sm:$0xff]   ;;  %v2224_v28 = vld [vmem:[%s2941_s1 + $0x40] sm:$0xff]   ;;  %v2234_v36 = vld [vmem:[%s2941_s1 + $0x178] sm:$0xff]  }
   0xa   :  { %1944 = vmatprep.subr.bf16.mxu1 %v2205_v9  ;;  %v2221_v25 = vld [vmem:[%s2941_s1 + $0xc8] sm:$0xff]   ;;  %v2225_v29 = vld [vmem:[%s2941_s1 + $0xc0] sm:$0xff]   ;;  %v2235_v37 = vld [vmem:[%s2941_s1 + $0x1f8] sm:$0xff]  }
   0xb   :  { %v2222_v26 = vld [vmem:[%s2941_s1 + $0x8] sm:$0xff]   ;;  %v2226_v30 = vld [vmem:[%s2941_s1] sm:$0xff]   ;;  %v2236_v38 = vld [vmem:[%s2941_s1 + $0x138] sm:$0xff]  }
   0xc   :  { %1881 = vmatpush3.bf16.msra.mxu0 %v2206_v10  ;;  %v2223_v27 = vld [vmem:[%s2941_s1 + $0x88] sm:$0xff]   ;;  %v2227_v31 = vld [vmem:[%s2941_s1 + $0x80] sm:$0xff]   ;;  %v2237_v39 = vld [vmem:[%s2941_s1 + $0x1b8] sm:$0xff]  }
   0xd   :  { %1945 = vmatpush3.bf16.msra.mxu1 %v2207_v11  ;;  %1882 = vmatprep.subr.bf16.mxu0 %v2208_v12  ;;  %v2228_v32 = vld [vmem:[%s2942_s0] ss:$36 sps:$4 sm:$0xff]   ;;  %v2231_v34 = vld [vmem:[%s2942_s0 + $0x8] ss:$36 sps:$4 sm:$0xff]   ;;  %v2240_v41 = vld [vmem:[%s2942_s0 + $0x54] ss:$36 sps:$4 sm:$0xff]  }
   0xe   :  { %1946 = vmatprep.subr.bf16.mxu1 %v2209_v13  ;;  %v2230_v33 = vld [vmem:[%s2942_s0 + $0x4] ss:$36 sps:$4 sm:$0xff]   ;;  %v2233_v35 = vld [vmem:[%s2942_s0 + $0xc] ss:$36 sps:$4 sm:$0xff]   ;;  %v2248_v48 = vld [vmem:[%s2942_s0 + $0x94] ss:$36 sps:$4 sm:$0xff]  }
   0xf   :  { %1068 = vmatprep.mubr.bf16.mxu0 %v2230_v33  ;;  %1165 = vmatprep.mubr.bf16.mxu1 %v2233_v35  ;;  %v2238_v40 = vld [vmem:[%s2942_s0 + $0x4c] ss:$36 sps:$4 sm:$0xff]   ;;  %v2250_v49 = vld [vmem:[%s2942_s0 + $0x9c] ss:$36 sps:$4 sm:$0xff]   ;;  %v2260_v57 = vld [vmem:[%s2942_s0 + $0xe4] ss:$36 sps:$4 sm:$0xff]  }
  0x10   :  { %1883 = vmatpush3.bf16.msra.mxu0 %v2210_v14  ;;  %v2242_v42 = vld [vmem:[%s2942_s0 + $0x48] ss:$36 sps:$4 sm:$0xff]   ;;  %v2243_v43 = vld [vmem:[%s2942_s0 + $0x50] ss:$36 sps:$4 sm:$0xff]   ;;  %v2253_v51 = vld [vmem:[%s2942_s0 + $0x98] ss:$36 sps:$4 sm:$0xff]  }
  0x11   :  { %1947 = vmatpush3.bf16.msra.mxu1 %v2211_v15  ;;  %1884 = vmatprep.subr.bf16.mxu0 %v2212_v16  ;;  %v2244_v44 = vld [vmem:[%s2941_s1 + $0x170] sm:$0xff]   ;;  %v2254_v52 = vld [vmem:[%s2941_s1 + $0x168] sm:$0xff]   ;;  %v2258_v56 = vld [vmem:[%s2942_s0 + $0xdc] ss:$36 sps:$4 sm:$0xff]  }
  0x12   :  { %1948 = vmatprep.subr.bf16.mxu1 %v2213_v17  ;;  %v2245_v45 = vld [vmem:[%s2941_s1 + $0x1f0] sm:$0xff]   ;;  %v2255_v53 = vld [vmem:[%s2941_s1 + $0x1e8] sm:$0xff]   ;;  %v2262_v58 = vld [vmem:[%s2942_s0 + $0xd8] ss:$36 sps:$4 sm:$0xff]  }
  0x13   :  { %v2246_v46 = vld [vmem:[%s2941_s1 + $0x130] sm:$0xff]   ;;  %v2256_v54 = vld [vmem:[%s2941_s1 + $0x128] sm:$0xff]   ;;  %v2263_v59 = vld [vmem:[%s2942_s0 + $0xe0] ss:$36 sps:$4 sm:$0xff]  }
  0x14   :  { %1885 = vmatpush3.bf16.msra.mxu0 %v2214_v18  ;;  %v2247_v47 = vld [vmem:[%s2941_s1 + $0x1b0] sm:$0xff]   ;;  %v2257_v55 = vld [vmem:[%s2941_s1 + $0x1a8] sm:$0xff]   ;;  %v2264_v60 = vld [vmem:[%s2941_s1 + $0x160] sm:$0xff]  }
  0x15   :  { %1949 = vmatpush3.bf16.msra.mxu1 %v2215_v19  ;;  %1886 = vmatprep.subr.bf16.mxu0 %v2216_v20  ;;  %v2252_v50 = vld [vmem:[%s2942_s0 + $0x90] ss:$36 sps:$4 sm:$0xff]   ;;  %v2265_v61 = vld [vmem:[%s2941_s1 + $0x1e0] sm:$0xff]   ;;  %v2274_v3 = vld [vmem:[%s2941_s1 + $0x158] sm:$0xff]  }
  0x16   :  { %1950 = vmatprep.subr.bf16.mxu1 %v2217_v21  ;;  %v2266_v62 = vld [vmem:[%s2941_s1 + $0x120] sm:$0xff]   ;;  %v2270_v1 = vld [vmem:[%s2942_s0 + $0x12c] ss:$36 sps:$4 sm:$0xff]   ;;  %v2275_v5 = vld [vmem:[%s2941_s1 + $0x1d8] sm:$0xff]  }
  0x17   :  { %v2267_v63 = vld [vmem:[%s2941_s1 + $0x1a0] sm:$0xff]   ;;  %v2273_v4 = vld [vmem:[%s2942_s0 + $0x128] ss:$36 sps:$4 sm:$0xff]   ;;  %v2276_v6 = vld [vmem:[%s2941_s1 + $0x118] sm:$0xff]  }
  0x18   :  { %1887 = vmatpush3.bf16.msra.mxu0 %v2218_v22  ;;  %v2268_v0 = vld [vmem:[%s2942_s0 + $0x124] ss:$36 sps:$4 sm:$0xff]   ;;  %v2277_v7 = vld [vmem:[%s2941_s1 + $0x198] sm:$0xff]   ;;  %v2278_v8 = vld [vmem:[%s2942_s0 + $0x16c] ss:$36 sps:$4 sm:$0xff]  }
  0x19   :  { %1951 = vmatpush3.bf16.msra.mxu1 %v2219_v23  ;;  %1888 = vmatprep.subr.bf16.mxu0 %v2220_v24  ;;  %v2272_v2 = vld [vmem:[%s2942_s0 + $0x120] ss:$36 sps:$4 sm:$0xff]   ;;  %v2280_v9 = vld [vmem:[%s2942_s0 + $0x174] ss:$36 sps:$4 sm:$0xff]   ;;  %v2282_v12 = vld [vmem:[%s2942_s0 + $0x168] ss:$36 sps:$4 sm:$0xff]  }
  0x1a   :  { %1952 = vmatprep.subr.bf16.mxu1 %v2221_v25  ;;  %v2284_v10 = vld [vmem:[%s2941_s1 + $0x150] sm:$0xff]   ;;  %v2290_v17 = vld [vmem:[%s2942_s0 + $0x1bc] ss:$36 sps:$4 sm:$0xff]   ;;  %v2294_v18 = vld [vmem:[%s2941_s1 + $0x148] sm:$0xff]  }
  0x1b   :  { %v2285_v11 = vld [vmem:[%s2941_s1 + $0x1d0] sm:$0xff]   ;;  %v2295_v19 = vld [vmem:[%s2941_s1 + $0x1c8] sm:$0xff]   ;;  %v2293_v23 = vld [vmem:[%s2942_s0 + $0x1b8] ss:$36 sps:$4 sm:$0xff]  }
  0x1c   :  { %1889 = vmatpush3.bf16.msra.mxu0 %v2222_v26  ;;  %v2286_v13 = vld [vmem:[%s2941_s1 + $0x110] sm:$0xff]   ;;  %v2296_v20 = vld [vmem:[%s2941_s1 + $0x108] sm:$0xff]   ;;  %v2298_v24 = vld [vmem:[%s2942_s0 + $0x1fc] ss:$36 sps:$4 sm:$0xff]  }
  0x1d   :  { %1953 = vmatpush3.bf16.msra.mxu1 %v2223_v27  ;;  %1890 = vmatprep.subr.bf16.mxu0 %v2224_v28  ;;  %v2287_v14 = vld [vmem:[%s2941_s1 + $0x190] sm:$0xff]   ;;  %v2297_v21 = vld [vmem:[%s2941_s1 + $0x188] sm:$0xff]   ;;  %v2304_v26 = vld [vmem:[%s2941_s1 + $0x140] sm:$0xff]  }
  0x1e   :  { %1954 = vmatprep.subr.bf16.mxu1 %v2225_v29  ;;  %v2283_v15 = vld [vmem:[%s2942_s0 + $0x170] ss:$36 sps:$4 sm:$0xff]   ;;  %v2300_v25 = vld [vmem:[%s2942_s0 + $0x204] ss:$36 sps:$4 sm:$0xff]  }
  0x1f   :  { %v2288_v16 = vld [vmem:[%s2942_s0 + $0x1b4] ss:$36 sps:$4 sm:$0xff]   ;;  %v2305_v27 = vld [vmem:[%s2941_s1 + $0x1c0] sm:$0xff]  }
  0x20   :  { %1891 = vmatpush3.bf16.msra.mxu0 %v2226_v30  ;;  %v2292_v22 = vld [vmem:[%s2942_s0 + $0x1b0] ss:$36 sps:$4 sm:$0xff]   ;;  %v2306_v28 = vld [vmem:[%s2941_s1 + $0x100] sm:$0xff]   ;;  %v2302_v30 = vld [vmem:[%s2942_s0 + $0x1f8] ss:$36 sps:$4 sm:$0xff]  }
  0x21   :  { %1955 = vmatpush3.bf16.msra.mxu1 %v2227_v31  ;;  %2004 = vmatprep.subr.bf16.mxu0 %v2234_v36  ;;  %v2307_v29 = vld [vmem:[%s2941_s1 + $0x180] sm:$0xff]   ;;  %v2310_v33 = vld [vmem:[%s2942_s0 + $0x14] ss:$36 sps:$4 sm:$0xff]  }
  0x22   :  { %2068 = vmatprep.subr.bf16.mxu1 %v2235_v37  ;;  %v2303_v31 = vld [vmem:[%s2942_s0 + $0x200] ss:$36 sps:$4 sm:$0xff]   ;;  %v2308_v35 = vld [vmem:[%s2942_s0 + $0x10] ss:$36 sps:$4 sm:$0xff]   ;;  %v2311_v36 = vld [vmem:[%s2942_s0 + $0x18] ss:$36 sps:$4 sm:$0xff]  }
  0x23   :  { %1069 = vmatmul.mubr.bf16.vlgmr.msra.gmra.mxu0 %v2228_v32  ;;  %v2314_v32 = vld [vmem:[%s2941_s1 + $0x238] sm:$0xff]  }
  0x24   :  { %1166 = vmatmul.mubr.bf16.vlgmr.msra.gmra.mxu1 %v2231_v34  ;;  %2005 = vmatpush3.bf16.msra.mxu0 %v2236_v38  ;;  %v2313_v34 = vld [vmem:[%s2942_s0 + $0x1c] ss:$36 sps:$4 sm:$0xff]   ;;  %v2317_v38 = vld [vmem:[%s2942_s0 + $0x64] ss:$36 sps:$4 sm:$0xff]  }
  0x25   :  { %2069 = vmatpush3.bf16.msra.mxu1 %v2237_v39  ;;  %1076 = vmatprep.mubr.bf16.mxu0 %v2238_v40  ;;  %v2315_v37 = vld [vmem:[%s2942_s0 + $0x5c] ss:$36 sps:$4 sm:$0xff]   ;;  %v2321_v39 = vld [vmem:[%s2941_s1 + $0x230] sm:$0xff]   ;;  %v2328_v40 = vld [vmem:[%s2941_s1 + $0x228] sm:$0xff]  }
  0x26   :  { %1173 = vmatprep.mubr.bf16.mxu1 %v2240_v41  ;;  %2006 = vmatprep.subr.bf16.mxu0 %v2244_v44  ;;  %v2319_v41 = vld [vmem:[%s2942_s0 + $0x58] ss:$36 sps:$4 sm:$0xff]   ;;  %v2324_v44 = vld [vmem:[%s2942_s0 + $0xac] ss:$36 sps:$4 sm:$0xff]  }
  0x27   :  { %2070 = vmatprep.subr.bf16.mxu1 %v2245_v45  ;;  %v2335_v45 = vld [vmem:[%s2941_s1 + $0x220] sm:$0xff]  }
  0x28   :  { %2007 = vmatpush3.bf16.msra.mxu0 %v2246_v46  ;;  %v2342_v46 = vld [vmem:[%s2941_s1 + $0x218] sm:$0xff]  }
  0x29   :  { %2071 = vmatpush3.bf16.msra.mxu1 %v2247_v47  ;;  %2008 = vmatprep.subr.bf16.mxu0 %v2254_v52  ;;  %v2326_v47 = vld [vmem:[%s2942_s0 + $0xa0] ss:$36 sps:$4 sm:$0xff]   ;;  %v2333_v52 = vld [vmem:[%s2942_s0 + $0xe8] ss:$36 sps:$4 sm:$0xff]  }
  0x2a   :  { %2072 = vmatprep.subr.bf16.mxu1 %v2255_v53  ;;  %v2356_v53 = vld [vmem:[%s2941_s1 + $0x208] sm:$0xff]  }
  0x2b   :  { %1077 = vmatmul.mubr.bf16.gmra.mxu0 %v2242_v42  ;;  %v2320_v42 = vld [vmem:[%s2942_s0 + $0x60] ss:$36 sps:$4 sm:$0xff]  }
  0x2c   :  { %1174 = vmatmul.mubr.bf16.gmra.mxu1 %v2243_v43  ;;  %1084 = vmatprep.mubr.bf16.mxu0 %v2248_v48  ;;  %v2322_v43 = vld [vmem:[%s2942_s0 + $0xa4] ss:$36 sps:$4 sm:$0xff]  }
  0x2d   :  { %1181 = vmatprep.mubr.bf16.mxu1 %v2250_v49  ;;  %2009 = vmatpush3.bf16.msra.mxu0 %v2256_v54  ;;  %v2327_v48 = vld [vmem:[%s2942_s0 + $0xa8] ss:$36 sps:$4 sm:$0xff]   ;;  %v2334_v54 = vld [vmem:[%s2942_s0 + $0xf0] ss:$36 sps:$4 sm:$0xff]  }
  0x2e   :  { %2073 = vmatpush3.bf16.msra.mxu1 %v2257_v55  ;;  %2010 = vmatprep.subr.bf16.mxu0 %v2264_v60  ;;  %v2329_v49 = vld [vmem:[%s2942_s0 + $0xec] ss:$36 sps:$4 sm:$0xff]   ;;  %v2336_v55 = vld [vmem:[%s2942_s0 + $0x134] ss:$36 sps:$4 sm:$0xff]   ;;  %v2343_v60 = vld [vmem:[%s2942_s0 + $0x17c] ss:$36 sps:$4 sm:$0xff]  }
  0x2f   :  { %2074 = vmatprep.subr.bf16.mxu1 %v2265_v61  ;;  %v2345_v61 = vld [vmem:[%s2942_s0 + $0x184] ss:$36 sps:$4 sm:$0xff]  }
  0x31   :  { %2011 = vmatpush3.bf16.msra.mxu0 %v2266_v62  ;;  %v2347_v62 = vld [vmem:[%s2942_s0 + $0x178] ss:$36 sps:$4 sm:$0xff]  }
  0x32   :  { %2075 = vmatpush3.bf16.msra.mxu1 %v2267_v63  ;;  %2012 = vmatprep.subr.bf16.mxu0 %v2274_v3  ;;  %v2348_v63 = vld [vmem:[%s2942_s0 + $0x180] ss:$36 sps:$4 sm:$0xff]   ;;  %v2355_v3 = vld [vmem:[%s2942_s0 + $0x1c8] ss:$36 sps:$4 sm:$0xff]  }
  0x33   :  { %1085 = vmatmul.mubr.bf16.gmra.mxu0 %v2252_v50  ;;  %2076 = vmatprep.subr.bf16.mxu1 %v2275_v5  ;;  %v2331_v50 = vld [vmem:[%s2942_s0 + $0xf4] ss:$36 sps:$4 sm:$0xff]  }
  0x34   :  { %1182 = vmatmul.mubr.bf16.gmra.mxu1 %v2253_v51  ;;  %1092 = vmatprep.mubr.bf16.mxu0 %v2258_v56  ;;  %v2349_v51 = vld [vmem:[%s2941_s1 + $0x210] sm:$0xff]   ;;  %v2338_v56 = vld [vmem:[%s2942_s0 + $0x13c] ss:$36 sps:$4 sm:$0xff]  }
  0x35   :  { %1189 = vmatprep.mubr.bf16.mxu1 %v2260_v57  ;;  %2013 = vmatpush3.bf16.msra.mxu0 %v2276_v6  ;;  %v2363_v57 = vld [vmem:[%s2941_s1 + $0x200] sm:$0xff]   ;;  %v2359_v5 = vld [vmem:[%s2942_s0 + $0x214] ss:$36 sps:$4 sm:$0xff]   ;;  %v2361_v6 = vld [vmem:[%s2942_s0 + $0x208] ss:$36 sps:$4 sm:$0xff]  }
  0x36   :  { %2077 = vmatpush3.bf16.msra.mxu1 %v2277_v7  ;;  %2014 = vmatprep.subr.bf16.mxu0 %v2284_v10  ;;  %v2362_v7 = vld [vmem:[%s2942_s0 + $0x210] ss:$36 sps:$4 sm:$0xff]   ;;  %v2366_v10 = vld [vmem:[%s2942_s0 + $0x68] ss:$36 sps:$4 sm:$0xff]  }
  0x37   :  { %2078 = vmatprep.subr.bf16.mxu1 %v2285_v11  ;;  %v2367_v11 = vld [vmem:[%s2942_s0 + $0x188] ss:$36 sps:$4 sm:$0xff]  }
  0x39   :  { %2015 = vmatpush3.bf16.msra.mxu0 %v2286_v13  ;;  %v2369_v13 = vld [vmem:[%s2942_s0 + $0x1d0] ss:$36 sps:$4 sm:$0xff]  }
  0x3a   :  { %2079 = vmatpush3.bf16.msra.mxu1 %v2287_v14  ;;  %2016 = vmatprep.subr.bf16.mxu0 %v2294_v18  ;;  %v2370_v14 = vld [vmem:[%s2942_s0 + $0xf8] ss:$36 sps:$4 sm:$0xff]  }
  0x3b   :  { %1093 = vmatmul.mubr.bf16.gmra.mxu0 %v2262_v58  ;;  %2080 = vmatprep.subr.bf16.mxu1 %v2295_v19  ;;  %v2340_v58 = vld [vmem:[%s2942_s0 + $0x130] ss:$36 sps:$4 sm:$0xff]  }
  0x3c   :  { %1190 = vmatmul.mubr.bf16.gmra.mxu1 %v2263_v59  ;;  %1100 = vmatprep.mubr.bf16.mxu0 %v2268_v0  ;;  %v2341_v59 = vld [vmem:[%s2942_s0 + $0x138] ss:$36 sps:$4 sm:$0xff]   ;;  %v2350_v0 = vld [vmem:[%s2942_s0 + $0x1c4] ss:$36 sps:$4 sm:$0xff]  }
  0x3d   :  { %1197 = vmatprep.mubr.bf16.mxu1 %v2270_v1  ;;  %2017 = vmatpush3.bf16.msra.mxu0 %v2296_v20  ;;  %v2352_v1 = vld [vmem:[%s2942_s0 + $0x1cc] ss:$36 sps:$4 sm:$0xff]  }
  0x3e   :  { %2081 = vmatpush3.bf16.msra.mxu1 %v2297_v21  ;;  %2018 = vmatprep.subr.bf16.mxu0 %v2304_v26 }
  0x3f   :  { %2082 = vmatprep.subr.bf16.mxu1 %v2305_v27 }
  0x41   :  { %2019 = vmatpush3.bf16.msra.mxu0 %v2306_v28 }
  0x42   :  { %2083 = vmatpush3.bf16.msra.mxu1 %v2307_v29  ;;  %2148 = vmatprep.subr.bf16.mxu0 %v2314_v32 }
  0x43   :  { %1101 = vmatmul.mubr.bf16.gmra.mxu0 %v2272_v2  ;;  %2180 = vmatprep.subr.bf16.mxu1 %v2314_v32  ;;  %v2354_v2 = vld [vmem:[%s2942_s0 + $0x1c0] ss:$36 sps:$4 sm:$0xff]  }
  0x44   :  { %1198 = vmatmul.mubr.bf16.gmra.mxu1 %v2273_v4  ;;  %1108 = vmatprep.mubr.bf16.mxu0 %v2278_v8  ;;  %v2357_v4 = vld [vmem:[%s2942_s0 + $0x20c] ss:$36 sps:$4 sm:$0xff]   ;;  %v2364_v8 = vld [vmem:[%s2942_s0 + $0x20] ss:$36 sps:$4 sm:$0xff]  }
  0x45   :  { %1205 = vmatprep.mubr.bf16.mxu1 %v2280_v9  ;;  %v2365_v9 = vld [vmem:[%s2942_s0 + $0x140] ss:$36 sps:$4 sm:$0xff]  }
  0x4b   :  { %1109 = vmatmul.mubr.bf16.gmra.mxu0 %v2282_v12  ;;  %v2368_v12 = vld [vmem:[%s2942_s0 + $0xb0] ss:$36 sps:$4 sm:$0xff]  }
  0x4c   :  { %1206 = vmatmul.mubr.bf16.gmra.mxu1 %v2283_v15  ;;  %1116 = vmatprep.mubr.bf16.mxu0 %v2288_v16  ;;  %v2371_v15 = vld [vmem:[%s2942_s0 + $0x218] ss:$36 sps:$4 sm:$0xff]  }
  0x4d   :  { %1213 = vmatprep.mubr.bf16.mxu1 %v2290_v17 }
  0x53   :  { %1117 = vmatmul.mubr.bf16.gmra.mxu0 %v2292_v22 }
  0x54   :  { %1214 = vmatmul.mubr.bf16.gmra.mxu1 %v2293_v23  ;;  %1124 = vmatprep.mubr.bf16.mxu0 %v2298_v24 }
  0x55   :  { %1221 = vmatprep.mubr.bf16.mxu1 %v2300_v25 }
  0x5b   :  { %1125 = vmatmul.mubr.bf16.gmra.mxu0 %v2302_v30 }
  0x5c   :  { %1222 = vmatmul.mubr.bf16.gmra.mxu1 %v2303_v31  ;;  %1262 = vmatprep.mubr.bf16.mxu0 %v2310_v33 }
  0x5d   :  { %1359 = vmatprep.mubr.bf16.mxu1 %v2313_v34 }
  0x63   :  { %1263 = vmatmul.mubr.bf16.vlgmr.msra.gmra.mxu0 %v2308_v35 }
  0x64   :  { %1360 = vmatmul.mubr.bf16.vlgmr.msra.gmra.mxu1 %v2311_v36  ;;  %2149 = vmatpush3.bf16.msra.mxu0 %v2314_v32 }
  0x65   :  { %2188 = vmatpush3.bf16.msra.mxu1 %v2314_v32  ;;  %1270 = vmatprep.mubr.bf16.mxu0 %v2315_v37 }
  0x66   :  { %1367 = vmatprep.mubr.bf16.mxu1 %v2317_v38  ;;  %2150 = vmatprep.subr.bf16.mxu0 %v2321_v39 }
  0x67   :  { %2181 = vmatprep.subr.bf16.mxu1 %v2321_v39 }
  0x68   :  { %2151 = vmatpush3.bf16.msra.mxu0 %v2321_v39 }
  0x69   :  { %2189 = vmatpush3.bf16.msra.mxu1 %v2321_v39  ;;  %2152 = vmatprep.subr.bf16.mxu0 %v2328_v40 }
  0x6a   :  { %2182 = vmatprep.subr.bf16.mxu1 %v2328_v40 }
  0x6b   :  { %1271 = vmatmul.mubr.bf16.gmra.mxu0 %v2319_v41 }
  0x6c   :  { %1368 = vmatmul.mubr.bf16.gmra.mxu1 %v2320_v42  ;;  %1278 = vmatprep.mubr.bf16.mxu0 %v2322_v43 }
  0x6d   :  { %1375 = vmatprep.mubr.bf16.mxu1 %v2324_v44  ;;  %2153 = vmatpush3.bf16.msra.mxu0 %v2328_v40 }
  0x6e   :  { %2190 = vmatpush3.bf16.msra.mxu1 %v2328_v40  ;;  %2154 = vmatprep.subr.bf16.mxu0 %v2335_v45 }
  0x6f   :  { %2183 = vmatprep.subr.bf16.mxu1 %v2335_v45 }
  0x71   :  { %2155 = vmatpush3.bf16.msra.mxu0 %v2335_v45 }
  0x72   :  { %2191 = vmatpush3.bf16.msra.mxu1 %v2335_v45  ;;  %2156 = vmatprep.subr.bf16.mxu0 %v2342_v46 }
  0x73   :  { %1279 = vmatmul.mubr.bf16.gmra.mxu0 %v2326_v47  ;;  %2184 = vmatprep.subr.bf16.mxu1 %v2342_v46 }
  0x74   :  { %1376 = vmatmul.mubr.bf16.gmra.mxu1 %v2327_v48  ;;  %1286 = vmatprep.mubr.bf16.mxu0 %v2329_v49 }
  0x75   :  { %1383 = vmatprep.mubr.bf16.mxu1 %v2331_v50  ;;  %2157 = vmatpush3.bf16.msra.mxu0 %v2342_v46 }
  0x76   :  { %2192 = vmatpush3.bf16.msra.mxu1 %v2342_v46  ;;  %2158 = vmatprep.subr.bf16.mxu0 %v2349_v51 }
  0x77   :  { %2185 = vmatprep.subr.bf16.mxu1 %v2349_v51 }
  0x79   :  { %2159 = vmatpush3.bf16.msra.mxu0 %v2349_v51 }
  0x7a   :  { %2193 = vmatpush3.bf16.msra.mxu1 %v2349_v51  ;;  %2160 = vmatprep.subr.bf16.mxu0 %v2356_v53 }
  0x7b   :  { %1287 = vmatmul.mubr.bf16.gmra.mxu0 %v2333_v52  ;;  %2186 = vmatprep.subr.bf16.mxu1 %v2356_v53 }
  0x7c   :  { %1384 = vmatmul.mubr.bf16.gmra.mxu1 %v2334_v54  ;;  %1294 = vmatprep.mubr.bf16.mxu0 %v2336_v55 }
  0x7d   :  { %1391 = vmatprep.mubr.bf16.mxu1 %v2338_v56  ;;  %2161 = vmatpush3.bf16.msra.mxu0 %v2356_v53 }
  0x7e   :  { %2194 = vmatpush3.bf16.msra.mxu1 %v2356_v53  ;;  %2162 = vmatprep.subr.bf16.mxu0 %v2363_v57 }
  0x7f   :  { %2187 = vmatprep.subr.bf16.mxu1 %v2363_v57 }
  0x81   :  { %2163 = vmatpush3.bf16.msra.mxu0 %v2363_v57 }
  0x82   :  { %2195 = vmatpush3.bf16.msra.mxu1 %v2363_v57 }
  0x83   :  { %1295 = vmatmul.mubr.bf16.gmra.mxu0 %v2340_v58 }
  0x84   :  { %1392 = vmatmul.mubr.bf16.gmra.mxu1 %v2341_v59  ;;  %1302 = vmatprep.mubr.bf16.mxu0 %v2343_v60 }
  0x85   :  { %1399 = vmatprep.mubr.bf16.mxu1 %v2345_v61 }
  0x8b   :  { %1303 = vmatmul.mubr.bf16.gmra.mxu0 %v2347_v62 }
  0x8c   :  { %1400 = vmatmul.mubr.bf16.gmra.mxu1 %v2348_v63  ;;  %1310 = vmatprep.mubr.bf16.mxu0 %v2350_v0 }
  0x8d   :  { %1407 = vmatprep.mubr.bf16.mxu1 %v2352_v1 }
  0x93   :  { %1311 = vmatmul.mubr.bf16.gmra.mxu0 %v2354_v2 }
  0x94   :  { %1408 = vmatmul.mubr.bf16.gmra.mxu1 %v2355_v3  ;;  %1318 = vmatprep.mubr.bf16.mxu0 %v2357_v4 }
  0x95   :  { %1415 = vmatprep.mubr.bf16.mxu1 %v2359_v5 }
  0x9b   :  { %1319 = vmatmul.mubr.bf16.gmra.mxu0 %v2361_v6 }
  0x9c   :  { %1416 = vmatmul.mubr.bf16.gmra.mxu1 %v2362_v7  ;;  %2164 = vmatprep.mubr.bf16.mxu0 %v2364_v8 }
  0x9d   :  { %2172 = vmatprep.mubr.bf16.mxu1 %v2365_v9 }
  0xa3   :  { %2165 = vmatmul.mubr.bf16.vlgmr.msra.gmra.mxu0 %v2366_v10 }
  0xa4   :  { %2173 = vmatmul.mubr.bf16.vlgmr.msra.gmra.mxu1 %v2367_v11  ;;  %2168 = vmatprep.mubr.bf16.mxu0 %v2368_v12 }
  0xa5   :  { %2176 = vmatprep.mubr.bf16.mxu1 %v2369_v13 }
  0xab   :  { %2169 = vmatmul.mubr.bf16.gmra.mxu0 %v2370_v14 }
  0xac   :  { %2177 = vmatmul.mubr.bf16.gmra.mxu1 %v2371_v15 }
  0xe3   :  { %v1892_v16 = vpop.f32.mrf.mxu0 }
  0xe4   :  { %v1956_v17 = vpop.f32.mrf.mxu1 }
  0xe5   :  { %v1893_v18 = vpop.f32.mrf.mxu0 }
  0xe6   :  { %v1894_v19 = vadd.f32 %v1893_v18, %v1892_v16  ;;  %v1957_v20 = vpop.f32.mrf.mxu1 }
  0xe7   :  { %v1958_v21 = vadd.f32 %v1957_v20, %v1956_v17  ;;  %v1895_v22 = vpop.f32.mrf.mxu0 }
  0xe8   :  { %v1959_v23 = vpop.f32.mrf.mxu1 }
  0xe9   :  { %v2819_v24 = vadd.f32 %v1958_v21, %v1894_v19  ;;  %v1896_v25 = vpop.f32.mrf.mxu0 }
  0xea   :  { %v1897_v26 = vadd.f32 %v1896_v25, %v1895_v22  ;;  %v1960_v27 = vpop.f32.mrf.mxu1 }
  0xeb   :  { %v1961_v28 = vadd.f32 %v1960_v27, %v1959_v23  ;;  %v1898_v29 = vpop.f32.mrf.mxu0 }
  0xec   :  { %v1962_v30 = vpop.f32.mrf.mxu1 }
  0xed   :  { %v2821_v31 = vadd.f32 %v1961_v28, %v1897_v26  ;;  %v1899_v32 = vpop.f32.mrf.mxu0 }
  0xee   :  { %v1900_v33 = vadd.f32 %v1899_v32, %v1898_v29  ;;  %v1963_v34 = vpop.f32.mrf.mxu1 }
  0xef   :  { %v1964_v35 = vadd.f32 %v1963_v34, %v1962_v30  ;;  %v1901_v36 = vpop.f32.mrf.mxu0 }
  0xf0   :  { %v1965_v37 = vpop.f32.mrf.mxu1 }
  0xf1   :  { %v2823_v38 = vadd.f32 %v1964_v35, %v1900_v33  ;;  %v1902_v39 = vpop.f32.mrf.mxu0 }
  0xf2   :  { %v1903_v40 = vadd.f32 %v1902_v39, %v1901_v36  ;;  %v1966_v41 = vpop.f32.mrf.mxu1 }
  0xf3   :  { %v1967_v42 = vadd.f32 %v1966_v41, %v1965_v37  ;;  %v1904_v43 = vpop.f32.mrf.mxu0 }
  0xf4   :  { %v1968_v44 = vpop.f32.mrf.mxu1 }
  0xf5   :  { %v2825_v45 = vadd.f32 %v1967_v42, %v1903_v40  ;;  %v1905_v46 = vpop.f32.mrf.mxu0 }
  0xf6   :  { %v1906_v47 = vadd.f32 %v1905_v46, %v1904_v43  ;;  %v1969_v48 = vpop.f32.mrf.mxu1 }
  0xf7   :  { %v1970_v49 = vadd.f32 %v1969_v48, %v1968_v44  ;;  %v1907_v50 = vpop.f32.mrf.mxu0 }
  0xf8   :  { %v1971_v51 = vpop.f32.mrf.mxu1 }
  0xf9   :  { %v2827_v52 = vadd.f32 %v1970_v49, %v1906_v47  ;;  %v1908_v53 = vpop.f32.mrf.mxu0 }
  0xfa   :  { %v1909_v54 = vadd.f32 %v1908_v53, %v1907_v50  ;;  %v1972_v55 = vpop.f32.mrf.mxu1 }
  0xfb   :  { %v1973_v56 = vadd.f32 %v1972_v55, %v1971_v51  ;;  %v1910_v57 = vpop.f32.mrf.mxu0 }
  0xfc   :  { %v1974_v58 = vpop.f32.mrf.mxu1 }
  0xfd   :  { %v2829_v59 = vadd.f32 %v1973_v56, %v1909_v54  ;;  %v1911_v60 = vpop.f32.mrf.mxu0 }
  0xfe   :  { %v1912_v61 = vadd.f32 %v1911_v60, %v1910_v57  ;;  %v1975_v62 = vpop.f32.mrf.mxu1 }
  0xff   :  { %v1976_v63 = vadd.f32 %v1975_v62, %v1974_v58  ;;  %v1913_v0 = vpop.f32.mrf.mxu0 }
 0x100   :  { %v1977_v1 = vpop.f32.mrf.mxu1 }
 0x101   :  { %v2831_v2 = vadd.f32 %v1976_v63, %v1912_v61  ;;  %v1914_v3 = vpop.f32.mrf.mxu0 }
 0x102   :  { %v1915_v4 = vadd.f32 %v1914_v3, %v1913_v0  ;;  %v1978_v5 = vpop.f32.mrf.mxu1 }
 0x103   :  { %v1979_v6 = vadd.f32 %v1978_v5, %v1977_v1  ;;  %v1916_v7 = vpop.f32.mrf.mxu0 }
 0x104   :  { %v1980_v8 = vpop.f32.mrf.mxu1 }
 0x105   :  { %v2833_v9 = vadd.f32 %v1979_v6, %v1915_v4  ;;  %v1917_v10 = vpop.f32.mrf.mxu0 }
 0x106   :  { %v1918_v11 = vadd.f32 %v1917_v10, %v1916_v7  ;;  %v1981_v12 = vpop.f32.mrf.mxu1 }
 0x107   :  { %v1982_v13 = vadd.f32 %v1981_v12, %v1980_v8  ;;  %v1919_v14 = vpop.f32.mrf.mxu0 }
 0x108   :  { %v1983_v15 = vpop.f32.mrf.mxu1 }
 0x109   :  { %v2835_v16 = vadd.f32 %v1982_v13, %v1918_v11  ;;  %v1920_v17 = vpop.f32.mrf.mxu0 }
 0x10a   :  { %v1921_v18 = vadd.f32 %v1920_v17, %v1919_v14  ;;  %v1984_v19 = vpop.f32.mrf.mxu1 }
 0x10b   :  { %v1985_v20 = vadd.f32 %v1984_v19, %v1983_v15  ;;  %v1922_v21 = vpop.f32.mrf.mxu0 }
 0x10c   :  { %v1986_v22 = vpop.f32.mrf.mxu1 }
 0x10d   :  { %v2837_v23 = vadd.f32 %v1985_v20, %v1921_v18  ;;  %v1923_v25 = vpop.f32.mrf.mxu0 }
 0x10e   :  { %v1924_v26 = vadd.f32 %v1923_v25, %v1922_v21  ;;  %v1987_v27 = vpop.f32.mrf.mxu1 }
 0x10f   :  { %2944 = vst [vmem:[#allocation2_spill] sm:$0xff] %v2837_v23  ;;  %v1988_v28 = vadd.f32 %v1987_v27, %v1986_v22  ;;  %v1925_v29 = vpop.f32.mrf.mxu0 }
 0x110   :  { %v1989_v30 = vpop.f32.mrf.mxu1 }
 0x111   :  { %v2839_v32 = vadd.f32 %v1988_v28, %v1924_v26  ;;  %v1926_v33 = vpop.f32.mrf.mxu0 }
 0x112   :  { %v1927_v34 = vadd.f32 %v1926_v33, %v1925_v29  ;;  %v1990_v35 = vpop.f32.mrf.mxu1 }
 0x113   :  { %2945 = vst [vmem:[#allocation3_spill] sm:$0xff] %v2839_v32  ;;  %v1991_v36 = vadd.f32 %v1990_v35, %v1989_v30  ;;  %v1928_v37 = vpop.f32.mrf.mxu0 }
 0x114   :  { %v1992_v39 = vpop.f32.mrf.mxu1 }
 0x115   :  { %v2841_v40 = vadd.f32 %v1991_v36, %v1927_v34  ;;  %v1929_v41 = vpop.f32.mrf.mxu0 }
 0x116   :  { %v1930_v42 = vadd.f32 %v1929_v41, %v1928_v37  ;;  %v1993_v43 = vpop.f32.mrf.mxu1 }
 0x117   :  { %2946 = vst [vmem:[#allocation4_spill] sm:$0xff] %v2841_v40  ;;  %v1994_v44 = vadd.f32 %v1993_v43, %v1992_v39  ;;  %v1931_v46 = vpop.f32.mrf.mxu0 }
 0x118   :  { %v1995_v47 = vpop.f32.mrf.mxu1 }
 0x119   :  { %v2843_v48 = vadd.f32 %v1994_v44, %v1930_v42  ;;  %v1932_v49 = vpop.f32.mrf.mxu0 }
 0x11a   :  { %v1933_v50 = vadd.f32 %v1932_v49, %v1931_v46  ;;  %v1996_v51 = vpop.f32.mrf.mxu1 }
 0x11b   :  { %2947 = vst [vmem:[#allocation5_spill] sm:$0xff] %v2843_v48  ;;  %v1997_v53 = vadd.f32 %v1996_v51, %v1995_v47  ;;  %v1934_v54 = vpop.f32.mrf.mxu0 }
 0x11c   :  { %v1998_v55 = vpop.f32.mrf.mxu1 }
 0x11d   :  { %v2845_v56 = vadd.f32 %v1997_v53, %v1933_v50  ;;  %v1935_v57 = vpop.f32.mrf.mxu0 }
 0x11e   :  { %v1936_v58 = vadd.f32 %v1935_v57, %v1934_v54  ;;  %v1999_v60 = vpop.f32.mrf.mxu1 }
 0x11f   :  { %2948 = vst [vmem:[#allocation6_spill] sm:$0xff] %v2845_v56  ;;  %v2000_v61 = vadd.f32 %v1999_v60, %v1998_v55  ;;  %v1937_v62 = vpop.f32.mrf.mxu0 }
 0x120   :  { %v2001_v63 = vpop.f32.mrf.mxu1 }
 0x121   :  { %v2847_v0 = vadd.f32 %v2000_v61, %v1936_v58  ;;  %v1938_v1 = vpop.f32.mrf.mxu0 }
 0x122   :  { %v1939_v3 = vadd.f32 %v1938_v1, %v1937_v62  ;;  %v2002_v4 = vpop.f32.mrf.mxu1 }
 0x123   :  { %2949 = vst [vmem:[#allocation7_spill] sm:$0xff] %v2847_v0  ;;  %v2003_v5 = vadd.f32 %v2002_v4, %v2001_v63  ;;  %v2020_v6 = vpop.f32.mrf.mxu0 }
 0x124   :  { %v2084_v7 = vpop.f32.mrf.mxu1 }
 0x125   :  { %v2849_v8 = vadd.f32 %v2003_v5, %v1939_v3  ;;  %v2021_v10 = vpop.f32.mrf.mxu0 }
 0x126   :  { %v2022_v11 = vadd.f32 %v2021_v10, %v2020_v6  ;;  %v2085_v12 = vpop.f32.mrf.mxu1 }
 0x127   :  { %2950 = vst [vmem:[#allocation8_spill] sm:$0xff] %v2849_v8  ;;  %v2023_v13 = vpop.f32.mrf.mxu0  ;;  %v2086_v15 = vadd.f32 %v2085_v12, %v2084_v7 }
 0x128   :  { %v1265_v14 = vadd.f32 %v2022_v11, %v2819_v24  ;;  %v2087_v17 = vpop.f32.mrf.mxu1 }
 0x129   :  { %v2024_v18 = vpop.f32.mrf.mxu0 }
 0x12a   :  { %v2088_v19 = vpop.f32.mrf.mxu1  ;;  %v2852_v20 = vadd.f32 %v2086_v15, %v1265_v14  ;;  %v2025_v14 = vadd.f32 %v2024_v18, %v2023_v13 }
 0x12b   :  { %v2026_v21 = vpop.f32.mrf.mxu0  ;;  %v2089_v48 = vadd.f32 %v2088_v19, %v2087_v17 }
 0x12c   :  { %2951 = vst [vmem:[#allocation9_spill] sm:$0xff] %v2852_v20  ;;  %v2090_v22 = vpop.f32.mrf.mxu1 }
 0x12d   :  { %v2027_v25 = vpop.f32.mrf.mxu0 }
 0x12e   :  { %v2091_v26 = vpop.f32.mrf.mxu1  ;;  %v2028_v15 = vadd.f32 %v2027_v25, %v2026_v21 }
 0x12f   :  { %v2029_v27 = vpop.f32.mrf.mxu0 }
 0x130   :  { %v2093_v28 = vpop.f32.mrf.mxu1  ;;  %v1273_v40 = vadd.f32 %v2028_v15, %v2823_v38 }
 0x131   :  { %v2030_v29 = vpop.f32.mrf.mxu0 }
 0x132   :  { %v2094_v30 = vpop.f32.mrf.mxu1  ;;  %v2031_v8 = vadd.f32 %v2030_v29, %v2029_v27 }
 0x133   :  { %v2032_v33 = vpop.f32.mrf.mxu0  ;;  %v2095_v32 = vadd.f32 %v2094_v30, %v2093_v28 }
 0x134   :  { %v2096_v34 = vpop.f32.mrf.mxu1  ;;  %v1276_v23 = vadd.f32 %v2031_v8, %v2825_v45 }
 0x135   :  { %v2033_v35 = vpop.f32.mrf.mxu0 }
 0x136   :  { %v2097_v36 = vpop.f32.mrf.mxu1  ;;  %v2034_v56 = vadd.f32 %v2033_v35, %v2032_v33 }
 0x137   :  { %v2035_v37 = vpop.f32.mrf.mxu0 }
 0x138   :  { %v2854_v24 = vpop.f32.mrf.mxu1  ;;  %v1281_v13 = vadd.f32 %v2034_v56, %v2827_v52 }
 0x139   :  { %v2036_v39 = vpop.f32.mrf.mxu0 }
 0x13a   :  { %v2100_v41 = vpop.f32.mrf.mxu1  ;;  %v2037_v25 = vadd.f32 %v2036_v39, %v2035_v37  ;;  %v2961_v39 = vld [vmem:[#allocation2_spill] sm:$0xff] }
 0x13b   :  { %v2038_v42 = vpop.f32.mrf.mxu0  ;;  %v2876_v52 = vadd.f32 %v2100_v41, %v2854_v24 }
 0x13c   :  { %v2102_v43 = vpop.f32.mrf.mxu1 }
 0x13d   :  { %v2039_v44 = vpop.f32.mrf.mxu0 }
 0x13e   :  { %v2103_v46 = vpop.f32.mrf.mxu1 }
 0x13f   :  { %v2041_v47 = vpop.f32.mrf.mxu0 }
 0x140   :  { %v2856_v49 = vpop.f32.mrf.mxu1 }
 0x141   :  { %2952 = vst [vmem:[#allocation10_spill] sm:$0xff] %v2856_v49  ;;  %v2042_v50 = vpop.f32.mrf.mxu0  ;;  %v2092_v49 = vadd.f32 %v2091_v26, %v2090_v22  ;;  %v1373_v22 = vadd.f32 %v2095_v32, %v1276_v23 }
 0x142   :  { %v2858_v51 = vpop.f32.mrf.mxu1  ;;  %v2043_v18 = vadd.f32 %v2042_v50, %v2041_v47 }
 0x143   :  { %2953 = vst [vmem:[#allocation11_spill] sm:$0xff] %v2858_v51  ;;  %v2044_v53 = vpop.f32.mrf.mxu0  ;;  %v1370_v8 = vadd.f32 %v2092_v49, %v1273_v40 }
 0x144   :  { %v2860_v54 = vpop.f32.mrf.mxu1  ;;  %v1292_v56 = vadd.f32 %v2043_v18, %v2833_v9  ;;  %v2962_v9 = vld [vmem:[#allocation4_spill] sm:$0xff] }
 0x145   :  { %2954 = vst [vmem:[#allocation12_spill] sm:$0xff] %v2860_v54  ;;  %v2045_v55 = vpop.f32.mrf.mxu0 }
 0x146   :  { %v2862_v57 = vpop.f32.mrf.mxu1  ;;  %v2046_v29 = vadd.f32 %v2045_v55, %v2044_v53 }
 0x147   :  { %2955 = vst [vmem:[#allocation13_spill] sm:$0xff] %v2862_v57  ;;  %v2047_v58 = vpop.f32.mrf.mxu0 }
 0x148   :  { %v2864_v60 = vpop.f32.mrf.mxu1  ;;  %v2959_v32 = vld [vmem:[#allocation10_spill] sm:$0xff] }
 0x149   :  { %2956 = vst [vmem:[#allocation14_spill] sm:$0xff] %v2864_v60  ;;  %v2048_v61 = vpop.f32.mrf.mxu0  ;;  %v2040_v60 = vadd.f32 %v2039_v44, %v2038_v42  ;;  %v2098_v42 = vadd.f32 %v2097_v36, %v2096_v34  ;;  %v2104_v44 = vadd.f32 %v2103_v46, %v2102_v43  ;;  %v2882_v34 = vadd.f32 %v2037_v25, %v2829_v59  ;;  %v2958_v36 = vld [vmem:[#allocation3_spill] sm:$0xff]  ;;  %v2963_v46 = vld [vmem:[#allocation5_spill] sm:$0xff] }
 0x14a   :  { %v2866_v62 = vpop.f32.mrf.mxu1 }
 0x14b   :  { %2957 = vst [vmem:[#allocation15_spill] sm:$0xff] %v2866_v62  ;;  %v2050_v63 = vpop.f32.mrf.mxu0  ;;  %v1268_v62 = vadd.f32 %v2025_v14, %v2821_v31  ;;  %v1289_v27 = vadd.f32 %v2040_v60, %v2831_v2  ;;  %v2049_v31 = vadd.f32 %v2048_v61, %v2047_v58  ;;  %v2879_v30 = vadd.f32 %v2098_v42, %v1281_v13  ;;  %v2966_v58 = vld [vmem:[#allocation7_spill] sm:$0xff] }
 0x14c   :  { %v2114_v1 = vpop.f32.mrf.mxu1  ;;  %v2964_v50 = vld [vmem:[#allocation12_spill] sm:$0xff] }
 0x14d   :  { %v2051_v3 = vpop.f32.mrf.mxu0  ;;  %v2873_v26 = vadd.f32 %v2089_v48, %v1268_v62  ;;  %v2886_v23 = vadd.f32 %v2104_v44, %v1289_v27  ;;  %v2960_v48 = vld [vmem:[#allocation11_spill] sm:$0xff]  ;;  %v1300_v41 = vadd.f32 %v2049_v31, %v2961_v39  ;;  %v2971_v44 = vld [vmem:[#allocation8_spill] sm:$0xff] }
 0x14e   :  { %v2115_v4 = vpop.f32.mrf.mxu1  ;;  %v2052_v33 = vadd.f32 %v2051_v3, %v2050_v63  ;;  %v2107_v24 = vadd.f32 %v2960_v48, %v2959_v32  ;;  %v2965_v59 = vld [vmem:[#allocation13_spill] sm:$0xff] }
 0x14f   :  { %v2053_v5 = vpop.f32.mrf.mxu0  ;;  %v2110_v53 = vadd.f32 %v2965_v59, %v2964_v50  ;;  %v2116_v55 = vadd.f32 %v2115_v4, %v2114_v1  ;;  %v2969_v4 = vld [vmem:[#allocation6_spill] sm:$0xff] }
 0x150   :  { %v2117_v6 = vpop.f32.mrf.mxu1  ;;  %v1305_v37 = vadd.f32 %v2052_v33, %v2958_v36  ;;  %v2967_v62 = vld [vmem:[#allocation14_spill] sm:$0xff]  ;;  %v2898_v14 = vadd.f32 %v2107_v24, %v1292_v56 }
 0x151   :  { %v2054_v7 = vpop.f32.mrf.mxu0 }
 0x152   :  { %v2118_v10 = vpop.f32.mrf.mxu1  ;;  %v2055_v17 = vadd.f32 %v2054_v7, %v2053_v5  ;;  %v2968_v63 = vld [vmem:[#allocation15_spill] sm:$0xff]  ;;  %v1402_v25 = vadd.f32 %v2116_v55, %v1305_v37 }
 0x153   :  { %v2056_v11 = vpop.f32.mrf.mxu0  ;;  %v2113_v3 = vadd.f32 %v2968_v63, %v2967_v62  ;;  %v2119_v5 = vadd.f32 %v2118_v10, %v2117_v6 }
 0x154   :  { %v2120_v12 = vpop.f32.mrf.mxu1  ;;  %v1308_v43 = vadd.f32 %v2055_v17, %v2962_v9  ;;  %v2970_v17 = vld [vmem:[#allocation9_spill] sm:$0xff] }
 0x155   :  { %v2057_v20 = vpop.f32.mrf.mxu0 }
 0x156   :  { %v2121_v0 = vpop.f32.mrf.mxu1  ;;  %v2058_v19 = vadd.f32 %v2057_v20, %v2056_v11  ;;  %v1297_v20 = vadd.f32 %v2046_v29, %v2835_v16  ;;  %v1405_v1 = vadd.f32 %v2119_v5, %v1308_v43 }
 0x157   :  { %v2059_v57 = vpop.f32.mrf.mxu0  ;;  %v2122_v7 = vadd.f32 %v2121_v0, %v2120_v12 }
 0x158   :  { %v2123_v54 = vpop.f32.mrf.mxu1  ;;  %v1313_v47 = vadd.f32 %v2058_v19, %v2963_v46  ;;  %v1394_v27 = vadd.f32 %v2110_v53, %v1297_v20 }
 0x159   :  { %v2060_v51 = vpop.f32.mrf.mxu0 }
 0x15a   :  { %v2124_v21 = vpop.f32.mrf.mxu1  ;;  %v2061_v16 = vadd.f32 %v2060_v51, %v2059_v57  ;;  %v1397_v51 = vadd.f32 %v2113_v3, %v1300_v41  ;;  %v1410_v57 = vadd.f32 %v2122_v7, %v1313_v47 }
 0x15b   :  { %v2062_v35 = vpop.f32.mrf.mxu0  ;;  %v2903_v42 = vadd.f32 %v2124_v21, %v2123_v54 }
 0x15c   :  { %v2126_v38 = vpop.f32.mrf.mxu1 }
 0x15d   :  { %v2063_v45 = vpop.f32.mrf.mxu0 }
 0x15e   :  { %v2064_v2 = vadd.f32 %v2063_v45, %v2062_v35  ;;  %v2127_v28 = vpop.f32.mrf.mxu1  ;;  %v2901_v35 = vadd.f32 %v2061_v16, %v2969_v4 }
 0x15f   :  { %v2065_v40 = vpop.f32.mrf.mxu0  ;;  %v2128_v15 = vadd.f32 %v2127_v28, %v2126_v38 }
 0x160   :  { %v2129_v49 = vpop.f32.mrf.mxu1  ;;  %v1321_v60 = vadd.f32 %v2064_v2, %v2966_v58 }
 0x161   :  { %v2066_v61 = vpop.f32.mrf.mxu0 }
 0x162   :  { %v2130_v11 = vpop.f32.mrf.mxu1  ;;  %v2067_v13 = vadd.f32 %v2066_v61, %v2065_v40  ;;  %v1418_v10 = vadd.f32 %v2128_v15, %v1321_v60 }
 0x163   :  { %v2166_v18 = vpop.f32.mrf.mxu0  ;;  %v2131_v12 = vadd.f32 %v2130_v11, %v2129_v49 }
 0x164   :  { %v1467_v29 = vadd.f32 %v2166_v18, %v1370_v8  ;;  %v2174_v33 = vpop.f32.mrf.mxu1  ;;  %v1324_v45 = vadd.f32 %v2067_v13, %v2971_v44 }
 0x165   :  { %v1499_v6 = vadd.f32 %v2174_v33, %v1402_v25  ;;  %v1458_v0 = vpop.f32.mrf.mxu0  ;;  %v1413_v33 = vadd.f32 %v2903_v42, %v2901_v35 }
 0x166   :  { %vm1523_vm0 = vcmp.gt.f32.partialorder %v1467_v29, 0.0  ;;  %v1539_v31 = vmul.f32 0.2, %v1467_v29  ;;  %v1459_v19 = vadd.f32 %v1458_v0, %v2970_v17  ;;  %v1490_v38 = vpop.f32.mrf.mxu1 }
 0x167   :  { %vm1531_vm1 = vcmp.gt.f32.partialorder %v1499_v6, 0.0  ;;  %v1547_v8 = vmul.f32 0.2, %v1499_v6  ;;  %v1491_v56 = vadd.f32 %v1490_v38, %v1394_v27  ;;  %v2167_v2 = vpop.f32.mrf.mxu0  ;;  %v1421_v27 = vadd.f32 %v2131_v12, %v1324_v45 }
 0x168   :  { %v1555_v28 = vsel %vm1523_vm0, %v1467_v29, %v1539_v31  ;;  %vm1521_vm2 = vcmp.gt.f32.partialorder %v1459_v19, 0.0  ;;  %v1537_v20 = vmul.f32 0.2, %v1459_v19  ;;  %v1470_v54 = vadd.f32 %v2167_v2, %v1373_v22  ;;  %v2175_v21 = vpop.f32.mrf.mxu1 }
 0x169   :  { %v1563_v36 = vsel %vm1531_vm1, %v1499_v6, %v1547_v8  ;;  %vm1529_vm3 = vcmp.gt.f32.partialorder %v1491_v56, 0.0  ;;  %v1545_v37 = vmul.f32 0.2, %v1491_v56  ;;  %v1502_v40 = vadd.f32 %v2175_v21, %v1405_v1  ;;  %v1461_v32 = vpop.f32.mrf.mxu0 }
 0x16a   :  { %v1553_v48 = vsel %vm1521_vm2, %v1459_v19, %v1537_v20  ;;  %vm1524_vm4 = vcmp.gt.f32.partialorder %v1470_v54, 0.0  ;;  %v1540_v24 = vmul.f32 0.2, %v1470_v54  ;;  %v1462_v39 = vadd.f32 %v1461_v32, %v2873_v26  ;;  %v1493_v41 = vpop.f32.mrf.mxu1 }
 0x16b   :  { %v1561_v9 = vsel %vm1529_vm3, %v1491_v56, %v1545_v37  ;;  %vm1532_vm5 = vcmp.gt.f32.partialorder %v1502_v40, 0.0  ;;  %v1548_v43 = vmul.f32 0.2, %v1502_v40  ;;  %v1494_v46 = vadd.f32 %v1493_v41, %v1397_v51  ;;  %v2170_v47 = vpop.f32.mrf.mxu0 }
 0x16c   :  { %v1556_v49 = vsel %vm1524_vm4, %v1470_v54, %v1540_v24  ;;  %vm1522_vm6 = vcmp.gt.f32.partialorder %v1462_v39, 0.0  ;;  %v1538_v22 = vmul.f32 0.2, %v1462_v39  ;;  %v1483_v50 = vadd.f32 %v2170_v47, %v2886_v23  ;;  %v2178_v59 = vpop.f32.mrf.mxu1 }
 0x16d   :  { %v1837_v53 = vpack.c.bf16 %v1556_v49, %v1555_v28  ;;  %v1564_v55 = vsel %vm1532_vm5, %v1502_v40, %v1548_v43  ;;  %vm1530_vm7 = vcmp.gt.f32.partialorder %v1494_v46, 0.0  ;;  %v1546_v16 = vmul.f32 0.2, %v1494_v46  ;;  %v1474_v58 = vpop.f32.mrf.mxu0 }
 0x16e   :  { %v1857_v60 = vpack.c.bf16 %v1564_v55, %v1563_v36  ;;  %v1554_v61 = vsel %vm1522_vm6, %v1462_v39, %v1538_v22  ;;  %vm1527_vm8 = vcmp.gt.f32.partialorder %v1483_v50, 0.0  ;;  %v1543_v26 = vmul.f32 0.2, %v1483_v50  ;;  %v1506_v62 = vpop.f32.mrf.mxu1 }
 0x16f   :  { %1869 = vst [vmem:[%s2943_s2 + $0x8] sm:$0xff] %v1837_v53   ;;  %v1832_v63 = vpack.c.bf16 %v1554_v61, %v1553_v48  ;;  %v1562_v3 = vsel %vm1530_vm7, %v1494_v46, %v1546_v16  ;;  %v1515_v5 = vadd.f32 %v2178_v59, %v1418_v10  ;;  %v1475_v23 = vadd.f32 %v1474_v58, %v2879_v30  ;;  %v2171_v7 = vpop.f32.mrf.mxu0 }
 0x170   :  { %1873 = vst [vmem:[%s2943_s2 + $0x28] sm:$0xff] %v1857_v60   ;;  %v1852_v11 = vpack.c.bf16 %v1562_v3, %v1561_v9  ;;  %v1507_v15 = vadd.f32 %v1506_v62, %v1410_v57  ;;  %v1486_v13 = vadd.f32 %v2171_v7, %v2898_v14  ;;  %v2179_v18 = vpop.f32.mrf.mxu1  ;;  %v1559_v25 = vsel %vm1527_vm8, %v1483_v50, %v1543_v26 }
 0x171   :  { %1833 = vst [vmem:[%s2943_s2] sm:$0xff] %v1832_v63   ;;  %v1381_v29 = vadd.f32 %v2876_v52, %v2882_v34  ;;  %v1477_v30 = vpop.f32.mrf.mxu0  ;;  %vm1535_vm9 = vcmp.gt.f32.partialorder %v1515_v5, 0.0  ;;  %v1551_v14 = vmul.f32 0.2, %v1515_v5  ;;  %vm1525_vm11 = vcmp.gt.f32.partialorder %v1475_v23, 0.0 }
 0x172   :  { %1872 = vst [vmem:[%s2943_s2 + $0x20] sm:$0xff] %v1852_v11   ;;  %vm1528_vm10 = vcmp.gt.f32.partialorder %v1486_v13, 0.0  ;;  %v1544_v1 = vmul.f32 0.2, %v1486_v13  ;;  %v1509_v51 = vpop.f32.mrf.mxu1  ;;  %v1541_v57 = vmul.f32 0.2, %v1475_v23  ;;  %v1518_v4 = vadd.f32 %v2179_v18, %v1421_v27 }
 0x173   :  { %v1478_v6 = vadd.f32 %v1477_v30, %v1381_v29  ;;  %vm1533_vm12 = vcmp.gt.f32.partialorder %v1507_v15, 0.0  ;;  %v1549_v0 = vmul.f32 0.2, %v1507_v15  ;;  %v1510_v34 = vadd.f32 %v1509_v51, %v1413_v33 }
 0x174   :  { %v1560_v52 = vsel %vm1528_vm10, %v1486_v13, %v1544_v1  ;;  %vm1536_vm13 = vcmp.gt.f32.partialorder %v1518_v4, 0.0  ;;  %v1552_v35 = vmul.f32 0.2, %v1518_v4  ;;  %v1567_v31 = vsel %vm1535_vm9, %v1515_v5, %v1551_v14 }
 0x175   :  { %v1847_v10 = vpack.c.bf16 %v1560_v52, %v1559_v25  ;;  %vm1526_vm14 = vcmp.gt.f32.partialorder %v1478_v6, 0.0  ;;  %v1542_v42 = vmul.f32 0.2, %v1478_v6  ;;  %vm1534_vm15 = vcmp.gt.f32.partialorder %v1510_v34, 0.0 }
 0x176   :  { %v1550_v12 = vmul.f32 0.2, %v1510_v34  ;;  %v1557_v17 = vsel %vm1525_vm11, %v1475_v23, %v1541_v57  ;;  %v1568_v19 = vsel %vm1536_vm13, %v1518_v4, %v1552_v35  ;;  %v1565_v38 = vsel %vm1533_vm12, %v1507_v15, %v1549_v0 }
 0x177   :  { %1871 = vst [vmem:[%s2943_s2 + $0x18] sm:$0xff] %v1847_v10   ;;  %v1867_v44 = vpack.c.bf16 %v1568_v19, %v1567_v31  ;;  %v1558_v45 = vsel %vm1526_vm14, %v1478_v6, %v1542_v42 }
 0x178   :  { %v1566_v8 = vsel %vm1534_vm15, %v1510_v34, %v1550_v12  ;;  %v1842_v56 = vpack.c.bf16 %v1558_v45, %v1557_v17 }
 0x179   :  { %v1862_v2 = vpack.c.bf16 %v1566_v8, %v1565_v38  ;;  %1875 = vst [vmem:[%s2943_s2 + $0x38] sm:$0xff] %v1867_v44  }
 0x17a   :  { %1870 = vst [vmem:[%s2943_s2 + $0x10] sm:$0xff] %v1842_v56  }
 0x17b   :  { %1874 = vst [vmem:[%s2943_s2 + $0x30] sm:$0xff] %v1862_v2  }

// kernel: discriminator_forward.9
= control target key start
LH: loop header
LB: loop body
LE: loop exit
PB: predicated region body
PF: predicated region fallthrough
CT: control target
= control target key end

     0   :  { %s3974_s9 = smov 0   ;;  %s4793_s0 = inlined_call_operand.vmem [shape: bf16[512,1152], index: 0, kind: input, shape index: {}]   ;;  %s4794_s1 = inlined_call_operand.vmem [shape: bf16[1152,128], index: 1, kind: input, shape index: {}]   ;;  %s4795_s2 = inlined_call_operand.vmem [shape: bf16[512,128], index: 2, kind: output, shape index: {}]  }
   0x1 LB: > { %s2740_s10 = sadd.s32 4294967295, %s3957_s9   ;;  %p2744_p0 = scmp.ge.s32.totalorder %s3957_s9, 1  ;;  %s3957_s9 = sphi %s3974_s9, %s12_s9  }
   0x2   : > { %p114_p1 = scmp.lt.s32.totalorder %s3957_s9, 3 }
   0x4   : > { %p115_p2 = pnand %p2744_p0, %p114_p1 }
   0x6   : > { %118 = sbr.rel (%p115_p2) target bundleno = 535 (0x217), region = 28 }
   0xb   : > { %v3671_v0 = vld [vmem:[%s4794_s1 + $0x78] sm:$0xff]   ;;  %s2745_s13 = sshll.u32 %s2740_s10, 5  ;;  %v3673_v2 = vld [vmem:[%s4794_s1 + $0x70] sm:$0xff]   ;;  %v3675_v4 = vld [vmem:[%s4794_s1 + $0x68] sm:$0xff]  }
   0xc   : > { %v3672_v1 = vld [vmem:[%s4794_s1 + $0x38] sm:$0xff]   ;;  %3126 = vmatprep.subr.bf16.mxu0 %v3671_v0  ;;  %3646 = vmatprep.subr.bf16.mxu1 %v3671_v0  ;;  %p138_p3 = scmp.lt.s32.totalorder %s2745_s13, 63  ;;  %v3674_v3 = vld [vmem:[%s4794_s1 + $0x30] sm:$0xff]   ;;  %v3676_v5 = vld [vmem:[%s4794_s1 + $0x28] sm:$0xff]  }
   0xd   : > { %3127 = vmatpush3.bf16.msra.mxu0 %v3672_v1  ;;  %3654 = vmatpush3.bf16.msra.mxu1 %v3672_v1  ;;  %v3677_v6 = vld [vmem:[%s4794_s1 + $0x60] sm:$0xff]   ;;  %v3679_v8 = vld [vmem:[%s4794_s1 + $0x58] sm:$0xff]   ;;  %v3681_v10 = vld [vmem:[%s4794_s1 + $0x50] sm:$0xff]  }
   0xe   : > { %3128 = vmatprep.subr.bf16.mxu0 %v3673_v2  ;;  %3647 = vmatprep.subr.bf16.mxu1 %v3673_v2  ;;  %s4815_s13 = smov (!%p138_p3, %s2745_s13), 63  ;;  %v3678_v7 = vld [vmem:[%s4794_s1 + $0x20] sm:$0xff]   ;;  %v3680_v9 = vld [vmem:[%s4794_s1 + $0x18] sm:$0xff]   ;;  %v3682_v13 = vld [vmem:[%s4794_s1 + $0x10] sm:$0xff]  }
   0xf   : > { %s3662_s26 = smul.u32 36, %s4815_s13  ;;  %v3683_v14 = vld [vmem:[%s4794_s1 + $0x48] sm:$0xff]   ;;  %v3685_v16 = vld [vmem:[%s4794_s1 + $0x40] sm:$0xff]   ;;  %v3693_v18 = vld [vmem:[%s4794_s1 + $0xf8] sm:$0xff]  }
  0x10   : > { %v3684_v15 = vld [vmem:[%s4794_s1 + $0x8] sm:$0xff]   ;;  %v3686_v17 = vld [vmem:[%s4794_s1] sm:$0xff]   ;;  %v3696_v21 = vld [vmem:[%s4794_s1 + $0x178] sm:$0xff]  }
  0x11   : > { %3129 = vmatpush3.bf16.msra.mxu0 %v3674_v3  ;;  %3655 = vmatpush3.bf16.msra.mxu1 %v3674_v3  ;;  %s4015_s5 = scalar_lea.vmem %s4793_s0, %s3662_s26  ;;  %v3694_v22 = vld [vmem:[%s4794_s1 + $0xb8] sm:$0xff]   ;;  %v3695_v23 = vld [vmem:[%s4794_s1 + $0xf0] sm:$0xff]   ;;  %v3705_v31 = vld [vmem:[%s4794_s1 + $0xe8] sm:$0xff]  }
  0x12   : > { %3130 = vmatprep.subr.bf16.mxu0 %v3675_v4  ;;  %3648 = vmatprep.subr.bf16.mxu1 %v3675_v4  ;;  %v3689_v11 = vld [vmem:[%s4015_s5 + $0x4] ss:$36 sps:$4 sm:$0xff]   ;;  %v3698_v24 = vld [vmem:[%s4794_s1 + $0x138] sm:$0xff]   ;;  %v3699_v25 = vld [vmem:[%s4015_s5 + $0x4c] ss:$36 sps:$4 sm:$0xff]  }
  0x13   : > { %v3692_v12 = vld [vmem:[%s4015_s5 + $0x364] ss:$36 sps:$4 sm:$0xff]   ;;  %1655 = vmatprep.mubr.bf16.mxu0 %v3689_v11  ;;  %v3701_v26 = vld [vmem:[%s4015_s5 + $0x3ac] ss:$36 sps:$4 sm:$0xff]   ;;  %v3709_v35 = vld [vmem:[%s4015_s5 + $0x94] ss:$36 sps:$4 sm:$0xff]  }
  0x14   : > { %1751 = vmatprep.mubr.bf16.mxu1 %v3692_v12  ;;  %v3687_v19 = vld [vmem:[%s4015_s5] ss:$36 sps:$4 sm:$0xff]   ;;  %v3697_v27 = vld [vmem:[%s4794_s1 + $0xb0] sm:$0xff]   ;;  %v3703_v29 = vld [vmem:[%s4015_s5 + $0x48] ss:$36 sps:$4 sm:$0xff]  }
  0x15   : > { %3131 = vmatpush3.bf16.msra.mxu0 %v3676_v5  ;;  %3656 = vmatpush3.bf16.msra.mxu1 %v3676_v5  ;;  %v3690_v20 = vld [vmem:[%s4015_s5 + $0x360] ss:$36 sps:$4 sm:$0xff]   ;;  %v3716_v28 = vld [vmem:[%s4794_s1 + $0x170] sm:$0xff]   ;;  %v3704_v30 = vld [vmem:[%s4015_s5 + $0x3a8] ss:$36 sps:$4 sm:$0xff]  }
  0x16   : > { %3132 = vmatprep.subr.bf16.mxu0 %v3677_v6  ;;  %3649 = vmatprep.subr.bf16.mxu1 %v3677_v6  ;;  %v3706_v32 = vld [vmem:[%s4794_s1 + $0xa8] sm:$0xff]   ;;  %v3718_v33 = vld [vmem:[%s4794_s1 + $0x130] sm:$0xff]   ;;  %v3707_v34 = vld [vmem:[%s4794_s1 + $0xe0] sm:$0xff]  }
  0x17   : > { %v3711_v36 = vld [vmem:[%s4015_s5 + $0x3f4] ss:$36 sps:$4 sm:$0xff]   ;;  %v3708_v37 = vld [vmem:[%s4794_s1 + $0xa0] sm:$0xff]   ;;  %v3730_v43 = vld [vmem:[%s4794_s1 + $0x168] sm:$0xff]  }
  0x18   : > { %v3713_v38 = vld [vmem:[%s4015_s5 + $0x90] ss:$36 sps:$4 sm:$0xff]   ;;  %v3715_v40 = vld [vmem:[%s4794_s1 + $0xd8] sm:$0xff]   ;;  %v3732_v46 = vld [vmem:[%s4794_s1 + $0x128] sm:$0xff]  }
  0x19   : > { %3133 = vmatpush3.bf16.msra.mxu0 %v3678_v7  ;;  %3657 = vmatpush3.bf16.msra.mxu1 %v3678_v7  ;;  %v3714_v39 = vld [vmem:[%s4015_s5 + $0x3f0] ss:$36 sps:$4 sm:$0xff]   ;;  %v3717_v41 = vld [vmem:[%s4794_s1 + $0x98] sm:$0xff]   ;;  %v3727_v48 = vld [vmem:[%s4794_s1 + $0xc8] sm:$0xff]  }
  0x1a   : > { %3134 = vmatprep.subr.bf16.mxu0 %v3679_v8  ;;  %3650 = vmatprep.subr.bf16.mxu1 %v3679_v8  ;;  %v3719_v42 = vld [vmem:[%s4794_s1 + $0xd0] sm:$0xff]   ;;  %v3721_v44 = vld [vmem:[%s4015_s5 + $0xdc] ss:$36 sps:$4 sm:$0xff]   ;;  %v3728_v51 = vld [vmem:[%s4794_s1 + $0x88] sm:$0xff]  }
  0x1b   : > { %v3723_v45 = vld [vmem:[%s4015_s5 + $0x43c] ss:$36 sps:$4 sm:$0xff]   ;;  %v3720_v47 = vld [vmem:[%s4794_s1 + $0x90] sm:$0xff]   ;;  %v3733_v53 = vld [vmem:[%s4015_s5 + $0x124] ss:$36 sps:$4 sm:$0xff]  }
  0x1c   : > { %v3725_v49 = vld [vmem:[%s4015_s5 + $0xd8] ss:$36 sps:$4 sm:$0xff]   ;;  %v3729_v52 = vld [vmem:[%s4794_s1 + $0xc0] sm:$0xff]   ;;  %v3737_v54 = vld [vmem:[%s4015_s5 + $0xc] ss:$36 sps:$4 sm:$0xff]  }
  0x1d   : > { %3135 = vmatpush3.bf16.msra.mxu0 %v3680_v9  ;;  %3658 = vmatpush3.bf16.msra.mxu1 %v3680_v9  ;;  %v3726_v50 = vld [vmem:[%s4015_s5 + $0x438] ss:$36 sps:$4 sm:$0xff]   ;;  %v3747_v55 = vld [vmem:[%s4794_s1 + $0x160] sm:$0xff]   ;;  %v3735_v58 = vld [vmem:[%s4015_s5 + $0x8] ss:$36 sps:$4 sm:$0xff]  }
  0x1e   : > { %3136 = vmatprep.subr.bf16.mxu0 %v3681_v10  ;;  %3651 = vmatprep.subr.bf16.mxu1 %v3681_v10  ;;  %v3748_v56 = vld [vmem:[%s4794_s1 + $0x120] sm:$0xff]   ;;  %v3739_v60 = vld [vmem:[%s4794_s1 + $0x1f8] sm:$0xff]   ;;  %v3741_v62 = vld [vmem:[%s4015_s5 + $0x16c] ss:$36 sps:$4 sm:$0xff]  }
  0x1f   : > { %v3731_v57 = vld [vmem:[%s4794_s1 + $0x80] sm:$0xff]   ;;  %v3740_v61 = vld [vmem:[%s4794_s1 + $0x1b8] sm:$0xff]   ;;  %v3755_v1 = vld [vmem:[%s4794_s1 + $0x1f0] sm:$0xff]  }
  0x20   : > { %v3738_v59 = vld [vmem:[%s4015_s5 + $0x120] ss:$36 sps:$4 sm:$0xff]   ;;  %v3743_v63 = vld [vmem:[%s4015_s5 + $0x54] ss:$36 sps:$4 sm:$0xff]   ;;  %v3745_v4 = vld [vmem:[%s4015_s5 + $0x168] ss:$36 sps:$4 sm:$0xff]  }
  0x21   : > { %3137 = vmatpush3.bf16.msra.mxu0 %v3682_v13  ;;  %3659 = vmatpush3.bf16.msra.mxu1 %v3682_v13  ;;  %v3757_v0 = vld [vmem:[%s4794_s1 + $0x158] sm:$0xff]   ;;  %v3756_v3 = vld [vmem:[%s4794_s1 + $0x1b0] sm:$0xff]   ;;  %v3772_v9 = vld [vmem:[%s4794_s1 + $0x1e8] sm:$0xff]  }
  0x22   : > { %3138 = vmatprep.subr.bf16.mxu0 %v3683_v14  ;;  %3652 = vmatprep.subr.bf16.mxu1 %v3683_v14  ;;  %v3758_v2 = vld [vmem:[%s4794_s1 + $0x118] sm:$0xff]   ;;  %v3746_v5 = vld [vmem:[%s4015_s5 + $0x50] ss:$36 sps:$4 sm:$0xff]   ;;  %v3774_v11 = vld [vmem:[%s4794_s1 + $0x1a8] sm:$0xff]  }
  0x23   : > { %v3749_v6 = vld [vmem:[%s4015_s5 + $0x1b4] ss:$36 sps:$4 sm:$0xff]   ;;  %v3751_v7 = vld [vmem:[%s4015_s5 + $0x9c] ss:$36 sps:$4 sm:$0xff]  }
  0x24   : > { %v3771_v8 = vld [vmem:[%s4794_s1 + $0x150] sm:$0xff]   ;;  %v3754_v13 = vld [vmem:[%s4015_s5 + $0x98] ss:$36 sps:$4 sm:$0xff]  }
  0x25   : > { %3139 = vmatpush3.bf16.msra.mxu0 %v3684_v15  ;;  %3660 = vmatpush3.bf16.msra.mxu1 %v3684_v15  ;;  %v3773_v10 = vld [vmem:[%s4794_s1 + $0x110] sm:$0xff]   ;;  %v3759_v14 = vld [vmem:[%s4015_s5 + $0x1fc] ss:$36 sps:$4 sm:$0xff]   ;;  %v3781_v15 = vld [vmem:[%s4794_s1 + $0x148] sm:$0xff]  }
  0x26   : > { %3140 = vmatprep.subr.bf16.mxu0 %v3685_v16  ;;  %3653 = vmatprep.subr.bf16.mxu1 %v3685_v16  ;;  %v3753_v12 = vld [vmem:[%s4015_s5 + $0x1b0] ss:$36 sps:$4 sm:$0xff]   ;;  %v3782_v16 = vld [vmem:[%s4794_s1 + $0x108] sm:$0xff]  }
  0x29   : > { %3141 = vmatpush3.bf16.msra.mxu0 %v3686_v17  ;;  %3661 = vmatpush3.bf16.msra.mxu1 %v3686_v17  ;;  %v3761_v17 = vld [vmem:[%s4015_s5 + $0xe4] ss:$36 sps:$4 sm:$0xff]  }
  0x2a   : > { %3238 = vmatprep.subr.bf16.mxu1 %v3693_v18  ;;  %3350 = vmatprep.subr.bf16.mxu0 %v3696_v21  ;;  %v3789_v18 = vld [vmem:[%s4794_s1 + $0x1e0] sm:$0xff]  }
  0x2b   : > { %v3764_v21 = vld [vmem:[%s4015_s5 + $0xe0] ss:$36 sps:$4 sm:$0xff]  }
  0x2c   : > { %1656 = vmatmul.mubr.bf16.vlgmr.msra.gmra.mxu0 %v3687_v19  ;;  %1752 = vmatmul.mubr.bf16.vlgmr.msra.gmra.mxu1 %v3690_v20  ;;  %v3790_v19 = vld [vmem:[%s4794_s1 + $0x1a0] sm:$0xff]   ;;  %v3763_v20 = vld [vmem:[%s4015_s5 + $0x1f8] ss:$36 sps:$4 sm:$0xff]  }
  0x2d   : > { %3239 = vmatpush3.bf16.msra.mxu1 %v3694_v22  ;;  %3351 = vmatpush3.bf16.msra.mxu0 %v3698_v24  ;;  %v3765_v22 = vld [vmem:[%s4015_s5 + $0x244] ss:$36 sps:$4 sm:$0xff]  }
  0x2e   : > { %3240 = vmatprep.subr.bf16.mxu1 %v3695_v23  ;;  %1663 = vmatprep.mubr.bf16.mxu0 %v3699_v25  ;;  %v3767_v23 = vld [vmem:[%s4015_s5 + $0x12c] ss:$36 sps:$4 sm:$0xff]   ;;  %v3797_v24 = vld [vmem:[%s4794_s1 + $0x140] sm:$0xff]  }
  0x2f   : > { %1759 = vmatprep.mubr.bf16.mxu1 %v3701_v26  ;;  %3352 = vmatprep.subr.bf16.mxu0 %v3716_v28  ;;  %v3798_v25 = vld [vmem:[%s4794_s1 + $0x100] sm:$0xff]   ;;  %v3805_v26 = vld [vmem:[%s4794_s1 + $0x1d8] sm:$0xff]  }
  0x30   : > { %v3806_v28 = vld [vmem:[%s4794_s1 + $0x198] sm:$0xff]  }
  0x31   : > { %3241 = vmatpush3.bf16.msra.mxu1 %v3697_v27  ;;  %3353 = vmatpush3.bf16.msra.mxu0 %v3718_v33  ;;  %v3769_v27 = vld [vmem:[%s4015_s5 + $0x240] ss:$36 sps:$4 sm:$0xff]   ;;  %v3820_v33 = vld [vmem:[%s4794_s1 + $0x1d0] sm:$0xff]  }
  0x32   : > { %3242 = vmatprep.subr.bf16.mxu1 %v3705_v31  ;;  %3354 = vmatprep.subr.bf16.mxu0 %v3730_v43  ;;  %v3775_v31 = vld [vmem:[%s4015_s5 + $0x28c] ss:$36 sps:$4 sm:$0xff]   ;;  %v3791_v43 = vld [vmem:[%s4015_s5 + $0x31c] ss:$36 sps:$4 sm:$0xff]  }
  0x34   : > { %1664 = vmatmul.mubr.bf16.gmra.mxu0 %v3703_v29  ;;  %1760 = vmatmul.mubr.bf16.gmra.mxu1 %v3704_v30  ;;  %v3807_v29 = vld [vmem:[%s4794_s1 + $0x238] sm:$0xff]   ;;  %v3770_v30 = vld [vmem:[%s4015_s5 + $0x128] ss:$36 sps:$4 sm:$0xff]  }
  0x35   : > { %3243 = vmatpush3.bf16.msra.mxu1 %v3706_v32  ;;  %1671 = vmatprep.mubr.bf16.mxu0 %v3709_v35  ;;  %v3777_v32 = vld [vmem:[%s4015_s5 + $0x174] ss:$36 sps:$4 sm:$0xff]  }
  0x36   : > { %3244 = vmatprep.subr.bf16.mxu1 %v3707_v34  ;;  %1767 = vmatprep.mubr.bf16.mxu1 %v3711_v36  ;;  %v3779_v34 = vld [vmem:[%s4015_s5 + $0x288] ss:$36 sps:$4 sm:$0xff]   ;;  %v3821_v35 = vld [vmem:[%s4794_s1 + $0x190] sm:$0xff]  }
  0x37   : > { %3355 = vmatpush3.bf16.msra.mxu0 %v3732_v46  ;;  %v3780_v36 = vld [vmem:[%s4015_s5 + $0x170] ss:$36 sps:$4 sm:$0xff]   ;;  %v3796_v46 = vld [vmem:[%s4015_s5 + $0x200] ss:$36 sps:$4 sm:$0xff]  }
  0x38   : > { %3356 = vmatprep.subr.bf16.mxu0 %v3747_v55  ;;  %v3822_v55 = vld [vmem:[%s4794_s1 + $0x230] sm:$0xff]  }
  0x39   : > { %3245 = vmatpush3.bf16.msra.mxu1 %v3708_v37  ;;  %v3783_v37 = vld [vmem:[%s4015_s5 + $0x2d4] ss:$36 sps:$4 sm:$0xff]  }
  0x3a   : > { %3246 = vmatprep.subr.bf16.mxu1 %v3715_v40  ;;  %v3788_v40 = vld [vmem:[%s4015_s5 + $0x1b8] ss:$36 sps:$4 sm:$0xff]  }
  0x3b   : > { %3357 = vmatpush3.bf16.msra.mxu0 %v3748_v56  ;;  %v3837_v56 = vld [vmem:[%s4794_s1 + $0x228] sm:$0xff]  }
  0x3c   : > { %1672 = vmatmul.mubr.bf16.gmra.mxu0 %v3713_v38  ;;  %1768 = vmatmul.mubr.bf16.gmra.mxu1 %v3714_v39  ;;  %v3785_v38 = vld [vmem:[%s4015_s5 + $0x1bc] ss:$36 sps:$4 sm:$0xff]   ;;  %v3787_v39 = vld [vmem:[%s4015_s5 + $0x2d0] ss:$36 sps:$4 sm:$0xff]  }
  0x3d   : > { %3247 = vmatpush3.bf16.msra.mxu1 %v3717_v41  ;;  %1679 = vmatprep.mubr.bf16.mxu0 %v3721_v44  ;;  %v3835_v41 = vld [vmem:[%s4794_s1 + $0x1c8] sm:$0xff]  }
  0x3e   : > { %3248 = vmatprep.subr.bf16.mxu1 %v3719_v42  ;;  %1775 = vmatprep.mubr.bf16.mxu1 %v3723_v45  ;;  %v3836_v42 = vld [vmem:[%s4794_s1 + $0x188] sm:$0xff]   ;;  %v3795_v45 = vld [vmem:[%s4015_s5 + $0x318] ss:$36 sps:$4 sm:$0xff]  }
  0x3f   : > { %3358 = vmatprep.subr.bf16.mxu0 %v3757_v0  ;;  %v3793_v44 = vld [vmem:[%s4015_s5 + $0x204] ss:$36 sps:$4 sm:$0xff]  }
  0x40   : > { %3359 = vmatpush3.bf16.msra.mxu0 %v3758_v2  ;;  %v3819_v0 = vld [vmem:[%s4015_s5 + $0xa0] ss:$36 sps:$4 sm:$0xff]   ;;  %v3825_v2 = vld [vmem:[%s4015_s5 + $0xec] ss:$36 sps:$4 sm:$0xff]  }
  0x41   : > { %3249 = vmatpush3.bf16.msra.mxu1 %v3720_v47  ;;  %3360 = vmatprep.subr.bf16.mxu0 %v3771_v8  ;;  %v3850_v47 = vld [vmem:[%s4794_s1 + $0x1c0] sm:$0xff]   ;;  %v3831_v8 = vld [vmem:[%s4015_s5 + $0x134] ss:$36 sps:$4 sm:$0xff]  }
  0x42   : > { %3250 = vmatprep.subr.bf16.mxu1 %v3727_v48  ;;  %v3851_v48 = vld [vmem:[%s4794_s1 + $0x180] sm:$0xff]  }
  0x44   : > { %1680 = vmatmul.mubr.bf16.gmra.mxu0 %v3725_v49  ;;  %1776 = vmatmul.mubr.bf16.gmra.mxu1 %v3726_v50  ;;  %v3799_v49 = vld [vmem:[%s4015_s5 + $0x24c] ss:$36 sps:$4 sm:$0xff]   ;;  %v3803_v50 = vld [vmem:[%s4015_s5 + $0x14] ss:$36 sps:$4 sm:$0xff]  }
  0x45   : > { %3251 = vmatpush3.bf16.msra.mxu1 %v3728_v51  ;;  %1687 = vmatprep.mubr.bf16.mxu0 %v3733_v53  ;;  %v3801_v51 = vld [vmem:[%s4015_s5 + $0x10] ss:$36 sps:$4 sm:$0xff]  }
  0x46   : > { %3252 = vmatprep.subr.bf16.mxu1 %v3729_v52  ;;  %1816 = vmatprep.mubr.bf16.mxu1 %v3737_v54  ;;  %v3804_v52 = vld [vmem:[%s4015_s5 + $0x248] ss:$36 sps:$4 sm:$0xff]   ;;  %v3808_v53 = vld [vmem:[%s4015_s5 + $0x294] ss:$36 sps:$4 sm:$0xff]   ;;  %v3810_v54 = vld [vmem:[%s4015_s5 + $0x5c] ss:$36 sps:$4 sm:$0xff]  }
  0x47   : > { %3361 = vmatpush3.bf16.msra.mxu0 %v3773_v10  ;;  %v3833_v10 = vld [vmem:[%s4015_s5 + $0x368] ss:$36 sps:$4 sm:$0xff]  }
  0x48   : > { %3362 = vmatprep.subr.bf16.mxu0 %v3781_v15  ;;  %v3843_v15 = vld [vmem:[%s4015_s5 + $0x178] ss:$36 sps:$4 sm:$0xff]  }
  0x49   : > { %3253 = vmatpush3.bf16.msra.mxu1 %v3731_v57  ;;  %v3812_v57 = vld [vmem:[%s4015_s5 + $0x290] ss:$36 sps:$4 sm:$0xff]  }
  0x4a   : > { %3462 = vmatprep.subr.bf16.mxu1 %v3739_v60  ;;  %v3816_v60 = vld [vmem:[%s4015_s5 + $0xa4] ss:$36 sps:$4 sm:$0xff]  }
  0x4b   : > { %3363 = vmatpush3.bf16.msra.mxu0 %v3782_v16  ;;  %v3844_v16 = vld [vmem:[%s4015_s5 + $0x3fc] ss:$36 sps:$4 sm:$0xff]  }
  0x4c   : > { %1688 = vmatmul.mubr.bf16.gmra.mxu0 %v3738_v59  ;;  %1817 = vmatmul.mubr.bf16.vlgmr.msra.gmra.mxu1 %v3735_v58  ;;  %v3813_v58 = vld [vmem:[%s4015_s5 + $0x58] ss:$36 sps:$4 sm:$0xff]  }
  0x4d   : > { %3463 = vmatpush3.bf16.msra.mxu1 %v3740_v61  ;;  %1695 = vmatprep.mubr.bf16.mxu0 %v3741_v62  ;;  %v3814_v59 = vld [vmem:[%s4015_s5 + $0x2dc] ss:$36 sps:$4 sm:$0xff]  }
  0x4e   : > { %1824 = vmatprep.mubr.bf16.mxu1 %v3743_v63  ;;  %3464 = vmatprep.subr.bf16.mxu1 %v3755_v1  ;;  %v3852_v61 = vld [vmem:[%s4794_s1 + $0x220] sm:$0xff]   ;;  %v3865_v62 = vld [vmem:[%s4794_s1 + $0x218] sm:$0xff]  }
  0x4f   : > { %3364 = vmatprep.subr.bf16.mxu0 %v3797_v24  ;;  %v3818_v63 = vld [vmem:[%s4015_s5 + $0x2d8] ss:$36 sps:$4 sm:$0xff]   ;;  %v3823_v1 = vld [vmem:[%s4015_s5 + $0x324] ss:$36 sps:$4 sm:$0xff]  }
  0x50   : > { %3365 = vmatpush3.bf16.msra.mxu0 %v3798_v25  ;;  %v3859_v24 = vld [vmem:[%s4015_s5 + $0x254] ss:$36 sps:$4 sm:$0xff]   ;;  %v3863_v25 = vld [vmem:[%s4015_s5 + $0x1c] ss:$36 sps:$4 sm:$0xff]  }
  0x51   : > { %3465 = vmatpush3.bf16.msra.mxu1 %v3756_v3  ;;  %3598 = vmatprep.subr.bf16.mxu0 %v3807_v29  ;;  %v3878_v3 = vld [vmem:[%s4794_s1 + $0x210] sm:$0xff]  }
  0x52   : > { %3466 = vmatprep.subr.bf16.mxu1 %v3772_v9  ;;  %v3904_v9 = vld [vmem:[%s4794_s1 + $0x200] sm:$0xff]  }
  0x54   : > { %1696 = vmatmul.mubr.bf16.gmra.mxu0 %v3745_v4  ;;  %1825 = vmatmul.mubr.bf16.gmra.mxu1 %v3746_v5  ;;  %v3827_v4 = vld [vmem:[%s4015_s5 + $0x320] ss:$36 sps:$4 sm:$0xff]   ;;  %v3828_v5 = vld [vmem:[%s4015_s5 + $0xe8] ss:$36 sps:$4 sm:$0xff]  }
  0x55   : > { %1703 = vmatprep.mubr.bf16.mxu0 %v3749_v6  ;;  %1832 = vmatprep.mubr.bf16.mxu1 %v3751_v7  ;;  %v3891_v6 = vld [vmem:[%s4794_s1 + $0x208] sm:$0xff]  }
  0x56   : > { %3467 = vmatpush3.bf16.msra.mxu1 %v3774_v11  ;;  %v3829_v7 = vld [vmem:[%s4015_s5 + $0x36c] ss:$36 sps:$4 sm:$0xff]  }
  0x57   : > { %3468 = vmatprep.subr.bf16.mxu1 %v3789_v18  ;;  %v3834_v11 = vld [vmem:[%s4015_s5 + $0x130] ss:$36 sps:$4 sm:$0xff]   ;;  %v3848_v18 = vld [vmem:[%s4015_s5 + $0x3f8] ss:$36 sps:$4 sm:$0xff]  }
  0x5a   : > { %3469 = vmatpush3.bf16.msra.mxu1 %v3790_v19  ;;  %v3849_v19 = vld [vmem:[%s4015_s5 + $0x1c0] ss:$36 sps:$4 sm:$0xff]  }
  0x5b   : > { %3470 = vmatprep.subr.bf16.mxu1 %v3805_v26  ;;  %v3861_v26 = vld [vmem:[%s4015_s5 + $0x18] ss:$36 sps:$4 sm:$0xff]  }
  0x5c   : > { %1704 = vmatmul.mubr.bf16.gmra.mxu0 %v3753_v12  ;;  %1833 = vmatmul.mubr.bf16.gmra.mxu1 %v3754_v13  ;;  %v3838_v12 = vld [vmem:[%s4015_s5 + $0x3b4] ss:$36 sps:$4 sm:$0xff]   ;;  %v3840_v13 = vld [vmem:[%s4015_s5 + $0x17c] ss:$36 sps:$4 sm:$0xff]  }
  0x5d   : > { %1711 = vmatprep.mubr.bf16.mxu0 %v3759_v14  ;;  %1840 = vmatprep.mubr.bf16.mxu1 %v3761_v17  ;;  %v3842_v14 = vld [vmem:[%s4015_s5 + $0x3b0] ss:$36 sps:$4 sm:$0xff]   ;;  %v3846_v17 = vld [vmem:[%s4015_s5 + $0x1c4] ss:$36 sps:$4 sm:$0xff]  }
  0x5e   : > { %3471 = vmatpush3.bf16.msra.mxu1 %v3806_v28  ;;  %v3866_v28 = vld [vmem:[%s4015_s5 + $0x29c] ss:$36 sps:$4 sm:$0xff]  }
  0x5f   : > { %3472 = vmatprep.subr.bf16.mxu1 %v3820_v33  ;;  %v3874_v33 = vld [vmem:[%s4015_s5 + $0xac] ss:$36 sps:$4 sm:$0xff]  }
  0x62   : > { %3473 = vmatpush3.bf16.msra.mxu1 %v3821_v35  ;;  %v3877_v35 = vld [vmem:[%s4015_s5 + $0xa8] ss:$36 sps:$4 sm:$0xff]  }
  0x63   : > { %3474 = vmatprep.subr.bf16.mxu1 %v3835_v41  ;;  %v3887_v41 = vld [vmem:[%s4015_s5 + $0x13c] ss:$36 sps:$4 sm:$0xff]  }
  0x64   : > { %1712 = vmatmul.mubr.bf16.gmra.mxu0 %v3763_v20  ;;  %1841 = vmatmul.mubr.bf16.gmra.mxu1 %v3764_v21  ;;  %v3853_v20 = vld [vmem:[%s4015_s5 + $0x444] ss:$36 sps:$4 sm:$0xff]   ;;  %v3855_v21 = vld [vmem:[%s4015_s5 + $0x20c] ss:$36 sps:$4 sm:$0xff]  }
  0x65   : > { %1719 = vmatprep.mubr.bf16.mxu0 %v3765_v22  ;;  %1848 = vmatprep.mubr.bf16.mxu1 %v3767_v23  ;;  %v3857_v22 = vld [vmem:[%s4015_s5 + $0x440] ss:$36 sps:$4 sm:$0xff]   ;;  %v3858_v23 = vld [vmem:[%s4015_s5 + $0x208] ss:$36 sps:$4 sm:$0xff]  }
  0x66   : > { %3475 = vmatpush3.bf16.msra.mxu1 %v3836_v42  ;;  %v3889_v42 = vld [vmem:[%s4015_s5 + $0x370] ss:$36 sps:$4 sm:$0xff]  }
  0x67   : > { %3476 = vmatprep.subr.bf16.mxu1 %v3850_v47 }
  0x6a   : > { %3477 = vmatpush3.bf16.msra.mxu1 %v3851_v48 }
  0x6c   : > { %1720 = vmatmul.mubr.bf16.gmra.mxu0 %v3769_v27  ;;  %1849 = vmatmul.mubr.bf16.gmra.mxu1 %v3770_v30  ;;  %v3864_v27 = vld [vmem:[%s4015_s5 + $0x250] ss:$36 sps:$4 sm:$0xff]   ;;  %v3870_v30 = vld [vmem:[%s4015_s5 + $0x298] ss:$36 sps:$4 sm:$0xff]  }
  0x6d   : > { %1727 = vmatprep.mubr.bf16.mxu0 %v3775_v31  ;;  %1856 = vmatprep.mubr.bf16.mxu1 %v3777_v32  ;;  %v3871_v31 = vld [vmem:[%s4015_s5 + $0x60] ss:$36 sps:$4 sm:$0xff]  }
  0x6e   : > { %v3872_v32 = vld [vmem:[%s4015_s5 + $0x2e4] ss:$36 sps:$4 sm:$0xff]  }
  0x74   : > { %1728 = vmatmul.mubr.bf16.gmra.mxu0 %v3779_v34  ;;  %1857 = vmatmul.mubr.bf16.gmra.mxu1 %v3780_v36  ;;  %v3876_v34 = vld [vmem:[%s4015_s5 + $0x2e0] ss:$36 sps:$4 sm:$0xff]   ;;  %v3879_v36 = vld [vmem:[%s4015_s5 + $0x32c] ss:$36 sps:$4 sm:$0xff]  }
  0x75   : > { %1735 = vmatprep.mubr.bf16.mxu0 %v3783_v37  ;;  %1864 = vmatprep.mubr.bf16.mxu1 %v3785_v38  ;;  %v3881_v37 = vld [vmem:[%s4015_s5 + $0xf4] ss:$36 sps:$4 sm:$0xff]   ;;  %v3883_v38 = vld [vmem:[%s4015_s5 + $0x328] ss:$36 sps:$4 sm:$0xff]  }
  0x7c   : > { %1736 = vmatmul.mubr.bf16.gmra.mxu0 %v3787_v39  ;;  %1865 = vmatmul.mubr.bf16.gmra.mxu1 %v3788_v40  ;;  %v3884_v39 = vld [vmem:[%s4015_s5 + $0xf0] ss:$36 sps:$4 sm:$0xff]  }
  0x7d   : > { %1743 = vmatprep.mubr.bf16.mxu0 %v3791_v43  ;;  %1872 = vmatprep.mubr.bf16.mxu1 %v3793_v44  ;;  %v3885_v40 = vld [vmem:[%s4015_s5 + $0x374] ss:$36 sps:$4 sm:$0xff]   ;;  %v3892_v44 = vld [vmem:[%s4015_s5 + $0x3bc] ss:$36 sps:$4 sm:$0xff]  }
  0x7e   : > { %v3890_v43 = vld [vmem:[%s4015_s5 + $0x138] ss:$36 sps:$4 sm:$0xff]  }
  0x84   : > { %1744 = vmatmul.mubr.bf16.gmra.mxu0 %v3795_v45  ;;  %1873 = vmatmul.mubr.bf16.gmra.mxu1 %v3796_v46  ;;  %v3894_v45 = vld [vmem:[%s4015_s5 + $0x184] ss:$36 sps:$4 sm:$0xff]  }
  0x85   : > { %1880 = vmatprep.mubr.bf16.mxu1 %v3799_v49  ;;  %1977 = vmatprep.mubr.bf16.mxu0 %v3803_v50 }
  0x8c   : > { %1881 = vmatmul.mubr.bf16.gmra.mxu1 %v3804_v52  ;;  %1978 = vmatmul.mubr.bf16.vlgmr.msra.gmra.mxu0 %v3801_v51 }
  0x8d   : > { %3599 = vmatpush3.bf16.msra.mxu0 %v3807_v29  ;;  %1888 = vmatprep.mubr.bf16.mxu1 %v3808_v53  ;;  %v3868_v29 = vld [vmem:[%s4015_s5 + $0x64] ss:$36 sps:$4 sm:$0xff]  }
  0x8e   : > { %1985 = vmatprep.mubr.bf16.mxu0 %v3810_v54  ;;  %3600 = vmatprep.subr.bf16.mxu0 %v3822_v55  ;;  %v3896_v54 = vld [vmem:[%s4015_s5 + $0x3b8] ss:$36 sps:$4 sm:$0xff]  }
  0x91   : > { %3601 = vmatpush3.bf16.msra.mxu0 %v3822_v55  ;;  %v3897_v55 = vld [vmem:[%s4015_s5 + $0x180] ss:$36 sps:$4 sm:$0xff]  }
  0x92   : > { %3602 = vmatprep.subr.bf16.mxu0 %v3837_v56 }
  0x94   : > { %1889 = vmatmul.mubr.bf16.gmra.mxu1 %v3812_v57  ;;  %1986 = vmatmul.mubr.bf16.gmra.mxu0 %v3813_v58  ;;  %v3900_v57 = vld [vmem:[%s4015_s5 + $0x1cc] ss:$36 sps:$4 sm:$0xff]  }
  0x95   : > { %1896 = vmatprep.mubr.bf16.mxu1 %v3814_v59  ;;  %1993 = vmatprep.mubr.bf16.mxu0 %v3816_v60 }
  0x96   : > { %3603 = vmatpush3.bf16.msra.mxu0 %v3837_v56  ;;  %v3898_v56 = vld [vmem:[%s4015_s5 + $0x404] ss:$36 sps:$4 sm:$0xff]  }
  0x97   : > { %3604 = vmatprep.subr.bf16.mxu0 %v3852_v61 }
  0x9a   : > { %3605 = vmatpush3.bf16.msra.mxu0 %v3852_v61 }
  0x9b   : > { %3606 = vmatprep.subr.bf16.mxu0 %v3865_v62 }
  0x9c   : > { %1897 = vmatmul.mubr.bf16.gmra.mxu1 %v3818_v63  ;;  %1994 = vmatmul.mubr.bf16.gmra.mxu0 %v3819_v0 }
  0x9d   : > { %1904 = vmatprep.mubr.bf16.mxu1 %v3823_v1  ;;  %2001 = vmatprep.mubr.bf16.mxu0 %v3825_v2 }
  0x9e   : > { %3607 = vmatpush3.bf16.msra.mxu0 %v3865_v62 }
  0x9f   : > { %3608 = vmatprep.subr.bf16.mxu0 %v3878_v3 }
  0xa2   : > { %3609 = vmatpush3.bf16.msra.mxu0 %v3878_v3 }
  0xa3   : > { %3610 = vmatprep.subr.bf16.mxu0 %v3891_v6 }
  0xa4   : > { %1905 = vmatmul.mubr.bf16.gmra.mxu1 %v3827_v4  ;;  %2002 = vmatmul.mubr.bf16.gmra.mxu0 %v3828_v5 }
  0xa5   : > { %1912 = vmatprep.mubr.bf16.mxu1 %v3829_v7  ;;  %2009 = vmatprep.mubr.bf16.mxu0 %v3831_v8  ;;  %v3903_v7 = vld [vmem:[%s4015_s5 + $0x1c8] ss:$36 sps:$4 sm:$0xff]  }
  0xa6   : > { %3611 = vmatpush3.bf16.msra.mxu0 %v3891_v6  ;;  %v3902_v6 = vld [vmem:[%s4015_s5 + $0x400] ss:$36 sps:$4 sm:$0xff]   ;;  %v3905_v8 = vld [vmem:[%s4015_s5 + $0x44c] ss:$36 sps:$4 sm:$0xff]  }
  0xa7   : > { %3612 = vmatprep.subr.bf16.mxu0 %v3904_v9 }
  0xaa   : > { %3613 = vmatpush3.bf16.msra.mxu0 %v3904_v9  ;;  %v3907_v9 = vld [vmem:[%s4015_s5 + $0x214] ss:$36 sps:$4 sm:$0xff]  }
  0xac   : > { %1913 = vmatmul.mubr.bf16.gmra.mxu1 %v3833_v10  ;;  %2010 = vmatmul.mubr.bf16.gmra.mxu0 %v3834_v11 }
  0xad   : > { %1920 = vmatprep.mubr.bf16.mxu1 %v3838_v12  ;;  %2017 = vmatprep.mubr.bf16.mxu0 %v3840_v13 }
  0xb4   : > { %1921 = vmatmul.mubr.bf16.gmra.mxu1 %v3842_v14  ;;  %2018 = vmatmul.mubr.bf16.gmra.mxu0 %v3843_v15 }
  0xb5   : > { %1928 = vmatprep.mubr.bf16.mxu1 %v3844_v16  ;;  %2025 = vmatprep.mubr.bf16.mxu0 %v3846_v17 }
  0xbc   : > { %1929 = vmatmul.mubr.bf16.gmra.mxu1 %v3848_v18  ;;  %2026 = vmatmul.mubr.bf16.gmra.mxu0 %v3849_v19 }
  0xbd   : > { %1936 = vmatprep.mubr.bf16.mxu1 %v3853_v20  ;;  %2033 = vmatprep.mubr.bf16.mxu0 %v3855_v21 }
  0xc4   : > { %1937 = vmatmul.mubr.bf16.gmra.mxu1 %v3857_v22  ;;  %2034 = vmatmul.mubr.bf16.gmra.mxu0 %v3858_v23  ;;  %v3909_v22 = vld [vmem:[%s4015_s5 + $0x448] ss:$36 sps:$4 sm:$0xff]   ;;  %v3910_v23 = vld [vmem:[%s4015_s5 + $0x210] ss:$36 sps:$4 sm:$0xff]  }
  0xc5   : > { %2041 = vmatprep.mubr.bf16.mxu0 %v3859_v24  ;;  %2138 = vmatprep.mubr.bf16.mxu1 %v3863_v25  ;;  %v3913_v24 = vld [vmem:[%s4015_s5 + $0x25c] ss:$36 sps:$4 sm:$0xff]  }
  0xc6   : > { %v3914_v25 = vld [vmem:[%s4015_s5 + $0x20] ss:$36 sps:$4 sm:$0xff]  }
  0xcc   : > { %2042 = vmatmul.mubr.bf16.gmra.mxu0 %v3864_v27  ;;  %2139 = vmatmul.mubr.bf16.vlgmr.msra.gmra.mxu1 %v3861_v26 }
  0xcd   : > { %2049 = vmatprep.mubr.bf16.mxu0 %v3866_v28  ;;  %2146 = vmatprep.mubr.bf16.mxu1 %v3868_v29 }
  0xd4   : > { %2050 = vmatmul.mubr.bf16.gmra.mxu0 %v3870_v30  ;;  %2147 = vmatmul.mubr.bf16.gmra.mxu1 %v3871_v31 }
  0xd5   : > { %2057 = vmatprep.mubr.bf16.mxu0 %v3872_v32  ;;  %2154 = vmatprep.mubr.bf16.mxu1 %v3874_v33 }
  0xdc   : > { %2058 = vmatmul.mubr.bf16.gmra.mxu0 %v3876_v34  ;;  %2155 = vmatmul.mubr.bf16.gmra.mxu1 %v3877_v35 }
  0xdd   : > { %2065 = vmatprep.mubr.bf16.mxu0 %v3879_v36  ;;  %2162 = vmatprep.mubr.bf16.mxu1 %v3881_v37 }
  0xe4   : > { %2066 = vmatmul.mubr.bf16.gmra.mxu0 %v3883_v38  ;;  %2163 = vmatmul.mubr.bf16.gmra.mxu1 %v3884_v39  ;;  %v3911_v38 = vld [vmem:[%s4015_s5 + $0x258] ss:$36 sps:$4 sm:$0xff]   ;;  %v3915_v39 = vld [vmem:[%s4015_s5 + $0x68] ss:$36 sps:$4 sm:$0xff]  }
  0xe5   : > { %2073 = vmatprep.mubr.bf16.mxu0 %v3885_v40  ;;  %2170 = vmatprep.mubr.bf16.mxu1 %v3887_v41  ;;  %v3918_v40 = vld [vmem:[%s4015_s5 + $0x2a4] ss:$36 sps:$4 sm:$0xff]   ;;  %v3919_v41 = vld [vmem:[%s4015_s5 + $0xb0] ss:$36 sps:$4 sm:$0xff]  }
  0xec   : > { %v3142_v46 = vpop.f32.mrf.mxu0  ;;  %v3214_v47 = vpop.f32.mrf.mxu1  ;;  %2074 = vmatmul.mubr.bf16.gmra.mxu0 %v3889_v42  ;;  %2171 = vmatmul.mubr.bf16.gmra.mxu1 %v3890_v43 }
  0xed   : > { %2081 = vmatprep.mubr.bf16.mxu0 %v3892_v44  ;;  %2178 = vmatprep.mubr.bf16.mxu1 %v3894_v45 }
  0xee   : > { %v3143_v48 = vpop.f32.mrf.mxu0  ;;  %v3215_v49 = vpop.f32.mrf.mxu1 }
  0xef   : > { %v4308_v50 = vadd.f32 %v3143_v48, %v3142_v46  ;;  %v4310_v51 = vadd.f32 %v3215_v49, %v3214_v47 }
  0xf0   : > { %v3145_v52 = vpop.f32.mrf.mxu0  ;;  %v3217_v53 = vpop.f32.mrf.mxu1 }
  0xf2   : > { %v3146_v58 = vpop.f32.mrf.mxu0  ;;  %v3218_v59 = vpop.f32.mrf.mxu1 }
  0xf3   : > { %v4316_v60 = vadd.f32 %v3146_v58, %v3145_v52  ;;  %v4318_v61 = vadd.f32 %v3218_v59, %v3217_v53  ;;  %v3923_v59 = vld [vmem:[%s4015_s5 + $0x2ec] ss:$36 sps:$4 sm:$0xff]  }
  0xf4   : > { %v3148_v62 = vpop.f32.mrf.mxu0  ;;  %v3220_v63 = vpop.f32.mrf.mxu1  ;;  %2082 = vmatmul.mubr.bf16.gmra.mxu0 %v3896_v54  ;;  %2179 = vmatmul.mubr.bf16.gmra.mxu1 %v3897_v55 }
  0xf5   : > { %2089 = vmatprep.mubr.bf16.mxu0 %v3898_v56  ;;  %2186 = vmatprep.mubr.bf16.mxu1 %v3900_v57  ;;  %v3916_v56 = vld [vmem:[%s4015_s5 + $0x2a0] ss:$36 sps:$4 sm:$0xff]   ;;  %v3920_v57 = vld [vmem:[%s4015_s5 + $0xf8] ss:$36 sps:$4 sm:$0xff]  }
  0xf6   : > { %v3149_v0 = vpop.f32.mrf.mxu0  ;;  %v3221_v1 = vpop.f32.mrf.mxu1 }
  0xf7   : > { %v4320_v2 = vadd.f32 %v3149_v0, %v3148_v62  ;;  %v4322_v3 = vadd.f32 %v3221_v1, %v3220_v63  ;;  %v3924_v62 = vld [vmem:[%s4015_s5 + $0x140] ss:$36 sps:$4 sm:$0xff]  }
  0xf8   : > { %v3151_v4 = vpop.f32.mrf.mxu0  ;;  %v3223_v5 = vpop.f32.mrf.mxu1 }
  0xfa   : > { %v3152_v10 = vpop.f32.mrf.mxu0  ;;  %v3224_v11 = vpop.f32.mrf.mxu1 }
  0xfb   : > { %v4328_v12 = vadd.f32 %v3152_v10, %v3151_v4  ;;  %v4330_v13 = vadd.f32 %v3224_v11, %v3223_v5 }
  0xfc   : > { %v3154_v14 = vpop.f32.mrf.mxu0  ;;  %v3226_v15 = vpop.f32.mrf.mxu1  ;;  %2090 = vmatmul.mubr.bf16.gmra.mxu0 %v3902_v6  ;;  %2187 = vmatmul.mubr.bf16.gmra.mxu1 %v3903_v7 }
  0xfd   : > { %2097 = vmatprep.mubr.bf16.mxu0 %v3905_v8  ;;  %2194 = vmatprep.mubr.bf16.mxu1 %v3907_v9 }
  0xfe   : > { %v3155_v16 = vpop.f32.mrf.mxu0  ;;  %v3227_v17 = vpop.f32.mrf.mxu1 }
  0xff   : > { %v4332_v18 = vadd.f32 %v3155_v16, %v3154_v14  ;;  %v4334_v19 = vadd.f32 %v3227_v17, %v3226_v15  ;;  %v3921_v15 = vld [vmem:[%s4015_s5 + $0x2e8] ss:$36 sps:$4 sm:$0xff]  }
 0x100   : > { %v3157_v20 = vpop.f32.mrf.mxu0  ;;  %v3229_v21 = vpop.f32.mrf.mxu1  ;;  %v3925_v16 = vld [vmem:[%s4015_s5 + $0x188] ss:$36 sps:$4 sm:$0xff]  }
 0x102   : > { %v3158_v26 = vpop.f32.mrf.mxu0  ;;  %v3230_v27 = vpop.f32.mrf.mxu1 }
 0x103   : > { %v4340_v28 = vadd.f32 %v3158_v26, %v3157_v20  ;;  %v4342_v29 = vadd.f32 %v3230_v27, %v3229_v21  ;;  %v3928_v20 = vld [vmem:[%s4015_s5 + $0x334] ss:$36 sps:$4 sm:$0xff]  }
 0x104   : > { %v3160_v30 = vpop.f32.mrf.mxu0  ;;  %v3232_v31 = vpop.f32.mrf.mxu1  ;;  %2098 = vmatmul.mubr.bf16.gmra.mxu0 %v3909_v22  ;;  %2195 = vmatmul.mubr.bf16.gmra.mxu1 %v3910_v23  ;;  %v3929_v21 = vld [vmem:[%s4015_s5 + $0x1d0] ss:$36 sps:$4 sm:$0xff]  }
 0x105   : > { %2202 = vmatprep.mubr.bf16.mxu1 %v3913_v24  ;;  %3614 = vmatprep.mubr.bf16.mxu0 %v3914_v25 }
 0x106   : > { %v3161_v32 = vpop.f32.mrf.mxu0  ;;  %v3233_v33 = vpop.f32.mrf.mxu1 }
 0x107   : > { %v4344_v34 = vadd.f32 %v3161_v32, %v3160_v30  ;;  %v4346_v35 = vadd.f32 %v3233_v33, %v3232_v31 }
 0x108   : > { %v3163_v36 = vpop.f32.mrf.mxu0  ;;  %v3235_v37 = vpop.f32.mrf.mxu1 }
 0x10a   : > { %v3164_v42 = vpop.f32.mrf.mxu0  ;;  %v3236_v43 = vpop.f32.mrf.mxu1 }
 0x10b   : > { %v4352_v44 = vadd.f32 %v3164_v42, %v3163_v36  ;;  %v4354_v45 = vadd.f32 %v3236_v43, %v3235_v37  ;;  %v3926_v37 = vld [vmem:[%s4015_s5 + $0x330] ss:$36 sps:$4 sm:$0xff]  }
 0x10c   : > { %v3166_v46 = vpop.f32.mrf.mxu0  ;;  %v3254_v47 = vpop.f32.mrf.mxu1  ;;  %2203 = vmatmul.mubr.bf16.gmra.mxu1 %v3911_v38  ;;  %3615 = vmatmul.mubr.bf16.vlgmr.msra.gmra.mxu0 %v3915_v39  ;;  %v3930_v38 = vld [vmem:[%s4015_s5 + $0x218] ss:$36 sps:$4 sm:$0xff]  }
 0x10d   : > { %2210 = vmatprep.mubr.bf16.mxu1 %v3918_v40  ;;  %3618 = vmatprep.mubr.bf16.mxu0 %v3919_v41  ;;  %v3933_v40 = vld [vmem:[%s4015_s5 + $0x37c] ss:$36 sps:$4 sm:$0xff]  }
 0x10e   : > { %v3167_v48 = vpop.f32.mrf.mxu0  ;;  %v3255_v49 = vpop.f32.mrf.mxu1  ;;  %v3934_v41 = vld [vmem:[%s4015_s5 + $0x260] ss:$36 sps:$4 sm:$0xff]  }
 0x10f   : > { %v4356_v52 = vadd.f32 %v3167_v48, %v3166_v46  ;;  %v3256_v53 = vadd.f32 %v3255_v49, %v3254_v47 }
 0x110   : > { %v3169_v54 = vpop.f32.mrf.mxu0  ;;  %v3257_v55 = vpop.f32.mrf.mxu1 }
 0x111   : > { %v4361_v58 = vadd.f32 %v3256_v53, %v4308_v50 }
 0x112   : > { %v3170_v63 = vpop.f32.mrf.mxu0  ;;  %v3258_v0 = vpop.f32.mrf.mxu1 }
 0x113   : > { %v4365_v1 = vadd.f32 %v3170_v63, %v3169_v54  ;;  %v3259_v4 = vadd.f32 %v3258_v0, %v3257_v55  ;;  %v3938_v0 = vld [vmem:[%s4015_s5 + $0x3c4] ss:$36 sps:$4 sm:$0xff]  }
 0x114   : > { %v3172_v5 = vpop.f32.mrf.mxu0  ;;  %v3260_v6 = vpop.f32.mrf.mxu1  ;;  %2211 = vmatmul.mubr.bf16.gmra.mxu1 %v3916_v56  ;;  %3619 = vmatmul.mubr.bf16.gmra.mxu0 %v3920_v57 }
 0x115   : > { %v4368_v7 = vadd.f32 %v3259_v4, %v4316_v60  ;;  %2218 = vmatprep.mubr.bf16.mxu1 %v3923_v59  ;;  %3622 = vmatprep.mubr.bf16.mxu0 %v3924_v62  ;;  %v3931_v59 = vld [vmem:[%s4015_s5 + $0x378] ss:$36 sps:$4 sm:$0xff]   ;;  %v3935_v62 = vld [vmem:[%s4015_s5 + $0x2a8] ss:$36 sps:$4 sm:$0xff]   ;;  %v3939_v4 = vld [vmem:[%s4015_s5 + $0x2f0] ss:$36 sps:$4 sm:$0xff]  }
 0x116   : > { %v3173_v50 = vpop.f32.mrf.mxu0  ;;  %v3261_v8 = vpop.f32.mrf.mxu1 }
 0x117   : > { %v4370_v9 = vadd.f32 %v3173_v50, %v3172_v5  ;;  %v3262_v10 = vadd.f32 %v3261_v8, %v3260_v6 }
 0x118   : > { %v3175_v11 = vpop.f32.mrf.mxu0  ;;  %v3263_v14 = vpop.f32.mrf.mxu1 }
 0x119   : > { %v4375_v17 = vadd.f32 %v3262_v10, %v4320_v2 }
 0x11a   : > { %v3176_v22 = vpop.f32.mrf.mxu0  ;;  %v3264_v23 = vpop.f32.mrf.mxu1 }
 0x11b   : > { %v4379_v60 = vadd.f32 %v3176_v22, %v3175_v11  ;;  %v3265_v24 = vadd.f32 %v3264_v23, %v3263_v14  ;;  %v3936_v22 = vld [vmem:[%s4015_s5 + $0x3c0] ss:$36 sps:$4 sm:$0xff]   ;;  %v3940_v23 = vld [vmem:[%s4015_s5 + $0x338] ss:$36 sps:$4 sm:$0xff]  }
 0x11c   : > { %v3178_v25 = vpop.f32.mrf.mxu0  ;;  %v3266_v26 = vpop.f32.mrf.mxu1  ;;  %2219 = vmatmul.mubr.bf16.gmra.mxu1 %v3921_v15  ;;  %3623 = vmatmul.mubr.bf16.gmra.mxu0 %v3925_v16 }
 0x11d   : > { %v4382_v27 = vadd.f32 %v3265_v24, %v4328_v12  ;;  %2226 = vmatprep.mubr.bf16.mxu1 %v3928_v20  ;;  %3626 = vmatprep.mubr.bf16.mxu0 %v3929_v21 }
 0x11e   : > { %v3179_v2 = vpop.f32.mrf.mxu0  ;;  %v3267_v30 = vpop.f32.mrf.mxu1 }
 0x11f   : > { %v4384_v31 = vadd.f32 %v3179_v2, %v3178_v25  ;;  %v3268_v32 = vadd.f32 %v3267_v30, %v3266_v26  ;;  %v3943_v25 = vld [vmem:[%s4015_s5 + $0x40c] ss:$36 sps:$4 sm:$0xff]   ;;  %v3944_v26 = vld [vmem:[%s4015_s5 + $0x380] ss:$36 sps:$4 sm:$0xff]  }
 0x120   : > { %v3181_v33 = vpop.f32.mrf.mxu0  ;;  %v3269_v36 = vpop.f32.mrf.mxu1 }
 0x121   : > { %v4389_v39 = vadd.f32 %v3268_v32, %v4332_v18 }
 0x122   : > { %v3182_v42 = vpop.f32.mrf.mxu0  ;;  %v3270_v43 = vpop.f32.mrf.mxu1 }
 0x123   : > { %v4393_v12 = vadd.f32 %v3182_v42, %v3181_v33  ;;  %v3271_v46 = vadd.f32 %v3270_v43, %v3269_v36 }
 0x124   : > { %v3184_v47 = vpop.f32.mrf.mxu0  ;;  %v3272_v48 = vpop.f32.mrf.mxu1  ;;  %2227 = vmatmul.mubr.bf16.gmra.mxu1 %v3926_v37  ;;  %3627 = vmatmul.mubr.bf16.gmra.mxu0 %v3930_v38 }
 0x125   : > { %v4396_v49 = vadd.f32 %v3271_v46, %v4340_v28  ;;  %2234 = vmatprep.mubr.bf16.mxu1 %v3933_v40  ;;  %3630 = vmatprep.mubr.bf16.mxu0 %v3934_v41  ;;  %v3941_v46 = vld [vmem:[%s4015_s5 + $0x408] ss:$36 sps:$4 sm:$0xff]  }
 0x126   : > { %v3185_v18 = vpop.f32.mrf.mxu0  ;;  %v3273_v53 = vpop.f32.mrf.mxu1 }
 0x127   : > { %v4398_v54 = vadd.f32 %v3185_v18, %v3184_v47  ;;  %v3274_v55 = vadd.f32 %v3273_v53, %v3272_v48  ;;  %v3945_v47 = vld [vmem:[%s4015_s5 + $0x3c8] ss:$36 sps:$4 sm:$0xff]   ;;  %v3948_v18 = vld [vmem:[%s4015_s5 + $0x454] ss:$36 sps:$4 sm:$0xff]  }
 0x128   : > { %v3187_v56 = vpop.f32.mrf.mxu0  ;;  %v3275_v57 = vpop.f32.mrf.mxu1  ;;  %v3949_v53 = vld [vmem:[%s4015_s5 + $0x410] ss:$36 sps:$4 sm:$0xff]  }
 0x129   : > { %v4403_v63 = vadd.f32 %v3274_v55, %v4344_v34 }
 0x12a   : > { %v3188_v5 = vpop.f32.mrf.mxu0  ;;  %v3276_v6 = vpop.f32.mrf.mxu1 }
 0x12b   : > { %v4407_v28 = vadd.f32 %v3188_v5, %v3187_v56  ;;  %v3277_v50 = vadd.f32 %v3276_v6, %v3275_v57 }
 0x12c   : > { %v3190_v8 = vpop.f32.mrf.mxu0  ;;  %v3278_v10 = vpop.f32.mrf.mxu1  ;;  %2235 = vmatmul.mubr.bf16.gmra.mxu1 %v3931_v59  ;;  %3631 = vmatmul.mubr.bf16.gmra.mxu0 %v3935_v62 }
 0x12d   : > { %v4410_v11 = vadd.f32 %v3277_v50, %v4352_v44  ;;  %2242 = vmatprep.mubr.bf16.mxu1 %v3938_v0  ;;  %3634 = vmatprep.mubr.bf16.mxu0 %v3939_v4 }
 0x12e   : > { %v3191_v34 = vpop.f32.mrf.mxu0  ;;  %v3279_v14 = vpop.f32.mrf.mxu1 }
 0x12f   : > { %v4412_v15 = vadd.f32 %v3191_v34, %v3190_v8  ;;  %v3280_v16 = vadd.f32 %v3279_v14, %v3278_v10  ;;  %v3946_v10 = vld [vmem:[%s4015_s5 + $0x450] ss:$36 sps:$4 sm:$0xff]   ;;  %v3950_v34 = vld [vmem:[%s4015_s5 + $0x458] ss:$36 sps:$4 sm:$0xff]   ;;  %s2748_s5 = sshll.u32 %s4815_s13, 2 }
 0x130   : > { %v3193_v20 = vpop.f32.mrf.mxu0  ;;  %v3281_v21 = vpop.f32.mrf.mxu1  ;;  %s4706_s8 = scalar_lea.vmem %s4795_s2, %s2748_s5 }
 0x131   : > { %v4417_v24 = vadd.f32 %v3280_v16, %v4356_v52 }
 0x132   : > { %v3194_v2 = vpop.f32.mrf.mxu0  ;;  %v3282_v30 = vpop.f32.mrf.mxu1 }
 0x133   : > { %v4421_v44 = vadd.f32 %v3194_v2, %v3193_v20  ;;  %v3283_v32 = vadd.f32 %v3282_v30, %v3281_v21 }
 0x134   : > { %v3196_v33 = vpop.f32.mrf.mxu0  ;;  %v3284_v36 = vpop.f32.mrf.mxu1  ;;  %2243 = vmatmul.mubr.bf16.gmra.mxu1 %v3936_v22  ;;  %3635 = vmatmul.mubr.bf16.gmra.mxu0 %v3940_v23 }
 0x135   : > { %v4424_v37 = vadd.f32 %v3283_v32, %v4365_v1  ;;  %2250 = vmatprep.mubr.bf16.mxu1 %v3943_v25  ;;  %3638 = vmatprep.mubr.bf16.mxu0 %v3944_v26 }
 0x136   : > { %v3197_v52 = vpop.f32.mrf.mxu0  ;;  %v3285_v38 = vpop.f32.mrf.mxu1 }
 0x137   : > { %v4426_v40 = vadd.f32 %v3197_v52, %v3196_v33  ;;  %v3286_v41 = vadd.f32 %v3285_v38, %v3284_v36 }
 0x138   : > { %v3199_v42 = vpop.f32.mrf.mxu0  ;;  %v3287_v43 = vpop.f32.mrf.mxu1 }
 0x139   : > { %v4431_v48 = vadd.f32 %v3286_v41, %v4370_v9 }
 0x13a   : > { %v3200_v55 = vpop.f32.mrf.mxu0  ;;  %v3288_v56 = vpop.f32.mrf.mxu1 }
 0x13b   : > { %v4435_v1 = vadd.f32 %v3200_v55, %v3199_v42  ;;  %v3289_v57 = vadd.f32 %v3288_v56, %v3287_v43 }
 0x13c   : > { %v3202_v59 = vpop.f32.mrf.mxu0  ;;  %v3290_v62 = vpop.f32.mrf.mxu1  ;;  %2251 = vmatmul.mubr.bf16.gmra.mxu1 %v3941_v46  ;;  %3639 = vmatmul.mubr.bf16.gmra.mxu0 %v3945_v47 }
 0x13d   : > { %v4438_v0 = vadd.f32 %v3289_v57, %v4379_v60  ;;  %2258 = vmatprep.mubr.bf16.mxu1 %v3948_v18  ;;  %3642 = vmatprep.mubr.bf16.mxu0 %v3949_v53 }
 0x13e   : > { %v3203_v9 = vpop.f32.mrf.mxu0  ;;  %v3291_v4 = vpop.f32.mrf.mxu1 }
 0x13f   : > { %v4440_v5 = vadd.f32 %v3203_v9, %v3202_v59  ;;  %v3292_v6 = vadd.f32 %v3291_v4, %v3290_v62 }
 0x140   : > { %v3205_v50 = vpop.f32.mrf.mxu0  ;;  %v3293_v8 = vpop.f32.mrf.mxu1 }
 0x141   : > { %v4445_v14 = vadd.f32 %v3292_v6, %v4384_v31 }
 0x142   : > { %v3206_v16 = vpop.f32.mrf.mxu0  ;;  %v3294_v20 = vpop.f32.mrf.mxu1 }
 0x143   : > { %v4447_v21 = vadd.f32 %v3206_v16, %v3205_v50  ;;  %v3295_v60 = vadd.f32 %v3294_v20, %v3293_v8 }
 0x144   : > { %v3208_v22 = vpop.f32.mrf.mxu0  ;;  %v3296_v23 = vpop.f32.mrf.mxu1  ;;  %2259 = vmatmul.mubr.bf16.gmra.mxu1 %v3946_v10  ;;  %3643 = vmatmul.mubr.bf16.gmra.mxu0 %v3950_v34 }
 0x145   : > { %v4450_v25 = vadd.f32 %v3295_v60, %v4393_v12 }
 0x146   : > { %v3209_v26 = vpop.f32.mrf.mxu0  ;;  %v3297_v2 = vpop.f32.mrf.mxu1 }
 0x147   : > { %v4452_v30 = vadd.f32 %v3209_v26, %v3208_v22  ;;  %v3298_v32 = vadd.f32 %v3297_v2, %v3296_v23 }
 0x148   : > { %v3211_v33 = vpop.f32.mrf.mxu0  ;;  %v3299_v31 = vpop.f32.mrf.mxu1 }
 0x149   : > { %v4455_v36 = vadd.f32 %v3298_v32, %v4398_v54 }
 0x14a   : > { %v3212_v52 = vpop.f32.mrf.mxu0  ;;  %v3300_v38 = vpop.f32.mrf.mxu1 }
 0x14b   : > { %v4457_v41 = vadd.f32 %v3212_v52, %v3211_v33  ;;  %v3301_v42 = vadd.f32 %v3300_v38, %v3299_v31 }
 0x14c   : > { %v3302_v43 = vpop.f32.mrf.mxu1  ;;  %v3366_v46 = vpop.f32.mrf.mxu0 }
 0x14d   : > { %v4460_v12 = vadd.f32 %v3301_v42, %v4407_v28 }
 0x14e   : > { %v3303_v47 = vpop.f32.mrf.mxu1  ;;  %v3367_v18 = vpop.f32.mrf.mxu0 }
 0x14f   : > { %v3304_v53 = vadd.f32 %v3303_v47, %v3302_v43  ;;  %v3368_v55 = vadd.f32 %v3367_v18, %v3366_v46 }
 0x150   : > { %v3305_v56 = vpop.f32.mrf.mxu1  ;;  %v3369_v57 = vpop.f32.mrf.mxu0 }
 0x151   : > { %v4463_v59 = vadd.f32 %v3304_v53, %v4412_v15  ;;  %v4466_v54 = vadd.f32 %v3368_v55, %v4361_v58 }
 0x152   : > { %v3306_v62 = vpop.f32.mrf.mxu1  ;;  %v3370_v9 = vpop.f32.mrf.mxu0 }
 0x153   : > { %v3307_v4 = vadd.f32 %v3306_v62, %v3305_v56  ;;  %v3371_v6 = vadd.f32 %v3370_v9, %v3369_v57 }
 0x154   : > { %v3308_v50 = vpop.f32.mrf.mxu1  ;;  %v3372_v8 = vpop.f32.mrf.mxu0 }
 0x155   : > { %v4469_v28 = vadd.f32 %v3307_v4, %v4421_v44  ;;  %v4472_v10 = vadd.f32 %v3371_v6, %v4368_v7 }
 0x156   : > { %v3309_v34 = vpop.f32.mrf.mxu1  ;;  %v3373_v16 = vpop.f32.mrf.mxu0 }
 0x157   : > { %v3310_v20 = vadd.f32 %v3309_v34, %v3308_v50  ;;  %v3374_v15 = vadd.f32 %v3373_v16, %v3372_v8 }
 0x158   : > { %v3311_v60 = vpop.f32.mrf.mxu1  ;;  %v3375_v22 = vpop.f32.mrf.mxu0 }
 0x159   : > { %v4475_v58 = vadd.f32 %v3310_v20, %v4426_v40  ;;  %v4478_v23 = vadd.f32 %v3374_v15, %v4375_v17 }
 0x15a   : > { %v3312_v26 = vpop.f32.mrf.mxu1  ;;  %v3376_v2 = vpop.f32.mrf.mxu0 }
 0x15b   : > { %v3313_v32 = vadd.f32 %v3312_v26, %v3311_v60  ;;  %v3377_v44 = vadd.f32 %v3376_v2, %v3375_v22 }
 0x15c   : > { %v3314_v33 = vpop.f32.mrf.mxu1  ;;  %v3378_v31 = vpop.f32.mrf.mxu0 }
 0x15d   : > { %v4481_v7 = vadd.f32 %v3313_v32, %v4435_v1  ;;  %v4484_v52 = vadd.f32 %v3377_v44, %v4382_v27 }
 0x15e   : > { %v3315_v38 = vpop.f32.mrf.mxu1  ;;  %v3379_v42 = vpop.f32.mrf.mxu0 }
 0x15f   : > { %v3316_v43 = vadd.f32 %v3315_v38, %v3314_v33  ;;  %v3380_v40 = vadd.f32 %v3379_v42, %v3378_v31 }
 0x160   : > { %v3317_v46 = vpop.f32.mrf.mxu1  ;;  %v3381_v47 = vpop.f32.mrf.mxu0 }
 0x161   : > { %v4487_v17 = vadd.f32 %v3316_v43, %v4440_v5  ;;  %v4490_v18 = vadd.f32 %v3380_v40, %v4389_v39 }
 0x162   : > { %v3318_v53 = vpop.f32.mrf.mxu1  ;;  %v3382_v55 = vpop.f32.mrf.mxu0 }
 0x163   : > { %v3319_v56 = vadd.f32 %v3318_v53, %v3317_v46  ;;  %v3383_v1 = vadd.f32 %v3382_v55, %v3381_v47 }
 0x164   : > { %v3320_v57 = vpop.f32.mrf.mxu1  ;;  %v3384_v62 = vpop.f32.mrf.mxu0 }
 0x165   : > { %v4493_v27 = vadd.f32 %v3319_v56, %v4447_v21  ;;  %v4496_v9 = vadd.f32 %v3383_v1, %v4396_v49 }
 0x166   : > { %v3321_v4 = vpop.f32.mrf.mxu1  ;;  %v3385_v6 = vpop.f32.mrf.mxu0 }
 0x167   : > { %v3322_v50 = vadd.f32 %v3321_v4, %v3320_v57  ;;  %v3386_v5 = vadd.f32 %v3385_v6, %v3384_v62 }
 0x168   : > { %v3323_v8 = vpop.f32.mrf.mxu1  ;;  %v3387_v34 = vpop.f32.mrf.mxu0 }
 0x169   : > { %v4499_v39 = vadd.f32 %v3322_v50, %v4452_v30  ;;  %v4502_v16 = vadd.f32 %v3386_v5, %v4403_v63 }
 0x16a   : > { %v3324_v20 = vpop.f32.mrf.mxu1  ;;  %v3388_v15 = vpop.f32.mrf.mxu0 }
 0x16b   : > { %v3325_v60 = vadd.f32 %v3324_v20, %v3323_v8  ;;  %v3389_v21 = vadd.f32 %v3388_v15, %v3387_v34 }
 0x16c   : > { %v3326_v22 = vpop.f32.mrf.mxu1  ;;  %v3390_v26 = vpop.f32.mrf.mxu0 }
 0x16d   : > { %v4505_v49 = vadd.f32 %v3325_v60, %v4457_v41  ;;  %v4508_v2 = vadd.f32 %v3389_v21, %v4410_v11 }
 0x16e   : > { %v3327_v32 = vpop.f32.mrf.mxu1  ;;  %v3391_v44 = vpop.f32.mrf.mxu0 }
 0x16f   : > { %v3328_v33 = vadd.f32 %v3327_v32, %v3326_v22  ;;  %v3392_v30 = vadd.f32 %v3391_v44, %v3390_v26 }
 0x170   : > { %v3329_v31 = vpop.f32.mrf.mxu1  ;;  %v3393_v38 = vpop.f32.mrf.mxu0 }
 0x171   : > { %v4511_v63 = vadd.f32 %v3328_v33, %v4310_v51  ;;  %v4514_v42 = vadd.f32 %v3392_v30, %v4417_v24 }
 0x172   : > { %v3330_v43 = vpop.f32.mrf.mxu1  ;;  %v3394_v40 = vpop.f32.mrf.mxu0 }
 0x173   : > { %v3331_v46 = vadd.f32 %v3330_v43, %v3329_v31  ;;  %v3395_v41 = vadd.f32 %v3394_v40, %v3393_v38 }
 0x174   : > { %v3332_v47 = vpop.f32.mrf.mxu1  ;;  %v3396_v53 = vpop.f32.mrf.mxu0 }
 0x175   : > { %v4517_v11 = vadd.f32 %v3331_v46, %v4318_v61  ;;  %v4520_v55 = vadd.f32 %v3395_v41, %v4424_v37 }
 0x176   : > { %v3333_v56 = vpop.f32.mrf.mxu1  ;;  %v3397_v1 = vpop.f32.mrf.mxu0 }
 0x177   : > { %v3334_v57 = vadd.f32 %v3333_v56, %v3332_v47  ;;  %v3398_v51 = vadd.f32 %v3397_v1, %v3396_v53 }
 0x178   : > { %v3335_v62 = vpop.f32.mrf.mxu1  ;;  %v3399_v4 = vpop.f32.mrf.mxu0 }
 0x179   : > { %v4523_v24 = vadd.f32 %v3334_v57, %v4322_v3  ;;  %v4526_v6 = vadd.f32 %v3398_v51, %v4431_v48 }
 0x17a   : > { %v3336_v50 = vpop.f32.mrf.mxu1  ;;  %v3400_v5 = vpop.f32.mrf.mxu0 }
 0x17b   : > { %v3337_v8 = vadd.f32 %v3336_v50, %v3335_v62  ;;  %v3401_v61 = vadd.f32 %v3400_v5, %v3399_v4 }
 0x17c   : > { %v3338_v34 = vpop.f32.mrf.mxu1  ;;  %v3402_v20 = vpop.f32.mrf.mxu0 }
 0x17d   : > { %v4529_v37 = vadd.f32 %v3337_v8, %v4330_v13  ;;  %v4532_v15 = vadd.f32 %v3401_v61, %v4438_v0 }
 0x17e   : > { %v3339_v60 = vpop.f32.mrf.mxu1  ;;  %v3403_v21 = vpop.f32.mrf.mxu0 }
 0x17f   : > { %v3340_v22 = vadd.f32 %v3339_v60, %v3338_v34  ;;  %v3404_v3 = vadd.f32 %v3403_v21, %v3402_v20 }
 0x180   : > { %v3341_v26 = vpop.f32.mrf.mxu1  ;;  %v3405_v32 = vpop.f32.mrf.mxu0 }
 0x181   : > { %v4535_v48 = vadd.f32 %v3340_v22, %v4334_v19  ;;  %v4538_v44 = vadd.f32 %v3404_v3, %v4445_v14 }
 0x182   : > { %v3342_v33 = vpop.f32.mrf.mxu1  ;;  %v3406_v30 = vpop.f32.mrf.mxu0 }
 0x183   : > { %v3343_v31 = vadd.f32 %v3342_v33, %v3341_v26  ;;  %v3407_v13 = vadd.f32 %v3406_v30, %v3405_v32 }
 0x184   : > { %v3344_v38 = vpop.f32.mrf.mxu1  ;;  %v3408_v43 = vpop.f32.mrf.mxu0 }
 0x185   : > { %v4541_v0 = vadd.f32 %v3343_v31, %v4342_v29  ;;  %v4544_v40 = vadd.f32 %v3407_v13, %v4450_v25 }
 0x186   : > { %v3345_v46 = vpop.f32.mrf.mxu1  ;;  %v3409_v41 = vpop.f32.mrf.mxu0 }
 0x187   : > { %v3346_v47 = vadd.f32 %v3345_v46, %v3344_v38  ;;  %v3410_v19 = vadd.f32 %v3409_v41, %v3408_v43 }
 0x188   : > { %v3347_v53 = vpop.f32.mrf.mxu1  ;;  %v3411_v56 = vpop.f32.mrf.mxu0 }
 0x189   : > { %v4547_v14 = vadd.f32 %v3346_v47, %v4346_v35  ;;  %v4550_v1 = vadd.f32 %v3410_v19, %v4455_v36 }
 0x18a   : > { %v3348_v57 = vpop.f32.mrf.mxu1  ;;  %v3412_v51 = vpop.f32.mrf.mxu0 }
 0x18b   : > { %v3349_v62 = vadd.f32 %v3348_v57, %v3347_v53  ;;  %v3413_v29 = vadd.f32 %v3412_v51, %v3411_v56 }
 0x18c   : > { %v3414_v4 = vpop.f32.mrf.mxu0  ;;  %v3478_v50 = vpop.f32.mrf.mxu1 }
 0x18d   : > { %v4553_v25 = vadd.f32 %v3349_v62, %v4354_v45  ;;  %v4556_v5 = vadd.f32 %v3413_v29, %v4460_v12 }
 0x18e   : > { %v3415_v8 = vpop.f32.mrf.mxu0  ;;  %v3479_v61 = vpop.f32.mrf.mxu1 }
 0x18f   : > { %v3416_v34 = vadd.f32 %v3415_v8, %v3414_v4  ;;  %v3480_v35 = vadd.f32 %v3479_v61, %v3478_v50 }
 0x190   : > { %v3417_v20 = vpop.f32.mrf.mxu0  ;;  %v4558_v60 = vpop.f32.mrf.mxu1 }
 0x191   : > { %v4561_v36 = vadd.f32 %v3416_v34, %v4463_v59  ;;  %v4564_v21 = vadd.f32 %v3480_v35, %v4466_v54 }
 0x192   : > { %v3418_v22 = vpop.f32.mrf.mxu0  ;;  %v4566_v3 = vpop.f32.mrf.mxu1 }
 0x193   : > { %v3419_v45 = vadd.f32 %v3418_v22, %v3417_v20 }
 0x194   : > { %v3420_v26 = vpop.f32.mrf.mxu0  ;;  %v4568_v12 = vpop.f32.mrf.mxu1 }
 0x195   : > { %v4571_v32 = vadd.f32 %v3419_v45, %v4469_v28 }
 0x196   : > { %v3421_v33 = vpop.f32.mrf.mxu0  ;;  %v4573_v30 = vpop.f32.mrf.mxu1 }
 0x197   : > { %v3422_v31 = vadd.f32 %v3421_v33, %v3420_v26 }
 0x198   : > { %v3423_v13 = vpop.f32.mrf.mxu0  ;;  %v4575_v59 = vpop.f32.mrf.mxu1 }
 0x199   : > { %v4578_v54 = vadd.f32 %v3422_v31, %v4475_v58 }
 0x19a   : > { %v3424_v38 = vpop.f32.mrf.mxu0  ;;  %v4580_v43 = vpop.f32.mrf.mxu1 }
 0x19b   : > { %v3425_v46 = vadd.f32 %v3424_v38, %v3423_v13 }
 0x19c   : > { %v3426_v41 = vpop.f32.mrf.mxu0  ;;  %v4582_v47 = vpop.f32.mrf.mxu1 }
 0x19d   : > { %v4585_v28 = vadd.f32 %v3425_v46, %v4481_v7 }
 0x19e   : > { %v3427_v19 = vpop.f32.mrf.mxu0  ;;  %v4587_v53 = vpop.f32.mrf.mxu1 }
 0x19f   : > { %v3428_v56 = vadd.f32 %v3427_v19, %v3426_v41 }
 0x1a0   : > { %v3429_v57 = vpop.f32.mrf.mxu0  ;;  %v4589_v51 = vpop.f32.mrf.mxu1 }
 0x1a1   : > { %v4592_v58 = vadd.f32 %v3428_v56, %v4487_v17 }
 0x1a2   : > { %v3430_v62 = vpop.f32.mrf.mxu0  ;;  %v4594_v29 = vpop.f32.mrf.mxu1 }
 0x1a3   : > { %4796 = vst [vmem:[#allocation2_spill] sm:$0xff] %v4592_v58  ;;  %v3431_v4 = vadd.f32 %v3430_v62, %v3429_v57 }
 0x1a4   : > { %v3432_v50 = vpop.f32.mrf.mxu0  ;;  %v4596_v8 = vpop.f32.mrf.mxu1 }
 0x1a5   : > { %v4599_v7 = vadd.f32 %v3431_v4, %v4493_v27 }
 0x1a6   : > { %v3433_v61 = vpop.f32.mrf.mxu0  ;;  %v4601_v34 = vpop.f32.mrf.mxu1 }
 0x1a7   : > { %4797 = vst [vmem:[#allocation3_spill] sm:$0xff] %v4599_v7  ;;  %v3434_v35 = vadd.f32 %v3433_v61, %v3432_v50 }
 0x1a8   : > { %v3435_v20 = vpop.f32.mrf.mxu0  ;;  %v4603_v22 = vpop.f32.mrf.mxu1 }
 0x1a9   : > { %v4606_v17 = vadd.f32 %v3434_v35, %v4499_v39 }
 0x1aa   : > { %v3436_v45 = vpop.f32.mrf.mxu0  ;;  %v4608_v26 = vpop.f32.mrf.mxu1 }
 0x1ab   : > { %v3437_v33 = vadd.f32 %v3436_v45, %v3435_v20 }
 0x1ac   : > { %v3438_v31 = vpop.f32.mrf.mxu0  ;;  %v4610_v13 = vpop.f32.mrf.mxu1 }
 0x1ad   : > { %v4613_v27 = vadd.f32 %v3437_v33, %v4505_v49 }
 0x1ae   : > { %v3439_v38 = vpop.f32.mrf.mxu0  ;;  %v4615_v46 = vpop.f32.mrf.mxu1 }
 0x1af   : > { %4798 = vst [vmem:[#allocation4_spill] sm:$0xff] %v4613_v27  ;;  %v3440_v41 = vadd.f32 %v3439_v38, %v3438_v31 }
 0x1b0   : > { %v3441_v19 = vpop.f32.mrf.mxu0  ;;  %v4617_v56 = vpop.f32.mrf.mxu1 }
 0x1b1   : > { %v4620_v39 = vadd.f32 %v3440_v41, %v4511_v63 }
 0x1b2   : > { %v3442_v57 = vpop.f32.mrf.mxu0  ;;  %v4622_v62 = vpop.f32.mrf.mxu1 }
 0x1b3   : > { %4799 = vst [vmem:[#allocation5_spill] sm:$0xff] %v4620_v39  ;;  %v3443_v4 = vadd.f32 %v3442_v57, %v3441_v19 }
 0x1b4   : > { %v3444_v50 = vpop.f32.mrf.mxu0  ;;  %v4624_v61 = vpop.f32.mrf.mxu1 }
 0x1b5   : > { %v4627_v49 = vadd.f32 %v3443_v4, %v4517_v11 }
 0x1b6   : > { %v3445_v35 = vpop.f32.mrf.mxu0  ;;  %v4629_v20 = vpop.f32.mrf.mxu1 }
 0x1b7   : > { %4800 = vst [vmem:[#allocation6_spill] sm:$0xff] %v4627_v49  ;;  %v3446_v45 = vadd.f32 %v3445_v35, %v3444_v50 }
 0x1b8   : > { %v3447_v33 = vpop.f32.mrf.mxu0  ;;  %v4631_v31 = vpop.f32.mrf.mxu1 }
 0x1b9   : > { %v4634_v63 = vadd.f32 %v3446_v45, %v4523_v24 }
 0x1ba   : > { %v3448_v38 = vpop.f32.mrf.mxu0  ;;  %v4636_v41 = vpop.f32.mrf.mxu1 }
 0x1bb   : > { %4801 = vst [vmem:[#allocation7_spill] sm:$0xff] %v4634_v63  ;;  %v3449_v19 = vadd.f32 %v3448_v38, %v3447_v33 }
 0x1bc   : > { %v3450_v57 = vpop.f32.mrf.mxu0  ;;  %v4638_v39 = vpop.f32.mrf.mxu1 }
 0x1bd   : > { %v4641_v11 = vadd.f32 %v3449_v19, %v4529_v37 }
 0x1be   : > { %v3451_v4 = vpop.f32.mrf.mxu0  ;;  %v4643_v49 = vpop.f32.mrf.mxu1 }
 0x1bf   : > { %4802 = vst [vmem:[#allocation8_spill] sm:$0xff] %v4641_v11  ;;  %v3452_v50 = vadd.f32 %v3451_v4, %v3450_v57  ;;  %v3486_v57 = vadd.f32 %v4573_v30, %v4568_v12 }
 0x1c0   : > { %v3453_v35 = vpop.f32.mrf.mxu0  ;;  %v4645_v7 = vpop.f32.mrf.mxu1 }
 0x1c1   : > { %v4648_v24 = vadd.f32 %v3452_v50, %v4535_v48 }
 0x1c2   : > { %v3454_v45 = vpop.f32.mrf.mxu0  ;;  %v4650_v63 = vpop.f32.mrf.mxu1 }
 0x1c3   : > { %4803 = vst [vmem:[#allocation9_spill] sm:$0xff] %v4648_v24  ;;  %v3455_v33 = vadd.f32 %v3454_v45, %v3453_v35 }
 0x1c4   : > { %v3456_v38 = vpop.f32.mrf.mxu0  ;;  %v4652_v27 = vpop.f32.mrf.mxu1 }
 0x1c5   : > { %v4655_v37 = vadd.f32 %v3455_v33, %v4541_v0  ;;  %v3489_v0 = vadd.f32 %v4580_v43, %v4575_v59  ;;  %v3492_v59 = vadd.f32 %v4587_v53, %v4582_v47 }
 0x1c6   : > { %v3457_v19 = vpop.f32.mrf.mxu0  ;;  %v4657_v11 = vpop.f32.mrf.mxu1 }
 0x1c7   : > { %4804 = vst [vmem:[#allocation10_spill] sm:$0xff] %v4655_v37  ;;  %v3458_v4 = vadd.f32 %v3457_v19, %v3456_v38  ;;  %v2149_v37 = vadd.f32 %v3486_v57, %v4478_v23  ;;  %v2152_v43 = vadd.f32 %v3489_v0, %v4484_v52  ;;  %v3498_v23 = vadd.f32 %v4601_v34, %v4596_v8 }
 0x1c8   : > { %v3459_v58 = vpop.f32.mrf.mxu0  ;;  %v4661_v48 = vpop.f32.mrf.mxu1  ;;  %v3495_v52 = vadd.f32 %v4594_v29, %v4589_v51  ;;  %v2157_v53 = vadd.f32 %v3492_v59, %v4490_v18 }
 0x1c9   : > { %v4664_v50 = vadd.f32 %v3458_v4, %v4547_v14  ;;  %v3483_v14 = vadd.f32 %v4566_v3, %v4558_v60 }
 0x1ca   : > { %v3460_v35 = vpop.f32.mrf.mxu0  ;;  %v4666_v45 = vpop.f32.mrf.mxu1 }
 0x1cb   : > { %v3461_v33 = vadd.f32 %v3460_v35, %v3459_v58  ;;  %v2144_v3 = vadd.f32 %v3483_v14, %v4472_v10  ;;  %v3510_v10 = vadd.f32 %v4629_v20, %v4624_v61 }
 0x1cc   : > { %v4671_v24 = vpop.f32.mrf.mxu1  ;;  %v3616_v12 = vpop.f32.mrf.mxu0 }
 0x1cd   : > { %v4674_v30 = vadd.f32 %v3461_v33, %v4553_v25  ;;  %v2310_v38 = vadd.f32 %v3616_v12, %v2149_v37  ;;  %v2165_v12 = vadd.f32 %v3498_v23, %v4502_v16 }
 0x1ce   : > { %v4678_v19 = vpop.f32.mrf.mxu1  ;;  %v2301_v4 = vpop.f32.mrf.mxu0 }
 0x1cf   : > { %v2302_v58 = vadd.f32 %v2301_v4, %v4564_v21  ;;  %v2462_v37 = vmul.f32 0.2, %v2310_v38  ;;  %vm2430_vm0 = vcmp.gt.f32.partialorder %v2310_v38, 0.0  ;;  %v3501_v21 = vadd.f32 %v4608_v26, %v4603_v22 }
 0x1d0   : > { %v4686_v57 = vpop.f32.mrf.mxu1  ;;  %v3617_v25 = vpop.f32.mrf.mxu0 }
 0x1d1   : > { %v2313_v35 = vadd.f32 %v3617_v25, %v2152_v43  ;;  %v2460_v8 = vmul.f32 0.2, %v2302_v58  ;;  %v2494_v14 = vsel %vm2430_vm0, %v2310_v38, %v2462_v37  ;;  %vm2428_vm2 = vcmp.gt.f32.partialorder %v2302_v58, 0.0 }
 0x1d2   : > { %v4689_v60 = vpop.f32.mrf.mxu1  ;;  %v2304_v33 = vpop.f32.mrf.mxu0  ;;  %v2168_v43 = vadd.f32 %v3501_v21, %v4508_v2  ;;  %v2160_v37 = vadd.f32 %v3495_v52, %v4496_v9 }
 0x1d3   : > { %vm2431_vm1 = vcmp.gt.f32.partialorder %v2313_v35, 0.0  ;;  %v2463_v47 = vmul.f32 0.2, %v2313_v35  ;;  %v2305_v34 = vadd.f32 %v2304_v33, %v2144_v3  ;;  %v2492_v61 = vsel %vm2428_vm2, %v2302_v58, %v2460_v8 }
 0x1d4   : > { %v4697_v0 = vpop.f32.mrf.mxu1  ;;  %v3620_v4 = vpop.f32.mrf.mxu0  ;;  %v2181_v58 = vadd.f32 %v3510_v10, %v4526_v6  ;;  %v3513_v8 = vadd.f32 %v4636_v41, %v4631_v31  ;;  %v3522_v6 = vadd.f32 %v4657_v11, %v4652_v27 }
 0x1d5   : > { %v2495_v18 = vsel %vm2431_vm1, %v2313_v35, %v2463_v47  ;;  %vm2429_vm3 = vcmp.gt.f32.partialorder %v2305_v34, 0.0  ;;  %v2461_v29 = vmul.f32 0.2, %v2305_v34  ;;  %v2326_v22 = vadd.f32 %v3620_v4, %v2165_v12 }
 0x1d6   : > { %v3039_v51 = vpack.c.bf16 %v2495_v18, %v2494_v14  ;;  %v4708_v26 = vpop.f32.mrf.mxu1  ;;  %v2317_v16 = vpop.f32.mrf.mxu0  ;;  %v3504_v35 = vadd.f32 %v4615_v46, %v4610_v13  ;;  %v3507_v46 = vadd.f32 %v4622_v62, %v4617_v56  ;;  %v2184_v56 = vadd.f32 %v3513_v8, %v4532_v15 }
 0x1d7   : > { %v2318_v59 = vadd.f32 %v2317_v16, %v2157_v53  ;;  %v2493_v20 = vsel %vm2429_vm3, %v2305_v34, %v2461_v29  ;;  %v2466_v3 = vmul.f32 0.2, %v2326_v22  ;;  %vm2434_vm4 = vcmp.gt.f32.partialorder %v2326_v22, 0.0 }
 0x1d8   : > { %3111 = vst [vmem:[%s4706_s8 + $0x8] sm:$0xff] %v3039_v51   ;;  %v4711_v38 = vpop.f32.mrf.mxu1  ;;  %v3621_v23 = vpop.f32.mrf.mxu0  ;;  %v3034_v25 = vpack.c.bf16 %v2493_v20, %v2492_v61  ;;  %v2173_v10 = vadd.f32 %v3504_v35, %v4514_v42  ;;  %v2176_v11 = vadd.f32 %v3507_v46, %v4520_v55  ;;  %v3516_v42 = vadd.f32 %v4643_v49, %v4638_v39 }
 0x1d9   : > { %v2329_v33 = vadd.f32 %v3621_v23, %v2168_v43  ;;  %v2464_v2 = vmul.f32 0.2, %v2318_v59  ;;  %vm2432_vm5 = vcmp.gt.f32.partialorder %v2318_v59, 0.0  ;;  %v2498_v31 = vsel %vm2434_vm4, %v2326_v22, %v2466_v3 }
 0x1da   : > { %v4717_v47 = vpop.f32.mrf.mxu1  ;;  %v2320_v53 = vpop.f32.mrf.mxu0  ;;  %3035 = vst [vmem:[%s4706_s8] sm:$0xff] %v3034_v25   ;;  %v3525_v22 = vadd.f32 %v4666_v45, %v4661_v48  ;;  %v2197_v23 = vadd.f32 %v3522_v6, %v4550_v1  ;;  %v3519_v3 = vadd.f32 %v4650_v63, %v4645_v7  ;;  %v2189_v8 = vadd.f32 %v3516_v42, %v4538_v44 }
 0x1db   : > { %v2321_v21 = vadd.f32 %v2320_v53, %v2160_v37  ;;  %vm2435_vm6 = vcmp.gt.f32.partialorder %v2329_v33, 0.0  ;;  %v2467_v9 = vmul.f32 0.2, %v2329_v33  ;;  %v2496_v18 = vsel %vm2432_vm5, %v2318_v59, %v2464_v2 }
 0x1dc   : > { %v4723_v52 = vpop.f32.mrf.mxu1  ;;  %v3624_v13 = vpop.f32.mrf.mxu0  ;;  %v3534_v53 = vadd.f32 %v4708_v26, %v4697_v0  ;;  %v2200_v63 = vadd.f32 %v3525_v22, %v4556_v5  ;;  %v2192_v0 = vadd.f32 %v3519_v3, %v4544_v40  ;;  %v3528_v26 = vadd.f32 %v4678_v19, %v4671_v24 }
 0x1dd   : > { %vm2433_vm7 = vcmp.gt.f32.partialorder %v2321_v21, 0.0  ;;  %v2465_v34 = vmul.f32 0.2, %v2321_v21  ;;  %v2342_v12 = vadd.f32 %v3624_v13, %v2181_v58  ;;  %v2499_v41 = vsel %vm2435_vm6, %v2329_v33, %v2467_v9 }
 0x1de   : > { %v4729_v4 = vpop.f32.mrf.mxu1  ;;  %v2333_v14 = vpop.f32.mrf.mxu0  ;;  %v3049_v51 = vpack.c.bf16 %v2499_v41, %v2498_v31  ;;  %v3537_v44 = vadd.f32 %v4717_v47, %v4711_v38  ;;  %v2213_v5 = vadd.f32 %v3534_v53, %v4578_v54  ;;  %v2205_v54 = vadd.f32 %v3528_v26, %v4561_v36 }
 0x1df   : > { %v2497_v29 = vsel %vm2433_vm7, %v2321_v21, %v2465_v34  ;;  %v2470_v16 = vmul.f32 0.2, %v2342_v12  ;;  %v2334_v61 = vadd.f32 %v2333_v14, %v2173_v10  ;;  %vm2438_vm8 = vcmp.gt.f32.partialorder %v2342_v12, 0.0 }
 0x1e0   : > { %v3044_v62 = vpack.c.bf16 %v2497_v29, %v2496_v18  ;;  %v4733_v20 = vpop.f32.mrf.mxu1  ;;  %v3625_v43 = vpop.f32.mrf.mxu0  ;;  %3113 = vst [vmem:[%s4706_s8 + $0x18] sm:$0xff] %v3049_v51   ;;  %v3531_v51 = vadd.f32 %v4689_v60, %v4686_v57  ;;  %v2216_v57 = vadd.f32 %v3537_v44, %v4585_v28 }
 0x1e1   : > { %v2345_v27 = vadd.f32 %v3625_v43, %v2184_v56  ;;  %v2468_v25 = vmul.f32 0.2, %v2334_v61  ;;  %v2502_v55 = vsel %vm2438_vm8, %v2342_v12, %v2470_v16  ;;  %vm2436_vm10 = vcmp.gt.f32.partialorder %v2334_v61, 0.0 }
 0x1e2   : > { %3112 = vst [vmem:[%s4706_s8 + $0x10] sm:$0xff] %v3044_v62   ;;  %v4742_v59 = vpop.f32.mrf.mxu1  ;;  %v2336_v15 = vpop.f32.mrf.mxu0 }
 0x1e3   : > { %vm2439_vm9 = vcmp.gt.f32.partialorder %v2345_v27, 0.0  ;;  %v2471_v37 = vmul.f32 0.2, %v2345_v27  ;;  %v2337_v35 = vadd.f32 %v2336_v15, %v2176_v11  ;;  %v2500_v21 = vsel %vm2436_vm10, %v2334_v61, %v2468_v25 }
 0x1e4   : > { %v3544_v39 = vpop.f32.mrf.mxu1  ;;  %v3628_v49 = vpop.f32.mrf.mxu0  ;;  %v2208_v25 = vadd.f32 %v3531_v51, %v4571_v32 }
 0x1e5   : > { %v2503_v33 = vsel %vm2439_vm9, %v2345_v27, %v2471_v37  ;;  %vm2437_vm11 = vcmp.gt.f32.partialorder %v2337_v35, 0.0  ;;  %v2469_v48 = vmul.f32 0.2, %v2337_v35  ;;  %v2358_v45 = vadd.f32 %v3628_v49, %v2197_v23 }
 0x1e6   : > { %v3059_v1 = vpack.c.bf16 %v2503_v33, %v2502_v55  ;;  %v3545_v58 = vpop.f32.mrf.mxu1  ;;  %v2349_v2 = vpop.f32.mrf.mxu0  ;;  %v3540_v37 = vadd.f32 %v4729_v4, %v4723_v52  ;;  %v3543_v33 = vadd.f32 %v4742_v59, %v4733_v20 }
 0x1e7   : > { %v2501_v7 = vsel %vm2437_vm11, %v2337_v35, %v2469_v48  ;;  %v2474_v13 = vmul.f32 0.2, %v2358_v45  ;;  %v2350_v46 = vadd.f32 %v2349_v2, %v2189_v8  ;;  %vm2442_vm12 = vcmp.gt.f32.partialorder %v2358_v45, 0.0  ;;  %v4805_v8 = vld [vmem:[#allocation2_spill] sm:$0xff] }
 0x1e8   : > { %3115 = vst [vmem:[%s4706_s8 + $0x28] sm:$0xff] %v3059_v1   ;;  %v3054_v9 = vpack.c.bf16 %v2501_v7, %v2500_v21  ;;  %v3547_v34 = vpop.f32.mrf.mxu1  ;;  %v3629_v12 = vpop.f32.mrf.mxu0  ;;  %v3546_v56 = vadd.f32 %v3545_v58, %v3544_v39 }
 0x1e9   : > { %v2361_v6 = vadd.f32 %v3629_v12, %v2200_v63  ;;  %v2472_v10 = vmul.f32 0.2, %v2350_v46  ;;  %v2506_v29 = vsel %vm2442_vm12, %v2358_v45, %v2474_v13  ;;  %vm2440_vm14 = vcmp.gt.f32.partialorder %v2350_v46, 0.0 }
 0x1ea   : > { %3114 = vst [vmem:[%s4706_s8 + $0x20] sm:$0xff] %v3054_v9   ;;  %v3548_v31 = vpop.f32.mrf.mxu1  ;;  %v2352_v41 = vpop.f32.mrf.mxu0  ;;  %v2229_v55 = vadd.f32 %v3546_v56, %v4606_v17  ;;  %v2221_v17 = vadd.f32 %v3540_v37, %v4805_v8  ;;  %v4806_v9 = vld [vmem:[#allocation4_spill] sm:$0xff] }
 0x1eb   : > { %vm2443_vm13 = vcmp.gt.f32.partialorder %v2361_v6, 0.0  ;;  %v2475_v14 = vmul.f32 0.2, %v2361_v6  ;;  %v2353_v18 = vadd.f32 %v2352_v41, %v2192_v0  ;;  %v2504_v43 = vsel %vm2440_vm14, %v2350_v46, %v2472_v10  ;;  %v4807_v0 = vld [vmem:[#allocation3_spill] sm:$0xff] }
 0x1ec   : > { %v3550_v40 = vpop.f32.mrf.mxu1  ;;  %v3632_v24 = vpop.f32.mrf.mxu0  ;;  %v3549_v36 = vadd.f32 %v3548_v31, %v3547_v34  ;;  %v2224_v26 = vadd.f32 %v3543_v33, %v4807_v0  ;;  %v4808_v10 = vld [vmem:[#allocation7_spill] sm:$0xff] }
 0x1ed   : > { %v2507_v19 = vsel %vm2443_vm13, %v2361_v6, %v2475_v14  ;;  %vm2441_vm15 = vcmp.gt.f32.partialorder %v2353_v18, 0.0  ;;  %v2473_v38 = vmul.f32 0.2, %v2353_v18  ;;  %v2374_v47 = vadd.f32 %v3632_v24, %v2213_v5 }
 0x1ee   : > { %v3069_v62 = vpack.c.bf16 %v2507_v19, %v2506_v29  ;;  %v3551_v16 = vpop.f32.mrf.mxu1  ;;  %v2365_v61 = vpop.f32.mrf.mxu0  ;;  %v2232_v20 = vadd.f32 %v3549_v36, %v4806_v9 }
 0x1ef   : > { %v2505_v27 = vsel %vm2441_vm15, %v2353_v18, %v2473_v38  ;;  %v2478_v11 = vmul.f32 0.2, %v2374_v47  ;;  %v2366_v42 = vadd.f32 %v2365_v61, %v2205_v54  ;;  %vm2446_vm0 = vcmp.gt.f32.partialorder %v2374_v47, 0.0  ;;  %v4809_v61 = vld [vmem:[#allocation5_spill] sm:$0xff] }
 0x1f0   : > { %3117 = vst [vmem:[%s4706_s8 + $0x38] sm:$0xff] %v3069_v62   ;;  %v3064_v60 = vpack.c.bf16 %v2505_v27, %v2504_v43  ;;  %v3553_v22 = vpop.f32.mrf.mxu1  ;;  %v3633_v15 = vpop.f32.mrf.mxu0  ;;  %v3552_v44 = vadd.f32 %v3551_v16, %v3550_v40 }
 0x1f1   : > { %v2377_v23 = vadd.f32 %v3633_v15, %v2216_v57  ;;  %v2476_v28 = vmul.f32 0.2, %v2366_v42  ;;  %v2510_v48 = vsel %vm2446_vm0, %v2374_v47, %v2478_v11  ;;  %vm2444_vm2 = vcmp.gt.f32.partialorder %v2366_v42, 0.0  ;;  %v4810_v11 = vld [vmem:[#allocation8_spill] sm:$0xff] }
 0x1f2   : > { %3116 = vst [vmem:[%s4706_s8 + $0x30] sm:$0xff] %v3064_v60   ;;  %v3554_v35 = vpop.f32.mrf.mxu1  ;;  %v2368_v3 = vpop.f32.mrf.mxu0  ;;  %v2237_v43 = vadd.f32 %v3552_v44, %v4809_v61 }
 0x1f3   : > { %vm2447_vm1 = vcmp.gt.f32.partialorder %v2377_v23, 0.0  ;;  %v2479_v39 = vmul.f32 0.2, %v2377_v23  ;;  %v2369_v49 = vadd.f32 %v2368_v3, %v2208_v25  ;;  %v2508_v21 = vsel %vm2444_vm2, %v2366_v42, %v2476_v28 }
 0x1f4   : > { %v3556_v32 = vpop.f32.mrf.mxu1  ;;  %v3636_v45 = vpop.f32.mrf.mxu0  ;;  %v3555_v24 = vadd.f32 %v3554_v35, %v3553_v22  ;;  %v4811_v35 = vld [vmem:[#allocation6_spill] sm:$0xff] }
 0x1f5   : > { %v2511_v53 = vsel %vm2447_vm1, %v2377_v23, %v2479_v39  ;;  %vm2445_vm3 = vcmp.gt.f32.partialorder %v2369_v49, 0.0  ;;  %v2477_v52 = vmul.f32 0.2, %v2369_v49  ;;  %v2390_v4 = vadd.f32 %v3636_v45, %v2229_v55 }
 0x1f6   : > { %v3079_v1 = vpack.c.bf16 %v2511_v53, %v2510_v48  ;;  %v3557_v58 = vpop.f32.mrf.mxu1  ;;  %v2381_v2 = vpop.f32.mrf.mxu0  ;;  %v2240_v3 = vadd.f32 %v3555_v24, %v4811_v35 }
 0x1f7   : > { %v2509_v7 = vsel %vm2445_vm3, %v2369_v49, %v2477_v52  ;;  %v3558_v63 = vadd.f32 %v3557_v58, %v3556_v32  ;;  %v2482_v13 = vmul.f32 0.2, %v2390_v4  ;;  %v2382_v46 = vadd.f32 %v2381_v2, %v2221_v17  ;;  %v4812_v17 = vld [vmem:[#allocation9_spill] sm:$0xff] }
 0x1f8   : > { %3119 = vst [vmem:[%s4706_s8 + $0x48] sm:$0xff] %v3079_v1   ;;  %v3074_v59 = vpack.c.bf16 %v2509_v7, %v2508_v21  ;;  %v3559_v34 = vpop.f32.mrf.mxu1  ;;  %v3637_v12 = vpop.f32.mrf.mxu0  ;;  %vm2450_vm4 = vcmp.gt.f32.partialorder %v2390_v4, 0.0 }
 0x1f9   : > { %v2393_v6 = vadd.f32 %v3637_v12, %v2232_v20  ;;  %v2480_v31 = vmul.f32 0.2, %v2382_v46  ;;  %v2245_v14 = vadd.f32 %v3558_v63, %v4808_v10  ;;  %v2514_v19 = vsel %vm2450_vm4, %v2390_v4, %v2482_v13  ;;  %v4813_v12 = vld [vmem:[#allocation10_spill] sm:$0xff] }
 0x1fa   : > { %3118 = vst [vmem:[%s4706_s8 + $0x40] sm:$0xff] %v3074_v59   ;;  %v3560_v41 = vpop.f32.mrf.mxu1  ;;  %v2384_v5 = vpop.f32.mrf.mxu0  ;;  %vm2448_vm6 = vcmp.gt.f32.partialorder %v2382_v46, 0.0 }
 0x1fb   : > { %vm2451_vm5 = vcmp.gt.f32.partialorder %v2393_v6, 0.0  ;;  %v2483_v18 = vmul.f32 0.2, %v2393_v6  ;;  %v3561_v51 = vadd.f32 %v3560_v41, %v3559_v34  ;;  %v2385_v29 = vadd.f32 %v2384_v5, %v2224_v26 }
 0x1fc   : > { %v3562_v38 = vpop.f32.mrf.mxu1  ;;  %v3640_v47 = vpop.f32.mrf.mxu0  ;;  %v2512_v57 = vsel %vm2448_vm6, %v2382_v46, %v2480_v31 }
 0x1fd   : > { %v2515_v56 = vsel %vm2451_vm5, %v2393_v6, %v2483_v18  ;;  %vm2449_vm7 = vcmp.gt.f32.partialorder %v2385_v29, 0.0  ;;  %v2481_v62 = vmul.f32 0.2, %v2385_v29  ;;  %v2406_v40 = vadd.f32 %v3640_v47, %v2245_v14 }
 0x1fe   : > { %v3089_v16 = vpack.c.bf16 %v2515_v56, %v2514_v19  ;;  %v3563_v54 = vpop.f32.mrf.mxu1  ;;  %v2397_v27 = vpop.f32.mrf.mxu0  ;;  %v2248_v42 = vadd.f32 %v3561_v51, %v4810_v11 }
 0x1ff   : > { %v2513_v60 = vsel %vm2449_vm7, %v2385_v29, %v2481_v62  ;;  %v2486_v15 = vmul.f32 0.2, %v2406_v40  ;;  %v2398_v23 = vadd.f32 %v2397_v27, %v2237_v43  ;;  %vm2454_vm8 = vcmp.gt.f32.partialorder %v2406_v40, 0.0 }
 0x200   : > { %3121 = vst [vmem:[%s4706_s8 + $0x58] sm:$0xff] %v3089_v16   ;;  %v3084_v22 = vpack.c.bf16 %v2513_v60, %v2512_v57  ;;  %v3565_v25 = vpop.f32.mrf.mxu1  ;;  %v3641_v37 = vpop.f32.mrf.mxu0  ;;  %v3564_v55 = vadd.f32 %v3563_v54, %v3562_v38 }
 0x201   : > { %v2409_v36 = vadd.f32 %v3641_v37, %v2248_v42  ;;  %v2484_v49 = vmul.f32 0.2, %v2398_v23  ;;  %v2518_v32 = vsel %vm2454_vm8, %v2406_v40, %v2486_v15  ;;  %vm2452_vm10 = vcmp.gt.f32.partialorder %v2398_v23, 0.0 }
 0x202   : > { %3120 = vst [vmem:[%s4706_s8 + $0x50] sm:$0xff] %v3084_v22   ;;  %v3566_v28 = vpop.f32.mrf.mxu1  ;;  %v2400_v39 = vpop.f32.mrf.mxu0  ;;  %v2253_v2 = vadd.f32 %v3564_v55, %v4812_v17 }
 0x203   : > { %vm2455_vm9 = vcmp.gt.f32.partialorder %v2409_v36, 0.0  ;;  %v2487_v33 = vmul.f32 0.2, %v2409_v36  ;;  %v2401_v48 = vadd.f32 %v2400_v39, %v2240_v3  ;;  %v3567_v4 = vadd.f32 %v3566_v28, %v3565_v25 }
 0x204   : > { %v3568_v45 = vpop.f32.mrf.mxu1  ;;  %v3644_v53 = vpop.f32.mrf.mxu0  ;;  %v2516_v7 = vsel %vm2452_vm10, %v2398_v23, %v2484_v49 }
 0x205   : > { %v2519_v52 = vsel %vm2455_vm9, %v2409_v36, %v2487_v33  ;;  %vm2453_vm11 = vcmp.gt.f32.partialorder %v2401_v48, 0.0  ;;  %v2485_v1 = vmul.f32 0.2, %v2401_v48  ;;  %v2256_v6 = vadd.f32 %v3567_v4, %v4813_v12 }
 0x206   : > { %v3099_v58 = vpack.c.bf16 %v2519_v52, %v2518_v32  ;;  %v3569_v8 = vpop.f32.mrf.mxu1  ;;  %v2413_v21 = vpop.f32.mrf.mxu0 }
 0x207   : > { %v2517_v63 = vsel %vm2453_vm11, %v2401_v48, %v2485_v1  ;;  %v3570_v9 = vadd.f32 %v3569_v8, %v3568_v45  ;;  %v2414_v59 = vadd.f32 %v2413_v21, %v2253_v2 }
 0x208   : > { %3123 = vst [vmem:[%s4706_s8 + $0x68] sm:$0xff] %v3099_v58   ;;  %v3094_v20 = vpack.c.bf16 %v2517_v63, %v2516_v7  ;;  %v3571_v13 = vpop.f32.mrf.mxu1  ;;  %v3645_v46 = vpop.f32.mrf.mxu0 }
 0x209   : > { %v2261_v34 = vadd.f32 %v3570_v9, %v4664_v50  ;;  %v2488_v5 = vmul.f32 0.2, %v2414_v59  ;;  %vm2456_vm12 = vcmp.gt.f32.partialorder %v2414_v59, 0.0 }
 0x20a   : > { %3122 = vst [vmem:[%s4706_s8 + $0x60] sm:$0xff] %v3094_v20   ;;  %v3572_v0 = vpop.f32.mrf.mxu1  ;;  %v2416_v26 = vpop.f32.mrf.mxu0 }
 0x20b   : > { %v2422_v44 = vadd.f32 %v3644_v53, %v2261_v34  ;;  %v3573_v31 = vadd.f32 %v3572_v0, %v3571_v13  ;;  %v2417_v41 = vadd.f32 %v2416_v26, %v2256_v6  ;;  %v2520_v50 = vsel %vm2456_vm12, %v2414_v59, %v2488_v5 }
 0x20d   : > { %v2264_v10 = vadd.f32 %v3573_v31, %v4674_v30  ;;  %vm2457_vm13 = vcmp.gt.f32.partialorder %v2417_v41, 0.0  ;;  %v2489_v14 = vmul.f32 0.2, %v2417_v41  ;;  %v2490_v18 = vmul.f32 0.2, %v2422_v44 }
 0x20e   : > { %vm2458_vm14 = vcmp.gt.f32.partialorder %v2422_v44, 0.0 }
 0x20f   : > { %v2425_v51 = vadd.f32 %v3645_v46, %v2264_v10  ;;  %v2521_v29 = vsel %vm2457_vm13, %v2417_v41, %v2489_v14  ;;  %v2522_v38 = vsel %vm2458_vm14, %v2422_v44, %v2490_v18 }
 0x210   : > { %v3104_v19 = vpack.c.bf16 %v2521_v29, %v2520_v50 }
 0x211   : > { %vm2459_vm15 = vcmp.gt.f32.partialorder %v2425_v51, 0.0  ;;  %v2491_v24 = vmul.f32 0.2, %v2425_v51 }
 0x212   : > { %3124 = vst [vmem:[%s4706_s8 + $0x70] sm:$0xff] %v3104_v19  }
 0x213   : > { %v2523_v47 = vsel %vm2459_vm15, %v2425_v51, %v2491_v24 }
 0x214   : > { %v3109_v56 = vpack.c.bf16 %v2523_v47, %v2522_v38 }
 0x216   : > { %3125 = vst [vmem:[%s4706_s8 + $0x78] sm:$0xff] %v3109_v56  }
 0x217 PF: > { %s12_s9 = sadd.s32 1, %s3957_s9  }
 0x218   : > { %p9_p4 = scmp.ge.s32.totalorder %s12_s9, 4  }
 0x21a   :  { %11 = sbr.rel (!%p9_p4) target bundleno = 1 (0x1), region = 58 }

// kernel: discriminator_forward.11
= control target key start
LH: loop header
LB: loop body
LE: loop exit
PB: predicated region body
PF: predicated region fallthrough
CT: control target
= control target key end

     0   :  { %vm2081_vm0 = vcmask 1043456   ;;  %vm2082_vm1 = vcmask 523268   ;;  %s3641_s1 = inlined_call_operand.vmem [shape: bf16[1152,192], index: 1, kind: input, shape index: {}]   ;;  %s3642_s0 = inlined_call_operand.vmem [shape: bf16[128,1152], index: 0, kind: input, shape index: {}]   ;;  %s3643_s2 = inlined_call_operand.vmem [shape: bf16[128,192], index: 2, kind: output, shape index: {}]  }
   0x1   :  { %v2369_v0 = vld [vmem:[%s3641_s1 + $0x74] ss:$8 sps:$4 sm:$0xff]   ;;  %v2373_v2 = vld [vmem:[%s3641_s1 + $0x70] ss:$8 sps:$4 sm:$0xff]   ;;  %v2375_v4 = vld [vmem:[%s3641_s1 + $0x64] ss:$8 sps:$4 sm:$0xff]  }
   0x2   :  { %v2371_v1 = vld [vmem:[%s3641_s1 + $0x174] ss:$8 sps:$4 sm:$0xff]   ;;  %1324 = vmatprep.subr.bf16.mxu0 %v2369_v0  ;;  %v2374_v3 = vld [vmem:[%s3641_s1 + $0x170] ss:$8 sps:$4 sm:$0xff]   ;;  %v2377_v5 = vld [vmem:[%s3641_s1 + $0x164] ss:$8 sps:$4 sm:$0xff]  }
   0x3   :  { %1437 = vmatprep.subr.bf16.mxu1 %v2371_v1  ;;  %1325 = vmatpush1.bf16.msra.mxu0 %v2373_v2  ;;  %v2379_v6 = vld [vmem:[%s3641_s1 + $0x60] ss:$8 sps:$4 sm:$0xff]   ;;  %v2381_v8 = vld [vmem:[%s3641_s1 + $0x54] ss:$8 sps:$4 sm:$0xff]   ;;  %v2385_v10 = vld [vmem:[%s3641_s1 + $0x50] ss:$8 sps:$4 sm:$0xff]  }
   0x4   :  { %1438 = vmatpush1.bf16.msra.mxu1 %v2374_v3  ;;  %1326 = vmatprep.subr.bf16.mxu0 %v2375_v4  ;;  %v2380_v7 = vld [vmem:[%s3641_s1 + $0x160] ss:$8 sps:$4 sm:$0xff]   ;;  %v2383_v9 = vld [vmem:[%s3641_s1 + $0x154] ss:$8 sps:$4 sm:$0xff]   ;;  %v2386_v11 = vld [vmem:[%s3641_s1 + $0x150] ss:$8 sps:$4 sm:$0xff]  }
   0x5   :  { %1439 = vmatprep.subr.bf16.mxu1 %v2377_v5  ;;  %v2387_v12 = vld [vmem:[%s3641_s1 + $0x44] ss:$8 sps:$4 sm:$0xff]   ;;  %v2391_v14 = vld [vmem:[%s3641_s1 + $0x40] ss:$8 sps:$4 sm:$0xff]   ;;  %v2393_v16 = vld [vmem:[%s3641_s1 + $0x34] ss:$8 sps:$4 sm:$0xff]  }
   0x6   :  { %v2389_v13 = vld [vmem:[%s3641_s1 + $0x144] ss:$8 sps:$4 sm:$0xff]   ;;  %v2392_v15 = vld [vmem:[%s3641_s1 + $0x140] ss:$8 sps:$4 sm:$0xff]   ;;  %v2395_v17 = vld [vmem:[%s3641_s1 + $0x134] ss:$8 sps:$4 sm:$0xff]  }
   0x7   :  { %1327 = vmatpush1.bf16.msra.mxu0 %v2379_v6  ;;  %v2397_v18 = vld [vmem:[%s3641_s1 + $0x30] ss:$8 sps:$4 sm:$0xff]   ;;  %v2399_v20 = vld [vmem:[%s3641_s1 + $0x24] ss:$8 sps:$4 sm:$0xff]   ;;  %v2403_v22 = vld [vmem:[%s3641_s1 + $0x20] ss:$8 sps:$4 sm:$0xff]  }
   0x8   :  { %1440 = vmatpush1.bf16.msra.mxu1 %v2380_v7  ;;  %1328 = vmatprep.subr.bf16.mxu0 %v2381_v8  ;;  %v2398_v19 = vld [vmem:[%s3641_s1 + $0x130] ss:$8 sps:$4 sm:$0xff]   ;;  %v2401_v21 = vld [vmem:[%s3641_s1 + $0x124] ss:$8 sps:$4 sm:$0xff]   ;;  %v2404_v23 = vld [vmem:[%s3641_s1 + $0x120] ss:$8 sps:$4 sm:$0xff]  }
   0x9   :  { %1441 = vmatprep.subr.bf16.mxu1 %v2383_v9  ;;  %v2405_v24 = vld [vmem:[%s3641_s1 + $0x14] ss:$8 sps:$4 sm:$0xff]   ;;  %v2409_v26 = vld [vmem:[%s3641_s1 + $0x10] ss:$8 sps:$4 sm:$0xff]   ;;  %v2411_v28 = vld [vmem:[%s3641_s1 + $0x4] ss:$8 sps:$4 sm:$0xff]  }
   0xa   :  { %v2407_v25 = vld [vmem:[%s3641_s1 + $0x114] ss:$8 sps:$4 sm:$0xff]   ;;  %v2410_v27 = vld [vmem:[%s3641_s1 + $0x110] ss:$8 sps:$4 sm:$0xff]   ;;  %v2413_v29 = vld [vmem:[%s3641_s1 + $0x104] ss:$8 sps:$4 sm:$0xff]  }
   0xb   :  { %1329 = vmatpush1.bf16.msra.mxu0 %v2385_v10  ;;  %v2415_v30 = vld [vmem:[%s3641_s1] ss:$8 sps:$4 sm:$0xff]   ;;  %v2417_v32 = vld [vmem:[%s3641_s1 + $0xf4] ss:$8 sps:$4 sm:$0xff]   ;;  %v2421_v34 = vld [vmem:[%s3641_s1 + $0xf0] ss:$8 sps:$4 sm:$0xff]  }
   0xc   :  { %1442 = vmatpush1.bf16.msra.mxu1 %v2386_v11  ;;  %1330 = vmatprep.subr.bf16.mxu0 %v2387_v12  ;;  %v2416_v31 = vld [vmem:[%s3641_s1 + $0x100] ss:$8 sps:$4 sm:$0xff]   ;;  %v2419_v33 = vld [vmem:[%s3641_s1 + $0x1f4] ss:$8 sps:$4 sm:$0xff]   ;;  %v2422_v35 = vld [vmem:[%s3641_s1 + $0x1f0] ss:$8 sps:$4 sm:$0xff]  }
   0xd   :  { %1443 = vmatprep.subr.bf16.mxu1 %v2389_v13  ;;  %v2423_v36 = vld [vmem:[%s3641_s1 + $0xe4] ss:$8 sps:$4 sm:$0xff]   ;;  %v2427_v38 = vld [vmem:[%s3641_s1 + $0xe0] ss:$8 sps:$4 sm:$0xff]   ;;  %v2429_v40 = vld [vmem:[%s3641_s1 + $0xd4] ss:$8 sps:$4 sm:$0xff]  }
   0xe   :  { %v2425_v37 = vld [vmem:[%s3641_s1 + $0x1e4] ss:$8 sps:$4 sm:$0xff]   ;;  %v2428_v39 = vld [vmem:[%s3641_s1 + $0x1e0] ss:$8 sps:$4 sm:$0xff]   ;;  %v2431_v41 = vld [vmem:[%s3641_s1 + $0x1d4] ss:$8 sps:$4 sm:$0xff]  }
   0xf   :  { %1331 = vmatpush1.bf16.msra.mxu0 %v2391_v14  ;;  %v2433_v42 = vld [vmem:[%s3641_s1 + $0xd0] ss:$8 sps:$4 sm:$0xff]   ;;  %v2435_v44 = vld [vmem:[%s3641_s1 + $0xc4] ss:$8 sps:$4 sm:$0xff]   ;;  %v2439_v46 = vld [vmem:[%s3641_s1 + $0xc0] ss:$8 sps:$4 sm:$0xff]  }
  0x10   :  { %1444 = vmatpush1.bf16.msra.mxu1 %v2392_v15  ;;  %1332 = vmatprep.subr.bf16.mxu0 %v2393_v16  ;;  %v2434_v43 = vld [vmem:[%s3641_s1 + $0x1d0] ss:$8 sps:$4 sm:$0xff]   ;;  %v2437_v45 = vld [vmem:[%s3641_s1 + $0x1c4] ss:$8 sps:$4 sm:$0xff]   ;;  %v2440_v47 = vld [vmem:[%s3641_s1 + $0x1c0] ss:$8 sps:$4 sm:$0xff]  }
  0x11   :  { %1445 = vmatprep.subr.bf16.mxu1 %v2395_v17  ;;  %v2441_v48 = vld [vmem:[%s3641_s1 + $0xb4] ss:$8 sps:$4 sm:$0xff]   ;;  %v2467_v49 = vld [vmem:[%s3642_s0 + $0x4] ss:$36 sps:$4 sm:$0xff]   ;;  %v2470_v51 = vld [vmem:[%s3642_s0 + $0xc] ss:$36 sps:$4 sm:$0xff]  }
  0x12   :  { %v2443_v50 = vld [vmem:[%s3641_s1 + $0x1b4] ss:$8 sps:$4 sm:$0xff]   ;;  %1356 = vmatprep.mubr.bf16.mxu0 %v2467_v49  ;;  %v2445_v52 = vld [vmem:[%s3641_s1 + $0xb0] ss:$8 sps:$4 sm:$0xff]   ;;  %1469 = vmatprep.mubr.bf16.mxu1 %v2470_v51  ;;  %v2447_v54 = vld [vmem:[%s3641_s1 + $0xa4] ss:$8 sps:$4 sm:$0xff]  }
  0x13   :  { %1333 = vmatpush1.bf16.msra.mxu0 %v2397_v18  ;;  %v2446_v53 = vld [vmem:[%s3641_s1 + $0x1b0] ss:$8 sps:$4 sm:$0xff]   ;;  %v2449_v55 = vld [vmem:[%s3641_s1 + $0x1a4] ss:$8 sps:$4 sm:$0xff]   ;;  %v2451_v56 = vld [vmem:[%s3641_s1 + $0xa0] ss:$8 sps:$4 sm:$0xff]  }
  0x14   :  { %1446 = vmatpush1.bf16.msra.mxu1 %v2398_v19  ;;  %1334 = vmatprep.subr.bf16.mxu0 %v2399_v20  ;;  %v2452_v57 = vld [vmem:[%s3641_s1 + $0x1a0] ss:$8 sps:$4 sm:$0xff]   ;;  %v2453_v58 = vld [vmem:[%s3641_s1 + $0x94] ss:$8 sps:$4 sm:$0xff]   ;;  %v2457_v60 = vld [vmem:[%s3641_s1 + $0x90] ss:$8 sps:$4 sm:$0xff]  }
  0x15   :  { %1447 = vmatprep.subr.bf16.mxu1 %v2401_v21  ;;  %v2455_v59 = vld [vmem:[%s3641_s1 + $0x194] ss:$8 sps:$4 sm:$0xff]   ;;  %v2458_v61 = vld [vmem:[%s3641_s1 + $0x190] ss:$8 sps:$4 sm:$0xff]   ;;  %v2459_v62 = vld [vmem:[%s3641_s1 + $0x84] ss:$8 sps:$4 sm:$0xff]  }
  0x16   :  { %v2461_v63 = vld [vmem:[%s3641_s1 + $0x184] ss:$8 sps:$4 sm:$0xff]   ;;  %v2463_v0 = vld [vmem:[%s3641_s1 + $0x80] ss:$8 sps:$4 sm:$0xff]   ;;  %v2473_v2 = vld [vmem:[%s3641_s1 + $0x274] ss:$8 sps:$4 sm:$0xff]  }
  0x17   :  { %1335 = vmatpush1.bf16.msra.mxu0 %v2403_v22  ;;  %v2464_v1 = vld [vmem:[%s3641_s1 + $0x180] ss:$8 sps:$4 sm:$0xff]   ;;  %v2476_v3 = vld [vmem:[%s3641_s1 + $0x374] ss:$8 sps:$4 sm:$0xff]   ;;  %v2471_v6 = vld [vmem:[%s3641_s1 + $0x270] ss:$8 sps:$4 sm:$0xff]  }
  0x18   :  { %1448 = vmatpush1.bf16.msra.mxu1 %v2404_v23  ;;  %1336 = vmatprep.subr.bf16.mxu0 %v2405_v24  ;;  %v2465_v4 = vld [vmem:[%s3642_s0] ss:$36 sps:$4 sm:$0xff]   ;;  %v2468_v5 = vld [vmem:[%s3642_s0 + $0x8] ss:$36 sps:$4 sm:$0xff]   ;;  %v2474_v7 = vld [vmem:[%s3641_s1 + $0x370] ss:$8 sps:$4 sm:$0xff]  }
  0x19   :  { %1449 = vmatprep.subr.bf16.mxu1 %v2407_v25  ;;  %v2479_v8 = vld [vmem:[%s3641_s1 + $0x264] ss:$8 sps:$4 sm:$0xff]   ;;  %v2485_v11 = vld [vmem:[%s3642_s0 + $0x54] ss:$36 sps:$4 sm:$0xff]   ;;  %v2477_v12 = vld [vmem:[%s3641_s1 + $0x260] ss:$8 sps:$4 sm:$0xff]  }
  0x1a   :  { %v2482_v9 = vld [vmem:[%s3641_s1 + $0x364] ss:$8 sps:$4 sm:$0xff]   ;;  %v2480_v13 = vld [vmem:[%s3641_s1 + $0x360] ss:$8 sps:$4 sm:$0xff]   ;;  %v2491_v14 = vld [vmem:[%s3641_s1 + $0x254] ss:$8 sps:$4 sm:$0xff]  }
  0x1b   :  { %1337 = vmatpush1.bf16.msra.mxu0 %v2409_v26  ;;  %v2483_v10 = vld [vmem:[%s3642_s0 + $0x4c] ss:$36 sps:$4 sm:$0xff]   ;;  %v2494_v15 = vld [vmem:[%s3641_s1 + $0x354] ss:$8 sps:$4 sm:$0xff]   ;;  %v2495_v24 = vld [vmem:[%s3641_s1 + $0x240] ss:$8 sps:$4 sm:$0xff]  }
  0x1c   :  { %1450 = vmatpush1.bf16.msra.mxu1 %v2410_v27  ;;  %1338 = vmatprep.subr.bf16.mxu0 %v2411_v28  ;;  %v2487_v16 = vld [vmem:[%s3642_s0 + $0x48] ss:$36 sps:$4 sm:$0xff]   ;;  %v2488_v17 = vld [vmem:[%s3642_s0 + $0x50] ss:$36 sps:$4 sm:$0xff]   ;;  %v2503_v23 = vld [vmem:[%s3642_s0 + $0x9c] ss:$36 sps:$4 sm:$0xff]  }
  0x1d   :  { %1451 = vmatprep.subr.bf16.mxu1 %v2413_v29  ;;  %v2489_v18 = vld [vmem:[%s3641_s1 + $0x250] ss:$8 sps:$4 sm:$0xff]   ;;  %v2497_v20 = vld [vmem:[%s3641_s1 + $0x244] ss:$8 sps:$4 sm:$0xff]   ;;  %v2498_v25 = vld [vmem:[%s3641_s1 + $0x340] ss:$8 sps:$4 sm:$0xff]  }
  0x1e   :  { %v2492_v19 = vld [vmem:[%s3641_s1 + $0x350] ss:$8 sps:$4 sm:$0xff]   ;;  %v2500_v21 = vld [vmem:[%s3641_s1 + $0x344] ss:$8 sps:$4 sm:$0xff]   ;;  %v2509_v26 = vld [vmem:[%s3641_s1 + $0x234] ss:$8 sps:$4 sm:$0xff]  }
  0x1f   :  { %1339 = vmatpush1.bf16.msra.mxu0 %v2415_v30  ;;  %v2501_v22 = vld [vmem:[%s3642_s0 + $0x94] ss:$36 sps:$4 sm:$0xff]   ;;  %v2534_v49 = vld [vmem:[%s3641_s1 + $0x300] ss:$8 sps:$4 sm:$0xff]   ;;  %vm3531_vm6 = vmor %vm2082_vm1, %vm2081_vm0 }
  0x20   :  { %1452 = vmatpush1.bf16.msra.mxu1 %v2416_v31  ;;  %1340 = vmatprep.subr.bf16.mxu0 %v2417_v32  ;;  %v2512_v27 = vld [vmem:[%s3641_s1 + $0x334] ss:$8 sps:$4 sm:$0xff]   ;;  %v2507_v30 = vld [vmem:[%s3641_s1 + $0x230] ss:$8 sps:$4 sm:$0xff]   ;;  %v2515_v32 = vld [vmem:[%s3641_s1 + $0x224] ss:$8 sps:$4 sm:$0xff]  }
  0x21   :  { %1453 = vmatprep.subr.bf16.mxu1 %v2419_v33  ;;  %v2505_v28 = vld [vmem:[%s3642_s0 + $0x90] ss:$36 sps:$4 sm:$0xff]   ;;  %v2506_v29 = vld [vmem:[%s3642_s0 + $0x98] ss:$36 sps:$4 sm:$0xff]   ;;  %v2518_v33 = vld [vmem:[%s3641_s1 + $0x324] ss:$8 sps:$4 sm:$0xff]  }
  0x22   :  { %v2510_v31 = vld [vmem:[%s3641_s1 + $0x330] ss:$8 sps:$4 sm:$0xff]   ;;  %v2548_v51 = vld [vmem:[%s3641_s1 + $0x3f4] ss:$8 sps:$4 sm:$0xff]  }
  0x23   :  { %1341 = vmatpush2.bf16.msra.mxu0 %v2421_v34  ;;  %v2519_v34 = vld [vmem:[%s3642_s0 + $0xdc] ss:$36 sps:$4 sm:$0xff]  }
  0x24   :  { %1454 = vmatpush2.bf16.msra.mxu1 %v2422_v35  ;;  %1342 = vmatprep.subr.bf16.mxu0 %v2423_v36  ;;  %v2521_v35 = vld [vmem:[%s3642_s0 + $0xe4] ss:$36 sps:$4 sm:$0xff]  }
  0x25   :  { %1455 = vmatprep.subr.bf16.mxu1 %v2425_v37  ;;  %v2513_v36 = vld [vmem:[%s3641_s1 + $0x220] ss:$8 sps:$4 sm:$0xff]  }
  0x26   :  { %v2516_v37 = vld [vmem:[%s3641_s1 + $0x320] ss:$8 sps:$4 sm:$0xff]  }
  0x27   :  { %1343 = vmatpush2.bf16.msra.mxu0 %v2427_v38  ;;  %v2527_v38 = vld [vmem:[%s3641_s1 + $0x214] ss:$8 sps:$4 sm:$0xff]  }
  0x28   :  { %1456 = vmatpush2.bf16.msra.mxu1 %v2428_v39  ;;  %1344 = vmatprep.subr.bf16.mxu0 %v2429_v40  ;;  %v2530_v39 = vld [vmem:[%s3641_s1 + $0x314] ss:$8 sps:$4 sm:$0xff]  }
  0x29   :  { %1457 = vmatprep.subr.bf16.mxu1 %v2431_v41  ;;  %v2523_v40 = vld [vmem:[%s3642_s0 + $0xd8] ss:$36 sps:$4 sm:$0xff]   ;;  %v2524_v41 = vld [vmem:[%s3642_s0 + $0xe0] ss:$36 sps:$4 sm:$0xff]  }
  0x2b   :  { %1345 = vmatpush2.bf16.msra.mxu0 %v2433_v42  ;;  %v2525_v42 = vld [vmem:[%s3641_s1 + $0x210] ss:$8 sps:$4 sm:$0xff]  }
  0x2c   :  { %1458 = vmatpush2.bf16.msra.mxu1 %v2434_v43  ;;  %1346 = vmatprep.subr.bf16.mxu0 %v2435_v44  ;;  %v2528_v43 = vld [vmem:[%s3641_s1 + $0x310] ss:$8 sps:$4 sm:$0xff]   ;;  %v2533_v44 = vld [vmem:[%s3641_s1 + $0x204] ss:$8 sps:$4 sm:$0xff]  }
  0x2d   :  { %1459 = vmatprep.subr.bf16.mxu1 %v2437_v45  ;;  %v2536_v45 = vld [vmem:[%s3641_s1 + $0x304] ss:$8 sps:$4 sm:$0xff]  }
  0x2f   :  { %1347 = vmatpush2.bf16.msra.mxu0 %v2439_v46  ;;  %v2537_v46 = vld [vmem:[%s3642_s0 + $0x124] ss:$36 sps:$4 sm:$0xff]  }
  0x30   :  { %1460 = vmatpush2.bf16.msra.mxu1 %v2440_v47  ;;  %1348 = vmatprep.subr.bf16.mxu0 %v2441_v48  ;;  %v2539_v47 = vld [vmem:[%s3642_s0 + $0x12c] ss:$36 sps:$4 sm:$0xff]   ;;  %v2531_v48 = vld [vmem:[%s3641_s1 + $0x200] ss:$8 sps:$4 sm:$0xff]  }
  0x31   :  { %1461 = vmatprep.subr.bf16.mxu1 %v2443_v50  ;;  %v2545_v50 = vld [vmem:[%s3641_s1 + $0x2f4] ss:$8 sps:$4 sm:$0xff]  }
  0x33   :  { %1349 = vmatpush2.bf16.msra.mxu0 %v2445_v52  ;;  %v2541_v52 = vld [vmem:[%s3642_s0 + $0x120] ss:$36 sps:$4 sm:$0xff]  }
  0x34   :  { %1462 = vmatpush2.bf16.msra.mxu1 %v2446_v53  ;;  %1350 = vmatprep.subr.bf16.mxu0 %v2447_v54  ;;  %v2542_v53 = vld [vmem:[%s3642_s0 + $0x128] ss:$36 sps:$4 sm:$0xff]   ;;  %v2543_v54 = vld [vmem:[%s3641_s1 + $0x2f0] ss:$8 sps:$4 sm:$0xff]  }
  0x35   :  { %1463 = vmatprep.subr.bf16.mxu1 %v2449_v55  ;;  %v2546_v55 = vld [vmem:[%s3641_s1 + $0x3f0] ss:$8 sps:$4 sm:$0xff]  }
  0x37   :  { %1351 = vmatpush2.bf16.msra.mxu0 %v2451_v56  ;;  %v2551_v56 = vld [vmem:[%s3641_s1 + $0x2e4] ss:$8 sps:$4 sm:$0xff]  }
  0x38   :  { %1464 = vmatpush2.bf16.msra.mxu1 %v2452_v57  ;;  %1352 = vmatprep.subr.bf16.mxu0 %v2453_v58  ;;  %v2554_v57 = vld [vmem:[%s3641_s1 + $0x3e4] ss:$8 sps:$4 sm:$0xff]  }
  0x39   :  { %1465 = vmatprep.subr.bf16.mxu1 %v2455_v59  ;;  %v2555_v58 = vld [vmem:[%s3642_s0 + $0x16c] ss:$36 sps:$4 sm:$0xff]   ;;  %v2557_v59 = vld [vmem:[%s3642_s0 + $0x174] ss:$36 sps:$4 sm:$0xff]  }
  0x3b   :  { %1353 = vmatpush2.bf16.msra.mxu0 %v2457_v60  ;;  %v2549_v60 = vld [vmem:[%s3641_s1 + $0x2e0] ss:$8 sps:$4 sm:$0xff]  }
  0x3c   :  { %1466 = vmatpush2.bf16.msra.mxu1 %v2458_v61  ;;  %1354 = vmatprep.subr.bf16.mxu0 %v2459_v62  ;;  %v2552_v61 = vld [vmem:[%s3641_s1 + $0x3e0] ss:$8 sps:$4 sm:$0xff]   ;;  %v2563_v62 = vld [vmem:[%s3641_s1 + $0x2d4] ss:$8 sps:$4 sm:$0xff]  }
  0x3d   :  { %1467 = vmatprep.subr.bf16.mxu1 %v2461_v63  ;;  %v2566_v63 = vld [vmem:[%s3641_s1 + $0x3d4] ss:$8 sps:$4 sm:$0xff]  }
  0x3f   :  { %1355 = vmatpush2.bf16.msra.mxu0 %v2463_v0  ;;  %v2559_v0 = vld [vmem:[%s3642_s0 + $0x168] ss:$36 sps:$4 sm:$0xff]  }
  0x40   :  { %1468 = vmatpush2.bf16.msra.mxu1 %v2464_v1  ;;  %1550 = vmatprep.subr.bf16.mxu0 %v2473_v2  ;;  %v2560_v1 = vld [vmem:[%s3642_s0 + $0x170] ss:$36 sps:$4 sm:$0xff]  }
  0x41   :  { %1663 = vmatprep.subr.bf16.mxu1 %v2476_v3  ;;  %v2561_v2 = vld [vmem:[%s3641_s1 + $0x2d0] ss:$8 sps:$4 sm:$0xff]  }
  0x42   :  { %1357 = vmatmul.mubr.bf16.vlgmr.msra.gmra.mxu0 %v2465_v4  ;;  %v2564_v3 = vld [vmem:[%s3641_s1 + $0x3d0] ss:$8 sps:$4 sm:$0xff]   ;;  %v2569_v4 = vld [vmem:[%s3641_s1 + $0x2c4] ss:$8 sps:$4 sm:$0xff]  }
  0x43   :  { %1470 = vmatmul.mubr.bf16.vlgmr.msra.gmra.mxu1 %v2468_v5  ;;  %1551 = vmatpush1.bf16.msra.mxu0 %v2471_v6  ;;  %v2572_v5 = vld [vmem:[%s3641_s1 + $0x3c4] ss:$8 sps:$4 sm:$0xff]   ;;  %v2573_v6 = vld [vmem:[%s3642_s0 + $0x1b4] ss:$36 sps:$4 sm:$0xff]  }
  0x44   :  { %1664 = vmatpush1.bf16.msra.mxu1 %v2474_v7  ;;  %1552 = vmatprep.subr.bf16.mxu0 %v2479_v8  ;;  %v2575_v7 = vld [vmem:[%s3642_s0 + $0x1bc] ss:$36 sps:$4 sm:$0xff]  }
  0x45   :  { %1665 = vmatprep.subr.bf16.mxu1 %v2482_v9  ;;  %1366 = vmatprep.mubr.bf16.mxu0 %v2483_v10  ;;  %v2567_v8 = vld [vmem:[%s3641_s1 + $0x2c0] ss:$8 sps:$4 sm:$0xff]   ;;  %v2581_v10 = vld [vmem:[%s3641_s1 + $0x2b4] ss:$8 sps:$4 sm:$0xff]  }
  0x46   :  { %1479 = vmatprep.mubr.bf16.mxu1 %v2485_v11  ;;  %v2570_v9 = vld [vmem:[%s3641_s1 + $0x3c0] ss:$8 sps:$4 sm:$0xff]   ;;  %v2584_v11 = vld [vmem:[%s3641_s1 + $0x3b4] ss:$8 sps:$4 sm:$0xff]  }
  0x47   :  { %1553 = vmatpush1.bf16.msra.mxu0 %v2477_v12  ;;  %v2577_v12 = vld [vmem:[%s3642_s0 + $0x1b0] ss:$36 sps:$4 sm:$0xff]  }
  0x48   :  { %1666 = vmatpush1.bf16.msra.mxu1 %v2480_v13  ;;  %1554 = vmatprep.subr.bf16.mxu0 %v2491_v14  ;;  %v2578_v13 = vld [vmem:[%s3642_s0 + $0x1b8] ss:$36 sps:$4 sm:$0xff]  }
  0x49   :  { %1667 = vmatprep.subr.bf16.mxu1 %v2494_v15  ;;  %v2579_v14 = vld [vmem:[%s3641_s1 + $0x2b0] ss:$8 sps:$4 sm:$0xff]  }
  0x4a   :  { %1367 = vmatmul.mubr.bf16.gmra.mxu0 %v2487_v16  ;;  %v2582_v15 = vld [vmem:[%s3641_s1 + $0x3b0] ss:$8 sps:$4 sm:$0xff]   ;;  %v2587_v16 = vld [vmem:[%s3641_s1 + $0x2a4] ss:$8 sps:$4 sm:$0xff]  }
  0x4b   :  { %1480 = vmatmul.mubr.bf16.gmra.mxu1 %v2488_v17  ;;  %1555 = vmatpush1.bf16.msra.mxu0 %v2489_v18  ;;  %v2590_v17 = vld [vmem:[%s3641_s1 + $0x3a4] ss:$8 sps:$4 sm:$0xff]   ;;  %v2591_v18 = vld [vmem:[%s3642_s0 + $0x1fc] ss:$36 sps:$4 sm:$0xff]  }
  0x4c   :  { %1668 = vmatpush1.bf16.msra.mxu1 %v2492_v19  ;;  %1556 = vmatprep.subr.bf16.mxu0 %v2497_v20  ;;  %v2593_v19 = vld [vmem:[%s3642_s0 + $0x204] ss:$36 sps:$4 sm:$0xff]  }
  0x4d   :  { %1669 = vmatprep.subr.bf16.mxu1 %v2500_v21  ;;  %1376 = vmatprep.mubr.bf16.mxu0 %v2501_v22  ;;  %v2585_v20 = vld [vmem:[%s3641_s1 + $0x2a0] ss:$8 sps:$4 sm:$0xff]   ;;  %v2599_v22 = vld [vmem:[%s3641_s1 + $0x294] ss:$8 sps:$4 sm:$0xff]  }
  0x4e   :  { %1489 = vmatprep.mubr.bf16.mxu1 %v2503_v23  ;;  %v2588_v21 = vld [vmem:[%s3641_s1 + $0x3a0] ss:$8 sps:$4 sm:$0xff]   ;;  %v2602_v23 = vld [vmem:[%s3641_s1 + $0x394] ss:$8 sps:$4 sm:$0xff]  }
  0x4f   :  { %1557 = vmatpush1.bf16.msra.mxu0 %v2495_v24  ;;  %v2595_v24 = vld [vmem:[%s3642_s0 + $0x1f8] ss:$36 sps:$4 sm:$0xff]  }
  0x50   :  { %1670 = vmatpush1.bf16.msra.mxu1 %v2498_v25  ;;  %1558 = vmatprep.subr.bf16.mxu0 %v2509_v26  ;;  %v2596_v25 = vld [vmem:[%s3642_s0 + $0x200] ss:$36 sps:$4 sm:$0xff]   ;;  %v2597_v26 = vld [vmem:[%s3641_s1 + $0x290] ss:$8 sps:$4 sm:$0xff]  }
  0x51   :  { %1671 = vmatprep.subr.bf16.mxu1 %v2512_v27  ;;  %v2600_v27 = vld [vmem:[%s3641_s1 + $0x390] ss:$8 sps:$4 sm:$0xff]  }
  0x52   :  { %1377 = vmatmul.mubr.bf16.gmra.mxu0 %v2505_v28  ;;  %v2605_v28 = vld [vmem:[%s3641_s1 + $0x284] ss:$8 sps:$4 sm:$0xff]  }
  0x53   :  { %1490 = vmatmul.mubr.bf16.gmra.mxu1 %v2506_v29  ;;  %1559 = vmatpush1.bf16.msra.mxu0 %v2507_v30  ;;  %v2608_v29 = vld [vmem:[%s3641_s1 + $0x384] ss:$8 sps:$4 sm:$0xff]   ;;  %v2611_v30 = vld [vmem:[%s3642_s0 + $0x14] ss:$36 sps:$4 sm:$0xff]  }
  0x54   :  { %1672 = vmatpush1.bf16.msra.mxu1 %v2510_v31  ;;  %1560 = vmatprep.subr.bf16.mxu0 %v2515_v32  ;;  %v2614_v31 = vld [vmem:[%s3642_s0 + $0x1c] ss:$36 sps:$4 sm:$0xff]  }
  0x55   :  { %1673 = vmatprep.subr.bf16.mxu1 %v2518_v33  ;;  %1386 = vmatprep.mubr.bf16.mxu0 %v2519_v34  ;;  %v2603_v32 = vld [vmem:[%s3641_s1 + $0x280] ss:$8 sps:$4 sm:$0xff]   ;;  %v2617_v34 = vld [vmem:[%s3641_s1 + $0x474] ss:$8 sps:$4 sm:$0xff]  }
  0x56   :  { %1499 = vmatprep.mubr.bf16.mxu1 %v2521_v35  ;;  %v2606_v33 = vld [vmem:[%s3641_s1 + $0x380] ss:$8 sps:$4 sm:$0xff]   ;;  %v2609_v35 = vld [vmem:[%s3642_s0 + $0x10] ss:$36 sps:$4 sm:$0xff]  }
  0x57   :  { %1561 = vmatpush1.bf16.msra.mxu0 %v2513_v36  ;;  %v2612_v36 = vld [vmem:[%s3642_s0 + $0x18] ss:$36 sps:$4 sm:$0xff]  }
  0x58   :  { %1674 = vmatpush1.bf16.msra.mxu1 %v2516_v37  ;;  %1562 = vmatprep.subr.bf16.mxu0 %v2527_v38  ;;  %v2615_v37 = vld [vmem:[%s3641_s1 + $0x470] ss:$8 sps:$4 sm:$0xff]   ;;  %v2618_v38 = vld [vmem:[%s3642_s0 + $0x5c] ss:$36 sps:$4 sm:$0xff]  }
  0x59   :  { %1675 = vmatprep.subr.bf16.mxu1 %v2530_v39  ;;  %v2620_v39 = vld [vmem:[%s3642_s0 + $0x64] ss:$36 sps:$4 sm:$0xff]  }
  0x5a   :  { %1387 = vmatmul.mubr.bf16.gmra.mxu0 %v2523_v40  ;;  %v2626_v40 = vld [vmem:[%s3641_s1 + $0x464] ss:$8 sps:$4 sm:$0xff]  }
  0x5b   :  { %1500 = vmatmul.mubr.bf16.gmra.mxu1 %v2524_v41  ;;  %1563 = vmatpush1.bf16.msra.mxu0 %v2525_v42  ;;  %v2624_v41 = vld [vmem:[%s3641_s1 + $0x460] ss:$8 sps:$4 sm:$0xff]   ;;  %v2635_v42 = vld [vmem:[%s3641_s1 + $0x454] ss:$8 sps:$4 sm:$0xff]  }
  0x5c   :  { %1676 = vmatpush1.bf16.msra.mxu1 %v2528_v43  ;;  %1564 = vmatprep.subr.bf16.mxu0 %v2533_v44  ;;  %v2622_v43 = vld [vmem:[%s3642_s0 + $0x58] ss:$36 sps:$4 sm:$0xff]   ;;  %v2623_v44 = vld [vmem:[%s3642_s0 + $0x60] ss:$36 sps:$4 sm:$0xff]  }
  0x5d   :  { %1677 = vmatprep.subr.bf16.mxu1 %v2536_v45  ;;  %1396 = vmatprep.mubr.bf16.mxu0 %v2537_v46  ;;  %v2627_v45 = vld [vmem:[%s3642_s0 + $0xa4] ss:$36 sps:$4 sm:$0xff]   ;;  %v2629_v46 = vld [vmem:[%s3642_s0 + $0xac] ss:$36 sps:$4 sm:$0xff]  }
  0x5e   :  { %1509 = vmatprep.mubr.bf16.mxu1 %v2539_v47  ;;  %v2633_v47 = vld [vmem:[%s3641_s1 + $0x450] ss:$8 sps:$4 sm:$0xff]  }
  0x5f   :  { %1565 = vmatpush1.bf16.msra.mxu0 %v2531_v48  ;;  %v2644_v48 = vld [vmem:[%s3641_s1 + $0x444] ss:$8 sps:$4 sm:$0xff]  }
  0x60   :  { %1678 = vmatpush1.bf16.msra.mxu1 %v2534_v49  ;;  %1566 = vmatprep.subr.bf16.mxu0 %v2545_v50  ;;  %v2631_v49 = vld [vmem:[%s3642_s0 + $0xa0] ss:$36 sps:$4 sm:$0xff]   ;;  %v2632_v50 = vld [vmem:[%s3642_s0 + $0xa8] ss:$36 sps:$4 sm:$0xff]  }
  0x61   :  { %1679 = vmatprep.subr.bf16.mxu1 %v2548_v51  ;;  %v2642_v51 = vld [vmem:[%s3641_s1 + $0x440] ss:$8 sps:$4 sm:$0xff]  }
  0x62   :  { %1397 = vmatmul.mubr.bf16.gmra.mxu0 %v2541_v52  ;;  %v2653_v52 = vld [vmem:[%s3641_s1 + $0x434] ss:$8 sps:$4 sm:$0xff]  }
  0x63   :  { %1510 = vmatmul.mubr.bf16.gmra.mxu1 %v2542_v53  ;;  %1567 = vmatpush2.bf16.msra.mxu0 %v2543_v54  ;;  %v2636_v53 = vld [vmem:[%s3642_s0 + $0xec] ss:$36 sps:$4 sm:$0xff]   ;;  %v2638_v54 = vld [vmem:[%s3642_s0 + $0xf4] ss:$36 sps:$4 sm:$0xff]  }
  0x64   :  { %1680 = vmatpush2.bf16.msra.mxu1 %v2546_v55  ;;  %1568 = vmatprep.subr.bf16.mxu0 %v2551_v56  ;;  %v2651_v55 = vld [vmem:[%s3641_s1 + $0x430] ss:$8 sps:$4 sm:$0xff]   ;;  %v2662_v56 = vld [vmem:[%s3641_s1 + $0x424] ss:$8 sps:$4 sm:$0xff]  }
  0x65   :  { %1681 = vmatprep.subr.bf16.mxu1 %v2554_v57  ;;  %1406 = vmatprep.mubr.bf16.mxu0 %v2555_v58  ;;  %v2660_v57 = vld [vmem:[%s3641_s1 + $0x420] ss:$8 sps:$4 sm:$0xff]   ;;  %v2671_v58 = vld [vmem:[%s3641_s1 + $0x414] ss:$8 sps:$4 sm:$0xff]  }
  0x66   :  { %1519 = vmatprep.mubr.bf16.mxu1 %v2557_v59  ;;  %v2640_v59 = vld [vmem:[%s3642_s0 + $0xe8] ss:$36 sps:$4 sm:$0xff]  }
  0x67   :  { %1569 = vmatpush2.bf16.msra.mxu0 %v2549_v60  ;;  %v2641_v60 = vld [vmem:[%s3642_s0 + $0xf0] ss:$36 sps:$4 sm:$0xff]  }
  0x68   :  { %1682 = vmatpush2.bf16.msra.mxu1 %v2552_v61  ;;  %1570 = vmatprep.subr.bf16.mxu0 %v2563_v62  ;;  %v2645_v61 = vld [vmem:[%s3642_s0 + $0x134] ss:$36 sps:$4 sm:$0xff]   ;;  %v2647_v62 = vld [vmem:[%s3642_s0 + $0x13c] ss:$36 sps:$4 sm:$0xff]  }
  0x69   :  { %1683 = vmatprep.subr.bf16.mxu1 %v2566_v63  ;;  %v2669_v63 = vld [vmem:[%s3641_s1 + $0x410] ss:$8 sps:$4 sm:$0xff]  }
  0x6a   :  { %1407 = vmatmul.mubr.bf16.gmra.mxu0 %v2559_v0  ;;  %v2680_v0 = vld [vmem:[%s3641_s1 + $0x404] ss:$8 sps:$4 sm:$0xff]  }
  0x6b   :  { %1520 = vmatmul.mubr.bf16.gmra.mxu1 %v2560_v1  ;;  %1571 = vmatpush2.bf16.msra.mxu0 %v2561_v2  ;;  %v2678_v1 = vld [vmem:[%s3641_s1 + $0x400] ss:$8 sps:$4 sm:$0xff]   ;;  %v2649_v2 = vld [vmem:[%s3642_s0 + $0x130] ss:$36 sps:$4 sm:$0xff]  }
  0x6c   :  { %1684 = vmatpush2.bf16.msra.mxu1 %v2564_v3  ;;  %1572 = vmatprep.subr.bf16.mxu0 %v2569_v4  ;;  %v2650_v3 = vld [vmem:[%s3642_s0 + $0x138] ss:$36 sps:$4 sm:$0xff]  }
  0x6d   :  { %1685 = vmatprep.subr.bf16.mxu1 %v2572_v5  ;;  %1416 = vmatprep.mubr.bf16.mxu0 %v2573_v6  ;;  %v2654_v4 = vld [vmem:[%s3642_s0 + $0x17c] ss:$36 sps:$4 sm:$0xff]   ;;  %v2656_v5 = vld [vmem:[%s3642_s0 + $0x184] ss:$36 sps:$4 sm:$0xff]  }
  0x6e   :  { %1529 = vmatprep.mubr.bf16.mxu1 %v2575_v7  ;;  %v2658_v6 = vld [vmem:[%s3642_s0 + $0x178] ss:$36 sps:$4 sm:$0xff]   ;;  %v2659_v7 = vld [vmem:[%s3642_s0 + $0x180] ss:$36 sps:$4 sm:$0xff]  }
  0x6f   :  { %1573 = vmatpush2.bf16.msra.mxu0 %v2567_v8  ;;  %v2663_v8 = vld [vmem:[%s3642_s0 + $0x1c4] ss:$36 sps:$4 sm:$0xff]  }
  0x70   :  { %1686 = vmatpush2.bf16.msra.mxu1 %v2570_v9  ;;  %1574 = vmatprep.subr.bf16.mxu0 %v2581_v10  ;;  %v2665_v9 = vld [vmem:[%s3642_s0 + $0x1cc] ss:$36 sps:$4 sm:$0xff]   ;;  %v2667_v10 = vld [vmem:[%s3642_s0 + $0x1c0] ss:$36 sps:$4 sm:$0xff]  }
  0x71   :  { %1687 = vmatprep.subr.bf16.mxu1 %v2584_v11  ;;  %v2668_v11 = vld [vmem:[%s3642_s0 + $0x1c8] ss:$36 sps:$4 sm:$0xff]  }
  0x72   :  { %1417 = vmatmul.mubr.bf16.gmra.mxu0 %v2577_v12  ;;  %v2672_v12 = vld [vmem:[%s3642_s0 + $0x20c] ss:$36 sps:$4 sm:$0xff]  }
  0x73   :  { %1530 = vmatmul.mubr.bf16.gmra.mxu1 %v2578_v13  ;;  %1575 = vmatpush2.bf16.msra.mxu0 %v2579_v14  ;;  %v2674_v13 = vld [vmem:[%s3642_s0 + $0x214] ss:$36 sps:$4 sm:$0xff]   ;;  %v2676_v14 = vld [vmem:[%s3642_s0 + $0x208] ss:$36 sps:$4 sm:$0xff]  }
  0x74   :  { %1688 = vmatpush2.bf16.msra.mxu1 %v2582_v15  ;;  %1576 = vmatprep.subr.bf16.mxu0 %v2587_v16  ;;  %v2677_v15 = vld [vmem:[%s3642_s0 + $0x210] ss:$36 sps:$4 sm:$0xff]   ;;  %v2689_v16 = vmov 0  }
  0x75   :  { %1689 = vmatprep.subr.bf16.mxu1 %v2590_v17  ;;  %1426 = vmatprep.mubr.bf16.mxu0 %v2591_v18  ;;  %v2681_v17 = vld [vmem:[%s3642_s0 + $0x20] ss:$36 sps:$4 sm:$0xff]  }
  0x76   :  { %1539 = vmatprep.mubr.bf16.mxu1 %v2593_v19  ;;  %v2682_v18 = vld [vmem:[%s3642_s0 + $0x140] ss:$36 sps:$4 sm:$0xff]   ;;  %v2683_v19 = vld [vmem:[%s3642_s0 + $0x68] ss:$36 sps:$4 sm:$0xff]  }
  0x77   :  { %1577 = vmatpush2.bf16.msra.mxu0 %v2585_v20  ;;  %v2684_v20 = vld [vmem:[%s3642_s0 + $0x188] ss:$36 sps:$4 sm:$0xff]  }
  0x78   :  { %1690 = vmatpush2.bf16.msra.mxu1 %v2588_v21  ;;  %1578 = vmatprep.subr.bf16.mxu0 %v2599_v22  ;;  %v2685_v21 = vld [vmem:[%s3642_s0 + $0xb0] ss:$36 sps:$4 sm:$0xff]  }
  0x79   :  { %1691 = vmatprep.subr.bf16.mxu1 %v2602_v23  ;;  %v2686_v22 = vld [vmem:[%s3642_s0 + $0x1d0] ss:$36 sps:$4 sm:$0xff]   ;;  %v2687_v23 = vld [vmem:[%s3642_s0 + $0xf8] ss:$36 sps:$4 sm:$0xff]  }
  0x7a   :  { %1427 = vmatmul.mubr.bf16.gmra.mxu0 %v2595_v24  ;;  %v2688_v24 = vld [vmem:[%s3642_s0 + $0x218] ss:$36 sps:$4 sm:$0xff]  }
  0x7b   :  { %1540 = vmatmul.mubr.bf16.gmra.mxu1 %v2596_v25  ;;  %1579 = vmatpush2.bf16.msra.mxu0 %v2597_v26 }
  0x7c   :  { %1692 = vmatpush2.bf16.msra.mxu1 %v2600_v27  ;;  %1580 = vmatprep.subr.bf16.mxu0 %v2605_v28 }
  0x7d   :  { %1693 = vmatprep.subr.bf16.mxu1 %v2608_v29  ;;  %1582 = vmatprep.mubr.bf16.mxu0 %v2611_v30 }
  0x7e   :  { %1695 = vmatprep.mubr.bf16.mxu1 %v2614_v31 }
  0x7f   :  { %1581 = vmatpush2.bf16.msra.mxu0 %v2603_v32 }
  0x80   :  { %1694 = vmatpush2.bf16.msra.mxu1 %v2606_v33  ;;  %1776 = vmatprep.subr.bf16.mxu0 %v2617_v34 }
  0x81   :  { %2352 = vmatprep.subr.bf16.mxu1 %v2617_v34 }
  0x82   :  { %1583 = vmatmul.mubr.bf16.vlgmr.msra.gmra.mxu0 %v2609_v35 }
  0x83   :  { %1696 = vmatmul.mubr.bf16.vlgmr.msra.gmra.mxu1 %v2612_v36  ;;  %1777 = vmatpush1.bf16.msra.mxu0 %v2615_v37 }
  0x84   :  { %2360 = vmatpush1.bf16.msra.mxu1 %v2615_v37  ;;  %1592 = vmatprep.mubr.bf16.mxu0 %v2618_v38 }
  0x85   :  { %1705 = vmatprep.mubr.bf16.mxu1 %v2620_v39  ;;  %1778 = vmatprep.subr.bf16.mxu0 %v2626_v40 }
  0x86   :  { %2353 = vmatprep.subr.bf16.mxu1 %v2626_v40 }
  0x87   :  { %1779 = vmatpush1.bf16.msra.mxu0 %v2624_v41 }
  0x88   :  { %2361 = vmatpush1.bf16.msra.mxu1 %v2624_v41  ;;  %1780 = vmatprep.subr.bf16.mxu0 %v2635_v42 }
  0x89   :  { %2354 = vmatprep.subr.bf16.mxu1 %v2635_v42 }
  0x8a   :  { %1593 = vmatmul.mubr.bf16.gmra.mxu0 %v2622_v43 }
  0x8b   :  { %1706 = vmatmul.mubr.bf16.gmra.mxu1 %v2623_v44  ;;  %1602 = vmatprep.mubr.bf16.mxu0 %v2627_v45 }
  0x8c   :  { %1715 = vmatprep.mubr.bf16.mxu1 %v2629_v46  ;;  %1781 = vmatpush1.bf16.msra.mxu0 %v2633_v47 }
  0x8d   :  { %2362 = vmatpush1.bf16.msra.mxu1 %v2633_v47  ;;  %1782 = vmatprep.subr.bf16.mxu0 %v2644_v48 }
  0x8e   :  { %2355 = vmatprep.subr.bf16.mxu1 %v2644_v48 }
  0x90   :  { %1783 = vmatpush1.bf16.msra.mxu0 %v2642_v51 }
  0x91   :  { %2363 = vmatpush1.bf16.msra.mxu1 %v2642_v51  ;;  %1784 = vmatprep.subr.bf16.mxu0 %v2653_v52 }
  0x92   :  { %2356 = vmatprep.subr.bf16.mxu1 %v2653_v52  ;;  %1603 = vmatmul.mubr.bf16.gmra.mxu0 %v2631_v49 }
  0x93   :  { %1716 = vmatmul.mubr.bf16.gmra.mxu1 %v2632_v50  ;;  %1612 = vmatprep.mubr.bf16.mxu0 %v2636_v53 }
  0x94   :  { %1725 = vmatprep.mubr.bf16.mxu1 %v2638_v54  ;;  %1785 = vmatpush1.bf16.msra.mxu0 %v2651_v55 }
  0x95   :  { %2364 = vmatpush1.bf16.msra.mxu1 %v2651_v55  ;;  %1786 = vmatprep.subr.bf16.mxu0 %v2662_v56 }
  0x96   :  { %2357 = vmatprep.subr.bf16.mxu1 %v2662_v56 }
  0x98   :  { %1787 = vmatpush1.bf16.msra.mxu0 %v2660_v57 }
  0x99   :  { %2365 = vmatpush1.bf16.msra.mxu1 %v2660_v57  ;;  %1788 = vmatprep.subr.bf16.mxu0 %v2671_v58 }
  0x9a   :  { %2358 = vmatprep.subr.bf16.mxu1 %v2671_v58  ;;  %1613 = vmatmul.mubr.bf16.gmra.mxu0 %v2640_v59 }
  0x9b   :  { %1726 = vmatmul.mubr.bf16.gmra.mxu1 %v2641_v60  ;;  %1622 = vmatprep.mubr.bf16.mxu0 %v2645_v61 }
  0x9c   :  { %1735 = vmatprep.mubr.bf16.mxu1 %v2647_v62  ;;  %1789 = vmatpush1.bf16.msra.mxu0 %v2669_v63 }
  0x9d   :  { %2366 = vmatpush1.bf16.msra.mxu1 %v2669_v63  ;;  %1790 = vmatprep.subr.bf16.mxu0 %v2680_v0 }
  0x9e   :  { %2359 = vmatprep.subr.bf16.mxu1 %v2680_v0 }
  0xa0   :  { %1791 = vmatpush1.bf16.msra.mxu0 %v2678_v1 }
  0xa1   :  { %2367 = vmatpush1.bf16.msra.mxu1 %v2678_v1 }
  0xa2   :  { %1623 = vmatmul.mubr.bf16.gmra.mxu0 %v2649_v2 }
  0xa3   :  { %1736 = vmatmul.mubr.bf16.gmra.mxu1 %v2650_v3  ;;  %1632 = vmatprep.mubr.bf16.mxu0 %v2654_v4 }
  0xa4   :  { %1745 = vmatprep.mubr.bf16.mxu1 %v2656_v5 }
  0xaa   :  { %1633 = vmatmul.mubr.bf16.gmra.mxu0 %v2658_v6 }
  0xab   :  { %1746 = vmatmul.mubr.bf16.gmra.mxu1 %v2659_v7  ;;  %1642 = vmatprep.mubr.bf16.mxu0 %v2663_v8 }
  0xac   :  { %1755 = vmatprep.mubr.bf16.mxu1 %v2665_v9 }
  0xb2   :  { %1643 = vmatmul.mubr.bf16.gmra.mxu0 %v2667_v10 }
  0xb3   :  { %1756 = vmatmul.mubr.bf16.gmra.mxu1 %v2668_v11  ;;  %1652 = vmatprep.mubr.bf16.mxu0 %v2672_v12 }
  0xb4   :  { %1765 = vmatprep.mubr.bf16.mxu1 %v2674_v13 }
  0xba   :  { %1653 = vmatmul.mubr.bf16.gmra.mxu0 %v2676_v14 }
  0xbb   :  { %1766 = vmatmul.mubr.bf16.gmra.mxu1 %v2677_v15  ;;  %1808 = vmatprep.mubr.bf16.mxu0 %v2689_v16 }
  0xbc   :  { %1848 = vmatprep.mubr.bf16.mxu1 %v2689_v16 }
  0xc2   :  { %1809 = vmatmul.mubr.bf16.vlgmr.msra.gmra.mxu0 %v2681_v17 }
  0xc3   :  { %1849 = vmatmul.mubr.bf16.vlgmr.msra.gmra.mxu1 %v2682_v18  ;;  %1818 = vmatprep.mubr.bf16.mxu0 %v2689_v16 }
  0xc4   :  { %1858 = vmatprep.mubr.bf16.mxu1 %v2689_v16 }
  0xca   :  { %1819 = vmatmul.mubr.bf16.gmra.mxu0 %v2683_v19 }
  0xcb   :  { %1859 = vmatmul.mubr.bf16.gmra.mxu1 %v2684_v20  ;;  %1828 = vmatprep.mubr.bf16.mxu0 %v2689_v16 }
  0xcc   :  { %1868 = vmatprep.mubr.bf16.mxu1 %v2689_v16 }
  0xd2   :  { %1829 = vmatmul.mubr.bf16.gmra.mxu0 %v2685_v21 }
  0xd3   :  { %1869 = vmatmul.mubr.bf16.gmra.mxu1 %v2686_v22  ;;  %1838 = vmatprep.mubr.bf16.mxu0 %v2689_v16 }
  0xd4   :  { %1878 = vmatprep.mubr.bf16.mxu1 %v2689_v16 }
  0xda   :  { %1839 = vmatmul.mubr.bf16.gmra.mxu0 %v2687_v23 }
  0xdb   :  { %1879 = vmatmul.mubr.bf16.gmra.mxu1 %v2688_v24 }
 0x102   :  { %v1358_v25 = vpop.f32.mrf.mxu0 }
 0x103   :  { %v1471_v26 = vpop.f32.mrf.mxu1 }
 0x104   :  { %v3353_v27 = vadd.f32 %v1471_v26, %v1358_v25  ;;  %v1360_v28 = vpop.f32.mrf.mxu0 }
 0x105   :  { %v1473_v29 = vpop.f32.mrf.mxu1 }
 0x106   :  { %v3355_v30 = vadd.f32 %v1473_v29, %v1360_v28  ;;  %v1362_v31 = vpop.f32.mrf.mxu0 }
 0x107   :  { %v1475_v32 = vpop.f32.mrf.mxu1 }
 0x108   :  { %v3357_v33 = vadd.f32 %v1475_v32, %v1362_v31  ;;  %v1364_v34 = vpop.f32.mrf.mxu0 }
 0x109   :  { %v1477_v35 = vpop.f32.mrf.mxu1 }
 0x10a   :  { %v3359_v36 = vadd.f32 %v1477_v35, %v1364_v34  ;;  %v1368_v37 = vpop.f32.mrf.mxu0 }
 0x10b   :  { %v1481_v38 = vpop.f32.mrf.mxu1 }
 0x10c   :  { %v3361_v39 = vadd.f32 %v1481_v38, %v1368_v37  ;;  %v1370_v40 = vpop.f32.mrf.mxu0 }
 0x10d   :  { %v1483_v41 = vpop.f32.mrf.mxu1 }
 0x10e   :  { %v3363_v42 = vadd.f32 %v1483_v41, %v1370_v40  ;;  %v1372_v43 = vpop.f32.mrf.mxu0 }
 0x10f   :  { %v1485_v44 = vpop.f32.mrf.mxu1 }
 0x110   :  { %v3365_v45 = vadd.f32 %v1485_v44, %v1372_v43  ;;  %v1374_v46 = vpop.f32.mrf.mxu0 }
 0x111   :  { %v1487_v47 = vpop.f32.mrf.mxu1 }
 0x112   :  { %v3367_v48 = vadd.f32 %v1487_v47, %v1374_v46  ;;  %v1378_v49 = vpop.f32.mrf.mxu0 }
 0x113   :  { %v1491_v50 = vpop.f32.mrf.mxu1 }
 0x114   :  { %v3369_v51 = vadd.f32 %v1491_v50, %v1378_v49  ;;  %v1380_v52 = vpop.f32.mrf.mxu0 }
 0x115   :  { %v1493_v53 = vpop.f32.mrf.mxu1 }
 0x116   :  { %v3371_v54 = vadd.f32 %v1493_v53, %v1380_v52  ;;  %v1382_v55 = vpop.f32.mrf.mxu0 }
 0x117   :  { %v1495_v56 = vpop.f32.mrf.mxu1 }
 0x118   :  { %v3373_v57 = vadd.f32 %v1495_v56, %v1382_v55  ;;  %v1384_v58 = vpop.f32.mrf.mxu0 }
 0x119   :  { %v1497_v59 = vpop.f32.mrf.mxu1 }
 0x11a   :  { %v3375_v60 = vadd.f32 %v1497_v59, %v1384_v58  ;;  %v1388_v61 = vpop.f32.mrf.mxu0 }
 0x11b   :  { %v1501_v62 = vpop.f32.mrf.mxu1 }
 0x11c   :  { %v3377_v63 = vadd.f32 %v1501_v62, %v1388_v61  ;;  %v1390_v0 = vpop.f32.mrf.mxu0 }
 0x11d   :  { %v1503_v1 = vpop.f32.mrf.mxu1 }
 0x11e   :  { %v3379_v2 = vadd.f32 %v1503_v1, %v1390_v0  ;;  %v1392_v3 = vpop.f32.mrf.mxu0 }
 0x11f   :  { %v1505_v4 = vpop.f32.mrf.mxu1 }
 0x120   :  { %v3381_v5 = vadd.f32 %v1505_v4, %v1392_v3  ;;  %v1394_v6 = vpop.f32.mrf.mxu0 }
 0x121   :  { %v1507_v7 = vpop.f32.mrf.mxu1 }
 0x122   :  { %v3383_v8 = vadd.f32 %v1507_v7, %v1394_v6  ;;  %v1398_v9 = vpop.f32.mrf.mxu0 }
 0x123   :  { %v1511_v10 = vpop.f32.mrf.mxu1 }
 0x124   :  { %v3385_v11 = vadd.f32 %v1511_v10, %v1398_v9  ;;  %v1400_v12 = vpop.f32.mrf.mxu0 }
 0x125   :  { %v1513_v13 = vpop.f32.mrf.mxu1 }
 0x126   :  { %v3387_v14 = vadd.f32 %v1513_v13, %v1400_v12  ;;  %v1402_v15 = vpop.f32.mrf.mxu0 }
 0x127   :  { %v1515_v16 = vpop.f32.mrf.mxu1 }
 0x128   :  { %v3389_v17 = vadd.f32 %v1515_v16, %v1402_v15  ;;  %v1404_v18 = vpop.f32.mrf.mxu0 }
 0x129   :  { %v1517_v19 = vpop.f32.mrf.mxu1 }
 0x12a   :  { %v3391_v20 = vadd.f32 %v1517_v19, %v1404_v18  ;;  %v1408_v21 = vpop.f32.mrf.mxu0 }
 0x12b   :  { %v1521_v22 = vpop.f32.mrf.mxu1 }
 0x12c   :  { %v3393_v23 = vadd.f32 %v1521_v22, %v1408_v21  ;;  %v1410_v24 = vpop.f32.mrf.mxu0 }
 0x12d   :  { %v1523_v25 = vpop.f32.mrf.mxu1 }
 0x12e   :  { %v3395_v26 = vadd.f32 %v1523_v25, %v1410_v24  ;;  %v1412_v28 = vpop.f32.mrf.mxu0 }
 0x12f   :  { %v1525_v29 = vpop.f32.mrf.mxu1 }
 0x130   :  { %v3397_v31 = vadd.f32 %v1525_v29, %v1412_v28  ;;  %v1414_v32 = vpop.f32.mrf.mxu0 }
 0x131   :  { %v1527_v34 = vpop.f32.mrf.mxu1 }
 0x132   :  { %v3399_v35 = vadd.f32 %v1527_v34, %v1414_v32  ;;  %v1418_v37 = vpop.f32.mrf.mxu0 }
 0x133   :  { %v1531_v38 = vpop.f32.mrf.mxu1 }
 0x134   :  { %v3401_v40 = vadd.f32 %v1531_v38, %v1418_v37  ;;  %v1420_v41 = vpop.f32.mrf.mxu0 }
 0x135   :  { %v1533_v43 = vpop.f32.mrf.mxu1 }
 0x136   :  { %v3403_v44 = vadd.f32 %v1533_v43, %v1420_v41  ;;  %v1422_v46 = vpop.f32.mrf.mxu0 }
 0x137   :  { %v1535_v47 = vpop.f32.mrf.mxu1 }
 0x138   :  { %v3405_v49 = vadd.f32 %v1535_v47, %v1422_v46  ;;  %v1424_v50 = vpop.f32.mrf.mxu0 }
 0x139   :  { %v1537_v52 = vpop.f32.mrf.mxu1 }
 0x13a   :  { %v3407_v53 = vadd.f32 %v1537_v52, %v1424_v50  ;;  %v1428_v55 = vpop.f32.mrf.mxu0 }
 0x13b   :  { %v1541_v56 = vpop.f32.mrf.mxu1 }
 0x13c   :  { %v3409_v58 = vadd.f32 %v1541_v56, %v1428_v55  ;;  %v1430_v59 = vpop.f32.mrf.mxu0 }
 0x13d   :  { %v1543_v61 = vpop.f32.mrf.mxu1 }
 0x13e   :  { %v3411_v62 = vadd.f32 %v1543_v61, %v1430_v59  ;;  %v1432_v0 = vpop.f32.mrf.mxu0 }
 0x13f   :  { %v1545_v1 = vpop.f32.mrf.mxu1 }
 0x140   :  { %v3413_v3 = vadd.f32 %v1545_v1, %v1432_v0  ;;  %v1434_v4 = vpop.f32.mrf.mxu0 }
 0x141   :  { %v1547_v6 = vpop.f32.mrf.mxu1 }
 0x142   :  { %v3415_v7 = vadd.f32 %v1547_v6, %v1434_v4  ;;  %v1584_v9 = vpop.f32.mrf.mxu0 }
 0x143   :  { %v1697_v10 = vpop.f32.mrf.mxu1  ;;  %v1585_v12 = vadd.f32 %v1584_v9, %v3353_v27 }
 0x144   :  { %3644 = vst [vmem:[#allocation2_spill] sm:$0xff] %v3415_v7  ;;  %v3418_v13 = vpop.f32.mrf.mxu0 }
 0x145   :  { %v3420_v15 = vpop.f32.mrf.mxu1  ;;  %v3422_v16 = vadd.f32 %v1697_v10, %v1585_v12 }
 0x146   :  { %v1588_v18 = vpop.f32.mrf.mxu0 }
 0x147   :  { %3645 = vst [vmem:[#allocation3_spill] sm:$0xff] %v3422_v16  ;;  %v1701_v19 = vpop.f32.mrf.mxu1  ;;  %v1589_v21 = vadd.f32 %v1588_v18, %v3357_v33 }
 0x148   :  { %v3425_v22 = vpop.f32.mrf.mxu0 }
 0x149   :  { %v3427_v24 = vpop.f32.mrf.mxu1  ;;  %v3429_v25 = vadd.f32 %v1701_v19, %v1589_v21 }
 0x14a   :  { %v1594_v28 = vpop.f32.mrf.mxu0 }
 0x14b   :  { %3646 = vst [vmem:[#allocation4_spill] sm:$0xff] %v3429_v25  ;;  %v1707_v29 = vpop.f32.mrf.mxu1  ;;  %v1595_v27 = vadd.f32 %v1594_v28, %v3361_v39 }
 0x14c   :  { %v3432_v32 = vpop.f32.mrf.mxu0 }
 0x14d   :  { %v3434_v34 = vpop.f32.mrf.mxu1  ;;  %v3436_v37 = vadd.f32 %v1707_v29, %v1595_v27 }
 0x14e   :  { %v1598_v38 = vpop.f32.mrf.mxu0 }
 0x14f   :  { %3647 = vst [vmem:[#allocation5_spill] sm:$0xff] %v3436_v37  ;;  %v1711_v41 = vpop.f32.mrf.mxu1  ;;  %v1599_v33 = vadd.f32 %v1598_v38, %v3365_v45 }
 0x150   :  { %v1600_v43 = vpop.f32.mrf.mxu0 }
 0x151   :  { %v3439_v46 = vpop.f32.mrf.mxu1  ;;  %v3441_v47 = vadd.f32 %v1711_v41, %v1599_v33 }
 0x152   :  { %v1604_v50 = vpop.f32.mrf.mxu0 }
 0x153   :  { %3648 = vst [vmem:[#allocation6_spill] sm:$0xff] %v3441_v47  ;;  %v1717_v52 = vpop.f32.mrf.mxu1  ;;  %v1605_v55 = vadd.f32 %v1604_v50, %v3369_v51  ;;  %v1601_v47 = vadd.f32 %v1600_v43, %v3367_v48 }
 0x154   :  { %v1606_v39 = vpop.f32.mrf.mxu0 }
 0x155   :  { %v3444_v56 = vpop.f32.mrf.mxu1  ;;  %v3446_v59 = vadd.f32 %v1717_v52, %v1605_v55  ;;  %v1607_v37 = vadd.f32 %v1606_v39, %v3371_v54 }
 0x156   :  { %v1608_v61 = vpop.f32.mrf.mxu0 }
 0x157   :  { %3649 = vst [vmem:[#allocation7_spill] sm:$0xff] %v3446_v59  ;;  %v1721_v0 = vpop.f32.mrf.mxu1  ;;  %v1609_v1 = vadd.f32 %v1608_v61, %v3373_v57 }
 0x158   :  { %v1610_v4 = vpop.f32.mrf.mxu0 }
 0x159   :  { %v1723_v45 = vpop.f32.mrf.mxu1  ;;  %v3449_v6 = vadd.f32 %v1721_v0, %v1609_v1  ;;  %v1611_v9 = vadd.f32 %v1610_v4, %v3375_v60 }
 0x15a   :  { %v1614_v10 = vpop.f32.mrf.mxu0 }
 0x15b   :  { %3650 = vst [vmem:[#allocation8_spill] sm:$0xff] %v3449_v6  ;;  %v1727_v12 = vpop.f32.mrf.mxu1  ;;  %v3452_v18 = vadd.f32 %v1723_v45, %v1611_v9  ;;  %v1615_v51 = vadd.f32 %v1614_v10, %v3377_v63 }
 0x15c   :  { %v1616_v19 = vpop.f32.mrf.mxu0 }
 0x15d   :  { %3651 = vst [vmem:[#allocation9_spill] sm:$0xff] %v3452_v18  ;;  %v1729_v21 = vpop.f32.mrf.mxu1  ;;  %v3455_v28 = vadd.f32 %v1727_v12, %v1615_v51  ;;  %v1617_v29 = vadd.f32 %v1616_v19, %v3379_v2  ;;  %v1597_v18 = vadd.f32 %v3432_v32, %v3363_v42 }
 0x15e   :  { %v1618_v27 = vpop.f32.mrf.mxu0 }
 0x15f   :  { %3652 = vst [vmem:[#allocation10_spill] sm:$0xff] %v3455_v28  ;;  %v1731_v57 = vpop.f32.mrf.mxu1  ;;  %v3458_v38 = vadd.f32 %v1729_v21, %v1617_v29  ;;  %v1619_v41 = vadd.f32 %v1618_v27, %v3381_v5  ;;  %v1591_v28 = vadd.f32 %v3425_v22, %v3359_v36  ;;  %v3480_v36 = vadd.f32 %v3434_v34, %v1597_v18 }
 0x160   :  { %v1620_v33 = vpop.f32.mrf.mxu0  ;;  %v3492_v34 = vadd.f32 %v3444_v56, %v1607_v37 }
 0x161   :  { %3653 = vst [vmem:[#allocation11_spill] sm:$0xff] %v3458_v38  ;;  %v1733_v60 = vpop.f32.mrf.mxu1  ;;  %v3461_v50 = vadd.f32 %v1731_v57, %v1619_v41  ;;  %v1621_v52 = vadd.f32 %v1620_v33, %v3383_v8 }
 0x162   :  { %v1624_v55 = vpop.f32.mrf.mxu0 }
 0x163   :  { %3654 = vst [vmem:[#allocation12_spill] sm:$0xff] %v3461_v50  ;;  %v1737_v63 = vpop.f32.mrf.mxu1  ;;  %v3464_v61 = vadd.f32 %v1733_v60, %v1621_v52  ;;  %v1625_v25 = vadd.f32 %v1624_v55, %v3385_v11 }
 0x164   :  { %v1626_v0 = vpop.f32.mrf.mxu0 }
 0x165   :  { %3655 = vst [vmem:[#allocation13_spill] sm:$0xff] %v3464_v61  ;;  %v1739_v1 = vpop.f32.mrf.mxu1  ;;  %v1587_v61 = vadd.f32 %v3418_v13, %v3355_v30  ;;  %v3477_v13 = vadd.f32 %v3427_v24, %v1591_v28  ;;  %v1627_v42 = vadd.f32 %v1626_v0, %v3387_v14  ;;  %v3489_v24 = vadd.f32 %v3439_v46, %v1601_v47 }
 0x166   :  { %v1628_v4 = vpop.f32.mrf.mxu0  ;;  %v1738_v39 = vadd.f32 %v1737_v63, %v1625_v25 }
 0x167   :  { %v1741_v2 = vpop.f32.mrf.mxu1  ;;  %v1700_v7 = vadd.f32 %v3420_v15, %v1587_v61  ;;  %v1629_v22 = vadd.f32 %v1628_v4, %v3389_v17  ;;  %v1740_v46 = vadd.f32 %v1739_v1, %v1627_v42 }
 0x168   :  { %v1630_v45 = vpop.f32.mrf.mxu0 }
 0x169   :  { %v1743_v9 = vpop.f32.mrf.mxu1  ;;  %v1631_v48 = vadd.f32 %v1630_v45, %v3391_v20  ;;  %v1742_v47 = vadd.f32 %v1741_v2, %v1629_v22 }
 0x16a   :  { %v1634_v10 = vpop.f32.mrf.mxu0 }
 0x16b   :  { %v1747_v12 = vpop.f32.mrf.mxu1  ;;  %v1635_v54 = vadd.f32 %v1634_v10, %v3393_v23 }
 0x16c   :  { %v1636_v51 = vpop.f32.mrf.mxu0 }
 0x16d   :  { %v1749_v5 = vpop.f32.mrf.mxu1  ;;  %v1637_v11 = vadd.f32 %v1636_v51, %v3395_v26  ;;  %v1748_v56 = vadd.f32 %v1747_v12, %v1635_v54 }
 0x16e   :  { %v1638_v19 = vpop.f32.mrf.mxu0 }
 0x16f   :  { %v1751_v21 = vpop.f32.mrf.mxu1  ;;  %v1639_v15 = vadd.f32 %v1638_v19, %v3397_v31  ;;  %v1750_v28 = vadd.f32 %v1749_v5, %v1637_v11  ;;  %v3657_v19 = vld [vmem:[#allocation2_spill] sm:$0xff] }
 0x170   :  { %v1640_v29 = vpop.f32.mrf.mxu0 }
 0x171   :  { %v1753_v27 = vpop.f32.mrf.mxu1  ;;  %v1641_v14 = vadd.f32 %v1640_v29, %v3399_v35  ;;  %v1744_v35 = vadd.f32 %v1743_v9, %v1631_v48  ;;  %v3503_v55 = vadd.f32 %v1751_v21, %v1639_v15 }
 0x172   :  { %v1644_v57 = vpop.f32.mrf.mxu0 }
 0x173   :  { %v1757_v8 = vpop.f32.mrf.mxu1  ;;  %v1645_v17 = vadd.f32 %v1644_v57, %v3401_v40  ;;  %v3505_v63 = vadd.f32 %v1753_v27, %v1641_v14 }
 0x174   :  { %v1646_v41 = vpop.f32.mrf.mxu0 }
 0x175   :  { %v1759_v33 = vpop.f32.mrf.mxu1  ;;  %v1647_v20 = vadd.f32 %v1646_v41, %v3403_v44  ;;  %v3509_v0 = vadd.f32 %v1757_v8, %v1645_v17 }
 0x176   :  { %v1648_v60 = vpop.f32.mrf.mxu0 }
 0x177   :  { %v1761_v52 = vpop.f32.mrf.mxu1  ;;  %v1649_v23 = vadd.f32 %v1648_v60, %v3405_v49  ;;  %v3511_v1 = vadd.f32 %v1759_v33, %v1647_v20 }
 0x178   :  { %v1650_v50 = vpop.f32.mrf.mxu0 }
 0x179   :  { %v1763_v38 = vpop.f32.mrf.mxu1  ;;  %v1651_v26 = vadd.f32 %v1650_v50, %v3407_v53  ;;  %v3656_v53 = vld [vmem:[#allocation3_spill] sm:$0xff] }
 0x17a   :  { %v1654_v6 = vpop.f32.mrf.mxu0 }
 0x17b   :  { %v1767_v59 = vpop.f32.mrf.mxu1  ;;  %v1655_v37 = vadd.f32 %v1654_v6, %v3409_v58  ;;  %v3513_v58 = vadd.f32 %v1761_v52, %v1649_v23 }
 0x17c   :  { %v1656_v16 = vpop.f32.mrf.mxu0 }
 0x17d   :  { %v1769_v30 = vpop.f32.mrf.mxu1  ;;  %v1657_v25 = vadd.f32 %v1656_v16, %v3411_v62  ;;  %v3515_v62 = vadd.f32 %v1763_v38, %v1651_v26  ;;  %v3517_v4 = vadd.f32 %v1767_v59, %v1655_v37  ;;  %v3658_v38 = vld [vmem:[#allocation4_spill] sm:$0xff] }
 0x17e   :  { %v1658_v32 = vpop.f32.mrf.mxu0 }
 0x17f   :  { %v1771_v43 = vpop.f32.mrf.mxu1  ;;  %v1659_v49 = vadd.f32 %v1658_v32, %v3413_v3  ;;  %v3519_v2 = vadd.f32 %v1769_v30, %v1657_v25 }
 0x180   :  { %v1660_v31 = vpop.f32.mrf.mxu0 }
 0x181   :  { %v3499_v18 = vpop.f32.mrf.mxu1  ;;  %v3521_v5 = vadd.f32 %v1771_v43, %v1659_v49  ;;  %v3524_v21 = vadd.f32 %v1660_v31, %v3657_v19 }
 0x182   :  { %v1810_v40 = vpop.f32.mrf.mxu0 }
 0x183   :  { %v1850_v44 = vpop.f32.mrf.mxu1  ;;  %v1811_v50 = vadd.f32 %v1810_v40, %v3656_v53 }
 0x184   :  { %v1851_v61 = vadd.f32 %v1850_v44, %v1738_v39  ;;  %v1812_v16 = vpop.f32.mrf.mxu0 }
 0x185   :  { %v1852_v6 = vpop.f32.mrf.mxu1  ;;  %v1921_v45 = vmul.f32 0.2, %v1811_v50  ;;  %vm1889_vm2 = vcmp.gt.f32.partialorder %v1811_v50, 0.0  ;;  %v1813_v3 = vadd.f32 %v1812_v16, %v1700_v7 }
 0x186   :  { %v1937_v9 = vmul.f32 0.2, %v1851_v61  ;;  %vm1905_vm3 = vcmp.gt.f32.partialorder %v1851_v61, 0.0  ;;  %v1853_v10 = vadd.f32 %v1852_v6, %v1740_v46  ;;  %v1814_v12 = vpop.f32.mrf.mxu0 }
 0x187   :  { %v1854_v51 = vpop.f32.mrf.mxu1  ;;  %v1815_v29 = vadd.f32 %v1814_v12, %v3658_v38  ;;  %vm1890_vm4 = vcmp.gt.f32.partialorder %v1813_v3, 0.0  ;;  %v1922_v59 = vmul.f32 0.2, %v1813_v3  ;;  %v1953_v33 = vsel %vm1889_vm2, %v1811_v50, %v1921_v45 }
 0x188   :  { %v1855_v27 = vadd.f32 %v1854_v51, %v1742_v47  ;;  %vm1906_vm5 = vcmp.gt.f32.partialorder %v1853_v10, 0.0  ;;  %v1938_v57 = vmul.f32 0.2, %v1853_v10  ;;  %v1816_v8 = vpop.f32.mrf.mxu0  ;;  %v1969_v7 = vsel %vm1905_vm3, %v1851_v61, %v1937_v9 }
 0x189   :  { %v1856_v41 = vpop.f32.mrf.mxu1  ;;  %v1923_v60 = vmul.f32 0.2, %v1815_v29  ;;  %v1954_v30 = vsel %vm1890_vm4, %v1813_v3, %v1922_v59  ;;  %v1817_v48 = vadd.f32 %v1816_v8, %v3477_v13  ;;  %vm1891_vm7 = vcmp.gt.f32.partialorder %v1815_v29, 0.0  ;;  %v3661_v13 = vld [vmem:[#allocation5_spill] sm:$0xff] }
 0x18a   :  { %v1939_v52 = vmul.f32 0.2, %v1855_v27  ;;  %v1970_v22 = vsel %vm1906_vm5, %v1853_v10, %v1938_v57  ;;  %v1857_v54 = vadd.f32 %v1856_v41, %v1744_v35  ;;  %v1820_v11 = vpop.f32.mrf.mxu0  ;;  %v2336_v32 = vpack.c.bf16 %v1954_v30, %v1953_v33 }
 0x18b   :  { %v1860_v15 = vpop.f32.mrf.mxu1  ;;  %v2344_v43 = vpack.c.bf16 %v1970_v22, %v1969_v7  ;;  %vm1907_vm8 = vcmp.gt.f32.partialorder %v1855_v27, 0.0  ;;  %vm1892_vm9 = vcmp.gt.f32.partialorder %v1817_v48, 0.0  ;;  %v1924_v39 = vmul.f32 0.2, %v1817_v48 }
 0x18c   :  { %vm1908_vm10 = vcmp.gt.f32.partialorder %v1857_v54, 0.0  ;;  %v1940_v14 = vmul.f32 0.2, %v1857_v54  ;;  %v1822_v17 = vpop.f32.mrf.mxu0  ;;  %2084 = vst.msk [vmem:[%s3643_s2] sm:$0xff] %vm3531_vm6, %v2336_v32  ;;  %v1821_v23 = vadd.f32 %v1820_v11, %v3661_v13  ;;  %v1861_v26 = vadd.f32 %v1860_v15, %v1748_v56 }
 0x18d   :  { %v1862_v20 = vpop.f32.mrf.mxu1  ;;  %2092 = vst.msk [vmem:[%s3643_s2 + $0x40] sm:$0xff] %vm3531_vm6, %v2344_v43  ;;  %v1823_v31 = vadd.f32 %v1822_v17, %v3480_v36  ;;  %v1955_v47 = vsel %vm1891_vm7, %v1815_v29, %v1923_v60  ;;  %v1971_v37 = vsel %vm1907_vm8, %v1855_v27, %v1939_v52  ;;  %v1956_v25 = vsel %vm1892_vm9, %v1817_v48, %v1924_v39  ;;  %v3663_v60 = vld [vmem:[#allocation7_spill] sm:$0xff] }
 0x18e   :  { %v1863_v46 = vadd.f32 %v1862_v20, %v1750_v28  ;;  %v1972_v35 = vsel %vm1908_vm10, %v1857_v54, %v1940_v14  ;;  %v1824_v40 = vpop.f32.mrf.mxu0  ;;  %v2337_v49 = vpack.c.bf16 %v1956_v25, %v1955_v47  ;;  %vm1893_vm11 = vcmp.gt.f32.partialorder %v1821_v23, 0.0  ;;  %v3662_v28 = vld [vmem:[#allocation6_spill] sm:$0xff] }
 0x18f   :  { %v1864_v44 = vpop.f32.mrf.mxu1  ;;  %v2345_v53 = vpack.c.bf16 %v1972_v35, %v1971_v37  ;;  %v1925_v50 = vmul.f32 0.2, %v1821_v23  ;;  %vm1909_vm12 = vcmp.gt.f32.partialorder %v1861_v26, 0.0  ;;  %v1941_v61 = vmul.f32 0.2, %v1861_v26  ;;  %v3664_v37 = vld [vmem:[#allocation8_spill] sm:$0xff] }
 0x190   :  { %vm1894_vm13 = vcmp.gt.f32.partialorder %v1823_v31, 0.0  ;;  %v1926_v16 = vmul.f32 0.2, %v1823_v31  ;;  %v1826_v6 = vpop.f32.mrf.mxu0  ;;  %2085 = vst.msk [vmem:[%s3643_s2 + $0x8] sm:$0xff] %vm3531_vm6, %v2337_v49  ;;  %vm1910_vm14 = vcmp.gt.f32.partialorder %v1863_v46, 0.0  ;;  %v1825_v9 = vadd.f32 %v1824_v40, %v3662_v28  ;;  %v3665_v40 = vld [vmem:[#allocation9_spill] sm:$0xff] }
 0x191   :  { %v1866_v45 = vpop.f32.mrf.mxu1  ;;  %2093 = vst.msk [vmem:[%s3643_s2 + $0x48] sm:$0xff] %vm3531_vm6, %v2345_v53  ;;  %v1957_v36 = vsel %vm1893_vm11, %v1821_v23, %v1925_v50  ;;  %v1942_v56 = vmul.f32 0.2, %v1863_v46  ;;  %v1973_v3 = vsel %vm1909_vm12, %v1861_v26, %v1941_v61  ;;  %v1865_v12 = vadd.f32 %v1864_v44, %v3503_v55  ;;  %v3666_v61 = vld [vmem:[#allocation10_spill] sm:$0xff] }
 0x192   :  { %v1958_v10 = vsel %vm1894_vm13, %v1823_v31, %v1926_v16  ;;  %v1827_v51 = vadd.f32 %v1826_v6, %v3489_v24  ;;  %v1830_v19 = vpop.f32.mrf.mxu0  ;;  %vm1895_vm15 = vcmp.gt.f32.partialorder %v1825_v9, 0.0  ;;  %v1927_v59 = vmul.f32 0.2, %v1825_v9 }
 0x193   :  { %v1870_v38 = vpop.f32.mrf.mxu1  ;;  %v2338_v29 = vpack.c.bf16 %v1958_v10, %v1957_v36  ;;  %v1974_v27 = vsel %vm1910_vm14, %v1863_v46, %v1942_v56  ;;  %vm1911_vm0 = vcmp.gt.f32.partialorder %v1865_v12, 0.0  ;;  %v1943_v8 = vmul.f32 0.2, %v1865_v12 }
 0x194   :  { %v2346_v57 = vpack.c.bf16 %v1974_v27, %v1973_v3  ;;  %vm1896_vm1 = vcmp.gt.f32.partialorder %v1827_v51, 0.0  ;;  %v1832_v41 = vpop.f32.mrf.mxu0  ;;  %v1959_v55 = vsel %vm1895_vm15, %v1825_v9, %v1927_v59  ;;  %v1928_v24 = vmul.f32 0.2, %v1827_v51 }
 0x195   :  { %v1872_v33 = vpop.f32.mrf.mxu1  ;;  %2086 = vst.msk [vmem:[%s3643_s2 + $0x10] sm:$0xff] %vm3531_vm6, %v2338_v29  ;;  %v1867_v7 = vadd.f32 %v1866_v45, %v3505_v63  ;;  %v1831_v52 = vadd.f32 %v1830_v19, %v3663_v60  ;;  %v1975_v30 = vsel %vm1911_vm0, %v1865_v12, %v1943_v8  ;;  %v1871_v22 = vadd.f32 %v1870_v38, %v3509_v0  ;;  %v3667_v29 = vld [vmem:[#allocation11_spill] sm:$0xff] }
 0x196   :  { %2094 = vst.msk [vmem:[%s3643_s2 + $0x50] sm:$0xff] %vm3531_vm6, %v2346_v57  ;;  %v1833_v48 = vadd.f32 %v1832_v41, %v3492_v34  ;;  %v1873_v54 = vadd.f32 %v1872_v33, %v3511_v1  ;;  %v1834_v11 = vpop.f32.mrf.mxu0  ;;  %v1960_v32 = vsel %vm1896_vm1, %v1827_v51, %v1928_v24  ;;  %v1774_v3 = vadd.f32 %v3499_v18, %v3524_v21 }
 0x197   :  { %v1874_v15 = vpop.f32.mrf.mxu1  ;;  %vm1912_vm2 = vcmp.gt.f32.partialorder %v1867_v7, 0.0  ;;  %v1944_v63 = vmul.f32 0.2, %v1867_v7  ;;  %vm1897_vm3 = vcmp.gt.f32.partialorder %v1831_v52, 0.0  ;;  %v2339_v43 = vpack.c.bf16 %v1960_v32, %v1959_v55 }
 0x198   :  { %v1929_v39 = vmul.f32 0.2, %v1831_v52  ;;  %vm1913_vm4 = vcmp.gt.f32.partialorder %v1871_v22, 0.0  ;;  %v1945_v14 = vmul.f32 0.2, %v1871_v22  ;;  %v1836_v17 = vpop.f32.mrf.mxu0  ;;  %vm1898_vm5 = vcmp.gt.f32.partialorder %v1833_v48, 0.0 }
 0x199   :  { %v1876_v20 = vpop.f32.mrf.mxu1  ;;  %v1976_v13 = vsel %vm1912_vm2, %v1867_v7, %v1944_v63  ;;  %v1930_v23 = vmul.f32 0.2, %v1833_v48  ;;  %vm1914_vm7 = vcmp.gt.f32.partialorder %v1873_v54, 0.0  ;;  %2087 = vst.msk [vmem:[%s3643_s2 + $0x18] sm:$0xff] %vm3531_vm6, %v2339_v43  ;;  %v1946_v26 = vmul.f32 0.2, %v1873_v54 }
 0x19a   :  { %v2347_v34 = vpack.c.bf16 %v1976_v13, %v1975_v30  ;;  %v1961_v0 = vsel %vm1897_vm3, %v1831_v52, %v1929_v39  ;;  %v1977_v1 = vsel %vm1913_vm4, %v1871_v22, %v1945_v14  ;;  %v1840_v31 = vpop.f32.mrf.mxu0  ;;  %v1835_v25 = vadd.f32 %v1834_v11, %v3664_v37  ;;  %v3668_v7 = vld [vmem:[#allocation12_spill] sm:$0xff]  ;;  %v3669_v30 = vld [vmem:[#allocation13_spill] sm:$0xff] }
 0x19b   :  { %v1880_v46 = vpop.f32.mrf.mxu1  ;;  %v1962_v47 = vsel %vm1898_vm5, %v1833_v48, %v1930_v23  ;;  %v1875_v35 = vadd.f32 %v1874_v15, %v3513_v58  ;;  %v1837_v44 = vadd.f32 %v1836_v17, %v3665_v40  ;;  %v1978_v53 = vsel %vm1914_vm7, %v1873_v54, %v1946_v26 }
 0x19c   :  { %2095 = vst.msk [vmem:[%s3643_s2 + $0x58] sm:$0xff] %vm3531_vm6, %v2347_v34  ;;  %v2340_v49 = vpack.c.bf16 %v1962_v47, %v1961_v0  ;;  %v1877_v50 = vadd.f32 %v1876_v20, %v3515_v62  ;;  %v1841_v16 = vadd.f32 %v1840_v31, %v3666_v61  ;;  %v1842_v6 = vpop.f32.mrf.mxu0  ;;  %v2348_v36 = vpack.c.bf16 %v1978_v53, %v1977_v1 }
 0x19d   :  { %v1882_v45 = vpop.f32.mrf.mxu1  ;;  %vm1899_vm8 = vcmp.gt.f32.partialorder %v1835_v25, 0.0  ;;  %v1931_v56 = vmul.f32 0.2, %v1835_v25  ;;  %vm1915_vm9 = vcmp.gt.f32.partialorder %v1875_v35, 0.0  ;;  %v1947_v58 = vmul.f32 0.2, %v1875_v35 }
 0x19e   :  { %2088 = vst.msk [vmem:[%s3643_s2 + $0x20] sm:$0xff] %vm3531_vm6, %v2340_v49  ;;  %vm1900_vm10 = vcmp.gt.f32.partialorder %v1837_v44, 0.0  ;;  %v1932_v28 = vmul.f32 0.2, %v1837_v44  ;;  %vm1916_vm11 = vcmp.gt.f32.partialorder %v1877_v50, 0.0  ;;  %v1844_v9 = vpop.f32.mrf.mxu0  ;;  %2096 = vst.msk [vmem:[%s3643_s2 + $0x60] sm:$0xff] %vm3531_vm6, %v2348_v36  ;;  %v1881_v38 = vadd.f32 %v1880_v46, %v3517_v4 }
 0x19f   :  { %v1884_v62 = vpop.f32.mrf.mxu1  ;;  %v1963_v10 = vsel %vm1899_vm8, %v1835_v25, %v1931_v56  ;;  %v1948_v12 = vmul.f32 0.2, %v1877_v50  ;;  %vm1901_vm12 = vcmp.gt.f32.partialorder %v1841_v16, 0.0  ;;  %v1933_v19 = vmul.f32 0.2, %v1841_v16 }
 0x1a0   :  { %v1964_v51 = vsel %vm1900_vm10, %v1837_v44, %v1932_v28  ;;  %v1843_v27 = vadd.f32 %v1842_v6, %v3667_v29  ;;  %v1979_v59 = vsel %vm1915_vm9, %v1875_v35, %v1947_v58  ;;  %v1883_v18 = vadd.f32 %v1882_v45, %v3519_v2  ;;  %v1846_v21 = vpop.f32.mrf.mxu0 }
 0x1a1   :  { %v2341_v57 = vpack.c.bf16 %v1964_v51, %v1963_v10  ;;  %v1980_v8 = vsel %vm1916_vm11, %v1877_v50, %v1948_v12  ;;  %v1886_v41 = vpop.f32.mrf.mxu1  ;;  %vm1917_vm13 = vcmp.gt.f32.partialorder %v1881_v38, 0.0  ;;  %v1949_v55 = vmul.f32 0.2, %v1881_v38 }
 0x1a2   :  { %v2349_v33 = vpack.c.bf16 %v1980_v8, %v1979_v59  ;;  %vm1902_vm14 = vcmp.gt.f32.partialorder %v1843_v27, 0.0  ;;  %v1934_v4 = vmul.f32 0.2, %v1843_v27  ;;  %vm1918_vm15 = vcmp.gt.f32.partialorder %v1883_v18, 0.0 }
 0x1a3   :  { %2089 = vst.msk [vmem:[%s3643_s2 + $0x28] sm:$0xff] %vm3531_vm6, %v2341_v57  ;;  %v1950_v24 = vmul.f32 0.2, %v1883_v18  ;;  %v1845_v60 = vadd.f32 %v1844_v9, %v3668_v7  ;;  %v1965_v2 = vsel %vm1901_vm12, %v1841_v16, %v1933_v19  ;;  %v1885_v52 = vadd.f32 %v1884_v62, %v3521_v5 }
 0x1a4   :  { %2097 = vst.msk [vmem:[%s3643_s2 + $0x68] sm:$0xff] %vm3531_vm6, %v2349_v33  ;;  %v1847_v22 = vadd.f32 %v1846_v21, %v3669_v30  ;;  %v1887_v48 = vadd.f32 %v1886_v41, %v1774_v3  ;;  %v1981_v54 = vsel %vm1917_vm13, %v1881_v38, %v1949_v55  ;;  %v1966_v11 = vsel %vm1902_vm14, %v1843_v27, %v1934_v4 }
 0x1a5   :  { %v1982_v15 = vsel %vm1918_vm15, %v1883_v18, %v1950_v24  ;;  %v1935_v32 = vmul.f32 0.2, %v1845_v60  ;;  %v2342_v63 = vpack.c.bf16 %v1966_v11, %v1965_v2  ;;  %vm1903_vm0 = vcmp.gt.f32.partialorder %v1845_v60, 0.0 }
 0x1a6   :  { %v2350_v43 = vpack.c.bf16 %v1982_v15, %v1981_v54  ;;  %v1951_v39 = vmul.f32 0.2, %v1885_v52  ;;  %vm1919_vm1 = vcmp.gt.f32.partialorder %v1885_v52, 0.0  ;;  %vm1904_vm2 = vcmp.gt.f32.partialorder %v1847_v22, 0.0 }
 0x1a7   :  { %v1936_v14 = vmul.f32 0.2, %v1847_v22  ;;  %vm1920_vm3 = vcmp.gt.f32.partialorder %v1887_v48, 0.0  ;;  %2090 = vst.msk [vmem:[%s3643_s2 + $0x30] sm:$0xff] %vm3531_vm6, %v2342_v63  ;;  %v1952_v5 = vmul.f32 0.2, %v1887_v48  ;;  %v1967_v17 = vsel %vm1903_vm0, %v1845_v60, %v1935_v32 }
 0x1a8   :  { %2098 = vst.msk [vmem:[%s3643_s2 + $0x70] sm:$0xff] %vm3531_vm6, %v2350_v43  ;;  %v1983_v13 = vsel %vm1919_vm1, %v1885_v52, %v1951_v39 }
 0x1a9   :  { %v1968_v20 = vsel %vm1904_vm2, %v1847_v22, %v1936_v14  ;;  %v1984_v34 = vsel %vm1920_vm3, %v1887_v48, %v1952_v5 }
 0x1aa   :  { %v2343_v23 = vpack.c.bf16 %v1968_v20, %v1967_v17  ;;  %v2351_v0 = vpack.c.bf16 %v1984_v34, %v1983_v13 }
 0x1ac   :  { %2091 = vst.msk [vmem:[%s3643_s2 + $0x38] sm:$0xff] %vm3531_vm6, %v2343_v23  ;;  %2099 = vst.msk [vmem:[%s3643_s2 + $0x78] sm:$0xff] %vm3531_vm6, %v2351_v0 }

// kernel: discriminator_forward.12
= control target key start
LH: loop header
LB: loop body
LE: loop exit
PB: predicated region body
PF: predicated region fallthrough
CT: control target
= control target key end

     0   :  { %vm1972_vm0 = vcmask 523264   ;;  %vm2980_vm1 = vcmask 1043456   ;;  %vm2981_vm2 = vcmask 523268   ;;  %s5278_s1 = inlined_call_operand.vmem [shape: bf16[1728,192], index: 1, kind: input, shape index: {}]   ;;  %s5279_s0 = inlined_call_operand.vmem [shape: bf16[128,1728], index: 0, kind: input, shape index: {}]   ;;  %s5280_s2 = inlined_call_operand.vmem [shape: bf16[128,192], index: 2, kind: output, shape index: {}]  }
   0x1   :  { %v3395_v0 = vld [vmem:[%s5278_s1 + $0x74] ss:$8 sps:$4 sm:$0xff]   ;;  %v3399_v2 = vld [vmem:[%s5278_s1 + $0x70] ss:$8 sps:$4 sm:$0xff]   ;;  %v3401_v4 = vld [vmem:[%s5278_s1 + $0x64] ss:$8 sps:$4 sm:$0xff]  }
   0x2   :  { %v3397_v1 = vld [vmem:[%s5278_s1 + $0x174] ss:$8 sps:$4 sm:$0xff]   ;;  %1997 = vmatprep.subr.bf16.mxu0 %v3395_v0  ;;  %v3400_v3 = vld [vmem:[%s5278_s1 + $0x170] ss:$8 sps:$4 sm:$0xff]   ;;  %v3403_v5 = vld [vmem:[%s5278_s1 + $0x164] ss:$8 sps:$4 sm:$0xff]  }
   0x3   :  { %2110 = vmatprep.subr.bf16.mxu1 %v3397_v1  ;;  %1998 = vmatpush1.bf16.msra.mxu0 %v3399_v2  ;;  %v3405_v6 = vld [vmem:[%s5278_s1 + $0x60] ss:$8 sps:$4 sm:$0xff]   ;;  %v3407_v8 = vld [vmem:[%s5278_s1 + $0x54] ss:$8 sps:$4 sm:$0xff]   ;;  %v3411_v10 = vld [vmem:[%s5278_s1 + $0x50] ss:$8 sps:$4 sm:$0xff]  }
   0x4   :  { %2111 = vmatpush1.bf16.msra.mxu1 %v3400_v3  ;;  %1999 = vmatprep.subr.bf16.mxu0 %v3401_v4  ;;  %v3406_v7 = vld [vmem:[%s5278_s1 + $0x160] ss:$8 sps:$4 sm:$0xff]   ;;  %v3409_v9 = vld [vmem:[%s5278_s1 + $0x154] ss:$8 sps:$4 sm:$0xff]   ;;  %v3412_v11 = vld [vmem:[%s5278_s1 + $0x150] ss:$8 sps:$4 sm:$0xff]  }
   0x5   :  { %2112 = vmatprep.subr.bf16.mxu1 %v3403_v5  ;;  %v3413_v12 = vld [vmem:[%s5278_s1 + $0x44] ss:$8 sps:$4 sm:$0xff]   ;;  %v3417_v14 = vld [vmem:[%s5278_s1 + $0x40] ss:$8 sps:$4 sm:$0xff]   ;;  %v3419_v16 = vld [vmem:[%s5278_s1 + $0x34] ss:$8 sps:$4 sm:$0xff]  }
   0x6   :  { %v3415_v13 = vld [vmem:[%s5278_s1 + $0x144] ss:$8 sps:$4 sm:$0xff]   ;;  %v3418_v15 = vld [vmem:[%s5278_s1 + $0x140] ss:$8 sps:$4 sm:$0xff]   ;;  %v3421_v17 = vld [vmem:[%s5278_s1 + $0x134] ss:$8 sps:$4 sm:$0xff]  }
   0x7   :  { %2000 = vmatpush1.bf16.msra.mxu0 %v3405_v6  ;;  %v3423_v18 = vld [vmem:[%s5278_s1 + $0x30] ss:$8 sps:$4 sm:$0xff]   ;;  %v3425_v20 = vld [vmem:[%s5278_s1 + $0x24] ss:$8 sps:$4 sm:$0xff]   ;;  %v3429_v22 = vld [vmem:[%s5278_s1 + $0x20] ss:$8 sps:$4 sm:$0xff]  }
   0x8   :  { %2113 = vmatpush1.bf16.msra.mxu1 %v3406_v7  ;;  %2001 = vmatprep.subr.bf16.mxu0 %v3407_v8  ;;  %v3424_v19 = vld [vmem:[%s5278_s1 + $0x130] ss:$8 sps:$4 sm:$0xff]   ;;  %v3427_v21 = vld [vmem:[%s5278_s1 + $0x124] ss:$8 sps:$4 sm:$0xff]   ;;  %v3430_v23 = vld [vmem:[%s5278_s1 + $0x120] ss:$8 sps:$4 sm:$0xff]  }
   0x9   :  { %2114 = vmatprep.subr.bf16.mxu1 %v3409_v9  ;;  %v3431_v24 = vld [vmem:[%s5278_s1 + $0x14] ss:$8 sps:$4 sm:$0xff]   ;;  %v3435_v26 = vld [vmem:[%s5278_s1 + $0x10] ss:$8 sps:$4 sm:$0xff]   ;;  %v3437_v28 = vld [vmem:[%s5278_s1 + $0x4] ss:$8 sps:$4 sm:$0xff]  }
   0xa   :  { %v3433_v25 = vld [vmem:[%s5278_s1 + $0x114] ss:$8 sps:$4 sm:$0xff]   ;;  %v3436_v27 = vld [vmem:[%s5278_s1 + $0x110] ss:$8 sps:$4 sm:$0xff]   ;;  %v3439_v29 = vld [vmem:[%s5278_s1 + $0x104] ss:$8 sps:$4 sm:$0xff]  }
   0xb   :  { %2002 = vmatpush1.bf16.msra.mxu0 %v3411_v10  ;;  %v3441_v30 = vld [vmem:[%s5278_s1] ss:$8 sps:$4 sm:$0xff]   ;;  %v3443_v32 = vld [vmem:[%s5278_s1 + $0xf4] ss:$8 sps:$4 sm:$0xff]   ;;  %v3447_v34 = vld [vmem:[%s5278_s1 + $0xf0] ss:$8 sps:$4 sm:$0xff]  }
   0xc   :  { %2115 = vmatpush1.bf16.msra.mxu1 %v3412_v11  ;;  %2003 = vmatprep.subr.bf16.mxu0 %v3413_v12  ;;  %v3442_v31 = vld [vmem:[%s5278_s1 + $0x100] ss:$8 sps:$4 sm:$0xff]   ;;  %v3445_v33 = vld [vmem:[%s5278_s1 + $0x1f4] ss:$8 sps:$4 sm:$0xff]   ;;  %v3448_v35 = vld [vmem:[%s5278_s1 + $0x1f0] ss:$8 sps:$4 sm:$0xff]  }
   0xd   :  { %2116 = vmatprep.subr.bf16.mxu1 %v3415_v13  ;;  %v3449_v36 = vld [vmem:[%s5278_s1 + $0xe4] ss:$8 sps:$4 sm:$0xff]   ;;  %v3453_v38 = vld [vmem:[%s5278_s1 + $0xe0] ss:$8 sps:$4 sm:$0xff]   ;;  %v3455_v40 = vld [vmem:[%s5278_s1 + $0xd4] ss:$8 sps:$4 sm:$0xff]  }
   0xe   :  { %v3451_v37 = vld [vmem:[%s5278_s1 + $0x1e4] ss:$8 sps:$4 sm:$0xff]   ;;  %v3454_v39 = vld [vmem:[%s5278_s1 + $0x1e0] ss:$8 sps:$4 sm:$0xff]   ;;  %v3457_v41 = vld [vmem:[%s5278_s1 + $0x1d4] ss:$8 sps:$4 sm:$0xff]  }
   0xf   :  { %2004 = vmatpush1.bf16.msra.mxu0 %v3417_v14  ;;  %v3459_v42 = vld [vmem:[%s5278_s1 + $0xd0] ss:$8 sps:$4 sm:$0xff]   ;;  %v3461_v44 = vld [vmem:[%s5278_s1 + $0xc4] ss:$8 sps:$4 sm:$0xff]   ;;  %v3465_v46 = vld [vmem:[%s5278_s1 + $0xc0] ss:$8 sps:$4 sm:$0xff]  }
  0x10   :  { %2117 = vmatpush1.bf16.msra.mxu1 %v3418_v15  ;;  %2005 = vmatprep.subr.bf16.mxu0 %v3419_v16  ;;  %v3460_v43 = vld [vmem:[%s5278_s1 + $0x1d0] ss:$8 sps:$4 sm:$0xff]   ;;  %v3463_v45 = vld [vmem:[%s5278_s1 + $0x1c4] ss:$8 sps:$4 sm:$0xff]   ;;  %v3466_v47 = vld [vmem:[%s5278_s1 + $0x1c0] ss:$8 sps:$4 sm:$0xff]  }
  0x11   :  { %2118 = vmatprep.subr.bf16.mxu1 %v3421_v17  ;;  %v3467_v48 = vld [vmem:[%s5278_s1 + $0xb4] ss:$8 sps:$4 sm:$0xff]   ;;  %v3496_v51 = vld [vmem:[%s5279_s0 + $0xc] ss:$56 sps:$4 sm:$0xff]   ;;  %v3471_v52 = vld [vmem:[%s5278_s1 + $0xb0] ss:$8 sps:$4 sm:$0xff]  }
  0x12   :  { %v3493_v49 = vld [vmem:[%s5279_s0 + $0x4] ss:$56 sps:$4 sm:$0xff]   ;;  %v3472_v53 = vld [vmem:[%s5278_s1 + $0x1b0] ss:$8 sps:$4 sm:$0xff]   ;;  %2142 = vmatprep.mubr.bf16.mxu1 %v3496_v51  ;;  %v3477_v56 = vld [vmem:[%s5278_s1 + $0xa0] ss:$8 sps:$4 sm:$0xff]  }
  0x13   :  { %2006 = vmatpush1.bf16.msra.mxu0 %v3423_v18  ;;  %v3469_v50 = vld [vmem:[%s5278_s1 + $0x1b4] ss:$8 sps:$4 sm:$0xff]   ;;  %2029 = vmatprep.mubr.bf16.mxu0 %v3493_v49  ;;  %v3473_v54 = vld [vmem:[%s5278_s1 + $0xa4] ss:$8 sps:$4 sm:$0xff]   ;;  %v3478_v57 = vld [vmem:[%s5278_s1 + $0x1a0] ss:$8 sps:$4 sm:$0xff]  }
  0x14   :  { %2119 = vmatpush1.bf16.msra.mxu1 %v3424_v19  ;;  %2007 = vmatprep.subr.bf16.mxu0 %v3425_v20  ;;  %v3475_v55 = vld [vmem:[%s5278_s1 + $0x1a4] ss:$8 sps:$4 sm:$0xff]   ;;  %v3479_v58 = vld [vmem:[%s5278_s1 + $0x94] ss:$8 sps:$4 sm:$0xff]   ;;  %v3483_v60 = vld [vmem:[%s5278_s1 + $0x90] ss:$8 sps:$4 sm:$0xff]  }
  0x15   :  { %2120 = vmatprep.subr.bf16.mxu1 %v3427_v21  ;;  %v3481_v59 = vld [vmem:[%s5278_s1 + $0x194] ss:$8 sps:$4 sm:$0xff]   ;;  %v3484_v61 = vld [vmem:[%s5278_s1 + $0x190] ss:$8 sps:$4 sm:$0xff]   ;;  %v3485_v62 = vld [vmem:[%s5278_s1 + $0x84] ss:$8 sps:$4 sm:$0xff]  }
  0x16   :  { %v3487_v63 = vld [vmem:[%s5278_s1 + $0x184] ss:$8 sps:$4 sm:$0xff]   ;;  %v3489_v0 = vld [vmem:[%s5278_s1 + $0x80] ss:$8 sps:$4 sm:$0xff]   ;;  %v3499_v2 = vld [vmem:[%s5278_s1 + $0x274] ss:$8 sps:$4 sm:$0xff]  }
  0x17   :  { %2008 = vmatpush1.bf16.msra.mxu0 %v3429_v22  ;;  %v3490_v1 = vld [vmem:[%s5278_s1 + $0x180] ss:$8 sps:$4 sm:$0xff]   ;;  %v3502_v3 = vld [vmem:[%s5278_s1 + $0x374] ss:$8 sps:$4 sm:$0xff]   ;;  %v3497_v6 = vld [vmem:[%s5278_s1 + $0x270] ss:$8 sps:$4 sm:$0xff]  }
  0x18   :  { %2121 = vmatpush1.bf16.msra.mxu1 %v3430_v23  ;;  %2009 = vmatprep.subr.bf16.mxu0 %v3431_v24  ;;  %v3491_v4 = vld [vmem:[%s5279_s0] ss:$56 sps:$4 sm:$0xff]   ;;  %v3505_v8 = vld [vmem:[%s5278_s1 + $0x264] ss:$8 sps:$4 sm:$0xff]   ;;  %v3511_v11 = vld [vmem:[%s5279_s0 + $0x7c] ss:$56 sps:$4 sm:$0xff]  }
  0x19   :  { %2122 = vmatprep.subr.bf16.mxu1 %v3433_v25  ;;  %v3494_v5 = vld [vmem:[%s5279_s0 + $0x8] ss:$56 sps:$4 sm:$0xff]   ;;  %v3500_v7 = vld [vmem:[%s5278_s1 + $0x370] ss:$8 sps:$4 sm:$0xff]   ;;  %v3508_v9 = vld [vmem:[%s5278_s1 + $0x364] ss:$8 sps:$4 sm:$0xff]  }
  0x1a   :  { %v3509_v10 = vld [vmem:[%s5279_s0 + $0x74] ss:$56 sps:$4 sm:$0xff]   ;;  %v3503_v12 = vld [vmem:[%s5278_s1 + $0x260] ss:$8 sps:$4 sm:$0xff]   ;;  %v3514_v17 = vld [vmem:[%s5279_s0 + $0x78] ss:$56 sps:$4 sm:$0xff]  }
  0x1b   :  { %2010 = vmatpush1.bf16.msra.mxu0 %v3435_v26  ;;  %v3506_v13 = vld [vmem:[%s5278_s1 + $0x360] ss:$8 sps:$4 sm:$0xff]   ;;  %v3517_v14 = vld [vmem:[%s5278_s1 + $0x254] ss:$8 sps:$4 sm:$0xff]   ;;  %v3515_v18 = vld [vmem:[%s5278_s1 + $0x250] ss:$8 sps:$4 sm:$0xff]  }
  0x1c   :  { %2123 = vmatpush1.bf16.msra.mxu1 %v3436_v27  ;;  %2011 = vmatprep.subr.bf16.mxu0 %v3437_v28  ;;  %v3520_v15 = vld [vmem:[%s5278_s1 + $0x354] ss:$8 sps:$4 sm:$0xff]   ;;  %v3513_v16 = vld [vmem:[%s5279_s0 + $0x70] ss:$56 sps:$4 sm:$0xff]   ;;  %v3523_v20 = vld [vmem:[%s5278_s1 + $0x244] ss:$8 sps:$4 sm:$0xff]  }
  0x1d   :  { %2124 = vmatprep.subr.bf16.mxu1 %v3439_v29  ;;  %v3518_v19 = vld [vmem:[%s5278_s1 + $0x350] ss:$8 sps:$4 sm:$0xff]   ;;  %v3526_v21 = vld [vmem:[%s5278_s1 + $0x344] ss:$8 sps:$4 sm:$0xff]   ;;  %v3521_v24 = vld [vmem:[%s5278_s1 + $0x240] ss:$8 sps:$4 sm:$0xff]  }
  0x1e   :  { %v3527_v22 = vld [vmem:[%s5279_s0 + $0xe4] ss:$56 sps:$4 sm:$0xff]   ;;  %v3524_v25 = vld [vmem:[%s5278_s1 + $0x340] ss:$8 sps:$4 sm:$0xff]   ;;  %vm5168_vm7 = vmor %vm2981_vm2, %vm2980_vm1 }
  0x1f   :  { %2012 = vmatpush1.bf16.msra.mxu0 %v3441_v30  ;;  %v3529_v23 = vld [vmem:[%s5279_s0 + $0xec] ss:$56 sps:$4 sm:$0xff]   ;;  %v3535_v26 = vld [vmem:[%s5278_s1 + $0x234] ss:$8 sps:$4 sm:$0xff]   ;;  %v3531_v28 = vld [vmem:[%s5279_s0 + $0xe0] ss:$56 sps:$4 sm:$0xff]  }
  0x20   :  { %2125 = vmatpush1.bf16.msra.mxu1 %v3442_v31  ;;  %2013 = vmatprep.subr.bf16.mxu0 %v3443_v32  ;;  %v3538_v27 = vld [vmem:[%s5278_s1 + $0x334] ss:$8 sps:$4 sm:$0xff]   ;;  %v3532_v29 = vld [vmem:[%s5279_s0 + $0xe8] ss:$56 sps:$4 sm:$0xff]   ;;  %v3533_v30 = vld [vmem:[%s5278_s1 + $0x230] ss:$8 sps:$4 sm:$0xff]  }
  0x21   :  { %2126 = vmatprep.subr.bf16.mxu1 %v3445_v33  ;;  %v3536_v31 = vld [vmem:[%s5278_s1 + $0x330] ss:$8 sps:$4 sm:$0xff]   ;;  %v3541_v32 = vld [vmem:[%s5278_s1 + $0x224] ss:$8 sps:$4 sm:$0xff]   ;;  %v3560_v49 = vld [vmem:[%s5278_s1 + $0x300] ss:$8 sps:$4 sm:$0xff]  }
  0x22   :  { %v3544_v33 = vld [vmem:[%s5278_s1 + $0x324] ss:$8 sps:$4 sm:$0xff]   ;;  %v3574_v51 = vld [vmem:[%s5278_s1 + $0x3f4] ss:$8 sps:$4 sm:$0xff]  }
  0x23   :  { %2014 = vmatpush2.bf16.msra.mxu0 %v3447_v34  ;;  %v3545_v34 = vld [vmem:[%s5279_s0 + $0x154] ss:$56 sps:$4 sm:$0xff]  }
  0x24   :  { %2127 = vmatpush2.bf16.msra.mxu1 %v3448_v35  ;;  %2015 = vmatprep.subr.bf16.mxu0 %v3449_v36  ;;  %v3547_v35 = vld [vmem:[%s5279_s0 + $0x15c] ss:$56 sps:$4 sm:$0xff]   ;;  %v3539_v36 = vld [vmem:[%s5278_s1 + $0x220] ss:$8 sps:$4 sm:$0xff]  }
  0x25   :  { %2128 = vmatprep.subr.bf16.mxu1 %v3451_v37  ;;  %v3542_v37 = vld [vmem:[%s5278_s1 + $0x320] ss:$8 sps:$4 sm:$0xff]  }
  0x27   :  { %2016 = vmatpush2.bf16.msra.mxu0 %v3453_v38  ;;  %v3553_v38 = vld [vmem:[%s5278_s1 + $0x214] ss:$8 sps:$4 sm:$0xff]  }
  0x28   :  { %2129 = vmatpush2.bf16.msra.mxu1 %v3454_v39  ;;  %2017 = vmatprep.subr.bf16.mxu0 %v3455_v40  ;;  %v3556_v39 = vld [vmem:[%s5278_s1 + $0x314] ss:$8 sps:$4 sm:$0xff]   ;;  %v3549_v40 = vld [vmem:[%s5279_s0 + $0x150] ss:$56 sps:$4 sm:$0xff]  }
  0x29   :  { %2130 = vmatprep.subr.bf16.mxu1 %v3457_v41  ;;  %v3550_v41 = vld [vmem:[%s5279_s0 + $0x158] ss:$56 sps:$4 sm:$0xff]  }
  0x2b   :  { %2018 = vmatpush2.bf16.msra.mxu0 %v3459_v42  ;;  %v3551_v42 = vld [vmem:[%s5278_s1 + $0x210] ss:$8 sps:$4 sm:$0xff]  }
  0x2c   :  { %2131 = vmatpush2.bf16.msra.mxu1 %v3460_v43  ;;  %2019 = vmatprep.subr.bf16.mxu0 %v3461_v44  ;;  %v3554_v43 = vld [vmem:[%s5278_s1 + $0x310] ss:$8 sps:$4 sm:$0xff]   ;;  %v3559_v44 = vld [vmem:[%s5278_s1 + $0x204] ss:$8 sps:$4 sm:$0xff]  }
  0x2d   :  { %2132 = vmatprep.subr.bf16.mxu1 %v3463_v45  ;;  %v3562_v45 = vld [vmem:[%s5278_s1 + $0x304] ss:$8 sps:$4 sm:$0xff]  }
  0x2f   :  { %2020 = vmatpush2.bf16.msra.mxu0 %v3465_v46  ;;  %v3563_v46 = vld [vmem:[%s5279_s0 + $0x1c4] ss:$56 sps:$4 sm:$0xff]  }
  0x30   :  { %2133 = vmatpush2.bf16.msra.mxu1 %v3466_v47  ;;  %2021 = vmatprep.subr.bf16.mxu0 %v3467_v48  ;;  %v3565_v47 = vld [vmem:[%s5279_s0 + $0x1cc] ss:$56 sps:$4 sm:$0xff]   ;;  %v3557_v48 = vld [vmem:[%s5278_s1 + $0x200] ss:$8 sps:$4 sm:$0xff]  }
  0x31   :  { %2134 = vmatprep.subr.bf16.mxu1 %v3469_v50  ;;  %v3571_v50 = vld [vmem:[%s5278_s1 + $0x2f4] ss:$8 sps:$4 sm:$0xff]  }
  0x33   :  { %2022 = vmatpush2.bf16.msra.mxu0 %v3471_v52  ;;  %v3567_v52 = vld [vmem:[%s5279_s0 + $0x1c0] ss:$56 sps:$4 sm:$0xff]  }
  0x34   :  { %2135 = vmatpush2.bf16.msra.mxu1 %v3472_v53  ;;  %2023 = vmatprep.subr.bf16.mxu0 %v3473_v54  ;;  %v3568_v53 = vld [vmem:[%s5279_s0 + $0x1c8] ss:$56 sps:$4 sm:$0xff]   ;;  %v3569_v54 = vld [vmem:[%s5278_s1 + $0x2f0] ss:$8 sps:$4 sm:$0xff]  }
  0x35   :  { %2136 = vmatprep.subr.bf16.mxu1 %v3475_v55  ;;  %v3572_v55 = vld [vmem:[%s5278_s1 + $0x3f0] ss:$8 sps:$4 sm:$0xff]  }
  0x37   :  { %2024 = vmatpush2.bf16.msra.mxu0 %v3477_v56  ;;  %v3577_v56 = vld [vmem:[%s5278_s1 + $0x2e4] ss:$8 sps:$4 sm:$0xff]  }
  0x38   :  { %2137 = vmatpush2.bf16.msra.mxu1 %v3478_v57  ;;  %2025 = vmatprep.subr.bf16.mxu0 %v3479_v58  ;;  %v3580_v57 = vld [vmem:[%s5278_s1 + $0x3e4] ss:$8 sps:$4 sm:$0xff]  }
  0x39   :  { %2138 = vmatprep.subr.bf16.mxu1 %v3481_v59  ;;  %v3581_v58 = vld [vmem:[%s5279_s0 + $0x234] ss:$56 sps:$4 sm:$0xff]  }
  0x3a   :  { %v3583_v59 = vld [vmem:[%s5279_s0 + $0x23c] ss:$56 sps:$4 sm:$0xff]  }
  0x3b   :  { %2026 = vmatpush2.bf16.msra.mxu0 %v3483_v60  ;;  %v3575_v60 = vld [vmem:[%s5278_s1 + $0x2e0] ss:$8 sps:$4 sm:$0xff]  }
  0x3c   :  { %2139 = vmatpush2.bf16.msra.mxu1 %v3484_v61  ;;  %2027 = vmatprep.subr.bf16.mxu0 %v3485_v62  ;;  %v3578_v61 = vld [vmem:[%s5278_s1 + $0x3e0] ss:$8 sps:$4 sm:$0xff]   ;;  %v3589_v62 = vld [vmem:[%s5278_s1 + $0x2d4] ss:$8 sps:$4 sm:$0xff]  }
  0x3d   :  { %2140 = vmatprep.subr.bf16.mxu1 %v3487_v63  ;;  %v3592_v63 = vld [vmem:[%s5278_s1 + $0x3d4] ss:$8 sps:$4 sm:$0xff]  }
  0x3f   :  { %2028 = vmatpush2.bf16.msra.mxu0 %v3489_v0  ;;  %v3585_v0 = vld [vmem:[%s5279_s0 + $0x230] ss:$56 sps:$4 sm:$0xff]  }
  0x40   :  { %2141 = vmatpush2.bf16.msra.mxu1 %v3490_v1  ;;  %2223 = vmatprep.subr.bf16.mxu0 %v3499_v2  ;;  %v3586_v1 = vld [vmem:[%s5279_s0 + $0x238] ss:$56 sps:$4 sm:$0xff]  }
  0x41   :  { %2336 = vmatprep.subr.bf16.mxu1 %v3502_v3  ;;  %v3587_v2 = vld [vmem:[%s5278_s1 + $0x2d0] ss:$8 sps:$4 sm:$0xff]  }
  0x42   :  { %2030 = vmatmul.mubr.bf16.vlgmr.msra.gmra.mxu0 %v3491_v4  ;;  %v3590_v3 = vld [vmem:[%s5278_s1 + $0x3d0] ss:$8 sps:$4 sm:$0xff]   ;;  %v3595_v4 = vld [vmem:[%s5278_s1 + $0x2c4] ss:$8 sps:$4 sm:$0xff]  }
  0x43   :  { %2143 = vmatmul.mubr.bf16.vlgmr.msra.gmra.mxu1 %v3494_v5  ;;  %2224 = vmatpush1.bf16.msra.mxu0 %v3497_v6  ;;  %v3598_v5 = vld [vmem:[%s5278_s1 + $0x3c4] ss:$8 sps:$4 sm:$0xff]  }
  0x44   :  { %2337 = vmatpush1.bf16.msra.mxu1 %v3500_v7  ;;  %2225 = vmatprep.subr.bf16.mxu0 %v3505_v8  ;;  %v3599_v6 = vld [vmem:[%s5279_s0 + $0x2a4] ss:$56 sps:$4 sm:$0xff]   ;;  %v3593_v8 = vld [vmem:[%s5278_s1 + $0x2c0] ss:$8 sps:$4 sm:$0xff]  }
  0x45   :  { %2338 = vmatprep.subr.bf16.mxu1 %v3508_v9  ;;  %2039 = vmatprep.mubr.bf16.mxu0 %v3509_v10  ;;  %v3601_v7 = vld [vmem:[%s5279_s0 + $0x2ac] ss:$56 sps:$4 sm:$0xff]   ;;  %v3596_v9 = vld [vmem:[%s5278_s1 + $0x3c0] ss:$8 sps:$4 sm:$0xff]   ;;  %v3607_v10 = vld [vmem:[%s5278_s1 + $0x2b4] ss:$8 sps:$4 sm:$0xff]  }
  0x46   :  { %2152 = vmatprep.mubr.bf16.mxu1 %v3511_v11  ;;  %v3610_v11 = vld [vmem:[%s5278_s1 + $0x3b4] ss:$8 sps:$4 sm:$0xff]  }
  0x47   :  { %2226 = vmatpush1.bf16.msra.mxu0 %v3503_v12  ;;  %v3603_v12 = vld [vmem:[%s5279_s0 + $0x2a0] ss:$56 sps:$4 sm:$0xff]  }
  0x48   :  { %2339 = vmatpush1.bf16.msra.mxu1 %v3506_v13  ;;  %2227 = vmatprep.subr.bf16.mxu0 %v3517_v14  ;;  %v3604_v13 = vld [vmem:[%s5279_s0 + $0x2a8] ss:$56 sps:$4 sm:$0xff]   ;;  %v3605_v14 = vld [vmem:[%s5278_s1 + $0x2b0] ss:$8 sps:$4 sm:$0xff]  }
  0x49   :  { %2340 = vmatprep.subr.bf16.mxu1 %v3520_v15  ;;  %v3608_v15 = vld [vmem:[%s5278_s1 + $0x3b0] ss:$8 sps:$4 sm:$0xff]  }
  0x4a   :  { %2040 = vmatmul.mubr.bf16.gmra.mxu0 %v3513_v16  ;;  %v3613_v16 = vld [vmem:[%s5278_s1 + $0x2a4] ss:$8 sps:$4 sm:$0xff]  }
  0x4b   :  { %2153 = vmatmul.mubr.bf16.gmra.mxu1 %v3514_v17  ;;  %2228 = vmatpush1.bf16.msra.mxu0 %v3515_v18  ;;  %v3616_v17 = vld [vmem:[%s5278_s1 + $0x3a4] ss:$8 sps:$4 sm:$0xff]  }
  0x4c   :  { %2341 = vmatpush1.bf16.msra.mxu1 %v3518_v19  ;;  %2229 = vmatprep.subr.bf16.mxu0 %v3523_v20  ;;  %v3617_v18 = vld [vmem:[%s5279_s0 + $0x314] ss:$56 sps:$4 sm:$0xff]   ;;  %v3611_v20 = vld [vmem:[%s5278_s1 + $0x2a0] ss:$8 sps:$4 sm:$0xff]  }
  0x4d   :  { %2342 = vmatprep.subr.bf16.mxu1 %v3526_v21  ;;  %2049 = vmatprep.mubr.bf16.mxu0 %v3527_v22  ;;  %v3619_v19 = vld [vmem:[%s5279_s0 + $0x31c] ss:$56 sps:$4 sm:$0xff]   ;;  %v3614_v21 = vld [vmem:[%s5278_s1 + $0x3a0] ss:$8 sps:$4 sm:$0xff]  }
  0x4e   :  { %2162 = vmatprep.mubr.bf16.mxu1 %v3529_v23  ;;  %v3625_v22 = vld [vmem:[%s5278_s1 + $0x294] ss:$8 sps:$4 sm:$0xff]  }
  0x4f   :  { %2230 = vmatpush1.bf16.msra.mxu0 %v3521_v24  ;;  %v3628_v23 = vld [vmem:[%s5278_s1 + $0x394] ss:$8 sps:$4 sm:$0xff]   ;;  %v3621_v24 = vld [vmem:[%s5279_s0 + $0x310] ss:$56 sps:$4 sm:$0xff]  }
  0x50   :  { %2343 = vmatpush1.bf16.msra.mxu1 %v3524_v25  ;;  %2231 = vmatprep.subr.bf16.mxu0 %v3535_v26  ;;  %v3622_v25 = vld [vmem:[%s5279_s0 + $0x318] ss:$56 sps:$4 sm:$0xff]  }
  0x51   :  { %2344 = vmatprep.subr.bf16.mxu1 %v3538_v27  ;;  %v3623_v26 = vld [vmem:[%s5278_s1 + $0x290] ss:$8 sps:$4 sm:$0xff]  }
  0x52   :  { %2050 = vmatmul.mubr.bf16.gmra.mxu0 %v3531_v28  ;;  %v3626_v27 = vld [vmem:[%s5278_s1 + $0x390] ss:$8 sps:$4 sm:$0xff]   ;;  %v3631_v28 = vld [vmem:[%s5278_s1 + $0x284] ss:$8 sps:$4 sm:$0xff]  }
  0x53   :  { %2163 = vmatmul.mubr.bf16.gmra.mxu1 %v3532_v29  ;;  %2232 = vmatpush1.bf16.msra.mxu0 %v3533_v30  ;;  %v3634_v29 = vld [vmem:[%s5278_s1 + $0x384] ss:$8 sps:$4 sm:$0xff]  }
  0x54   :  { %2345 = vmatpush1.bf16.msra.mxu1 %v3536_v31  ;;  %2233 = vmatprep.subr.bf16.mxu0 %v3541_v32  ;;  %v3637_v30 = vld [vmem:[%s5279_s0 + $0x14] ss:$56 sps:$4 sm:$0xff]   ;;  %v3629_v32 = vld [vmem:[%s5278_s1 + $0x280] ss:$8 sps:$4 sm:$0xff]  }
  0x55   :  { %2346 = vmatprep.subr.bf16.mxu1 %v3544_v33  ;;  %2059 = vmatprep.mubr.bf16.mxu0 %v3545_v34  ;;  %v3640_v31 = vld [vmem:[%s5279_s0 + $0x1c] ss:$56 sps:$4 sm:$0xff]   ;;  %v3632_v33 = vld [vmem:[%s5278_s1 + $0x380] ss:$8 sps:$4 sm:$0xff]  }
  0x56   :  { %2172 = vmatprep.mubr.bf16.mxu1 %v3547_v35  ;;  %v3643_v34 = vld [vmem:[%s5278_s1 + $0x474] ss:$8 sps:$4 sm:$0xff]  }
  0x57   :  { %2234 = vmatpush1.bf16.msra.mxu0 %v3539_v36  ;;  %v3646_v35 = vld [vmem:[%s5278_s1 + $0x574] ss:$8 sps:$4 sm:$0xff]   ;;  %v3635_v36 = vld [vmem:[%s5279_s0 + $0x10] ss:$56 sps:$4 sm:$0xff]  }
  0x58   :  { %2347 = vmatpush1.bf16.msra.mxu1 %v3542_v37  ;;  %2235 = vmatprep.subr.bf16.mxu0 %v3553_v38  ;;  %v3638_v37 = vld [vmem:[%s5279_s0 + $0x18] ss:$56 sps:$4 sm:$0xff]  }
  0x59   :  { %2348 = vmatprep.subr.bf16.mxu1 %v3556_v39  ;;  %v3641_v38 = vld [vmem:[%s5278_s1 + $0x470] ss:$8 sps:$4 sm:$0xff]  }
  0x5a   :  { %2060 = vmatmul.mubr.bf16.gmra.mxu0 %v3549_v40  ;;  %v3644_v39 = vld [vmem:[%s5278_s1 + $0x570] ss:$8 sps:$4 sm:$0xff]   ;;  %v3649_v40 = vld [vmem:[%s5278_s1 + $0x464] ss:$8 sps:$4 sm:$0xff]  }
  0x5b   :  { %2173 = vmatmul.mubr.bf16.gmra.mxu1 %v3550_v41  ;;  %2236 = vmatpush1.bf16.msra.mxu0 %v3551_v42  ;;  %v3652_v41 = vld [vmem:[%s5278_s1 + $0x564] ss:$8 sps:$4 sm:$0xff]  }
  0x5c   :  { %2349 = vmatpush1.bf16.msra.mxu1 %v3554_v43  ;;  %2237 = vmatprep.subr.bf16.mxu0 %v3559_v44  ;;  %v3653_v42 = vld [vmem:[%s5279_s0 + $0x84] ss:$56 sps:$4 sm:$0xff]   ;;  %v3647_v44 = vld [vmem:[%s5278_s1 + $0x460] ss:$8 sps:$4 sm:$0xff]  }
  0x5d   :  { %2350 = vmatprep.subr.bf16.mxu1 %v3562_v45  ;;  %2069 = vmatprep.mubr.bf16.mxu0 %v3563_v46  ;;  %v3655_v43 = vld [vmem:[%s5279_s0 + $0x8c] ss:$56 sps:$4 sm:$0xff]   ;;  %v3650_v45 = vld [vmem:[%s5278_s1 + $0x560] ss:$8 sps:$4 sm:$0xff]   ;;  %v3661_v46 = vld [vmem:[%s5278_s1 + $0x454] ss:$8 sps:$4 sm:$0xff]  }
  0x5e   :  { %2182 = vmatprep.mubr.bf16.mxu1 %v3565_v47  ;;  %v3664_v47 = vld [vmem:[%s5278_s1 + $0x554] ss:$8 sps:$4 sm:$0xff]  }
  0x5f   :  { %2238 = vmatpush1.bf16.msra.mxu0 %v3557_v48  ;;  %v3657_v48 = vld [vmem:[%s5279_s0 + $0x80] ss:$56 sps:$4 sm:$0xff]  }
  0x60   :  { %2351 = vmatpush1.bf16.msra.mxu1 %v3560_v49  ;;  %2239 = vmatprep.subr.bf16.mxu0 %v3571_v50  ;;  %v3658_v49 = vld [vmem:[%s5279_s0 + $0x88] ss:$56 sps:$4 sm:$0xff]   ;;  %v3659_v50 = vld [vmem:[%s5278_s1 + $0x450] ss:$8 sps:$4 sm:$0xff]  }
  0x61   :  { %2352 = vmatprep.subr.bf16.mxu1 %v3574_v51  ;;  %v3662_v51 = vld [vmem:[%s5278_s1 + $0x550] ss:$8 sps:$4 sm:$0xff]  }
  0x62   :  { %2070 = vmatmul.mubr.bf16.gmra.mxu0 %v3567_v52  ;;  %v3667_v52 = vld [vmem:[%s5278_s1 + $0x444] ss:$8 sps:$4 sm:$0xff]  }
  0x63   :  { %2183 = vmatmul.mubr.bf16.gmra.mxu1 %v3568_v53  ;;  %2240 = vmatpush2.bf16.msra.mxu0 %v3569_v54  ;;  %v3670_v53 = vld [vmem:[%s5278_s1 + $0x544] ss:$8 sps:$4 sm:$0xff]  }
  0x64   :  { %2353 = vmatpush2.bf16.msra.mxu1 %v3572_v55  ;;  %2241 = vmatprep.subr.bf16.mxu0 %v3577_v56  ;;  %v3671_v54 = vld [vmem:[%s5279_s0 + $0xf4] ss:$56 sps:$4 sm:$0xff]   ;;  %v3665_v56 = vld [vmem:[%s5278_s1 + $0x440] ss:$8 sps:$4 sm:$0xff]  }
  0x65   :  { %2354 = vmatprep.subr.bf16.mxu1 %v3580_v57  ;;  %2079 = vmatprep.mubr.bf16.mxu0 %v3581_v58  ;;  %v3673_v55 = vld [vmem:[%s5279_s0 + $0xfc] ss:$56 sps:$4 sm:$0xff]   ;;  %v3668_v57 = vld [vmem:[%s5278_s1 + $0x540] ss:$8 sps:$4 sm:$0xff]  }
  0x66   :  { %2192 = vmatprep.mubr.bf16.mxu1 %v3583_v59  ;;  %v3679_v58 = vld [vmem:[%s5278_s1 + $0x434] ss:$8 sps:$4 sm:$0xff]  }
  0x67   :  { %2242 = vmatpush2.bf16.msra.mxu0 %v3575_v60  ;;  %v3682_v59 = vld [vmem:[%s5278_s1 + $0x534] ss:$8 sps:$4 sm:$0xff]   ;;  %v3675_v60 = vld [vmem:[%s5279_s0 + $0xf0] ss:$56 sps:$4 sm:$0xff]  }
  0x68   :  { %2355 = vmatpush2.bf16.msra.mxu1 %v3578_v61  ;;  %2243 = vmatprep.subr.bf16.mxu0 %v3589_v62  ;;  %v3676_v61 = vld [vmem:[%s5279_s0 + $0xf8] ss:$56 sps:$4 sm:$0xff]  }
  0x69   :  { %2356 = vmatprep.subr.bf16.mxu1 %v3592_v63  ;;  %v3677_v62 = vld [vmem:[%s5278_s1 + $0x430] ss:$8 sps:$4 sm:$0xff]  }
  0x6a   :  { %2080 = vmatmul.mubr.bf16.gmra.mxu0 %v3585_v0  ;;  %v3680_v63 = vld [vmem:[%s5278_s1 + $0x530] ss:$8 sps:$4 sm:$0xff]   ;;  %v3685_v0 = vld [vmem:[%s5278_s1 + $0x424] ss:$8 sps:$4 sm:$0xff]  }
  0x6b   :  { %2193 = vmatmul.mubr.bf16.gmra.mxu1 %v3586_v1  ;;  %2244 = vmatpush2.bf16.msra.mxu0 %v3587_v2  ;;  %v3688_v1 = vld [vmem:[%s5278_s1 + $0x524] ss:$8 sps:$4 sm:$0xff]  }
  0x6c   :  { %2357 = vmatpush2.bf16.msra.mxu1 %v3590_v3  ;;  %2245 = vmatprep.subr.bf16.mxu0 %v3595_v4  ;;  %v3689_v2 = vld [vmem:[%s5279_s0 + $0x164] ss:$56 sps:$4 sm:$0xff]   ;;  %v3683_v4 = vld [vmem:[%s5278_s1 + $0x420] ss:$8 sps:$4 sm:$0xff]  }
  0x6d   :  { %2358 = vmatprep.subr.bf16.mxu1 %v3598_v5  ;;  %2089 = vmatprep.mubr.bf16.mxu0 %v3599_v6  ;;  %v3691_v3 = vld [vmem:[%s5279_s0 + $0x16c] ss:$56 sps:$4 sm:$0xff]   ;;  %v3686_v5 = vld [vmem:[%s5278_s1 + $0x520] ss:$8 sps:$4 sm:$0xff]   ;;  %v3697_v6 = vld [vmem:[%s5278_s1 + $0x414] ss:$8 sps:$4 sm:$0xff]  }
  0x6e   :  { %2202 = vmatprep.mubr.bf16.mxu1 %v3601_v7  ;;  %v3700_v7 = vld [vmem:[%s5278_s1 + $0x514] ss:$8 sps:$4 sm:$0xff]  }
  0x6f   :  { %2246 = vmatpush2.bf16.msra.mxu0 %v3593_v8  ;;  %v3693_v8 = vld [vmem:[%s5279_s0 + $0x160] ss:$56 sps:$4 sm:$0xff]  }
  0x70   :  { %2359 = vmatpush2.bf16.msra.mxu1 %v3596_v9  ;;  %2247 = vmatprep.subr.bf16.mxu0 %v3607_v10  ;;  %v3694_v9 = vld [vmem:[%s5279_s0 + $0x168] ss:$56 sps:$4 sm:$0xff]   ;;  %v3695_v10 = vld [vmem:[%s5278_s1 + $0x410] ss:$8 sps:$4 sm:$0xff]  }
  0x71   :  { %2360 = vmatprep.subr.bf16.mxu1 %v3610_v11  ;;  %v3698_v11 = vld [vmem:[%s5278_s1 + $0x510] ss:$8 sps:$4 sm:$0xff]  }
  0x72   :  { %2090 = vmatmul.mubr.bf16.gmra.mxu0 %v3603_v12  ;;  %v3703_v12 = vld [vmem:[%s5278_s1 + $0x404] ss:$8 sps:$4 sm:$0xff]  }
  0x73   :  { %2203 = vmatmul.mubr.bf16.gmra.mxu1 %v3604_v13  ;;  %2248 = vmatpush2.bf16.msra.mxu0 %v3605_v14  ;;  %v3706_v13 = vld [vmem:[%s5278_s1 + $0x504] ss:$8 sps:$4 sm:$0xff]  }
  0x74   :  { %2361 = vmatpush2.bf16.msra.mxu1 %v3608_v15  ;;  %2249 = vmatprep.subr.bf16.mxu0 %v3613_v16  ;;  %v3707_v14 = vld [vmem:[%s5279_s0 + $0x1d4] ss:$56 sps:$4 sm:$0xff]   ;;  %v3701_v16 = vld [vmem:[%s5278_s1 + $0x400] ss:$8 sps:$4 sm:$0xff]  }
  0x75   :  { %2362 = vmatprep.subr.bf16.mxu1 %v3616_v17  ;;  %2099 = vmatprep.mubr.bf16.mxu0 %v3617_v18  ;;  %v3709_v15 = vld [vmem:[%s5279_s0 + $0x1dc] ss:$56 sps:$4 sm:$0xff]   ;;  %v3704_v17 = vld [vmem:[%s5278_s1 + $0x500] ss:$8 sps:$4 sm:$0xff]  }
  0x76   :  { %2212 = vmatprep.mubr.bf16.mxu1 %v3619_v19  ;;  %v3715_v18 = vld [vmem:[%s5278_s1 + $0x4f4] ss:$8 sps:$4 sm:$0xff]  }
  0x77   :  { %2250 = vmatpush2.bf16.msra.mxu0 %v3611_v20  ;;  %v3718_v19 = vld [vmem:[%s5278_s1 + $0x5f4] ss:$8 sps:$4 sm:$0xff]   ;;  %v3711_v20 = vld [vmem:[%s5279_s0 + $0x1d0] ss:$56 sps:$4 sm:$0xff]  }
  0x78   :  { %2363 = vmatpush2.bf16.msra.mxu1 %v3614_v21  ;;  %2251 = vmatprep.subr.bf16.mxu0 %v3625_v22  ;;  %v3712_v21 = vld [vmem:[%s5279_s0 + $0x1d8] ss:$56 sps:$4 sm:$0xff]  }
  0x79   :  { %2364 = vmatprep.subr.bf16.mxu1 %v3628_v23  ;;  %v3713_v22 = vld [vmem:[%s5278_s1 + $0x4f0] ss:$8 sps:$4 sm:$0xff]  }
  0x7a   :  { %2100 = vmatmul.mubr.bf16.gmra.mxu0 %v3621_v24  ;;  %v3716_v23 = vld [vmem:[%s5278_s1 + $0x5f0] ss:$8 sps:$4 sm:$0xff]   ;;  %v3721_v24 = vld [vmem:[%s5278_s1 + $0x4e4] ss:$8 sps:$4 sm:$0xff]  }
  0x7b   :  { %2213 = vmatmul.mubr.bf16.gmra.mxu1 %v3622_v25  ;;  %2252 = vmatpush2.bf16.msra.mxu0 %v3623_v26  ;;  %v3724_v25 = vld [vmem:[%s5278_s1 + $0x5e4] ss:$8 sps:$4 sm:$0xff]  }
  0x7c   :  { %2365 = vmatpush2.bf16.msra.mxu1 %v3626_v27  ;;  %2253 = vmatprep.subr.bf16.mxu0 %v3631_v28  ;;  %v3725_v26 = vld [vmem:[%s5279_s0 + $0x244] ss:$56 sps:$4 sm:$0xff]   ;;  %v3719_v28 = vld [vmem:[%s5278_s1 + $0x4e0] ss:$8 sps:$4 sm:$0xff]  }
  0x7d   :  { %2366 = vmatprep.subr.bf16.mxu1 %v3634_v29  ;;  %2255 = vmatprep.mubr.bf16.mxu0 %v3637_v30  ;;  %v3727_v27 = vld [vmem:[%s5279_s0 + $0x24c] ss:$56 sps:$4 sm:$0xff]   ;;  %v3722_v29 = vld [vmem:[%s5278_s1 + $0x5e0] ss:$8 sps:$4 sm:$0xff]   ;;  %v3733_v30 = vld [vmem:[%s5278_s1 + $0x4d4] ss:$8 sps:$4 sm:$0xff]  }
  0x7e   :  { %2368 = vmatprep.mubr.bf16.mxu1 %v3640_v31  ;;  %v3736_v31 = vld [vmem:[%s5278_s1 + $0x5d4] ss:$8 sps:$4 sm:$0xff]  }
  0x7f   :  { %2254 = vmatpush2.bf16.msra.mxu0 %v3629_v32  ;;  %v3729_v32 = vld [vmem:[%s5279_s0 + $0x240] ss:$56 sps:$4 sm:$0xff]  }
  0x80   :  { %2367 = vmatpush2.bf16.msra.mxu1 %v3632_v33  ;;  %2449 = vmatprep.subr.bf16.mxu0 %v3643_v34  ;;  %v3730_v33 = vld [vmem:[%s5279_s0 + $0x248] ss:$56 sps:$4 sm:$0xff]   ;;  %v3731_v34 = vld [vmem:[%s5278_s1 + $0x4d0] ss:$8 sps:$4 sm:$0xff]  }
  0x81   :  { %2562 = vmatprep.subr.bf16.mxu1 %v3646_v35  ;;  %v3734_v35 = vld [vmem:[%s5278_s1 + $0x5d0] ss:$8 sps:$4 sm:$0xff]  }
  0x82   :  { %2256 = vmatmul.mubr.bf16.vlgmr.msra.gmra.mxu0 %v3635_v36  ;;  %v3739_v36 = vld [vmem:[%s5278_s1 + $0x4c4] ss:$8 sps:$4 sm:$0xff]  }
  0x83   :  { %2369 = vmatmul.mubr.bf16.vlgmr.msra.gmra.mxu1 %v3638_v37  ;;  %2450 = vmatpush1.bf16.msra.mxu0 %v3641_v38  ;;  %v3742_v37 = vld [vmem:[%s5278_s1 + $0x5c4] ss:$8 sps:$4 sm:$0xff]  }
  0x84   :  { %2563 = vmatpush1.bf16.msra.mxu1 %v3644_v39  ;;  %2451 = vmatprep.subr.bf16.mxu0 %v3649_v40  ;;  %v3743_v38 = vld [vmem:[%s5279_s0 + $0x2b4] ss:$56 sps:$4 sm:$0xff]   ;;  %v3737_v40 = vld [vmem:[%s5278_s1 + $0x4c0] ss:$8 sps:$4 sm:$0xff]  }
  0x85   :  { %2564 = vmatprep.subr.bf16.mxu1 %v3652_v41  ;;  %2265 = vmatprep.mubr.bf16.mxu0 %v3653_v42  ;;  %v3745_v39 = vld [vmem:[%s5279_s0 + $0x2bc] ss:$56 sps:$4 sm:$0xff]   ;;  %v3740_v41 = vld [vmem:[%s5278_s1 + $0x5c0] ss:$8 sps:$4 sm:$0xff]  }
  0x86   :  { %2378 = vmatprep.mubr.bf16.mxu1 %v3655_v43  ;;  %v3751_v42 = vld [vmem:[%s5278_s1 + $0x4b4] ss:$8 sps:$4 sm:$0xff]  }
  0x87   :  { %2452 = vmatpush1.bf16.msra.mxu0 %v3647_v44  ;;  %v3754_v43 = vld [vmem:[%s5278_s1 + $0x5b4] ss:$8 sps:$4 sm:$0xff]   ;;  %v3747_v44 = vld [vmem:[%s5279_s0 + $0x2b0] ss:$56 sps:$4 sm:$0xff]  }
  0x88   :  { %2565 = vmatpush1.bf16.msra.mxu1 %v3650_v45  ;;  %2453 = vmatprep.subr.bf16.mxu0 %v3661_v46  ;;  %v3748_v45 = vld [vmem:[%s5279_s0 + $0x2b8] ss:$56 sps:$4 sm:$0xff]  }
  0x89   :  { %2566 = vmatprep.subr.bf16.mxu1 %v3664_v47  ;;  %v3749_v46 = vld [vmem:[%s5278_s1 + $0x4b0] ss:$8 sps:$4 sm:$0xff]  }
  0x8a   :  { %2266 = vmatmul.mubr.bf16.gmra.mxu0 %v3657_v48  ;;  %v3752_v47 = vld [vmem:[%s5278_s1 + $0x5b0] ss:$8 sps:$4 sm:$0xff]   ;;  %v3757_v48 = vld [vmem:[%s5278_s1 + $0x4a4] ss:$8 sps:$4 sm:$0xff]  }
  0x8b   :  { %2379 = vmatmul.mubr.bf16.gmra.mxu1 %v3658_v49  ;;  %2454 = vmatpush1.bf16.msra.mxu0 %v3659_v50  ;;  %v3760_v49 = vld [vmem:[%s5278_s1 + $0x5a4] ss:$8 sps:$4 sm:$0xff]  }
  0x8c   :  { %2567 = vmatpush1.bf16.msra.mxu1 %v3662_v51  ;;  %2455 = vmatprep.subr.bf16.mxu0 %v3667_v52  ;;  %v3761_v50 = vld [vmem:[%s5279_s0 + $0x324] ss:$56 sps:$4 sm:$0xff]   ;;  %v3755_v52 = vld [vmem:[%s5278_s1 + $0x4a0] ss:$8 sps:$4 sm:$0xff]  }
  0x8d   :  { %2568 = vmatprep.subr.bf16.mxu1 %v3670_v53  ;;  %2275 = vmatprep.mubr.bf16.mxu0 %v3671_v54  ;;  %v3763_v51 = vld [vmem:[%s5279_s0 + $0x32c] ss:$56 sps:$4 sm:$0xff]   ;;  %v3758_v53 = vld [vmem:[%s5278_s1 + $0x5a0] ss:$8 sps:$4 sm:$0xff]   ;;  %v3769_v54 = vld [vmem:[%s5278_s1 + $0x494] ss:$8 sps:$4 sm:$0xff]  }
  0x8e   :  { %2388 = vmatprep.mubr.bf16.mxu1 %v3673_v55  ;;  %v3765_v55 = vld [vmem:[%s5279_s0 + $0x320] ss:$56 sps:$4 sm:$0xff]  }
  0x8f   :  { %2456 = vmatpush1.bf16.msra.mxu0 %v3665_v56  ;;  %v3772_v56 = vld [vmem:[%s5278_s1 + $0x594] ss:$8 sps:$4 sm:$0xff]  }
  0x90   :  { %2569 = vmatpush1.bf16.msra.mxu1 %v3668_v57  ;;  %2457 = vmatprep.subr.bf16.mxu0 %v3679_v58  ;;  %v3766_v57 = vld [vmem:[%s5279_s0 + $0x328] ss:$56 sps:$4 sm:$0xff]   ;;  %v3767_v58 = vld [vmem:[%s5278_s1 + $0x490] ss:$8 sps:$4 sm:$0xff]  }
  0x91   :  { %2570 = vmatprep.subr.bf16.mxu1 %v3682_v59  ;;  %v3770_v59 = vld [vmem:[%s5278_s1 + $0x590] ss:$8 sps:$4 sm:$0xff]  }
  0x92   :  { %2276 = vmatmul.mubr.bf16.gmra.mxu0 %v3675_v60  ;;  %v3775_v60 = vld [vmem:[%s5278_s1 + $0x484] ss:$8 sps:$4 sm:$0xff]  }
  0x93   :  { %2389 = vmatmul.mubr.bf16.gmra.mxu1 %v3676_v61  ;;  %2458 = vmatpush1.bf16.msra.mxu0 %v3677_v62  ;;  %v3778_v61 = vld [vmem:[%s5278_s1 + $0x584] ss:$8 sps:$4 sm:$0xff]  }
  0x94   :  { %2571 = vmatpush1.bf16.msra.mxu1 %v3680_v63  ;;  %2459 = vmatprep.subr.bf16.mxu0 %v3685_v0  ;;  %v3781_v62 = vld [vmem:[%s5279_s0 + $0x24] ss:$56 sps:$4 sm:$0xff]   ;;  %v3773_v0 = vld [vmem:[%s5278_s1 + $0x480] ss:$8 sps:$4 sm:$0xff]  }
  0x95   :  { %2572 = vmatprep.subr.bf16.mxu1 %v3688_v1  ;;  %2285 = vmatprep.mubr.bf16.mxu0 %v3689_v2  ;;  %v3784_v63 = vld [vmem:[%s5279_s0 + $0x2c] ss:$56 sps:$4 sm:$0xff]   ;;  %v3776_v1 = vld [vmem:[%s5278_s1 + $0x580] ss:$8 sps:$4 sm:$0xff]   ;;  %v3787_v2 = vld [vmem:[%s5278_s1 + $0x674] ss:$8 sps:$4 sm:$0xff]  }
  0x96   :  { %2398 = vmatprep.mubr.bf16.mxu1 %v3691_v3  ;;  %v3779_v3 = vld [vmem:[%s5279_s0 + $0x20] ss:$56 sps:$4 sm:$0xff]  }
  0x97   :  { %2460 = vmatpush1.bf16.msra.mxu0 %v3683_v4  ;;  %v3782_v4 = vld [vmem:[%s5279_s0 + $0x28] ss:$56 sps:$4 sm:$0xff]  }
  0x98   :  { %2573 = vmatpush1.bf16.msra.mxu1 %v3686_v5  ;;  %2461 = vmatprep.subr.bf16.mxu0 %v3697_v6  ;;  %v3785_v5 = vld [vmem:[%s5278_s1 + $0x670] ss:$8 sps:$4 sm:$0xff]   ;;  %v3790_v6 = vld [vmem:[%s5278_s1 + $0x664] ss:$8 sps:$4 sm:$0xff]  }
  0x99   :  { %2574 = vmatprep.subr.bf16.mxu1 %v3700_v7  ;;  %v3791_v7 = vld [vmem:[%s5279_s0 + $0x94] ss:$56 sps:$4 sm:$0xff]  }
  0x9a   :  { %2286 = vmatmul.mubr.bf16.gmra.mxu0 %v3693_v8  ;;  %v3793_v8 = vld [vmem:[%s5279_s0 + $0x9c] ss:$56 sps:$4 sm:$0xff]  }
  0x9b   :  { %2399 = vmatmul.mubr.bf16.gmra.mxu1 %v3694_v9  ;;  %2462 = vmatpush1.bf16.msra.mxu0 %v3695_v10  ;;  %v3788_v9 = vld [vmem:[%s5278_s1 + $0x660] ss:$8 sps:$4 sm:$0xff]   ;;  %v3799_v10 = vld [vmem:[%s5278_s1 + $0x654] ss:$8 sps:$4 sm:$0xff]  }
  0x9c   :  { %2575 = vmatpush1.bf16.msra.mxu1 %v3698_v11  ;;  %2463 = vmatprep.subr.bf16.mxu0 %v3703_v12  ;;  %v3795_v11 = vld [vmem:[%s5279_s0 + $0x90] ss:$56 sps:$4 sm:$0xff]  }
  0x9d   :  { %2576 = vmatprep.subr.bf16.mxu1 %v3706_v13  ;;  %2295 = vmatprep.mubr.bf16.mxu0 %v3707_v14  ;;  %v3796_v12 = vld [vmem:[%s5279_s0 + $0x98] ss:$56 sps:$4 sm:$0xff]   ;;  %v3800_v14 = vld [vmem:[%s5279_s0 + $0x104] ss:$56 sps:$4 sm:$0xff]  }
  0x9e   :  { %2408 = vmatprep.mubr.bf16.mxu1 %v3709_v15  ;;  %v3797_v13 = vld [vmem:[%s5278_s1 + $0x650] ss:$8 sps:$4 sm:$0xff]   ;;  %v3802_v15 = vld [vmem:[%s5279_s0 + $0x10c] ss:$56 sps:$4 sm:$0xff]  }
  0x9f   :  { %2464 = vmatpush1.bf16.msra.mxu0 %v3701_v16  ;;  %v3808_v16 = vld [vmem:[%s5278_s1 + $0x644] ss:$8 sps:$4 sm:$0xff]  }
  0xa0   :  { %2577 = vmatpush1.bf16.msra.mxu1 %v3704_v17  ;;  %2465 = vmatprep.subr.bf16.mxu0 %v3715_v18  ;;  %v3806_v17 = vld [vmem:[%s5278_s1 + $0x640] ss:$8 sps:$4 sm:$0xff]   ;;  %v3811_v18 = vld [vmem:[%s5278_s1 + $0x634] ss:$8 sps:$4 sm:$0xff]  }
  0xa1   :  { %2578 = vmatprep.subr.bf16.mxu1 %v3718_v19  ;;  %v3804_v19 = vld [vmem:[%s5279_s0 + $0x100] ss:$56 sps:$4 sm:$0xff]  }
  0xa2   :  { %2296 = vmatmul.mubr.bf16.gmra.mxu0 %v3711_v20  ;;  %v3805_v20 = vld [vmem:[%s5279_s0 + $0x108] ss:$56 sps:$4 sm:$0xff]  }
  0xa3   :  { %2409 = vmatmul.mubr.bf16.gmra.mxu1 %v3712_v21  ;;  %2466 = vmatpush2.bf16.msra.mxu0 %v3713_v22  ;;  %v3812_v21 = vld [vmem:[%s5279_s0 + $0x174] ss:$56 sps:$4 sm:$0xff]  }
  0xa4   :  { %2579 = vmatpush2.bf16.msra.mxu1 %v3716_v23  ;;  %2467 = vmatprep.subr.bf16.mxu0 %v3721_v24  ;;  %v3814_v22 = vld [vmem:[%s5279_s0 + $0x17c] ss:$56 sps:$4 sm:$0xff]   ;;  %v3809_v23 = vld [vmem:[%s5278_s1 + $0x630] ss:$8 sps:$4 sm:$0xff]   ;;  %v3820_v24 = vld [vmem:[%s5278_s1 + $0x624] ss:$8 sps:$4 sm:$0xff]  }
  0xa5   :  { %2580 = vmatprep.subr.bf16.mxu1 %v3724_v25  ;;  %2305 = vmatprep.mubr.bf16.mxu0 %v3725_v26  ;;  %v3818_v25 = vld [vmem:[%s5278_s1 + $0x620] ss:$8 sps:$4 sm:$0xff]   ;;  %v3829_v26 = vld [vmem:[%s5278_s1 + $0x614] ss:$8 sps:$4 sm:$0xff]  }
  0xa6   :  { %2418 = vmatprep.mubr.bf16.mxu1 %v3727_v27  ;;  %v3816_v27 = vld [vmem:[%s5279_s0 + $0x170] ss:$56 sps:$4 sm:$0xff]  }
  0xa7   :  { %2468 = vmatpush2.bf16.msra.mxu0 %v3719_v28  ;;  %v3817_v28 = vld [vmem:[%s5279_s0 + $0x178] ss:$56 sps:$4 sm:$0xff]  }
  0xa8   :  { %2581 = vmatpush2.bf16.msra.mxu1 %v3722_v29  ;;  %2469 = vmatprep.subr.bf16.mxu0 %v3733_v30  ;;  %v3821_v29 = vld [vmem:[%s5279_s0 + $0x1e4] ss:$56 sps:$4 sm:$0xff]  }
  0xa9   :  { %2582 = vmatprep.subr.bf16.mxu1 %v3736_v31  ;;  %v3823_v30 = vld [vmem:[%s5279_s0 + $0x1ec] ss:$56 sps:$4 sm:$0xff]   ;;  %v3827_v31 = vld [vmem:[%s5278_s1 + $0x610] ss:$8 sps:$4 sm:$0xff]  }
  0xaa   :  { %2306 = vmatmul.mubr.bf16.gmra.mxu0 %v3729_v32  ;;  %v3832_v32 = vld [vmem:[%s5278_s1 + $0x604] ss:$8 sps:$4 sm:$0xff]  }
  0xab   :  { %2419 = vmatmul.mubr.bf16.gmra.mxu1 %v3730_v33  ;;  %2470 = vmatpush2.bf16.msra.mxu0 %v3731_v34  ;;  %v3830_v33 = vld [vmem:[%s5278_s1 + $0x600] ss:$8 sps:$4 sm:$0xff]   ;;  %v3841_v34 = vld [vmem:[%s5278_s1 + $0x6b4] ss:$8 sps:$4 sm:$0xff]  }
  0xac   :  { %2583 = vmatpush2.bf16.msra.mxu1 %v3734_v35  ;;  %2471 = vmatprep.subr.bf16.mxu0 %v3739_v36  ;;  %v3825_v35 = vld [vmem:[%s5279_s0 + $0x1e0] ss:$56 sps:$4 sm:$0xff]  }
  0xad   :  { %2584 = vmatprep.subr.bf16.mxu1 %v3742_v37  ;;  %2315 = vmatprep.mubr.bf16.mxu0 %v3743_v38  ;;  %v3826_v36 = vld [vmem:[%s5279_s0 + $0x1e8] ss:$56 sps:$4 sm:$0xff]   ;;  %v3833_v37 = vld [vmem:[%s5279_s0 + $0x254] ss:$56 sps:$4 sm:$0xff]  }
  0xae   :  { %2428 = vmatprep.mubr.bf16.mxu1 %v3745_v39  ;;  %v3835_v38 = vld [vmem:[%s5279_s0 + $0x25c] ss:$56 sps:$4 sm:$0xff]   ;;  %v3839_v39 = vld [vmem:[%s5278_s1 + $0x6b0] ss:$8 sps:$4 sm:$0xff]  }
  0xaf   :  { %2472 = vmatpush2.bf16.msra.mxu0 %v3737_v40  ;;  %v3850_v40 = vld [vmem:[%s5278_s1 + $0x6a4] ss:$8 sps:$4 sm:$0xff]  }
  0xb0   :  { %2585 = vmatpush2.bf16.msra.mxu1 %v3740_v41  ;;  %2473 = vmatprep.subr.bf16.mxu0 %v3751_v42  ;;  %v3848_v41 = vld [vmem:[%s5278_s1 + $0x6a0] ss:$8 sps:$4 sm:$0xff]   ;;  %v3853_v42 = vld [vmem:[%s5278_s1 + $0x694] ss:$8 sps:$4 sm:$0xff]  }
  0xb1   :  { %2586 = vmatprep.subr.bf16.mxu1 %v3754_v43  ;;  %v3837_v43 = vld [vmem:[%s5279_s0 + $0x250] ss:$56 sps:$4 sm:$0xff]  }
  0xb2   :  { %2316 = vmatmul.mubr.bf16.gmra.mxu0 %v3747_v44  ;;  %v3838_v44 = vld [vmem:[%s5279_s0 + $0x258] ss:$56 sps:$4 sm:$0xff]  }
  0xb3   :  { %2429 = vmatmul.mubr.bf16.gmra.mxu1 %v3748_v45  ;;  %2474 = vmatpush2.bf16.msra.mxu0 %v3749_v46  ;;  %v3842_v45 = vld [vmem:[%s5279_s0 + $0x2c4] ss:$56 sps:$4 sm:$0xff]  }
  0xb4   :  { %2587 = vmatpush2.bf16.msra.mxu1 %v3752_v47  ;;  %2475 = vmatprep.subr.bf16.mxu0 %v3757_v48  ;;  %v3844_v46 = vld [vmem:[%s5279_s0 + $0x2cc] ss:$56 sps:$4 sm:$0xff]   ;;  %v3851_v47 = vld [vmem:[%s5278_s1 + $0x690] ss:$8 sps:$4 sm:$0xff]  }
  0xb5   :  { %2588 = vmatprep.subr.bf16.mxu1 %v3760_v49  ;;  %2325 = vmatprep.mubr.bf16.mxu0 %v3761_v50  ;;  %v3862_v48 = vld [vmem:[%s5278_s1 + $0x684] ss:$8 sps:$4 sm:$0xff]   ;;  %v3860_v49 = vld [vmem:[%s5278_s1 + $0x680] ss:$8 sps:$4 sm:$0xff]  }
  0xb6   :  { %2438 = vmatprep.mubr.bf16.mxu1 %v3763_v51  ;;  %v3846_v50 = vld [vmem:[%s5279_s0 + $0x2c0] ss:$56 sps:$4 sm:$0xff]  }
  0xb7   :  { %2476 = vmatpush2.bf16.msra.mxu0 %v3755_v52  ;;  %v3847_v51 = vld [vmem:[%s5279_s0 + $0x2c8] ss:$56 sps:$4 sm:$0xff]   ;;  %v3854_v52 = vld [vmem:[%s5279_s0 + $0x334] ss:$56 sps:$4 sm:$0xff]  }
  0xb8   :  { %2589 = vmatpush2.bf16.msra.mxu1 %v3758_v53  ;;  %2477 = vmatprep.subr.bf16.mxu0 %v3769_v54  ;;  %v3856_v53 = vld [vmem:[%s5279_s0 + $0x33c] ss:$56 sps:$4 sm:$0xff]   ;;  %v3858_v54 = vld [vmem:[%s5279_s0 + $0x330] ss:$56 sps:$4 sm:$0xff]  }
  0xb9   :  { %2590 = vmatprep.subr.bf16.mxu1 %v3772_v56  ;;  %v3865_v56 = vld [vmem:[%s5279_s0 + $0x34] ss:$56 sps:$4 sm:$0xff]  }
  0xba   :  { %2326 = vmatmul.mubr.bf16.gmra.mxu0 %v3765_v55  ;;  %v3859_v55 = vld [vmem:[%s5279_s0 + $0x338] ss:$56 sps:$4 sm:$0xff]  }
  0xbb   :  { %2439 = vmatmul.mubr.bf16.gmra.mxu1 %v3766_v57  ;;  %2478 = vmatpush2.bf16.msra.mxu0 %v3767_v58  ;;  %v3868_v57 = vld [vmem:[%s5279_s0 + $0x1f4] ss:$56 sps:$4 sm:$0xff]   ;;  %v3863_v58 = vld [vmem:[%s5279_s0 + $0x30] ss:$56 sps:$4 sm:$0xff]  }
  0xbc   :  { %2591 = vmatpush2.bf16.msra.mxu1 %v3770_v59  ;;  %2479 = vmatprep.subr.bf16.mxu0 %v3775_v60  ;;  %v3866_v59 = vld [vmem:[%s5279_s0 + $0x1f0] ss:$56 sps:$4 sm:$0xff]   ;;  %v3869_v60 = vld [vmem:[%s5279_s0 + $0xa4] ss:$56 sps:$4 sm:$0xff]  }
  0xbd   :  { %2592 = vmatprep.subr.bf16.mxu1 %v3778_v61  ;;  %2481 = vmatprep.mubr.bf16.mxu0 %v3781_v62  ;;  %v3871_v61 = vld [vmem:[%s5279_s0 + $0x264] ss:$56 sps:$4 sm:$0xff]  }
  0xbe   :  { %2594 = vmatprep.mubr.bf16.mxu1 %v3784_v63 }
  0xbf   :  { %2480 = vmatpush2.bf16.msra.mxu0 %v3773_v0 }
  0xc0   :  { %2593 = vmatpush2.bf16.msra.mxu1 %v3776_v1  ;;  %2675 = vmatprep.subr.bf16.mxu0 %v3787_v2 }
  0xc1   :  { %3371 = vmatprep.subr.bf16.mxu1 %v3787_v2 }
  0xc2   :  { %2482 = vmatmul.mubr.bf16.vlgmr.msra.gmra.mxu0 %v3779_v3 }
  0xc3   :  { %2595 = vmatmul.mubr.bf16.vlgmr.msra.gmra.mxu1 %v3782_v4  ;;  %2676 = vmatpush1.bf16.msra.mxu0 %v3785_v5 }
  0xc4   :  { %3383 = vmatpush1.bf16.msra.mxu1 %v3785_v5  ;;  %2677 = vmatprep.subr.bf16.mxu0 %v3790_v6 }
  0xc5   :  { %3372 = vmatprep.subr.bf16.mxu1 %v3790_v6  ;;  %2491 = vmatprep.mubr.bf16.mxu0 %v3791_v7  ;;  %v3873_v6 = vld [vmem:[%s5279_s0 + $0xa0] ss:$56 sps:$4 sm:$0xff]  }
  0xc6   :  { %2604 = vmatprep.mubr.bf16.mxu1 %v3793_v8  ;;  %v3874_v7 = vld [vmem:[%s5279_s0 + $0x260] ss:$56 sps:$4 sm:$0xff]  }
  0xc7   :  { %2678 = vmatpush1.bf16.msra.mxu0 %v3788_v9 }
  0xc8   :  { %3384 = vmatpush1.bf16.msra.mxu1 %v3788_v9  ;;  %2679 = vmatprep.subr.bf16.mxu0 %v3799_v10  ;;  %v3875_v9 = vld [vmem:[%s5279_s0 + $0x114] ss:$56 sps:$4 sm:$0xff]  }
  0xc9   :  { %3373 = vmatprep.subr.bf16.mxu1 %v3799_v10  ;;  %v3877_v10 = vld [vmem:[%s5279_s0 + $0x2d4] ss:$56 sps:$4 sm:$0xff]  }
  0xca   :  { %2492 = vmatmul.mubr.bf16.gmra.mxu0 %v3795_v11 }
  0xcb   :  { %2605 = vmatmul.mubr.bf16.gmra.mxu1 %v3796_v12  ;;  %2680 = vmatpush1.bf16.msra.mxu0 %v3797_v13 }
  0xcc   :  { %3385 = vmatpush1.bf16.msra.mxu1 %v3797_v13  ;;  %2501 = vmatprep.mubr.bf16.mxu0 %v3800_v14 }
  0xcd   :  { %2614 = vmatprep.mubr.bf16.mxu1 %v3802_v15  ;;  %2681 = vmatprep.subr.bf16.mxu0 %v3808_v16 }
  0xce   :  { %3374 = vmatprep.subr.bf16.mxu1 %v3808_v16 }
  0xcf   :  { %2682 = vmatpush1.bf16.msra.mxu0 %v3806_v17 }
  0xd0   :  { %3386 = vmatpush1.bf16.msra.mxu1 %v3806_v17  ;;  %2683 = vmatprep.subr.bf16.mxu0 %v3811_v18 }
  0xd1   :  { %3375 = vmatprep.subr.bf16.mxu1 %v3811_v18 }
  0xd2   :  { %2502 = vmatmul.mubr.bf16.gmra.mxu0 %v3804_v19 }
  0xd3   :  { %2615 = vmatmul.mubr.bf16.gmra.mxu1 %v3805_v20  ;;  %2511 = vmatprep.mubr.bf16.mxu0 %v3812_v21 }
  0xd4   :  { %2624 = vmatprep.mubr.bf16.mxu1 %v3814_v22  ;;  %2684 = vmatpush1.bf16.msra.mxu0 %v3809_v23  ;;  %v3879_v22 = vld [vmem:[%s5279_s0 + $0x110] ss:$56 sps:$4 sm:$0xff]  }
  0xd5   :  { %3387 = vmatpush1.bf16.msra.mxu1 %v3809_v23  ;;  %2685 = vmatprep.subr.bf16.mxu0 %v3820_v24  ;;  %v3880_v23 = vld [vmem:[%s5279_s0 + $0x2d0] ss:$56 sps:$4 sm:$0xff]  }
  0xd6   :  { %3376 = vmatprep.subr.bf16.mxu1 %v3820_v24 }
  0xd8   :  { %2686 = vmatpush1.bf16.msra.mxu0 %v3818_v25 }
  0xd9   :  { %3388 = vmatpush1.bf16.msra.mxu1 %v3818_v25  ;;  %2687 = vmatprep.subr.bf16.mxu0 %v3829_v26  ;;  %v3881_v25 = vld [vmem:[%s5279_s0 + $0x184] ss:$56 sps:$4 sm:$0xff]  }
  0xda   :  { %3377 = vmatprep.subr.bf16.mxu1 %v3829_v26  ;;  %2512 = vmatmul.mubr.bf16.gmra.mxu0 %v3816_v27  ;;  %v3883_v26 = vld [vmem:[%s5279_s0 + $0x344] ss:$56 sps:$4 sm:$0xff]  }
  0xdb   :  { %2625 = vmatmul.mubr.bf16.gmra.mxu1 %v3817_v28  ;;  %2521 = vmatprep.mubr.bf16.mxu0 %v3821_v29 }
  0xdc   :  { %2634 = vmatprep.mubr.bf16.mxu1 %v3823_v30  ;;  %2688 = vmatpush1.bf16.msra.mxu0 %v3827_v31 }
  0xdd   :  { %3389 = vmatpush1.bf16.msra.mxu1 %v3827_v31  ;;  %2689 = vmatprep.subr.bf16.mxu0 %v3832_v32 }
  0xde   :  { %3378 = vmatprep.subr.bf16.mxu1 %v3832_v32 }
  0xe0   :  { %2690 = vmatpush1.bf16.msra.mxu0 %v3830_v33 }
  0xe1   :  { %3390 = vmatpush1.bf16.msra.mxu1 %v3830_v33  ;;  %2699 = vmatprep.subr.bf16.mxu0 %v3841_v34 }
  0xe2   :  { %3379 = vmatprep.subr.bf16.mxu1 %v3841_v34  ;;  %2522 = vmatmul.mubr.bf16.gmra.mxu0 %v3825_v35 }
  0xe3   :  { %2635 = vmatmul.mubr.bf16.gmra.mxu1 %v3826_v36  ;;  %2531 = vmatprep.mubr.bf16.mxu0 %v3833_v37 }
  0xe4   :  { %2644 = vmatprep.mubr.bf16.mxu1 %v3835_v38  ;;  %2700 = vmatpush2.bf16.msra.mxu0 %v3839_v39  ;;  %v3885_v38 = vld [vmem:[%s5279_s0 + $0x180] ss:$56 sps:$4 sm:$0xff]  }
  0xe5   :  { %3391 = vmatpush2.bf16.msra.mxu1 %v3839_v39  ;;  %2701 = vmatprep.subr.bf16.mxu0 %v3850_v40  ;;  %v3886_v39 = vld [vmem:[%s5279_s0 + $0x340] ss:$56 sps:$4 sm:$0xff]  }
  0xe6   :  { %3380 = vmatprep.subr.bf16.mxu1 %v3850_v40 }
  0xe8   :  { %2702 = vmatpush2.bf16.msra.mxu0 %v3848_v41 }
  0xe9   :  { %3392 = vmatpush2.bf16.msra.mxu1 %v3848_v41  ;;  %2703 = vmatprep.subr.bf16.mxu0 %v3853_v42 }
  0xea   :  { %3381 = vmatprep.subr.bf16.mxu1 %v3853_v42  ;;  %2532 = vmatmul.mubr.bf16.gmra.mxu0 %v3837_v43 }
  0xeb   :  { %2645 = vmatmul.mubr.bf16.gmra.mxu1 %v3838_v44  ;;  %2541 = vmatprep.mubr.bf16.mxu0 %v3842_v45 }
  0xec   :  { %2654 = vmatprep.mubr.bf16.mxu1 %v3844_v46  ;;  %2704 = vmatpush2.bf16.msra.mxu0 %v3851_v47 }
  0xed   :  { %3393 = vmatpush2.bf16.msra.mxu1 %v3851_v47  ;;  %2705 = vmatprep.subr.bf16.mxu0 %v3862_v48 }
  0xee   :  { %3382 = vmatprep.subr.bf16.mxu1 %v3862_v48 }
  0xf0   :  { %2706 = vmatpush2.bf16.msra.mxu0 %v3860_v49 }
  0xf1   :  { %3394 = vmatpush2.bf16.msra.mxu1 %v3860_v49 }
  0xf2   :  { %2542 = vmatmul.mubr.bf16.gmra.mxu0 %v3846_v50 }
  0xf3   :  { %2655 = vmatmul.mubr.bf16.gmra.mxu1 %v3847_v51  ;;  %2551 = vmatprep.mubr.bf16.mxu0 %v3854_v52 }
  0xf4   :  { %2664 = vmatprep.mubr.bf16.mxu1 %v3856_v53 }
  0xfa   :  { %2552 = vmatmul.mubr.bf16.gmra.mxu0 %v3858_v54 }
  0xfb   :  { %2665 = vmatmul.mubr.bf16.gmra.mxu1 %v3859_v55  ;;  %3331 = vmatprep.mubr.msk.bf16.mxu0 %vm1972_vm0, %v3865_v56 }
  0xfc   :  { %3335 = vmatprep.mubr.msk.bf16.mxu1 %vm1972_vm0, %v3868_v57 }
 0x102   :  { %v2031_v62 = vpop.f32.mrf.mxu0  ;;  %2708 = vmatmul.mubr.bf16.vlgmr.msra.gmra.mxu0 %v3863_v58 }
 0x103   :  { %v2144_v63 = vpop.f32.mrf.mxu1  ;;  %2748 = vmatmul.mubr.bf16.vlgmr.msra.gmra.mxu1 %v3866_v59  ;;  %3332 = vmatprep.mubr.msk.bf16.mxu0 %vm1972_vm0, %v3869_v60 }
 0x104   :  { %v4858_v0 = vadd.f32 %v2144_v63, %v2031_v62  ;;  %3336 = vmatprep.mubr.msk.bf16.mxu1 %vm1972_vm0, %v3871_v61  ;;  %v2033_v1 = vpop.f32.mrf.mxu0 }
 0x105   :  { %v2146_v2 = vpop.f32.mrf.mxu1 }
 0x106   :  { %v4862_v3 = vadd.f32 %v2146_v2, %v2033_v1  ;;  %v2035_v4 = vpop.f32.mrf.mxu0 }
 0x107   :  { %v2148_v5 = vpop.f32.mrf.mxu1 }
 0x108   :  { %v4870_v8 = vadd.f32 %v2148_v5, %v2035_v4  ;;  %v2037_v11 = vpop.f32.mrf.mxu0 }
 0x109   :  { %v2150_v12 = vpop.f32.mrf.mxu1 }
 0x10a   :  { %v4878_v13 = vadd.f32 %v2150_v12, %v2037_v11  ;;  %v2041_v14 = vpop.f32.mrf.mxu0  ;;  %2718 = vmatmul.mubr.bf16.gmra.mxu0 %v3873_v6 }
 0x10b   :  { %v2154_v15 = vpop.f32.mrf.mxu1  ;;  %2758 = vmatmul.mubr.bf16.gmra.mxu1 %v3874_v7  ;;  %3333 = vmatprep.mubr.msk.bf16.mxu0 %vm1972_vm0, %v3875_v9 }
 0x10c   :  { %v4880_v16 = vadd.f32 %v2154_v15, %v2041_v14  ;;  %3337 = vmatprep.mubr.msk.bf16.mxu1 %vm1972_vm0, %v3877_v10  ;;  %v2043_v17 = vpop.f32.mrf.mxu0 }
 0x10d   :  { %v2156_v18 = vpop.f32.mrf.mxu1 }
 0x10e   :  { %v4884_v19 = vadd.f32 %v2156_v18, %v2043_v17  ;;  %v2045_v20 = vpop.f32.mrf.mxu0 }
 0x10f   :  { %v2158_v21 = vpop.f32.mrf.mxu1 }
 0x110   :  { %v4892_v24 = vadd.f32 %v2158_v21, %v2045_v20  ;;  %v2047_v27 = vpop.f32.mrf.mxu0 }
 0x111   :  { %v2160_v28 = vpop.f32.mrf.mxu1 }
 0x112   :  { %v4900_v29 = vadd.f32 %v2160_v28, %v2047_v27  ;;  %v2051_v30 = vpop.f32.mrf.mxu0  ;;  %2728 = vmatmul.mubr.bf16.gmra.mxu0 %v3879_v22 }
 0x113   :  { %v2164_v31 = vpop.f32.mrf.mxu1  ;;  %2768 = vmatmul.mubr.bf16.gmra.mxu1 %v3880_v23  ;;  %3334 = vmatprep.mubr.msk.bf16.mxu0 %vm1972_vm0, %v3881_v25 }
 0x114   :  { %v4902_v32 = vadd.f32 %v2164_v31, %v2051_v30  ;;  %3338 = vmatprep.mubr.msk.bf16.mxu1 %vm1972_vm0, %v3883_v26  ;;  %v2053_v33 = vpop.f32.mrf.mxu0 }
 0x115   :  { %v2166_v34 = vpop.f32.mrf.mxu1 }
 0x116   :  { %v4906_v35 = vadd.f32 %v2166_v34, %v2053_v33  ;;  %v2055_v36 = vpop.f32.mrf.mxu0 }
 0x117   :  { %v2168_v37 = vpop.f32.mrf.mxu1 }
 0x118   :  { %v4914_v40 = vadd.f32 %v2168_v37, %v2055_v36  ;;  %v2057_v41 = vpop.f32.mrf.mxu0 }
 0x119   :  { %v2170_v42 = vpop.f32.mrf.mxu1 }
 0x11a   :  { %v4916_v43 = vadd.f32 %v2170_v42, %v2057_v41  ;;  %v2061_v44 = vpop.f32.mrf.mxu0  ;;  %2738 = vmatmul.mubr.bf16.gmra.mxu0 %v3885_v38 }
 0x11b   :  { %v2174_v45 = vpop.f32.mrf.mxu1  ;;  %2778 = vmatmul.mubr.bf16.gmra.mxu1 %v3886_v39 }
 0x11c   :  { %v4918_v46 = vadd.f32 %v2174_v45, %v2061_v44  ;;  %v2063_v47 = vpop.f32.mrf.mxu0 }
 0x11d   :  { %v2176_v48 = vpop.f32.mrf.mxu1 }
 0x11e   :  { %v4920_v49 = vadd.f32 %v2176_v48, %v2063_v47  ;;  %v2065_v50 = vpop.f32.mrf.mxu0 }
 0x11f   :  { %v2178_v51 = vpop.f32.mrf.mxu1 }
 0x120   :  { %v4922_v52 = vadd.f32 %v2178_v51, %v2065_v50  ;;  %v2067_v53 = vpop.f32.mrf.mxu0 }
 0x121   :  { %v2180_v54 = vpop.f32.mrf.mxu1 }
 0x122   :  { %v4924_v55 = vadd.f32 %v2180_v54, %v2067_v53  ;;  %v2071_v56 = vpop.f32.mrf.mxu0 }
 0x123   :  { %v2184_v57 = vpop.f32.mrf.mxu1 }
 0x124   :  { %v4926_v58 = vadd.f32 %v2184_v57, %v2071_v56  ;;  %v2073_v59 = vpop.f32.mrf.mxu0 }
 0x125   :  { %v2186_v60 = vpop.f32.mrf.mxu1 }
 0x126   :  { %v4928_v61 = vadd.f32 %v2186_v60, %v2073_v59  ;;  %v2075_v62 = vpop.f32.mrf.mxu0 }
 0x127   :  { %v2188_v63 = vpop.f32.mrf.mxu1 }
 0x128   :  { %v4930_v1 = vadd.f32 %v2188_v63, %v2075_v62  ;;  %v2077_v2 = vpop.f32.mrf.mxu0 }
 0x129   :  { %v2190_v4 = vpop.f32.mrf.mxu1 }
 0x12a   :  { %v4932_v5 = vadd.f32 %v2190_v4, %v2077_v2  ;;  %v2081_v6 = vpop.f32.mrf.mxu0 }
 0x12b   :  { %v2194_v7 = vpop.f32.mrf.mxu1 }
 0x12c   :  { %v4934_v9 = vadd.f32 %v2194_v7, %v2081_v6  ;;  %v2083_v10 = vpop.f32.mrf.mxu0 }
 0x12d   :  { %v2196_v11 = vpop.f32.mrf.mxu1 }
 0x12e   :  { %v4936_v12 = vadd.f32 %v2196_v11, %v2083_v10  ;;  %v2085_v14 = vpop.f32.mrf.mxu0 }
 0x12f   :  { %v2198_v15 = vpop.f32.mrf.mxu1 }
 0x130   :  { %v4938_v17 = vadd.f32 %v2198_v15, %v2085_v14  ;;  %v2087_v18 = vpop.f32.mrf.mxu0 }
 0x131   :  { %v2200_v20 = vpop.f32.mrf.mxu1 }
 0x132   :  { %v4940_v21 = vadd.f32 %v2200_v20, %v2087_v18  ;;  %v2091_v22 = vpop.f32.mrf.mxu0 }
 0x133   :  { %v2204_v23 = vpop.f32.mrf.mxu1 }
 0x134   :  { %v4942_v25 = vadd.f32 %v2204_v23, %v2091_v22  ;;  %v2093_v26 = vpop.f32.mrf.mxu0 }
 0x135   :  { %v2206_v27 = vpop.f32.mrf.mxu1 }
 0x136   :  { %v4944_v28 = vadd.f32 %v2206_v27, %v2093_v26  ;;  %v2095_v30 = vpop.f32.mrf.mxu0 }
 0x137   :  { %v2208_v31 = vpop.f32.mrf.mxu1 }
 0x138   :  { %v4946_v33 = vadd.f32 %v2208_v31, %v2095_v30  ;;  %v2097_v34 = vpop.f32.mrf.mxu0 }
 0x139   :  { %v2210_v36 = vpop.f32.mrf.mxu1 }
 0x13a   :  { %v4948_v37 = vadd.f32 %v2210_v36, %v2097_v34  ;;  %v2101_v38 = vpop.f32.mrf.mxu0 }
 0x13b   :  { %v2214_v39 = vpop.f32.mrf.mxu1 }
 0x13c   :  { %v4950_v41 = vadd.f32 %v2214_v39, %v2101_v38  ;;  %v2103_v42 = vpop.f32.mrf.mxu0 }
 0x13d   :  { %v2216_v44 = vpop.f32.mrf.mxu1 }
 0x13e   :  { %v4952_v45 = vadd.f32 %v2216_v44, %v2103_v42  ;;  %v2105_v47 = vpop.f32.mrf.mxu0 }
 0x13f   :  { %v2218_v48 = vpop.f32.mrf.mxu1 }
 0x140   :  { %v4954_v50 = vadd.f32 %v2218_v48, %v2105_v47  ;;  %v2107_v51 = vpop.f32.mrf.mxu0 }
 0x141   :  { %v2220_v53 = vpop.f32.mrf.mxu1 }
 0x142   :  { %v4956_v54 = vadd.f32 %v2220_v53, %v2107_v51  ;;  %v2257_v56 = vpop.f32.mrf.mxu0 }
 0x143   :  { %v2370_v57 = vpop.f32.mrf.mxu1  ;;  %v2258_v59 = vadd.f32 %v2257_v56, %v4858_v0 }
 0x144   :  { %v2259_v60 = vpop.f32.mrf.mxu0 }
 0x145   :  { %v2372_v62 = vpop.f32.mrf.mxu1  ;;  %v4959_v63 = vadd.f32 %v2370_v57, %v2258_v59  ;;  %v2260_v2 = vadd.f32 %v2259_v60, %v4862_v3 }
 0x146   :  { %v2261_v4 = vpop.f32.mrf.mxu0 }
 0x147   :  { %v2374_v6 = vpop.f32.mrf.mxu1  ;;  %v4962_v7 = vadd.f32 %v2372_v62, %v2260_v2  ;;  %v2262_v10 = vadd.f32 %v2261_v4, %v4870_v8 }
 0x148   :  { %v2263_v11 = vpop.f32.mrf.mxu0 }
 0x149   :  { %v2376_v14 = vpop.f32.mrf.mxu1  ;;  %v4965_v15 = vadd.f32 %v2374_v6, %v2262_v10  ;;  %v2264_v18 = vadd.f32 %v2263_v11, %v4878_v13 }
 0x14a   :  { %v2267_v20 = vpop.f32.mrf.mxu0 }
 0x14b   :  { %v2380_v0 = vpop.f32.mrf.mxu1  ;;  %v4968_v22 = vadd.f32 %v2376_v14, %v2264_v18  ;;  %v2268_v23 = vadd.f32 %v2267_v20, %v4880_v16 }
 0x14c   :  { %v2269_v26 = vpop.f32.mrf.mxu0 }
 0x14d   :  { %v2382_v3 = vpop.f32.mrf.mxu1  ;;  %v4971_v27 = vadd.f32 %v2380_v0, %v2268_v23  ;;  %v2270_v30 = vadd.f32 %v2269_v26, %v4884_v19 }
 0x14e   :  { %v2271_v31 = vpop.f32.mrf.mxu0 }
 0x14f   :  { %v2384_v8 = vpop.f32.mrf.mxu1  ;;  %v4974_v34 = vadd.f32 %v2382_v3, %v2270_v30  ;;  %v2272_v36 = vadd.f32 %v2271_v31, %v4892_v24 }
 0x150   :  { %v2273_v38 = vpop.f32.mrf.mxu0 }
 0x151   :  { %v2386_v13 = vpop.f32.mrf.mxu1  ;;  %v4977_v39 = vadd.f32 %v2384_v8, %v2272_v36  ;;  %v2274_v42 = vadd.f32 %v2273_v38, %v4900_v29 }
 0x152   :  { %v2277_v44 = vpop.f32.mrf.mxu0 }
 0x153   :  { %v2390_v16 = vpop.f32.mrf.mxu1  ;;  %v4980_v47 = vadd.f32 %v2386_v13, %v2274_v42  ;;  %v2278_v48 = vadd.f32 %v2277_v44, %v4902_v32 }
 0x154   :  { %v2279_v51 = vpop.f32.mrf.mxu0 }
 0x155   :  { %v2392_v19 = vpop.f32.mrf.mxu1  ;;  %v4983_v53 = vadd.f32 %v2390_v16, %v2278_v48  ;;  %v2280_v56 = vadd.f32 %v2279_v51, %v4906_v35 }
 0x156   :  { %v2281_v57 = vpop.f32.mrf.mxu0 }
 0x157   :  { %v2394_v24 = vpop.f32.mrf.mxu1  ;;  %v4986_v59 = vadd.f32 %v2392_v19, %v2280_v56  ;;  %v2282_v60 = vadd.f32 %v2281_v57, %v4914_v40 }
 0x158   :  { %v2283_v62 = vpop.f32.mrf.mxu0 }
 0x159   :  { %v2396_v29 = vpop.f32.mrf.mxu1  ;;  %v4989_v2 = vadd.f32 %v2394_v24, %v2282_v60  ;;  %v2284_v4 = vadd.f32 %v2283_v62, %v4916_v43 }
 0x15a   :  { %v2287_v6 = vpop.f32.mrf.mxu0 }
 0x15b   :  { %v2400_v32 = vpop.f32.mrf.mxu1  ;;  %v4992_v10 = vadd.f32 %v2396_v29, %v2284_v4  ;;  %v2288_v11 = vadd.f32 %v2287_v6, %v4918_v46 }
 0x15c   :  { %v2289_v14 = vpop.f32.mrf.mxu0 }
 0x15d   :  { %v2402_v35 = vpop.f32.mrf.mxu1  ;;  %v4995_v18 = vadd.f32 %v2400_v32, %v2288_v11  ;;  %v2290_v20 = vadd.f32 %v2289_v14, %v4920_v49 }
 0x15e   :  { %v2291_v0 = vpop.f32.mrf.mxu0 }
 0x15f   :  { %v2404_v40 = vpop.f32.mrf.mxu1  ;;  %v4998_v23 = vadd.f32 %v2402_v35, %v2290_v20  ;;  %v2292_v26 = vadd.f32 %v2291_v0, %v4922_v52 }
 0x160   :  { %v2293_v3 = vpop.f32.mrf.mxu0 }
 0x161   :  { %v2406_v43 = vpop.f32.mrf.mxu1  ;;  %v5001_v30 = vadd.f32 %v2404_v40, %v2292_v26  ;;  %v2294_v31 = vadd.f32 %v2293_v3, %v4924_v55 }
 0x162   :  { %v2297_v8 = vpop.f32.mrf.mxu0 }
 0x163   :  { %v2410_v46 = vpop.f32.mrf.mxu1  ;;  %v5004_v36 = vadd.f32 %v2406_v43, %v2294_v31  ;;  %v2298_v38 = vadd.f32 %v2297_v8, %v4926_v58 }
 0x164   :  { %v2299_v13 = vpop.f32.mrf.mxu0 }
 0x165   :  { %v2412_v49 = vpop.f32.mrf.mxu1  ;;  %v5007_v42 = vadd.f32 %v2410_v46, %v2298_v38  ;;  %v2300_v44 = vadd.f32 %v2299_v13, %v4928_v61 }
 0x166   :  { %v2301_v16 = vpop.f32.mrf.mxu0 }
 0x167   :  { %v2414_v52 = vpop.f32.mrf.mxu1  ;;  %v5010_v48 = vadd.f32 %v2412_v49, %v2300_v44  ;;  %v2302_v51 = vadd.f32 %v2301_v16, %v4930_v1 }
 0x168   :  { %v2303_v19 = vpop.f32.mrf.mxu0 }
 0x169   :  { %v2416_v55 = vpop.f32.mrf.mxu1  ;;  %v5013_v56 = vadd.f32 %v2414_v52, %v2302_v51  ;;  %v2304_v57 = vadd.f32 %v2303_v19, %v4932_v5 }
 0x16a   :  { %v2307_v24 = vpop.f32.mrf.mxu0 }
 0x16b   :  { %v2420_v58 = vpop.f32.mrf.mxu1  ;;  %v5016_v60 = vadd.f32 %v2416_v55, %v2304_v57  ;;  %v2308_v62 = vadd.f32 %v2307_v24, %v4934_v9 }
 0x16c   :  { %v2309_v29 = vpop.f32.mrf.mxu0 }
 0x16d   :  { %v2422_v61 = vpop.f32.mrf.mxu1  ;;  %v5019_v4 = vadd.f32 %v2420_v58, %v2308_v62  ;;  %v2310_v6 = vadd.f32 %v2309_v29, %v4936_v12 }
 0x16e   :  { %v2311_v32 = vpop.f32.mrf.mxu0 }
 0x16f   :  { %v2424_v1 = vpop.f32.mrf.mxu1  ;;  %v5022_v11 = vadd.f32 %v2422_v61, %v2310_v6  ;;  %v2312_v14 = vadd.f32 %v2311_v32, %v4938_v17 }
 0x170   :  { %v2313_v35 = vpop.f32.mrf.mxu0 }
 0x171   :  { %v2426_v5 = vpop.f32.mrf.mxu1  ;;  %v5025_v20 = vadd.f32 %v2424_v1, %v2312_v14  ;;  %v2314_v0 = vadd.f32 %v2313_v35, %v4940_v21 }
 0x172   :  { %v2317_v40 = vpop.f32.mrf.mxu0 }
 0x173   :  { %v2430_v9 = vpop.f32.mrf.mxu1  ;;  %v5028_v26 = vadd.f32 %v2426_v5, %v2314_v0  ;;  %v2318_v3 = vadd.f32 %v2317_v40, %v4942_v25 }
 0x174   :  { %v2319_v43 = vpop.f32.mrf.mxu0 }
 0x175   :  { %v2432_v12 = vpop.f32.mrf.mxu1  ;;  %v5031_v31 = vadd.f32 %v2430_v9, %v2318_v3  ;;  %v2320_v8 = vadd.f32 %v2319_v43, %v4944_v28 }
 0x176   :  { %v2321_v46 = vpop.f32.mrf.mxu0 }
 0x177   :  { %v2434_v17 = vpop.f32.mrf.mxu1  ;;  %v5034_v38 = vadd.f32 %v2432_v12, %v2320_v8  ;;  %v2322_v13 = vadd.f32 %v2321_v46, %v4946_v33 }
 0x178   :  { %v2323_v49 = vpop.f32.mrf.mxu0 }
 0x179   :  { %v2436_v21 = vpop.f32.mrf.mxu1  ;;  %v5037_v44 = vadd.f32 %v2434_v17, %v2322_v13  ;;  %v2324_v16 = vadd.f32 %v2323_v49, %v4948_v37 }
 0x17a   :  { %v2327_v52 = vpop.f32.mrf.mxu0 }
 0x17b   :  { %v2440_v25 = vpop.f32.mrf.mxu1  ;;  %v5040_v51 = vadd.f32 %v2436_v21, %v2324_v16  ;;  %v2328_v19 = vadd.f32 %v2327_v52, %v4950_v41 }
 0x17c   :  { %v2329_v55 = vpop.f32.mrf.mxu0 }
 0x17d   :  { %v2442_v28 = vpop.f32.mrf.mxu1  ;;  %v5043_v57 = vadd.f32 %v2440_v25, %v2328_v19  ;;  %v2330_v24 = vadd.f32 %v2329_v55, %v4952_v45 }
 0x17e   :  { %v2331_v58 = vpop.f32.mrf.mxu0 }
 0x17f   :  { %v2444_v33 = vpop.f32.mrf.mxu1  ;;  %v5046_v62 = vadd.f32 %v2442_v28, %v2330_v24  ;;  %v2332_v29 = vadd.f32 %v2331_v58, %v4954_v50 }
 0x180   :  { %v2333_v61 = vpop.f32.mrf.mxu0 }
 0x181   :  { %v2446_v37 = vpop.f32.mrf.mxu1  ;;  %v5049_v6 = vadd.f32 %v2444_v33, %v2332_v29  ;;  %v2334_v32 = vadd.f32 %v2333_v61, %v4956_v54 }
 0x182   :  { %v2483_v1 = vpop.f32.mrf.mxu0 }
 0x183   :  { %v2596_v41 = vpop.f32.mrf.mxu1  ;;  %v5052_v14 = vadd.f32 %v2446_v37, %v2334_v32  ;;  %v2484_v35 = vadd.f32 %v2483_v1, %v4959_v63 }
 0x184   :  { %v5055_v5 = vpop.f32.mrf.mxu0 }
 0x185   :  { %5281 = vst [vmem:[#allocation2_spill] sm:$0xff] %v5052_v14  ;;  %v5057_v45 = vpop.f32.mrf.mxu1  ;;  %v5059_v0 = vadd.f32 %v2596_v41, %v2484_v35 }
 0x186   :  { %v2487_v40 = vpop.f32.mrf.mxu0 }
 0x187   :  { %5282 = vst [vmem:[#allocation3_spill] sm:$0xff] %v5059_v0  ;;  %v2600_v50 = vpop.f32.mrf.mxu1  ;;  %v2488_v9 = vadd.f32 %v2487_v40, %v4965_v15 }
 0x188   :  { %v5062_v3 = vpop.f32.mrf.mxu0 }
 0x189   :  { %v5064_v43 = vpop.f32.mrf.mxu1  ;;  %v5066_v54 = vadd.f32 %v2600_v50, %v2488_v9 }
 0x18a   :  { %v2493_v12 = vpop.f32.mrf.mxu0 }
 0x18b   :  { %5283 = vst [vmem:[#allocation4_spill] sm:$0xff] %v5066_v54  ;;  %v2606_v8 = vpop.f32.mrf.mxu1  ;;  %v2494_v63 = vadd.f32 %v2493_v12, %v4971_v27 }
 0x18c   :  { %v5069_v46 = vpop.f32.mrf.mxu0 }
 0x18d   :  { %v5071_v17 = vpop.f32.mrf.mxu1  ;;  %v5073_v13 = vadd.f32 %v2606_v8, %v2494_v63 }
 0x18e   :  { %v2497_v49 = vpop.f32.mrf.mxu0 }
 0x18f   :  { %5284 = vst [vmem:[#allocation5_spill] sm:$0xff] %v5073_v13  ;;  %v2610_v21 = vpop.f32.mrf.mxu1  ;;  %v2498_v15 = vadd.f32 %v2497_v49, %v4977_v39 }
 0x190   :  { %v2499_v16 = vpop.f32.mrf.mxu0 }
 0x191   :  { %v5076_v52 = vpop.f32.mrf.mxu1  ;;  %v5078_v25 = vadd.f32 %v2610_v21, %v2498_v15 }
 0x192   :  { %v2503_v19 = vpop.f32.mrf.mxu0 }
 0x193   :  { %5285 = vst [vmem:[#allocation6_spill] sm:$0xff] %v5078_v25  ;;  %v2616_v55 = vpop.f32.mrf.mxu1  ;;  %v2504_v28 = vadd.f32 %v2503_v19, %v4983_v53  ;;  %v2500_v25 = vadd.f32 %v2499_v16, %v4980_v47 }
 0x194   :  { %v2505_v27 = vpop.f32.mrf.mxu0 }
 0x195   :  { %v5081_v24 = vpop.f32.mrf.mxu1  ;;  %v5083_v58 = vadd.f32 %v2616_v55, %v2504_v28  ;;  %v2506_v13 = vadd.f32 %v2505_v27, %v4986_v59 }
 0x196   :  { %v2507_v33 = vpop.f32.mrf.mxu0 }
 0x197   :  { %5286 = vst [vmem:[#allocation7_spill] sm:$0xff] %v5083_v58  ;;  %v2620_v29 = vpop.f32.mrf.mxu1  ;;  %v2508_v61 = vadd.f32 %v2507_v33, %v4989_v2 }
 0x198   :  { %v2509_v37 = vpop.f32.mrf.mxu0 }
 0x199   :  { %v2622_v39 = vpop.f32.mrf.mxu1  ;;  %v5086_v32 = vadd.f32 %v2620_v29, %v2508_v61  ;;  %v2510_v1 = vadd.f32 %v2509_v37, %v4992_v10 }
 0x19a   :  { %v2513_v41 = vpop.f32.mrf.mxu0 }
 0x19b   :  { %5287 = vst [vmem:[#allocation8_spill] sm:$0xff] %v5086_v32  ;;  %v2626_v35 = vpop.f32.mrf.mxu1  ;;  %v5089_v40 = vadd.f32 %v2622_v39, %v2510_v1  ;;  %v2514_v53 = vadd.f32 %v2513_v41, %v4995_v18 }
 0x19c   :  { %v2515_v50 = vpop.f32.mrf.mxu0 }
 0x19d   :  { %5288 = vst [vmem:[#allocation9_spill] sm:$0xff] %v5089_v40  ;;  %v2628_v9 = vpop.f32.mrf.mxu1  ;;  %v5092_v12 = vadd.f32 %v2626_v35, %v2514_v53  ;;  %v2516_v8 = vadd.f32 %v2515_v50, %v4998_v23  ;;  %v2496_v40 = vadd.f32 %v5069_v46, %v4974_v34 }
 0x19e   :  { %v2517_v63 = vpop.f32.mrf.mxu0 }
 0x19f   :  { %5289 = vst [vmem:[#allocation10_spill] sm:$0xff] %v5092_v12  ;;  %v2630_v2 = vpop.f32.mrf.mxu1  ;;  %v5095_v49 = vadd.f32 %v2628_v9, %v2516_v8  ;;  %v2518_v21 = vadd.f32 %v2517_v63, %v5001_v30  ;;  %v2490_v12 = vadd.f32 %v5062_v3, %v4968_v22  ;;  %v5117_v22 = vadd.f32 %v5071_v17, %v2496_v40 }
 0x1a0   :  { %v2519_v15 = vpop.f32.mrf.mxu0  ;;  %v5129_v17 = vadd.f32 %v5081_v24, %v2506_v13 }
 0x1a1   :  { %5290 = vst [vmem:[#allocation11_spill] sm:$0xff] %v5095_v49  ;;  %v2632_v10 = vpop.f32.mrf.mxu1  ;;  %v5098_v19 = vadd.f32 %v2630_v2, %v2518_v21  ;;  %v2520_v55 = vadd.f32 %v2519_v15, %v5004_v36 }
 0x1a2   :  { %v2523_v28 = vpop.f32.mrf.mxu0 }
 0x1a3   :  { %5291 = vst [vmem:[#allocation12_spill] sm:$0xff] %v5098_v19  ;;  %v2636_v18 = vpop.f32.mrf.mxu1  ;;  %v5101_v33 = vadd.f32 %v2632_v10, %v2520_v55  ;;  %v2524_v54 = vadd.f32 %v2523_v28, %v5007_v42 }
 0x1a4   :  { %v2525_v29 = vpop.f32.mrf.mxu0 }
 0x1a5   :  { %5292 = vst [vmem:[#allocation13_spill] sm:$0xff] %v5101_v33  ;;  %v2638_v61 = vpop.f32.mrf.mxu1  ;;  %v2486_v33 = vadd.f32 %v5055_v5, %v4962_v7  ;;  %v5114_v5 = vadd.f32 %v5064_v43, %v2490_v12  ;;  %v2526_v34 = vadd.f32 %v2525_v29, %v5010_v48  ;;  %v5126_v43 = vadd.f32 %v5076_v52, %v2500_v25 }
 0x1a6   :  { %v2527_v37 = vpop.f32.mrf.mxu0  ;;  %v2637_v27 = vadd.f32 %v2636_v18, %v2524_v54 }
 0x1a7   :  { %v2640_v23 = vpop.f32.mrf.mxu1  ;;  %v2599_v14 = vadd.f32 %v5057_v45, %v2486_v33  ;;  %v2528_v3 = vadd.f32 %v2527_v37, %v5013_v56  ;;  %v2639_v52 = vadd.f32 %v2638_v61, %v2526_v34 }
 0x1a8   :  { %v2529_v39 = vpop.f32.mrf.mxu0 }
 0x1a9   :  { %v2642_v1 = vpop.f32.mrf.mxu1  ;;  %v2530_v47 = vadd.f32 %v2529_v39, %v5016_v60  ;;  %v2641_v25 = vadd.f32 %v2640_v23, %v2528_v3 }
 0x1aa   :  { %v2533_v41 = vpop.f32.mrf.mxu0 }
 0x1ab   :  { %v2646_v35 = vpop.f32.mrf.mxu1  ;;  %v2534_v59 = vadd.f32 %v2533_v41, %v5019_v4 }
 0x1ac   :  { %v2535_v53 = vpop.f32.mrf.mxu0 }
 0x1ad   :  { %v2648_v30 = vpop.f32.mrf.mxu1  ;;  %v2536_v42 = vadd.f32 %v2535_v53, %v5022_v11  ;;  %v2647_v24 = vadd.f32 %v2646_v35, %v2534_v59 }
 0x1ae   :  { %v2537_v50 = vpop.f32.mrf.mxu0 }
 0x1af   :  { %v2650_v9 = vpop.f32.mrf.mxu1  ;;  %v2538_v45 = vadd.f32 %v2537_v50, %v5025_v20  ;;  %v2649_v12 = vadd.f32 %v2648_v30, %v2536_v42  ;;  %v5294_v50 = vld [vmem:[#allocation2_spill] sm:$0xff] }
 0x1b0   :  { %v2539_v8 = vpop.f32.mrf.mxu0 }
 0x1b1   :  { %v2652_v63 = vpop.f32.mrf.mxu1  ;;  %v2540_v48 = vadd.f32 %v2539_v8, %v5028_v26  ;;  %v2643_v26 = vadd.f32 %v2642_v1, %v2530_v47  ;;  %v5140_v28 = vadd.f32 %v2650_v9, %v2538_v45 }
 0x1b2   :  { %v2543_v2 = vpop.f32.mrf.mxu0 }
 0x1b3   :  { %v2656_v36 = vpop.f32.mrf.mxu1  ;;  %v2544_v56 = vadd.f32 %v2543_v2, %v5031_v31  ;;  %v5142_v18 = vadd.f32 %v2652_v63, %v2540_v48 }
 0x1b4   :  { %v2545_v21 = vpop.f32.mrf.mxu0 }
 0x1b5   :  { %v2658_v15 = vpop.f32.mrf.mxu1  ;;  %v2546_v60 = vadd.f32 %v2545_v21, %v5034_v38  ;;  %v5146_v29 = vadd.f32 %v2656_v36, %v2544_v56 }
 0x1b6   :  { %v2547_v10 = vpop.f32.mrf.mxu0 }
 0x1b7   :  { %v2660_v55 = vpop.f32.mrf.mxu1  ;;  %v2548_v4 = vadd.f32 %v2547_v10, %v5037_v44  ;;  %v5148_v61 = vadd.f32 %v2658_v15, %v2546_v60 }
 0x1b8   :  { %v2549_v19 = vpop.f32.mrf.mxu0 }
 0x1b9   :  { %v2662_v49 = vpop.f32.mrf.mxu1  ;;  %v2550_v11 = vadd.f32 %v2549_v19, %v5040_v51  ;;  %v5293_v51 = vld [vmem:[#allocation3_spill] sm:$0xff] }
 0x1ba   :  { %v2553_v32 = vpop.f32.mrf.mxu0 }
 0x1bb   :  { %v2666_v58 = vpop.f32.mrf.mxu1  ;;  %v2554_v13 = vadd.f32 %v2553_v32, %v5043_v57  ;;  %v5150_v57 = vadd.f32 %v2660_v55, %v2548_v4 }
 0x1bc   :  { %v2555_v0 = vpop.f32.mrf.mxu0 }
 0x1bd   :  { %v2668_v7 = vpop.f32.mrf.mxu1  ;;  %v2556_v54 = vadd.f32 %v2555_v0, %v5046_v62  ;;  %v5152_v62 = vadd.f32 %v2662_v49, %v2550_v11  ;;  %v5154_v37 = vadd.f32 %v2666_v58, %v2554_v13  ;;  %v5295_v49 = vld [vmem:[#allocation4_spill] sm:$0xff] }
 0x1be   :  { %v2557_v46 = vpop.f32.mrf.mxu0 }
 0x1bf   :  { %v2670_v16 = vpop.f32.mrf.mxu1  ;;  %v2558_v44 = vadd.f32 %v2557_v46, %v5049_v6  ;;  %v5156_v23 = vadd.f32 %v2668_v7, %v2556_v54 }
 0x1c0   :  { %v2559_v20 = vpop.f32.mrf.mxu0 }
 0x1c1   :  { %v5136_v40 = vpop.f32.mrf.mxu1  ;;  %v5158_v30 = vadd.f32 %v2670_v16, %v2558_v44  ;;  %v5161_v9 = vadd.f32 %v2559_v20, %v5294_v50 }
 0x1c2   :  { %v2709_v31 = vpop.f32.mrf.mxu0 }
 0x1c3   :  { %v2749_v38 = vpop.f32.mrf.mxu1  ;;  %v2710_v19 = vadd.f32 %v2709_v31, %v5293_v51 }
 0x1c4   :  { %v2750_v33 = vadd.f32 %v2749_v38, %v2637_v27  ;;  %v2711_v0 = vpop.f32.mrf.mxu0 }
 0x1c5   :  { %v2751_v32 = vpop.f32.mrf.mxu1  ;;  %v2820_v39 = vmul.f32 0.2, %v2710_v19  ;;  %vm2788_vm3 = vcmp.gt.f32.partialorder %v2710_v19, 0.0  ;;  %v2712_v6 = vadd.f32 %v2711_v0, %v2599_v14 }
 0x1c6   :  { %v2836_v1 = vmul.f32 0.2, %v2750_v33  ;;  %vm2804_vm4 = vcmp.gt.f32.partialorder %v2750_v33, 0.0  ;;  %v2752_v41 = vadd.f32 %v2751_v32, %v2639_v52  ;;  %v2713_v35 = vpop.f32.mrf.mxu0 }
 0x1c7   :  { %v2753_v53 = vpop.f32.mrf.mxu1  ;;  %v2714_v8 = vadd.f32 %v2713_v35, %v5295_v49  ;;  %vm2789_vm5 = vcmp.gt.f32.partialorder %v2712_v6, 0.0  ;;  %v2821_v58 = vmul.f32 0.2, %v2712_v6  ;;  %v2852_v15 = vsel %vm2788_vm3, %v2710_v19, %v2820_v39 }
 0x1c8   :  { %v2754_v63 = vadd.f32 %v2753_v53, %v2641_v25  ;;  %vm2805_vm6 = vcmp.gt.f32.partialorder %v2752_v41, 0.0  ;;  %v2837_v2 = vmul.f32 0.2, %v2752_v41  ;;  %v2715_v36 = vpop.f32.mrf.mxu0  ;;  %v2868_v14 = vsel %vm2804_vm4, %v2750_v33, %v2836_v1 }
 0x1c9   :  { %v2755_v21 = vpop.f32.mrf.mxu1  ;;  %v2822_v10 = vmul.f32 0.2, %v2714_v8  ;;  %v2853_v7 = vsel %vm2789_vm5, %v2712_v6, %v2821_v58  ;;  %v2716_v47 = vadd.f32 %v2715_v36, %v5114_v5  ;;  %vm2790_vm8 = vcmp.gt.f32.partialorder %v2714_v8, 0.0  ;;  %v5298_v5 = vld [vmem:[#allocation5_spill] sm:$0xff] }
 0x1ca   :  { %v2838_v55 = vmul.f32 0.2, %v2754_v63  ;;  %v2869_v3 = vsel %vm2805_vm6, %v2752_v41, %v2837_v2  ;;  %v2756_v59 = vadd.f32 %v2755_v21, %v2643_v26  ;;  %v2719_v42 = vpop.f32.mrf.mxu0  ;;  %v3355_v46 = vpack.c.bf16 %v2853_v7, %v2852_v15 }
 0x1cb   :  { %v2759_v45 = vpop.f32.mrf.mxu1  ;;  %v3363_v16 = vpack.c.bf16 %v2869_v3, %v2868_v14  ;;  %vm2806_vm9 = vcmp.gt.f32.partialorder %v2754_v63, 0.0  ;;  %vm2791_vm10 = vcmp.gt.f32.partialorder %v2716_v47, 0.0  ;;  %v2823_v27 = vmul.f32 0.2, %v2716_v47 }
 0x1cc   :  { %vm2807_vm11 = vcmp.gt.f32.partialorder %v2756_v59, 0.0  ;;  %v2839_v48 = vmul.f32 0.2, %v2756_v59  ;;  %v2721_v56 = vpop.f32.mrf.mxu0  ;;  %2983 = vst.msk [vmem:[%s5280_s2] sm:$0xff] %vm5168_vm7, %v3355_v46  ;;  %v2720_v4 = vadd.f32 %v2719_v42, %v5298_v5  ;;  %v2760_v11 = vadd.f32 %v2759_v45, %v2647_v24 }
 0x1cd   :  { %v2761_v60 = vpop.f32.mrf.mxu1  ;;  %2991 = vst.msk [vmem:[%s5280_s2 + $0x40] sm:$0xff] %vm5168_vm7, %v3363_v16  ;;  %v2722_v20 = vadd.f32 %v2721_v56, %v5117_v22  ;;  %v2854_v25 = vsel %vm2790_vm8, %v2714_v8, %v2822_v10  ;;  %v2870_v13 = vsel %vm2806_vm9, %v2754_v63, %v2838_v55  ;;  %v2855_v54 = vsel %vm2791_vm10, %v2716_v47, %v2823_v27  ;;  %v5300_v10 = vld [vmem:[#allocation7_spill] sm:$0xff] }
 0x1ce   :  { %v2762_v52 = vadd.f32 %v2761_v60, %v2649_v12  ;;  %v2871_v26 = vsel %vm2807_vm11, %v2756_v59, %v2839_v48  ;;  %v2723_v31 = vpop.f32.mrf.mxu0  ;;  %v3356_v44 = vpack.c.bf16 %v2855_v54, %v2854_v25  ;;  %vm2792_vm12 = vcmp.gt.f32.partialorder %v2720_v4, 0.0  ;;  %v5299_v12 = vld [vmem:[#allocation6_spill] sm:$0xff] }
 0x1cf   :  { %v2763_v38 = vpop.f32.mrf.mxu1  ;;  %v3364_v51 = vpack.c.bf16 %v2871_v26, %v2870_v13  ;;  %v2824_v19 = vmul.f32 0.2, %v2720_v4  ;;  %vm2808_vm13 = vcmp.gt.f32.partialorder %v2760_v11, 0.0  ;;  %v2840_v33 = vmul.f32 0.2, %v2760_v11  ;;  %v5301_v13 = vld [vmem:[#allocation8_spill] sm:$0xff] }
 0x1d0   :  { %vm2793_vm14 = vcmp.gt.f32.partialorder %v2722_v20, 0.0  ;;  %v2825_v0 = vmul.f32 0.2, %v2722_v20  ;;  %v2725_v32 = vpop.f32.mrf.mxu0  ;;  %2984 = vst.msk [vmem:[%s5280_s2 + $0x8] sm:$0xff] %vm5168_vm7, %v3356_v44  ;;  %vm2809_vm15 = vcmp.gt.f32.partialorder %v2762_v52, 0.0  ;;  %v2724_v1 = vadd.f32 %v2723_v31, %v5299_v12  ;;  %v5302_v31 = vld [vmem:[#allocation9_spill] sm:$0xff] }
 0x1d1   :  { %v2765_v39 = vpop.f32.mrf.mxu1  ;;  %2992 = vst.msk [vmem:[%s5280_s2 + $0x48] sm:$0xff] %vm5168_vm7, %v3364_v51  ;;  %v2856_v22 = vsel %vm2792_vm12, %v2720_v4, %v2824_v19  ;;  %v2841_v24 = vmul.f32 0.2, %v2762_v52  ;;  %v2872_v6 = vsel %vm2808_vm13, %v2760_v11, %v2840_v33  ;;  %v2764_v35 = vadd.f32 %v2763_v38, %v5140_v28  ;;  %v5303_v33 = vld [vmem:[#allocation10_spill] sm:$0xff] }
 0x1d2   :  { %v2857_v41 = vsel %vm2793_vm14, %v2722_v20, %v2825_v0  ;;  %v2726_v53 = vadd.f32 %v2725_v32, %v5126_v43  ;;  %v2729_v50 = vpop.f32.mrf.mxu0  ;;  %vm2794_vm0 = vcmp.gt.f32.partialorder %v2724_v1, 0.0  ;;  %v2826_v58 = vmul.f32 0.2, %v2724_v1 }
 0x1d3   :  { %v2769_v49 = vpop.f32.mrf.mxu1  ;;  %v3357_v8 = vpack.c.bf16 %v2857_v41, %v2856_v22  ;;  %v2873_v63 = vsel %vm2809_vm15, %v2762_v52, %v2841_v24  ;;  %vm2810_vm1 = vcmp.gt.f32.partialorder %v2764_v35, 0.0  ;;  %v2842_v36 = vmul.f32 0.2, %v2764_v35 }
 0x1d4   :  { %v3365_v2 = vpack.c.bf16 %v2873_v63, %v2872_v6  ;;  %vm2795_vm2 = vcmp.gt.f32.partialorder %v2726_v53, 0.0  ;;  %v2731_v21 = vpop.f32.mrf.mxu0  ;;  %v2858_v28 = vsel %vm2794_vm0, %v2724_v1, %v2826_v58  ;;  %v2827_v43 = vmul.f32 0.2, %v2726_v53 }
 0x1d5   :  { %v2771_v15 = vpop.f32.mrf.mxu1  ;;  %2985 = vst.msk [vmem:[%s5280_s2 + $0x10] sm:$0xff] %vm5168_vm7, %v3357_v8  ;;  %v2766_v14 = vadd.f32 %v2765_v39, %v5142_v18  ;;  %v2730_v55 = vadd.f32 %v2729_v50, %v5300_v10  ;;  %v2874_v7 = vsel %vm2810_vm1, %v2764_v35, %v2842_v36  ;;  %v2770_v3 = vadd.f32 %v2769_v49, %v5146_v29  ;;  %v5304_v8 = vld [vmem:[#allocation11_spill] sm:$0xff] }
 0x1d6   :  { %2993 = vst.msk [vmem:[%s5280_s2 + $0x50] sm:$0xff] %vm5168_vm7, %v3365_v2  ;;  %v2732_v47 = vadd.f32 %v2731_v21, %v5129_v17  ;;  %v2772_v59 = vadd.f32 %v2771_v15, %v5148_v61  ;;  %v2733_v42 = vpop.f32.mrf.mxu0  ;;  %v2859_v46 = vsel %vm2795_vm2, %v2726_v53, %v2827_v43  ;;  %v2673_v6 = vadd.f32 %v5136_v40, %v5161_v9 }
 0x1d7   :  { %v2773_v45 = vpop.f32.mrf.mxu1  ;;  %vm2811_vm3 = vcmp.gt.f32.partialorder %v2766_v14, 0.0  ;;  %v2843_v18 = vmul.f32 0.2, %v2766_v14  ;;  %vm2796_vm4 = vcmp.gt.f32.partialorder %v2730_v55, 0.0  ;;  %v3358_v16 = vpack.c.bf16 %v2859_v46, %v2858_v28 }
 0x1d8   :  { %v2828_v27 = vmul.f32 0.2, %v2730_v55  ;;  %vm2812_vm5 = vcmp.gt.f32.partialorder %v2770_v3, 0.0  ;;  %v2844_v48 = vmul.f32 0.2, %v2770_v3  ;;  %v2735_v56 = vpop.f32.mrf.mxu0  ;;  %vm2797_vm6 = vcmp.gt.f32.partialorder %v2732_v47, 0.0 }
 0x1d9   :  { %v2775_v60 = vpop.f32.mrf.mxu1  ;;  %v2875_v5 = vsel %vm2811_vm3, %v2766_v14, %v2843_v18  ;;  %v2829_v4 = vmul.f32 0.2, %v2732_v47  ;;  %vm2813_vm8 = vcmp.gt.f32.partialorder %v2772_v59, 0.0  ;;  %2986 = vst.msk [vmem:[%s5280_s2 + $0x18] sm:$0xff] %vm5168_vm7, %v3358_v16  ;;  %v2845_v11 = vmul.f32 0.2, %v2772_v59 }
 0x1da   :  { %v3366_v17 = vpack.c.bf16 %v2875_v5, %v2874_v7  ;;  %v2860_v29 = vsel %vm2796_vm4, %v2730_v55, %v2828_v27  ;;  %v2876_v61 = vsel %vm2812_vm5, %v2770_v3, %v2844_v48  ;;  %v2739_v20 = vpop.f32.mrf.mxu0  ;;  %v2734_v54 = vadd.f32 %v2733_v42, %v5301_v13  ;;  %v5305_v14 = vld [vmem:[#allocation12_spill] sm:$0xff]  ;;  %v5306_v7 = vld [vmem:[#allocation13_spill] sm:$0xff] }
 0x1db   :  { %v2779_v52 = vpop.f32.mrf.mxu1  ;;  %v2861_v25 = vsel %vm2797_vm6, %v2732_v47, %v2829_v4  ;;  %v2774_v26 = vadd.f32 %v2773_v45, %v5150_v57  ;;  %v2736_v38 = vadd.f32 %v2735_v56, %v5302_v31  ;;  %v2877_v51 = vsel %vm2813_vm8, %v2772_v59, %v2845_v11 }
 0x1dc   :  { %2994 = vst.msk [vmem:[%s5280_s2 + $0x58] sm:$0xff] %vm5168_vm7, %v3366_v17  ;;  %v3359_v44 = vpack.c.bf16 %v2861_v25, %v2860_v29  ;;  %v2776_v19 = vadd.f32 %v2775_v60, %v5152_v62  ;;  %v2740_v0 = vadd.f32 %v2739_v20, %v5303_v33  ;;  %v2741_v32 = vpop.f32.mrf.mxu0  ;;  %v3367_v22 = vpack.c.bf16 %v2877_v51, %v2876_v61 }
 0x1dd   :  { %v2781_v39 = vpop.f32.mrf.mxu1  ;;  %vm2798_vm9 = vcmp.gt.f32.partialorder %v2734_v54, 0.0  ;;  %v2830_v24 = vmul.f32 0.2, %v2734_v54  ;;  %vm2814_vm10 = vcmp.gt.f32.partialorder %v2774_v26, 0.0  ;;  %v2846_v57 = vmul.f32 0.2, %v2774_v26 }
 0x1de   :  { %2987 = vst.msk [vmem:[%s5280_s2 + $0x20] sm:$0xff] %vm5168_vm7, %v3359_v44  ;;  %vm2799_vm11 = vcmp.gt.f32.partialorder %v2736_v38, 0.0  ;;  %v2831_v12 = vmul.f32 0.2, %v2736_v38  ;;  %vm2815_vm12 = vcmp.gt.f32.partialorder %v2776_v19, 0.0  ;;  %v2743_v1 = vpop.f32.mrf.mxu0  ;;  %2995 = vst.msk [vmem:[%s5280_s2 + $0x60] sm:$0xff] %vm5168_vm7, %v3367_v22  ;;  %v2780_v49 = vadd.f32 %v2779_v52, %v5154_v37 }
 0x1df   :  { %v2783_v62 = vpop.f32.mrf.mxu1  ;;  %v2862_v41 = vsel %vm2798_vm9, %v2734_v54, %v2830_v24  ;;  %v2847_v35 = vmul.f32 0.2, %v2776_v19  ;;  %vm2800_vm13 = vcmp.gt.f32.partialorder %v2740_v0, 0.0  ;;  %v2832_v50 = vmul.f32 0.2, %v2740_v0 }
 0x1e0   :  { %v2863_v53 = vsel %vm2799_vm11, %v2736_v38, %v2831_v12  ;;  %v2742_v63 = vadd.f32 %v2741_v32, %v5304_v8  ;;  %v2878_v58 = vsel %vm2814_vm10, %v2774_v26, %v2846_v57  ;;  %v2782_v40 = vadd.f32 %v2781_v39, %v5156_v23  ;;  %v2745_v9 = vpop.f32.mrf.mxu0 }
 0x1e1   :  { %v3360_v2 = vpack.c.bf16 %v2863_v53, %v2862_v41  ;;  %v2879_v36 = vsel %vm2815_vm12, %v2776_v19, %v2847_v35  ;;  %v2785_v21 = vpop.f32.mrf.mxu1  ;;  %vm2816_vm14 = vcmp.gt.f32.partialorder %v2780_v49, 0.0  ;;  %v2848_v28 = vmul.f32 0.2, %v2780_v49 }
 0x1e2   :  { %v3368_v15 = vpack.c.bf16 %v2879_v36, %v2878_v58  ;;  %vm2801_vm15 = vcmp.gt.f32.partialorder %v2742_v63, 0.0  ;;  %v2833_v37 = vmul.f32 0.2, %v2742_v63  ;;  %vm2817_vm0 = vcmp.gt.f32.partialorder %v2782_v40, 0.0 }
 0x1e3   :  { %2988 = vst.msk [vmem:[%s5280_s2 + $0x28] sm:$0xff] %vm5168_vm7, %v3360_v2  ;;  %v2849_v43 = vmul.f32 0.2, %v2782_v40  ;;  %v2744_v10 = vadd.f32 %v2743_v1, %v5305_v14  ;;  %v2864_v23 = vsel %vm2800_vm13, %v2740_v0, %v2832_v50  ;;  %v2784_v55 = vadd.f32 %v2783_v62, %v5158_v30 }
 0x1e4   :  { %2996 = vst.msk [vmem:[%s5280_s2 + $0x68] sm:$0xff] %vm5168_vm7, %v3368_v15  ;;  %v2746_v3 = vadd.f32 %v2745_v9, %v5306_v7  ;;  %v2786_v47 = vadd.f32 %v2785_v21, %v2673_v6  ;;  %v2880_v59 = vsel %vm2816_vm14, %v2780_v49, %v2848_v28  ;;  %v2865_v42 = vsel %vm2801_vm15, %v2742_v63, %v2833_v37 }
 0x1e5   :  { %v2881_v45 = vsel %vm2817_vm0, %v2782_v40, %v2849_v43  ;;  %v2834_v46 = vmul.f32 0.2, %v2744_v10  ;;  %v3361_v18 = vpack.c.bf16 %v2865_v42, %v2864_v23  ;;  %vm2802_vm1 = vcmp.gt.f32.partialorder %v2744_v10, 0.0 }
 0x1e6   :  { %v3369_v16 = vpack.c.bf16 %v2881_v45, %v2880_v59  ;;  %v2850_v27 = vmul.f32 0.2, %v2784_v55  ;;  %vm2818_vm2 = vcmp.gt.f32.partialorder %v2784_v55, 0.0  ;;  %vm2803_vm3 = vcmp.gt.f32.partialorder %v2746_v3, 0.0 }
 0x1e7   :  { %v2835_v48 = vmul.f32 0.2, %v2746_v3  ;;  %vm2819_vm4 = vcmp.gt.f32.partialorder %v2786_v47, 0.0  ;;  %2989 = vst.msk [vmem:[%s5280_s2 + $0x30] sm:$0xff] %vm5168_vm7, %v3361_v18  ;;  %v2851_v30 = vmul.f32 0.2, %v2786_v47  ;;  %v2866_v56 = vsel %vm2802_vm1, %v2744_v10, %v2834_v46 }
 0x1e8   :  { %2997 = vst.msk [vmem:[%s5280_s2 + $0x70] sm:$0xff] %vm5168_vm7, %v3369_v16  ;;  %v2882_v5 = vsel %vm2818_vm2, %v2784_v55, %v2850_v27 }
 0x1e9   :  { %v2867_v60 = vsel %vm2803_vm3, %v2746_v3, %v2835_v48  ;;  %v2883_v17 = vsel %vm2819_vm4, %v2786_v47, %v2851_v30 }
 0x1ea   :  { %v3362_v4 = vpack.c.bf16 %v2867_v60, %v2866_v56  ;;  %v3370_v29 = vpack.c.bf16 %v2883_v17, %v2882_v5 }
 0x1ec   :  { %2990 = vst.msk [vmem:[%s5280_s2 + $0x38] sm:$0xff] %vm5168_vm7, %v3362_v4  ;;  %2998 = vst.msk [vmem:[%s5280_s2 + $0x78] sm:$0xff] %vm5168_vm7, %v3370_v29 }

// kernel: discriminator_forward.13
= control target key start
LH: loop header
LB: loop body
LE: loop exit
PB: predicated region body
PF: predicated region fallthrough
CT: control target
= control target key end

     0   :  { %vm1474_vm0 = vcmask 523264   ;;  %vm1900_vm1 = vcmask 1043456   ;;  %vm1901_vm2 = vcmask 523268   ;;  %s3333_s1 = inlined_call_operand.vmem [shape: bf16[1728,192], index: 1, kind: input, shape index: {}]   ;;  %s3334_s0 = inlined_call_operand.vmem [shape: bf16[32,1728], index: 0, kind: input, shape index: {}]   ;;  %s3335_s2 = inlined_call_operand.vmem [shape: bf16[32,192], index: 2, kind: output, shape index: {}]  }
   0x1   :  { %v2189_v0 = vld [vmem:[%s3333_s1 + $0x74] ss:$8 sps:$4 sm:$0xff]   ;;  %v2193_v2 = vld [vmem:[%s3333_s1 + $0x70] ss:$8 sps:$4 sm:$0xff]   ;;  %v2195_v4 = vld [vmem:[%s3333_s1 + $0x64] ss:$8 sps:$4 sm:$0xff]  }
   0x2   :  { %v2191_v1 = vld [vmem:[%s3333_s1 + $0x174] ss:$8 sps:$4 sm:$0xff]   ;;  %1481 = vmatprep.subr.bf16.mxu0 %v2189_v0  ;;  %v2194_v3 = vld [vmem:[%s3333_s1 + $0x170] ss:$8 sps:$4 sm:$0xff]   ;;  %v2197_v5 = vld [vmem:[%s3333_s1 + $0x164] ss:$8 sps:$4 sm:$0xff]  }
   0x3   :  { %1534 = vmatprep.subr.bf16.mxu1 %v2191_v1  ;;  %1482 = vmatpush1.bf16.msra.mxu0 %v2193_v2  ;;  %v2199_v6 = vld [vmem:[%s3333_s1 + $0x60] ss:$8 sps:$4 sm:$0xff]   ;;  %v2201_v8 = vld [vmem:[%s3333_s1 + $0x54] ss:$8 sps:$4 sm:$0xff]   ;;  %v2205_v10 = vld [vmem:[%s3333_s1 + $0x50] ss:$8 sps:$4 sm:$0xff]  }
   0x4   :  { %1535 = vmatpush1.bf16.msra.mxu1 %v2194_v3  ;;  %1483 = vmatprep.subr.bf16.mxu0 %v2195_v4  ;;  %v2200_v7 = vld [vmem:[%s3333_s1 + $0x160] ss:$8 sps:$4 sm:$0xff]   ;;  %v2203_v9 = vld [vmem:[%s3333_s1 + $0x154] ss:$8 sps:$4 sm:$0xff]   ;;  %v2206_v11 = vld [vmem:[%s3333_s1 + $0x150] ss:$8 sps:$4 sm:$0xff]  }
   0x5   :  { %1536 = vmatprep.subr.bf16.mxu1 %v2197_v5  ;;  %v2207_v12 = vld [vmem:[%s3333_s1 + $0x44] ss:$8 sps:$4 sm:$0xff]   ;;  %v2211_v14 = vld [vmem:[%s3333_s1 + $0x40] ss:$8 sps:$4 sm:$0xff]   ;;  %v2213_v16 = vld [vmem:[%s3333_s1 + $0x34] ss:$8 sps:$4 sm:$0xff]  }
   0x6   :  { %v2209_v13 = vld [vmem:[%s3333_s1 + $0x144] ss:$8 sps:$4 sm:$0xff]   ;;  %v2212_v15 = vld [vmem:[%s3333_s1 + $0x140] ss:$8 sps:$4 sm:$0xff]   ;;  %v2215_v17 = vld [vmem:[%s3333_s1 + $0x134] ss:$8 sps:$4 sm:$0xff]  }
   0x7   :  { %1484 = vmatpush1.bf16.msra.mxu0 %v2199_v6  ;;  %v2217_v18 = vld [vmem:[%s3333_s1 + $0x30] ss:$8 sps:$4 sm:$0xff]   ;;  %v2219_v20 = vld [vmem:[%s3333_s1 + $0x24] ss:$8 sps:$4 sm:$0xff]   ;;  %v2223_v22 = vld [vmem:[%s3333_s1 + $0x20] ss:$8 sps:$4 sm:$0xff]  }
   0x8   :  { %1537 = vmatpush1.bf16.msra.mxu1 %v2200_v7  ;;  %1485 = vmatprep.subr.bf16.mxu0 %v2201_v8  ;;  %v2218_v19 = vld [vmem:[%s3333_s1 + $0x130] ss:$8 sps:$4 sm:$0xff]   ;;  %v2221_v21 = vld [vmem:[%s3333_s1 + $0x124] ss:$8 sps:$4 sm:$0xff]   ;;  %v2224_v23 = vld [vmem:[%s3333_s1 + $0x120] ss:$8 sps:$4 sm:$0xff]  }
   0x9   :  { %1538 = vmatprep.subr.bf16.mxu1 %v2203_v9  ;;  %v2225_v24 = vld [vmem:[%s3333_s1 + $0x14] ss:$8 sps:$4 sm:$0xff]   ;;  %v2229_v26 = vld [vmem:[%s3333_s1 + $0x10] ss:$8 sps:$4 sm:$0xff]   ;;  %v2231_v28 = vld [vmem:[%s3333_s1 + $0x4] ss:$8 sps:$4 sm:$0xff]  }
   0xa   :  { %v2227_v25 = vld [vmem:[%s3333_s1 + $0x114] ss:$8 sps:$4 sm:$0xff]   ;;  %v2230_v27 = vld [vmem:[%s3333_s1 + $0x110] ss:$8 sps:$4 sm:$0xff]   ;;  %v2233_v29 = vld [vmem:[%s3333_s1 + $0x104] ss:$8 sps:$4 sm:$0xff]  }
   0xb   :  { %1486 = vmatpush1.bf16.msra.mxu0 %v2205_v10  ;;  %v2235_v30 = vld [vmem:[%s3333_s1] ss:$8 sps:$4 sm:$0xff]   ;;  %v2237_v32 = vld [vmem:[%s3333_s1 + $0xf4] ss:$8 sps:$4 sm:$0xff]   ;;  %v2241_v34 = vld [vmem:[%s3333_s1 + $0xf0] ss:$8 sps:$4 sm:$0xff]  }
   0xc   :  { %1539 = vmatpush1.bf16.msra.mxu1 %v2206_v11  ;;  %1487 = vmatprep.subr.bf16.mxu0 %v2207_v12  ;;  %v2236_v31 = vld [vmem:[%s3333_s1 + $0x100] ss:$8 sps:$4 sm:$0xff]   ;;  %v2239_v33 = vld [vmem:[%s3333_s1 + $0x1f4] ss:$8 sps:$4 sm:$0xff]   ;;  %v2242_v35 = vld [vmem:[%s3333_s1 + $0x1f0] ss:$8 sps:$4 sm:$0xff]  }
   0xd   :  { %1540 = vmatprep.subr.bf16.mxu1 %v2209_v13  ;;  %v2243_v36 = vld [vmem:[%s3333_s1 + $0xe4] ss:$8 sps:$4 sm:$0xff]   ;;  %v2247_v38 = vld [vmem:[%s3333_s1 + $0xe0] ss:$8 sps:$4 sm:$0xff]   ;;  %v2249_v40 = vld [vmem:[%s3333_s1 + $0xd4] ss:$8 sps:$4 sm:$0xff]  }
   0xe   :  { %v2245_v37 = vld [vmem:[%s3333_s1 + $0x1e4] ss:$8 sps:$4 sm:$0xff]   ;;  %v2248_v39 = vld [vmem:[%s3333_s1 + $0x1e0] ss:$8 sps:$4 sm:$0xff]   ;;  %v2251_v41 = vld [vmem:[%s3333_s1 + $0x1d4] ss:$8 sps:$4 sm:$0xff]  }
   0xf   :  { %1488 = vmatpush1.bf16.msra.mxu0 %v2211_v14  ;;  %v2253_v42 = vld [vmem:[%s3333_s1 + $0xd0] ss:$8 sps:$4 sm:$0xff]   ;;  %v2255_v44 = vld [vmem:[%s3333_s1 + $0xc4] ss:$8 sps:$4 sm:$0xff]   ;;  %v2259_v46 = vld [vmem:[%s3333_s1 + $0xc0] ss:$8 sps:$4 sm:$0xff]  }
  0x10   :  { %1541 = vmatpush1.bf16.msra.mxu1 %v2212_v15  ;;  %1489 = vmatprep.subr.bf16.mxu0 %v2213_v16  ;;  %v2254_v43 = vld [vmem:[%s3333_s1 + $0x1d0] ss:$8 sps:$4 sm:$0xff]   ;;  %v2257_v45 = vld [vmem:[%s3333_s1 + $0x1c4] ss:$8 sps:$4 sm:$0xff]   ;;  %v2260_v47 = vld [vmem:[%s3333_s1 + $0x1c0] ss:$8 sps:$4 sm:$0xff]  }
  0x11   :  { %1542 = vmatprep.subr.bf16.mxu1 %v2215_v17  ;;  %v2261_v48 = vld [vmem:[%s3333_s1 + $0xb4] ss:$8 sps:$4 sm:$0xff]   ;;  %v2290_v51 = vld [vmem:[%s3334_s0 + $0xc] ss:$56 sps:$4 sm:$0xff]   ;;  %v2265_v52 = vld [vmem:[%s3333_s1 + $0xb0] ss:$8 sps:$4 sm:$0xff]  }
  0x12   :  { %v2287_v49 = vld [vmem:[%s3334_s0 + $0x4] ss:$56 sps:$4 sm:$0xff]   ;;  %v2266_v53 = vld [vmem:[%s3333_s1 + $0x1b0] ss:$8 sps:$4 sm:$0xff]   ;;  %1566 = vmatprep.mubr.bf16.mxu1 %v2290_v51  ;;  %v2271_v56 = vld [vmem:[%s3333_s1 + $0xa0] ss:$8 sps:$4 sm:$0xff]  }
  0x13   :  { %1490 = vmatpush1.bf16.msra.mxu0 %v2217_v18  ;;  %v2263_v50 = vld [vmem:[%s3333_s1 + $0x1b4] ss:$8 sps:$4 sm:$0xff]   ;;  %1513 = vmatprep.mubr.bf16.mxu0 %v2287_v49  ;;  %v2267_v54 = vld [vmem:[%s3333_s1 + $0xa4] ss:$8 sps:$4 sm:$0xff]   ;;  %v2272_v57 = vld [vmem:[%s3333_s1 + $0x1a0] ss:$8 sps:$4 sm:$0xff]  }
  0x14   :  { %1543 = vmatpush1.bf16.msra.mxu1 %v2218_v19  ;;  %1491 = vmatprep.subr.bf16.mxu0 %v2219_v20  ;;  %v2269_v55 = vld [vmem:[%s3333_s1 + $0x1a4] ss:$8 sps:$4 sm:$0xff]   ;;  %v2273_v58 = vld [vmem:[%s3333_s1 + $0x94] ss:$8 sps:$4 sm:$0xff]   ;;  %v2277_v60 = vld [vmem:[%s3333_s1 + $0x90] ss:$8 sps:$4 sm:$0xff]  }
  0x15   :  { %1544 = vmatprep.subr.bf16.mxu1 %v2221_v21  ;;  %v2275_v59 = vld [vmem:[%s3333_s1 + $0x194] ss:$8 sps:$4 sm:$0xff]   ;;  %v2278_v61 = vld [vmem:[%s3333_s1 + $0x190] ss:$8 sps:$4 sm:$0xff]   ;;  %v2279_v62 = vld [vmem:[%s3333_s1 + $0x84] ss:$8 sps:$4 sm:$0xff]  }
  0x16   :  { %v2281_v63 = vld [vmem:[%s3333_s1 + $0x184] ss:$8 sps:$4 sm:$0xff]   ;;  %v2283_v0 = vld [vmem:[%s3333_s1 + $0x80] ss:$8 sps:$4 sm:$0xff]   ;;  %v2293_v2 = vld [vmem:[%s3333_s1 + $0x274] ss:$8 sps:$4 sm:$0xff]  }
  0x17   :  { %1492 = vmatpush1.bf16.msra.mxu0 %v2223_v22  ;;  %v2284_v1 = vld [vmem:[%s3333_s1 + $0x180] ss:$8 sps:$4 sm:$0xff]   ;;  %v2296_v3 = vld [vmem:[%s3333_s1 + $0x374] ss:$8 sps:$4 sm:$0xff]   ;;  %v2291_v6 = vld [vmem:[%s3333_s1 + $0x270] ss:$8 sps:$4 sm:$0xff]  }
  0x18   :  { %1545 = vmatpush1.bf16.msra.mxu1 %v2224_v23  ;;  %1493 = vmatprep.subr.bf16.mxu0 %v2225_v24  ;;  %v2285_v4 = vld [vmem:[%s3334_s0] ss:$56 sps:$4 sm:$0xff]   ;;  %v2299_v8 = vld [vmem:[%s3333_s1 + $0x264] ss:$8 sps:$4 sm:$0xff]   ;;  %v2305_v12 = vld [vmem:[%s3333_s1 + $0x254] ss:$8 sps:$4 sm:$0xff]  }
  0x19   :  { %1546 = vmatprep.subr.bf16.mxu1 %v2227_v25  ;;  %v2288_v5 = vld [vmem:[%s3334_s0 + $0x8] ss:$56 sps:$4 sm:$0xff]   ;;  %v2294_v7 = vld [vmem:[%s3333_s1 + $0x370] ss:$8 sps:$4 sm:$0xff]   ;;  %v2302_v9 = vld [vmem:[%s3333_s1 + $0x364] ss:$8 sps:$4 sm:$0xff]  }
  0x1a   :  { %v2297_v10 = vld [vmem:[%s3333_s1 + $0x260] ss:$8 sps:$4 sm:$0xff]   ;;  %v2308_v13 = vld [vmem:[%s3333_s1 + $0x354] ss:$8 sps:$4 sm:$0xff]   ;;  %v2303_v14 = vld [vmem:[%s3333_s1 + $0x250] ss:$8 sps:$4 sm:$0xff]  }
  0x1b   :  { %1494 = vmatpush1.bf16.msra.mxu0 %v2229_v26  ;;  %v2300_v11 = vld [vmem:[%s3333_s1 + $0x360] ss:$8 sps:$4 sm:$0xff]   ;;  %v2306_v15 = vld [vmem:[%s3333_s1 + $0x350] ss:$8 sps:$4 sm:$0xff]   ;;  %v2311_v16 = vld [vmem:[%s3333_s1 + $0x244] ss:$8 sps:$4 sm:$0xff]  }
  0x1c   :  { %1547 = vmatpush1.bf16.msra.mxu1 %v2230_v27  ;;  %1495 = vmatprep.subr.bf16.mxu0 %v2231_v28  ;;  %v2314_v17 = vld [vmem:[%s3333_s1 + $0x344] ss:$8 sps:$4 sm:$0xff]   ;;  %v2309_v18 = vld [vmem:[%s3333_s1 + $0x240] ss:$8 sps:$4 sm:$0xff]   ;;  %v2317_v20 = vld [vmem:[%s3333_s1 + $0x234] ss:$8 sps:$4 sm:$0xff]  }
  0x1d   :  { %1548 = vmatprep.subr.bf16.mxu1 %v2233_v29  ;;  %v2312_v19 = vld [vmem:[%s3333_s1 + $0x340] ss:$8 sps:$4 sm:$0xff]   ;;  %v2320_v21 = vld [vmem:[%s3333_s1 + $0x334] ss:$8 sps:$4 sm:$0xff]   ;;  %v2315_v22 = vld [vmem:[%s3333_s1 + $0x230] ss:$8 sps:$4 sm:$0xff]  }
  0x1e   :  { %v2318_v23 = vld [vmem:[%s3333_s1 + $0x330] ss:$8 sps:$4 sm:$0xff]   ;;  %v2323_v24 = vld [vmem:[%s3333_s1 + $0x224] ss:$8 sps:$4 sm:$0xff]   ;;  %v2371_v27 = vld [vmem:[%s3334_s0 + $0x7c] ss:$56 sps:$4 sm:$0xff]  }
  0x1f   :  { %1496 = vmatpush1.bf16.msra.mxu0 %v2235_v30  ;;  %v2326_v25 = vld [vmem:[%s3333_s1 + $0x324] ss:$8 sps:$4 sm:$0xff]   ;;  %v2373_v28 = vld [vmem:[%s3334_s0 + $0x70] ss:$56 sps:$4 sm:$0xff]   ;;  %v2356_v51 = vld [vmem:[%s3333_s1 + $0x3d4] ss:$8 sps:$4 sm:$0xff]  }
  0x20   :  { %1549 = vmatpush1.bf16.msra.mxu1 %v2236_v31  ;;  %1497 = vmatprep.subr.bf16.mxu0 %v2237_v32  ;;  %v2369_v26 = vld [vmem:[%s3334_s0 + $0x74] ss:$56 sps:$4 sm:$0xff]   ;;  %v2374_v29 = vld [vmem:[%s3334_s0 + $0x78] ss:$56 sps:$4 sm:$0xff]   ;;  %v2321_v30 = vld [vmem:[%s3333_s1 + $0x220] ss:$8 sps:$4 sm:$0xff]  }
  0x21   :  { %1550 = vmatprep.subr.bf16.mxu1 %v2239_v33  ;;  %v2324_v31 = vld [vmem:[%s3333_s1 + $0x320] ss:$8 sps:$4 sm:$0xff]   ;;  %v2329_v32 = vld [vmem:[%s3333_s1 + $0x214] ss:$8 sps:$4 sm:$0xff]   ;;  %vm3309_vm7 = vmor %vm1901_vm2, %vm1900_vm1 }
  0x22   :  { %v2332_v33 = vld [vmem:[%s3333_s1 + $0x314] ss:$8 sps:$4 sm:$0xff]   ;;  %v2348_v49 = vld [vmem:[%s3333_s1 + $0x3e0] ss:$8 sps:$4 sm:$0xff]  }
  0x23   :  { %1498 = vmatpush2.bf16.msra.mxu0 %v2241_v34  ;;  %v2327_v34 = vld [vmem:[%s3333_s1 + $0x210] ss:$8 sps:$4 sm:$0xff]  }
  0x24   :  { %1551 = vmatpush2.bf16.msra.mxu1 %v2242_v35  ;;  %1499 = vmatprep.subr.bf16.mxu0 %v2243_v36  ;;  %v2330_v35 = vld [vmem:[%s3333_s1 + $0x310] ss:$8 sps:$4 sm:$0xff]   ;;  %v2335_v36 = vld [vmem:[%s3333_s1 + $0x204] ss:$8 sps:$4 sm:$0xff]  }
  0x25   :  { %1552 = vmatprep.subr.bf16.mxu1 %v2245_v37  ;;  %v2338_v37 = vld [vmem:[%s3333_s1 + $0x304] ss:$8 sps:$4 sm:$0xff]  }
  0x27   :  { %1500 = vmatpush2.bf16.msra.mxu0 %v2247_v38  ;;  %v2333_v38 = vld [vmem:[%s3333_s1 + $0x200] ss:$8 sps:$4 sm:$0xff]  }
  0x28   :  { %1553 = vmatpush2.bf16.msra.mxu1 %v2248_v39  ;;  %1501 = vmatprep.subr.bf16.mxu0 %v2249_v40  ;;  %v2336_v39 = vld [vmem:[%s3333_s1 + $0x300] ss:$8 sps:$4 sm:$0xff]   ;;  %v2341_v40 = vld [vmem:[%s3333_s1 + $0x2f4] ss:$8 sps:$4 sm:$0xff]  }
  0x29   :  { %1554 = vmatprep.subr.bf16.mxu1 %v2251_v41  ;;  %v2395_v41 = vld [vmem:[%s3334_s0 + $0x14] ss:$56 sps:$4 sm:$0xff]  }
  0x2b   :  { %1502 = vmatpush2.bf16.msra.mxu0 %v2253_v42  ;;  %v2344_v42 = vld [vmem:[%s3333_s1 + $0x3f4] ss:$8 sps:$4 sm:$0xff]  }
  0x2c   :  { %1555 = vmatpush2.bf16.msra.mxu1 %v2254_v43  ;;  %1503 = vmatprep.subr.bf16.mxu0 %v2255_v44  ;;  %v2398_v43 = vld [vmem:[%s3334_s0 + $0x1c] ss:$56 sps:$4 sm:$0xff]   ;;  %v2339_v44 = vld [vmem:[%s3333_s1 + $0x2f0] ss:$8 sps:$4 sm:$0xff]  }
  0x2d   :  { %1556 = vmatprep.subr.bf16.mxu1 %v2257_v45  ;;  %v2342_v45 = vld [vmem:[%s3333_s1 + $0x3f0] ss:$8 sps:$4 sm:$0xff]  }
  0x2f   :  { %1504 = vmatpush2.bf16.msra.mxu0 %v2259_v46  ;;  %v2347_v46 = vld [vmem:[%s3333_s1 + $0x2e4] ss:$8 sps:$4 sm:$0xff]  }
  0x30   :  { %1557 = vmatpush2.bf16.msra.mxu1 %v2260_v47  ;;  %1505 = vmatprep.subr.bf16.mxu0 %v2261_v48  ;;  %v2350_v47 = vld [vmem:[%s3333_s1 + $0x3e4] ss:$8 sps:$4 sm:$0xff]   ;;  %v2345_v48 = vld [vmem:[%s3333_s1 + $0x2e0] ss:$8 sps:$4 sm:$0xff]  }
  0x31   :  { %1558 = vmatprep.subr.bf16.mxu1 %v2263_v50  ;;  %v2353_v50 = vld [vmem:[%s3333_s1 + $0x2d4] ss:$8 sps:$4 sm:$0xff]  }
  0x33   :  { %1506 = vmatpush2.bf16.msra.mxu0 %v2265_v52  ;;  %v2351_v52 = vld [vmem:[%s3333_s1 + $0x2d0] ss:$8 sps:$4 sm:$0xff]  }
  0x34   :  { %1559 = vmatpush2.bf16.msra.mxu1 %v2266_v53  ;;  %1507 = vmatprep.subr.bf16.mxu0 %v2267_v54  ;;  %v2354_v53 = vld [vmem:[%s3333_s1 + $0x3d0] ss:$8 sps:$4 sm:$0xff]   ;;  %v2359_v54 = vld [vmem:[%s3333_s1 + $0x2c4] ss:$8 sps:$4 sm:$0xff]  }
  0x35   :  { %1560 = vmatprep.subr.bf16.mxu1 %v2269_v55  ;;  %v2362_v55 = vld [vmem:[%s3333_s1 + $0x3c4] ss:$8 sps:$4 sm:$0xff]  }
  0x37   :  { %1508 = vmatpush2.bf16.msra.mxu0 %v2271_v56  ;;  %v2357_v56 = vld [vmem:[%s3333_s1 + $0x2c0] ss:$8 sps:$4 sm:$0xff]  }
  0x38   :  { %1561 = vmatpush2.bf16.msra.mxu1 %v2272_v57  ;;  %1509 = vmatprep.subr.bf16.mxu0 %v2273_v58  ;;  %v2360_v57 = vld [vmem:[%s3333_s1 + $0x3c0] ss:$8 sps:$4 sm:$0xff]   ;;  %v2365_v58 = vld [vmem:[%s3333_s1 + $0x2b4] ss:$8 sps:$4 sm:$0xff]  }
  0x39   :  { %1562 = vmatprep.subr.bf16.mxu1 %v2275_v59  ;;  %v2368_v59 = vld [vmem:[%s3333_s1 + $0x3b4] ss:$8 sps:$4 sm:$0xff]  }
  0x3b   :  { %1510 = vmatpush2.bf16.msra.mxu0 %v2277_v60  ;;  %v2363_v60 = vld [vmem:[%s3333_s1 + $0x2b0] ss:$8 sps:$4 sm:$0xff]  }
  0x3c   :  { %1563 = vmatpush2.bf16.msra.mxu1 %v2278_v61  ;;  %1511 = vmatprep.subr.bf16.mxu0 %v2279_v62  ;;  %v2366_v61 = vld [vmem:[%s3333_s1 + $0x3b0] ss:$8 sps:$4 sm:$0xff]   ;;  %v2377_v62 = vld [vmem:[%s3333_s1 + $0x2a4] ss:$8 sps:$4 sm:$0xff]  }
  0x3d   :  { %1564 = vmatprep.subr.bf16.mxu1 %v2281_v63  ;;  %v2380_v63 = vld [vmem:[%s3333_s1 + $0x3a4] ss:$8 sps:$4 sm:$0xff]  }
  0x3f   :  { %1512 = vmatpush2.bf16.msra.mxu0 %v2283_v0  ;;  %v2375_v0 = vld [vmem:[%s3333_s1 + $0x2a0] ss:$8 sps:$4 sm:$0xff]  }
  0x40   :  { %1565 = vmatpush2.bf16.msra.mxu1 %v2284_v1  ;;  %1587 = vmatprep.subr.bf16.mxu0 %v2293_v2  ;;  %v2378_v1 = vld [vmem:[%s3333_s1 + $0x3a0] ss:$8 sps:$4 sm:$0xff]   ;;  %v2383_v2 = vld [vmem:[%s3333_s1 + $0x294] ss:$8 sps:$4 sm:$0xff]  }
  0x41   :  { %1640 = vmatprep.subr.bf16.mxu1 %v2296_v3  ;;  %v2386_v3 = vld [vmem:[%s3333_s1 + $0x394] ss:$8 sps:$4 sm:$0xff]  }
  0x42   :  { %1514 = vmatmul.mubr.bf16.vlgmr.msra.gmra.mxu0 %v2285_v4  ;;  %v2381_v4 = vld [vmem:[%s3333_s1 + $0x290] ss:$8 sps:$4 sm:$0xff]  }
  0x43   :  { %1567 = vmatmul.mubr.bf16.vlgmr.msra.gmra.mxu1 %v2288_v5  ;;  %1588 = vmatpush1.bf16.msra.mxu0 %v2291_v6  ;;  %v2384_v5 = vld [vmem:[%s3333_s1 + $0x390] ss:$8 sps:$4 sm:$0xff]   ;;  %v2389_v6 = vld [vmem:[%s3333_s1 + $0x284] ss:$8 sps:$4 sm:$0xff]  }
  0x44   :  { %1641 = vmatpush1.bf16.msra.mxu1 %v2294_v7  ;;  %1589 = vmatprep.subr.bf16.mxu0 %v2299_v8  ;;  %v2392_v7 = vld [vmem:[%s3333_s1 + $0x384] ss:$8 sps:$4 sm:$0xff]   ;;  %v2387_v8 = vld [vmem:[%s3333_s1 + $0x280] ss:$8 sps:$4 sm:$0xff]  }
  0x45   :  { %1642 = vmatprep.subr.bf16.mxu1 %v2302_v9  ;;  %1523 = vmatprep.mubr.bf16.mxu0 %v2369_v26  ;;  %v2390_v9 = vld [vmem:[%s3333_s1 + $0x380] ss:$8 sps:$4 sm:$0xff]   ;;  %v2417_v26 = vld [vmem:[%s3333_s1 + $0x550] ss:$8 sps:$4 sm:$0xff]  }
  0x46   :  { %1576 = vmatprep.mubr.bf16.mxu1 %v2371_v27  ;;  %v2422_v27 = vld [vmem:[%s3334_s0 + $0x88] ss:$56 sps:$4 sm:$0xff]  }
  0x47   :  { %1590 = vmatpush1.bf16.msra.mxu0 %v2297_v10  ;;  %v2401_v10 = vld [vmem:[%s3333_s1 + $0x474] ss:$8 sps:$4 sm:$0xff]  }
  0x48   :  { %1643 = vmatpush1.bf16.msra.mxu1 %v2300_v11  ;;  %1591 = vmatprep.subr.bf16.mxu0 %v2305_v12  ;;  %v2404_v11 = vld [vmem:[%s3333_s1 + $0x574] ss:$8 sps:$4 sm:$0xff]   ;;  %v2393_v12 = vld [vmem:[%s3334_s0 + $0x10] ss:$56 sps:$4 sm:$0xff]  }
  0x49   :  { %1644 = vmatprep.subr.bf16.mxu1 %v2308_v13  ;;  %v2396_v13 = vld [vmem:[%s3334_s0 + $0x18] ss:$56 sps:$4 sm:$0xff]  }
  0x4a   :  { %1524 = vmatmul.mubr.bf16.gmra.mxu0 %v2373_v28  ;;  %v2425_v28 = vld [vmem:[%s3333_s1 + $0x444] ss:$8 sps:$4 sm:$0xff]  }
  0x4b   :  { %1592 = vmatpush1.bf16.msra.mxu0 %v2303_v14  ;;  %1577 = vmatmul.mubr.bf16.gmra.mxu1 %v2374_v29  ;;  %v2399_v14 = vld [vmem:[%s3333_s1 + $0x470] ss:$8 sps:$4 sm:$0xff]   ;;  %v2428_v29 = vld [vmem:[%s3333_s1 + $0x544] ss:$8 sps:$4 sm:$0xff]  }
  0x4c   :  { %1645 = vmatpush1.bf16.msra.mxu1 %v2306_v15  ;;  %1593 = vmatprep.subr.bf16.mxu0 %v2311_v16  ;;  %v2402_v15 = vld [vmem:[%s3333_s1 + $0x570] ss:$8 sps:$4 sm:$0xff]   ;;  %v2407_v16 = vld [vmem:[%s3333_s1 + $0x464] ss:$8 sps:$4 sm:$0xff]  }
  0x4d   :  { %1646 = vmatprep.subr.bf16.mxu1 %v2314_v17  ;;  %1619 = vmatprep.mubr.bf16.mxu0 %v2395_v41  ;;  %v2410_v17 = vld [vmem:[%s3333_s1 + $0x564] ss:$8 sps:$4 sm:$0xff]   ;;  %v2438_v41 = vld [vmem:[%s3333_s1 + $0x520] ss:$8 sps:$4 sm:$0xff]  }
  0x4e   :  { %1672 = vmatprep.mubr.bf16.mxu1 %v2398_v43  ;;  %v2446_v43 = vld [vmem:[%s3333_s1 + $0x514] ss:$8 sps:$4 sm:$0xff]  }
  0x4f   :  { %1594 = vmatpush1.bf16.msra.mxu0 %v2309_v18  ;;  %v2411_v18 = vld [vmem:[%s3334_s0 + $0x84] ss:$56 sps:$4 sm:$0xff]  }
  0x50   :  { %1647 = vmatpush1.bf16.msra.mxu1 %v2312_v19  ;;  %1595 = vmatprep.subr.bf16.mxu0 %v2317_v20  ;;  %v2420_v19 = vld [vmem:[%s3334_s0 + $0x8c] ss:$56 sps:$4 sm:$0xff]   ;;  %v2405_v20 = vld [vmem:[%s3333_s1 + $0x460] ss:$8 sps:$4 sm:$0xff]  }
  0x51   :  { %1648 = vmatprep.subr.bf16.mxu1 %v2320_v21  ;;  %v2408_v21 = vld [vmem:[%s3333_s1 + $0x560] ss:$8 sps:$4 sm:$0xff]  }
  0x53   :  { %1596 = vmatpush1.bf16.msra.mxu0 %v2315_v22  ;;  %v2416_v22 = vld [vmem:[%s3333_s1 + $0x454] ss:$8 sps:$4 sm:$0xff]  }
  0x54   :  { %1649 = vmatpush1.bf16.msra.mxu1 %v2318_v23  ;;  %1597 = vmatprep.subr.bf16.mxu0 %v2323_v24  ;;  %v2419_v23 = vld [vmem:[%s3333_s1 + $0x554] ss:$8 sps:$4 sm:$0xff]   ;;  %v2413_v24 = vld [vmem:[%s3334_s0 + $0x80] ss:$56 sps:$4 sm:$0xff]  }
  0x55   :  { %1650 = vmatprep.subr.bf16.mxu1 %v2326_v25  ;;  %v2414_v25 = vld [vmem:[%s3333_s1 + $0x450] ss:$8 sps:$4 sm:$0xff]  }
  0x57   :  { %1598 = vmatpush1.bf16.msra.mxu0 %v2321_v30  ;;  %v2423_v30 = vld [vmem:[%s3333_s1 + $0x440] ss:$8 sps:$4 sm:$0xff]  }
  0x58   :  { %1651 = vmatpush1.bf16.msra.mxu1 %v2324_v31  ;;  %1599 = vmatprep.subr.bf16.mxu0 %v2329_v32  ;;  %v2426_v31 = vld [vmem:[%s3333_s1 + $0x540] ss:$8 sps:$4 sm:$0xff]   ;;  %v2431_v32 = vld [vmem:[%s3333_s1 + $0x434] ss:$8 sps:$4 sm:$0xff]  }
  0x59   :  { %1652 = vmatprep.subr.bf16.mxu1 %v2332_v33  ;;  %v2503_v33 = vld [vmem:[%s3334_s0 + $0x24] ss:$56 sps:$4 sm:$0xff]  }
  0x5b   :  { %1600 = vmatpush1.bf16.msra.mxu0 %v2327_v34  ;;  %v2434_v34 = vld [vmem:[%s3333_s1 + $0x534] ss:$8 sps:$4 sm:$0xff]  }
  0x5c   :  { %1653 = vmatpush1.bf16.msra.mxu1 %v2330_v35  ;;  %1601 = vmatprep.subr.bf16.mxu0 %v2335_v36  ;;  %v2506_v35 = vld [vmem:[%s3334_s0 + $0x2c] ss:$56 sps:$4 sm:$0xff]   ;;  %v2429_v36 = vld [vmem:[%s3333_s1 + $0x430] ss:$8 sps:$4 sm:$0xff]  }
  0x5d   :  { %1654 = vmatprep.subr.bf16.mxu1 %v2338_v37  ;;  %v2432_v37 = vld [vmem:[%s3333_s1 + $0x530] ss:$8 sps:$4 sm:$0xff]  }
  0x5f   :  { %1602 = vmatpush1.bf16.msra.mxu0 %v2333_v38  ;;  %v2437_v38 = vld [vmem:[%s3333_s1 + $0x424] ss:$8 sps:$4 sm:$0xff]  }
  0x60   :  { %1655 = vmatpush1.bf16.msra.mxu1 %v2336_v39  ;;  %1603 = vmatprep.subr.bf16.mxu0 %v2341_v40  ;;  %v2440_v39 = vld [vmem:[%s3333_s1 + $0x524] ss:$8 sps:$4 sm:$0xff]   ;;  %v2435_v40 = vld [vmem:[%s3333_s1 + $0x420] ss:$8 sps:$4 sm:$0xff]  }
  0x61   :  { %1656 = vmatprep.subr.bf16.mxu1 %v2344_v42  ;;  %v2443_v42 = vld [vmem:[%s3333_s1 + $0x414] ss:$8 sps:$4 sm:$0xff]  }
  0x63   :  { %1604 = vmatpush2.bf16.msra.mxu0 %v2339_v44  ;;  %v2441_v44 = vld [vmem:[%s3333_s1 + $0x410] ss:$8 sps:$4 sm:$0xff]  }
  0x64   :  { %1657 = vmatpush2.bf16.msra.mxu1 %v2342_v45  ;;  %1605 = vmatprep.subr.bf16.mxu0 %v2347_v46  ;;  %v2444_v45 = vld [vmem:[%s3333_s1 + $0x510] ss:$8 sps:$4 sm:$0xff]   ;;  %v2449_v46 = vld [vmem:[%s3333_s1 + $0x404] ss:$8 sps:$4 sm:$0xff]  }
  0x65   :  { %1658 = vmatprep.subr.bf16.mxu1 %v2350_v47  ;;  %v2452_v47 = vld [vmem:[%s3333_s1 + $0x504] ss:$8 sps:$4 sm:$0xff]  }
  0x67   :  { %1606 = vmatpush2.bf16.msra.mxu0 %v2345_v48  ;;  %v2447_v48 = vld [vmem:[%s3333_s1 + $0x400] ss:$8 sps:$4 sm:$0xff]  }
  0x68   :  { %1659 = vmatpush2.bf16.msra.mxu1 %v2348_v49  ;;  %1607 = vmatprep.subr.bf16.mxu0 %v2353_v50  ;;  %v2450_v49 = vld [vmem:[%s3333_s1 + $0x500] ss:$8 sps:$4 sm:$0xff]   ;;  %v2455_v50 = vld [vmem:[%s3333_s1 + $0x4f4] ss:$8 sps:$4 sm:$0xff]  }
  0x69   :  { %1660 = vmatprep.subr.bf16.mxu1 %v2356_v51  ;;  %v2458_v51 = vld [vmem:[%s3333_s1 + $0x5f4] ss:$8 sps:$4 sm:$0xff]  }
  0x6b   :  { %1608 = vmatpush2.bf16.msra.mxu0 %v2351_v52  ;;  %v2453_v52 = vld [vmem:[%s3333_s1 + $0x4f0] ss:$8 sps:$4 sm:$0xff]  }
  0x6c   :  { %1661 = vmatpush2.bf16.msra.mxu1 %v2354_v53  ;;  %1609 = vmatprep.subr.bf16.mxu0 %v2359_v54  ;;  %v2456_v53 = vld [vmem:[%s3333_s1 + $0x5f0] ss:$8 sps:$4 sm:$0xff]   ;;  %v2461_v54 = vld [vmem:[%s3333_s1 + $0x4e4] ss:$8 sps:$4 sm:$0xff]  }
  0x6d   :  { %1662 = vmatprep.subr.bf16.mxu1 %v2362_v55  ;;  %v2464_v55 = vld [vmem:[%s3333_s1 + $0x5e4] ss:$8 sps:$4 sm:$0xff]  }
  0x6f   :  { %1610 = vmatpush2.bf16.msra.mxu0 %v2357_v56  ;;  %v2459_v56 = vld [vmem:[%s3333_s1 + $0x4e0] ss:$8 sps:$4 sm:$0xff]  }
  0x70   :  { %1663 = vmatpush2.bf16.msra.mxu1 %v2360_v57  ;;  %1611 = vmatprep.subr.bf16.mxu0 %v2365_v58  ;;  %v2462_v57 = vld [vmem:[%s3333_s1 + $0x5e0] ss:$8 sps:$4 sm:$0xff]   ;;  %v2467_v58 = vld [vmem:[%s3333_s1 + $0x4d4] ss:$8 sps:$4 sm:$0xff]  }
  0x71   :  { %1664 = vmatprep.subr.bf16.mxu1 %v2368_v59  ;;  %v2470_v59 = vld [vmem:[%s3333_s1 + $0x5d4] ss:$8 sps:$4 sm:$0xff]  }
  0x73   :  { %1612 = vmatpush2.bf16.msra.mxu0 %v2363_v60  ;;  %v2465_v60 = vld [vmem:[%s3333_s1 + $0x4d0] ss:$8 sps:$4 sm:$0xff]  }
  0x74   :  { %1665 = vmatpush2.bf16.msra.mxu1 %v2366_v61  ;;  %1613 = vmatprep.subr.bf16.mxu0 %v2377_v62  ;;  %v2468_v61 = vld [vmem:[%s3333_s1 + $0x5d0] ss:$8 sps:$4 sm:$0xff]   ;;  %v2473_v62 = vld [vmem:[%s3333_s1 + $0x4c4] ss:$8 sps:$4 sm:$0xff]  }
  0x75   :  { %1666 = vmatprep.subr.bf16.mxu1 %v2380_v63  ;;  %v2476_v63 = vld [vmem:[%s3333_s1 + $0x5c4] ss:$8 sps:$4 sm:$0xff]  }
  0x77   :  { %1614 = vmatpush2.bf16.msra.mxu0 %v2375_v0  ;;  %v2471_v0 = vld [vmem:[%s3333_s1 + $0x4c0] ss:$8 sps:$4 sm:$0xff]  }
  0x78   :  { %1667 = vmatpush2.bf16.msra.mxu1 %v2378_v1  ;;  %1615 = vmatprep.subr.bf16.mxu0 %v2383_v2  ;;  %v2474_v1 = vld [vmem:[%s3333_s1 + $0x5c0] ss:$8 sps:$4 sm:$0xff]   ;;  %v2479_v2 = vld [vmem:[%s3333_s1 + $0x4b4] ss:$8 sps:$4 sm:$0xff]  }
  0x79   :  { %1668 = vmatprep.subr.bf16.mxu1 %v2386_v3  ;;  %v2482_v3 = vld [vmem:[%s3333_s1 + $0x5b4] ss:$8 sps:$4 sm:$0xff]  }
  0x7b   :  { %1616 = vmatpush2.bf16.msra.mxu0 %v2381_v4  ;;  %v2477_v4 = vld [vmem:[%s3333_s1 + $0x4b0] ss:$8 sps:$4 sm:$0xff]  }
  0x7c   :  { %1669 = vmatpush2.bf16.msra.mxu1 %v2384_v5  ;;  %1617 = vmatprep.subr.bf16.mxu0 %v2389_v6  ;;  %v2480_v5 = vld [vmem:[%s3333_s1 + $0x5b0] ss:$8 sps:$4 sm:$0xff]   ;;  %v2485_v6 = vld [vmem:[%s3333_s1 + $0x4a4] ss:$8 sps:$4 sm:$0xff]  }
  0x7d   :  { %1670 = vmatprep.subr.bf16.mxu1 %v2392_v7  ;;  %v2488_v7 = vld [vmem:[%s3333_s1 + $0x5a4] ss:$8 sps:$4 sm:$0xff]  }
  0x7f   :  { %1618 = vmatpush2.bf16.msra.mxu0 %v2387_v8  ;;  %v2483_v8 = vld [vmem:[%s3333_s1 + $0x4a0] ss:$8 sps:$4 sm:$0xff]  }
  0x80   :  { %1671 = vmatpush2.bf16.msra.mxu1 %v2390_v9  ;;  %1693 = vmatprep.subr.bf16.mxu0 %v2401_v10  ;;  %v2486_v9 = vld [vmem:[%s3333_s1 + $0x5a0] ss:$8 sps:$4 sm:$0xff]   ;;  %v2491_v10 = vld [vmem:[%s3333_s1 + $0x494] ss:$8 sps:$4 sm:$0xff]  }
  0x81   :  { %1746 = vmatprep.subr.bf16.mxu1 %v2404_v11  ;;  %v2494_v11 = vld [vmem:[%s3333_s1 + $0x594] ss:$8 sps:$4 sm:$0xff]  }
  0x82   :  { %1620 = vmatmul.mubr.bf16.vlgmr.msra.gmra.mxu0 %v2393_v12  ;;  %v2489_v12 = vld [vmem:[%s3333_s1 + $0x490] ss:$8 sps:$4 sm:$0xff]  }
  0x83   :  { %1673 = vmatmul.mubr.bf16.vlgmr.msra.gmra.mxu1 %v2396_v13  ;;  %1694 = vmatpush1.bf16.msra.mxu0 %v2399_v14  ;;  %v2492_v13 = vld [vmem:[%s3333_s1 + $0x590] ss:$8 sps:$4 sm:$0xff]   ;;  %v2497_v14 = vld [vmem:[%s3333_s1 + $0x484] ss:$8 sps:$4 sm:$0xff]  }
  0x84   :  { %1747 = vmatpush1.bf16.msra.mxu1 %v2402_v15  ;;  %1695 = vmatprep.subr.bf16.mxu0 %v2407_v16  ;;  %v2500_v15 = vld [vmem:[%s3333_s1 + $0x584] ss:$8 sps:$4 sm:$0xff]   ;;  %v2495_v16 = vld [vmem:[%s3333_s1 + $0x480] ss:$8 sps:$4 sm:$0xff]  }
  0x85   :  { %1748 = vmatprep.subr.bf16.mxu1 %v2410_v17  ;;  %1629 = vmatprep.mubr.bf16.mxu0 %v2411_v18  ;;  %v2498_v17 = vld [vmem:[%s3333_s1 + $0x580] ss:$8 sps:$4 sm:$0xff]   ;;  %v2509_v18 = vld [vmem:[%s3333_s1 + $0x674] ss:$8 sps:$4 sm:$0xff]  }
  0x86   :  { %1682 = vmatprep.mubr.bf16.mxu1 %v2420_v19  ;;  %v2501_v19 = vld [vmem:[%s3334_s0 + $0x20] ss:$56 sps:$4 sm:$0xff]  }
  0x87   :  { %1696 = vmatpush1.bf16.msra.mxu0 %v2405_v20  ;;  %v2504_v20 = vld [vmem:[%s3334_s0 + $0x28] ss:$56 sps:$4 sm:$0xff]  }
  0x88   :  { %1749 = vmatpush1.bf16.msra.mxu1 %v2408_v21  ;;  %1697 = vmatprep.subr.bf16.mxu0 %v2416_v22  ;;  %v2507_v21 = vld [vmem:[%s3333_s1 + $0x670] ss:$8 sps:$4 sm:$0xff]   ;;  %v2512_v22 = vld [vmem:[%s3333_s1 + $0x664] ss:$8 sps:$4 sm:$0xff]  }
  0x89   :  { %1750 = vmatprep.subr.bf16.mxu1 %v2419_v23  ;;  %v2513_v23 = vld [vmem:[%s3334_s0 + $0x94] ss:$56 sps:$4 sm:$0xff]  }
  0x8a   :  { %1630 = vmatmul.mubr.bf16.gmra.mxu0 %v2413_v24  ;;  %v2519_v24 = vld [vmem:[%s3334_s0 + $0x9c] ss:$56 sps:$4 sm:$0xff]  }
  0x8b   :  { %1683 = vmatmul.mubr.bf16.gmra.mxu1 %v2422_v27  ;;  %1698 = vmatpush1.bf16.msra.mxu0 %v2414_v25  ;;  %v2510_v25 = vld [vmem:[%s3333_s1 + $0x660] ss:$8 sps:$4 sm:$0xff]  }
  0x8c   :  { %1751 = vmatpush1.bf16.msra.mxu1 %v2417_v26  ;;  %1699 = vmatprep.subr.bf16.mxu0 %v2425_v28  ;;  %v2518_v26 = vld [vmem:[%s3333_s1 + $0x654] ss:$8 sps:$4 sm:$0xff]   ;;  %v2515_v27 = vld [vmem:[%s3334_s0 + $0x90] ss:$56 sps:$4 sm:$0xff]  }
  0x8d   :  { %1752 = vmatprep.subr.bf16.mxu1 %v2428_v29  ;;  %1725 = vmatprep.mubr.bf16.mxu0 %v2503_v33  ;;  %v2521_v28 = vld [vmem:[%s3334_s0 + $0x98] ss:$56 sps:$4 sm:$0xff]   ;;  %v2522_v33 = vld [vmem:[%s3333_s1 + $0x640] ss:$8 sps:$4 sm:$0xff]  }
  0x8e   :  { %1778 = vmatprep.mubr.bf16.mxu1 %v2506_v35  ;;  %v2516_v29 = vld [vmem:[%s3333_s1 + $0x650] ss:$8 sps:$4 sm:$0xff]  }
  0x8f   :  { %1700 = vmatpush1.bf16.msra.mxu0 %v2423_v30  ;;  %v2524_v30 = vld [vmem:[%s3333_s1 + $0x644] ss:$8 sps:$4 sm:$0xff]   ;;  %v2525_v35 = vld [vmem:[%s3333_s1 + $0x630] ss:$8 sps:$4 sm:$0xff]  }
  0x90   :  { %1753 = vmatpush1.bf16.msra.mxu1 %v2426_v31  ;;  %1701 = vmatprep.subr.bf16.mxu0 %v2431_v32  ;;  %v2551_v31 = vld [vmem:[%s3334_s0 + $0x34] ss:$56 sps:$4 sm:$0xff]   ;;  %v2554_v32 = vld [vmem:[%s3334_s0 + $0xa4] ss:$56 sps:$4 sm:$0xff]  }
  0x91   :  { %1754 = vmatprep.subr.bf16.mxu1 %v2434_v34  ;;  %v2527_v34 = vld [vmem:[%s3333_s1 + $0x634] ss:$8 sps:$4 sm:$0xff]  }
  0x93   :  { %1702 = vmatpush1.bf16.msra.mxu0 %v2429_v36  ;;  %v2530_v36 = vld [vmem:[%s3333_s1 + $0x624] ss:$8 sps:$4 sm:$0xff]  }
  0x94   :  { %1755 = vmatpush1.bf16.msra.mxu1 %v2432_v37  ;;  %1703 = vmatprep.subr.bf16.mxu0 %v2437_v38  ;;  %v2528_v37 = vld [vmem:[%s3333_s1 + $0x620] ss:$8 sps:$4 sm:$0xff]   ;;  %v2533_v38 = vld [vmem:[%s3333_s1 + $0x614] ss:$8 sps:$4 sm:$0xff]  }
  0x95   :  { %1756 = vmatprep.subr.bf16.mxu1 %v2440_v39  ;;  %v2531_v39 = vld [vmem:[%s3333_s1 + $0x610] ss:$8 sps:$4 sm:$0xff]  }
  0x97   :  { %1704 = vmatpush1.bf16.msra.mxu0 %v2435_v40  ;;  %v2536_v40 = vld [vmem:[%s3333_s1 + $0x604] ss:$8 sps:$4 sm:$0xff]  }
  0x98   :  { %1757 = vmatpush1.bf16.msra.mxu1 %v2438_v41  ;;  %1705 = vmatprep.subr.bf16.mxu0 %v2443_v42  ;;  %v2534_v41 = vld [vmem:[%s3333_s1 + $0x600] ss:$8 sps:$4 sm:$0xff]   ;;  %v2539_v42 = vld [vmem:[%s3333_s1 + $0x6b4] ss:$8 sps:$4 sm:$0xff]  }
  0x99   :  { %1758 = vmatprep.subr.bf16.mxu1 %v2446_v43  ;;  %v2537_v43 = vld [vmem:[%s3333_s1 + $0x6b0] ss:$8 sps:$4 sm:$0xff]  }
  0x9b   :  { %1706 = vmatpush1.bf16.msra.mxu0 %v2441_v44  ;;  %v2542_v44 = vld [vmem:[%s3333_s1 + $0x6a4] ss:$8 sps:$4 sm:$0xff]  }
  0x9c   :  { %1759 = vmatpush1.bf16.msra.mxu1 %v2444_v45  ;;  %1707 = vmatprep.subr.bf16.mxu0 %v2449_v46  ;;  %v2540_v45 = vld [vmem:[%s3333_s1 + $0x6a0] ss:$8 sps:$4 sm:$0xff]   ;;  %v2545_v46 = vld [vmem:[%s3333_s1 + $0x694] ss:$8 sps:$4 sm:$0xff]  }
  0x9d   :  { %1760 = vmatprep.subr.bf16.mxu1 %v2452_v47  ;;  %v2543_v47 = vld [vmem:[%s3333_s1 + $0x690] ss:$8 sps:$4 sm:$0xff]  }
  0x9f   :  { %1708 = vmatpush1.bf16.msra.mxu0 %v2447_v48  ;;  %v2548_v48 = vld [vmem:[%s3333_s1 + $0x684] ss:$8 sps:$4 sm:$0xff]  }
  0xa0   :  { %1761 = vmatpush1.bf16.msra.mxu1 %v2450_v49  ;;  %1709 = vmatprep.subr.bf16.mxu0 %v2455_v50  ;;  %v2546_v49 = vld [vmem:[%s3333_s1 + $0x680] ss:$8 sps:$4 sm:$0xff]  }
  0xa1   :  { %1762 = vmatprep.subr.bf16.mxu1 %v2458_v51  ;;  %v2549_v50 = vld [vmem:[%s3334_s0 + $0x30] ss:$56 sps:$4 sm:$0xff]   ;;  %v2552_v51 = vld [vmem:[%s3334_s0 + $0xa0] ss:$56 sps:$4 sm:$0xff]  }
  0xa3   :  { %1710 = vmatpush2.bf16.msra.mxu0 %v2453_v52 }
  0xa4   :  { %1763 = vmatpush2.bf16.msra.mxu1 %v2456_v53  ;;  %1711 = vmatprep.subr.bf16.mxu0 %v2461_v54 }
  0xa5   :  { %1764 = vmatprep.subr.bf16.mxu1 %v2464_v55 }
  0xa7   :  { %1712 = vmatpush2.bf16.msra.mxu0 %v2459_v56 }
  0xa8   :  { %1765 = vmatpush2.bf16.msra.mxu1 %v2462_v57  ;;  %1713 = vmatprep.subr.bf16.mxu0 %v2467_v58 }
  0xa9   :  { %1766 = vmatprep.subr.bf16.mxu1 %v2470_v59 }
  0xab   :  { %1714 = vmatpush2.bf16.msra.mxu0 %v2465_v60 }
  0xac   :  { %1767 = vmatpush2.bf16.msra.mxu1 %v2468_v61  ;;  %1715 = vmatprep.subr.bf16.mxu0 %v2473_v62 }
  0xad   :  { %1768 = vmatprep.subr.bf16.mxu1 %v2476_v63 }
  0xaf   :  { %1716 = vmatpush2.bf16.msra.mxu0 %v2471_v0 }
  0xb0   :  { %1769 = vmatpush2.bf16.msra.mxu1 %v2474_v1  ;;  %1717 = vmatprep.subr.bf16.mxu0 %v2479_v2 }
  0xb1   :  { %1770 = vmatprep.subr.bf16.mxu1 %v2482_v3 }
  0xb3   :  { %1718 = vmatpush2.bf16.msra.mxu0 %v2477_v4 }
  0xb4   :  { %1771 = vmatpush2.bf16.msra.mxu1 %v2480_v5  ;;  %1719 = vmatprep.subr.bf16.mxu0 %v2485_v6 }
  0xb5   :  { %1772 = vmatprep.subr.bf16.mxu1 %v2488_v7 }
  0xb7   :  { %1720 = vmatpush2.bf16.msra.mxu0 %v2483_v8 }
  0xb8   :  { %1773 = vmatpush2.bf16.msra.mxu1 %v2486_v9  ;;  %1721 = vmatprep.subr.bf16.mxu0 %v2491_v10 }
  0xb9   :  { %1774 = vmatprep.subr.bf16.mxu1 %v2494_v11 }
  0xbb   :  { %1722 = vmatpush2.bf16.msra.mxu0 %v2489_v12 }
  0xbc   :  { %1775 = vmatpush2.bf16.msra.mxu1 %v2492_v13  ;;  %1723 = vmatprep.subr.bf16.mxu0 %v2497_v14 }
  0xbd   :  { %1776 = vmatprep.subr.bf16.mxu1 %v2500_v15 }
  0xbf   :  { %1724 = vmatpush2.bf16.msra.mxu0 %v2495_v16 }
  0xc0   :  { %1777 = vmatpush2.bf16.msra.mxu1 %v2498_v17  ;;  %1799 = vmatprep.subr.bf16.mxu0 %v2509_v18 }
  0xc1   :  { %2165 = vmatprep.subr.bf16.mxu1 %v2509_v18 }
  0xc2   :  { %1726 = vmatmul.mubr.bf16.vlgmr.msra.gmra.mxu0 %v2501_v19 }
  0xc3   :  { %1779 = vmatmul.mubr.bf16.vlgmr.msra.gmra.mxu1 %v2504_v20  ;;  %1800 = vmatpush1.bf16.msra.mxu0 %v2507_v21 }
  0xc4   :  { %2177 = vmatpush1.bf16.msra.mxu1 %v2507_v21  ;;  %1801 = vmatprep.subr.bf16.mxu0 %v2512_v22 }
  0xc5   :  { %2166 = vmatprep.subr.bf16.mxu1 %v2512_v22  ;;  %1735 = vmatprep.mubr.bf16.mxu0 %v2513_v23 }
  0xc6   :  { %1788 = vmatprep.mubr.bf16.mxu1 %v2519_v24 }
  0xc7   :  { %1802 = vmatpush1.bf16.msra.mxu0 %v2510_v25 }
  0xc8   :  { %2178 = vmatpush1.bf16.msra.mxu1 %v2510_v25  ;;  %1803 = vmatprep.subr.bf16.mxu0 %v2518_v26 }
  0xc9   :  { %2167 = vmatprep.subr.bf16.mxu1 %v2518_v26 }
  0xca   :  { %1736 = vmatmul.mubr.bf16.gmra.mxu0 %v2515_v27 }
  0xcb   :  { %1789 = vmatmul.mubr.bf16.gmra.mxu1 %v2521_v28  ;;  %1804 = vmatpush1.bf16.msra.mxu0 %v2516_v29 }
  0xcc   :  { %2179 = vmatpush1.bf16.msra.mxu1 %v2516_v29  ;;  %1805 = vmatprep.subr.bf16.mxu0 %v2524_v30 }
  0xcd   :  { %2168 = vmatprep.subr.bf16.mxu1 %v2524_v30  ;;  %2155 = vmatprep.mubr.msk.bf16.mxu0 %vm1474_vm0, %v2551_v31 }
  0xce   :  { %2156 = vmatprep.mubr.msk.bf16.mxu1 %vm1474_vm0, %v2554_v32 }
  0xcf   :  { %1806 = vmatpush1.bf16.msra.mxu0 %v2522_v33 }
  0xd0   :  { %2180 = vmatpush1.bf16.msra.mxu1 %v2522_v33  ;;  %1807 = vmatprep.subr.bf16.mxu0 %v2527_v34 }
  0xd1   :  { %2169 = vmatprep.subr.bf16.mxu1 %v2527_v34 }
  0xd3   :  { %1808 = vmatpush1.bf16.msra.mxu0 %v2525_v35 }
  0xd4   :  { %2181 = vmatpush1.bf16.msra.mxu1 %v2525_v35  ;;  %1809 = vmatprep.subr.bf16.mxu0 %v2530_v36 }
  0xd5   :  { %2170 = vmatprep.subr.bf16.mxu1 %v2530_v36 }
  0xd7   :  { %1810 = vmatpush1.bf16.msra.mxu0 %v2528_v37 }
  0xd8   :  { %2182 = vmatpush1.bf16.msra.mxu1 %v2528_v37  ;;  %1811 = vmatprep.subr.bf16.mxu0 %v2533_v38 }
  0xd9   :  { %2171 = vmatprep.subr.bf16.mxu1 %v2533_v38 }
  0xdb   :  { %1812 = vmatpush1.bf16.msra.mxu0 %v2531_v39 }
  0xdc   :  { %2183 = vmatpush1.bf16.msra.mxu1 %v2531_v39  ;;  %1813 = vmatprep.subr.bf16.mxu0 %v2536_v40 }
  0xdd   :  { %2172 = vmatprep.subr.bf16.mxu1 %v2536_v40 }
  0xdf   :  { %1814 = vmatpush1.bf16.msra.mxu0 %v2534_v41 }
  0xe0   :  { %2184 = vmatpush1.bf16.msra.mxu1 %v2534_v41  ;;  %1823 = vmatprep.subr.bf16.mxu0 %v2539_v42 }
  0xe1   :  { %2173 = vmatprep.subr.bf16.mxu1 %v2539_v42 }
  0xe3   :  { %1824 = vmatpush2.bf16.msra.mxu0 %v2537_v43 }
  0xe4   :  { %2185 = vmatpush2.bf16.msra.mxu1 %v2537_v43  ;;  %1825 = vmatprep.subr.bf16.mxu0 %v2542_v44 }
  0xe5   :  { %2174 = vmatprep.subr.bf16.mxu1 %v2542_v44 }
  0xe7   :  { %1826 = vmatpush2.bf16.msra.mxu0 %v2540_v45 }
  0xe8   :  { %2186 = vmatpush2.bf16.msra.mxu1 %v2540_v45  ;;  %1827 = vmatprep.subr.bf16.mxu0 %v2545_v46 }
  0xe9   :  { %2175 = vmatprep.subr.bf16.mxu1 %v2545_v46 }
  0xeb   :  { %1828 = vmatpush2.bf16.msra.mxu0 %v2543_v47 }
  0xec   :  { %2187 = vmatpush2.bf16.msra.mxu1 %v2543_v47  ;;  %1829 = vmatprep.subr.bf16.mxu0 %v2548_v48 }
  0xed   :  { %2176 = vmatprep.subr.bf16.mxu1 %v2548_v48 }
  0xef   :  { %1830 = vmatpush2.bf16.msra.mxu0 %v2546_v49 }
  0xf0   :  { %2188 = vmatpush2.bf16.msra.mxu1 %v2546_v49 }
  0xf2   :  { %1832 = vmatmul.mubr.bf16.vlgmr.msra.gmra.mxu0 %v2549_v50 }
  0xf3   :  { %1842 = vmatmul.mubr.bf16.vlgmr.msra.gmra.mxu1 %v2552_v51 }
 0x102   :  { %v1515_v52 = vpop.f32.mrf.mxu0 }
 0x103   :  { %v1568_v53 = vpop.f32.mrf.mxu1 }
 0x104   :  { %v1517_v54 = vpop.f32.mrf.mxu0  ;;  %v1569_v30 = vadd.f32 %v1568_v53, %v1515_v52 }
 0x105   :  { %v1570_v55 = vpop.f32.mrf.mxu1 }
 0x106   :  { %v1519_v56 = vpop.f32.mrf.mxu0  ;;  %v1571_v34 = vadd.f32 %v1570_v55, %v1517_v54 }
 0x107   :  { %v1572_v57 = vpop.f32.mrf.mxu1 }
 0x108   :  { %v1521_v58 = vpop.f32.mrf.mxu0  ;;  %v1573_v38 = vadd.f32 %v1572_v57, %v1519_v56 }
 0x109   :  { %v1574_v60 = vpop.f32.mrf.mxu1 }
 0x10a   :  { %v1525_v59 = vpop.f32.mrf.mxu0  ;;  %v1575_v40 = vadd.f32 %v1574_v60, %v1521_v58 }
 0x10b   :  { %v1578_v61 = vpop.f32.mrf.mxu1 }
 0x10c   :  { %v1527_v62 = vpop.f32.mrf.mxu0  ;;  %v1579_v31 = vadd.f32 %v1578_v61, %v1525_v59 }
 0x10d   :  { %v1580_v63 = vpop.f32.mrf.mxu1 }
 0x10e   :  { %v1529_v0 = vpop.f32.mrf.mxu0  ;;  %v1581_v35 = vadd.f32 %v1580_v63, %v1527_v62 }
 0x10f   :  { %v1582_v1 = vpop.f32.mrf.mxu1 }
 0x110   :  { %v1531_v2 = vpop.f32.mrf.mxu0  ;;  %v1583_v39 = vadd.f32 %v1582_v1, %v1529_v0 }
 0x111   :  { %v1584_v4 = vpop.f32.mrf.mxu1 }
 0x112   :  { %v1585_v41 = vadd.f32 %v1584_v4, %v1531_v2 }
 0x142   :  { %v1621_v3 = vpop.f32.mrf.mxu0 }
 0x143   :  { %v1674_v5 = vpop.f32.mrf.mxu1  ;;  %v1622_v32 = vadd.f32 %v1621_v3, %v1569_v30 }
 0x144   :  { %v1623_v6 = vpop.f32.mrf.mxu0 }
 0x145   :  { %v1676_v7 = vpop.f32.mrf.mxu1  ;;  %v1624_v42 = vadd.f32 %v1623_v6, %v1571_v34  ;;  %v1675_v44 = vadd.f32 %v1674_v5, %v1622_v32 }
 0x146   :  { %v1625_v8 = vpop.f32.mrf.mxu0 }
 0x147   :  { %v1678_v9 = vpop.f32.mrf.mxu1  ;;  %v1626_v45 = vadd.f32 %v1625_v8, %v1573_v38  ;;  %v1677_v54 = vadd.f32 %v1676_v7, %v1624_v42 }
 0x148   :  { %v1627_v10 = vpop.f32.mrf.mxu0 }
 0x149   :  { %v1680_v11 = vpop.f32.mrf.mxu1  ;;  %v1628_v48 = vadd.f32 %v1627_v10, %v1575_v40  ;;  %v1679_v59 = vadd.f32 %v1678_v9, %v1626_v45 }
 0x14a   :  { %v1631_v12 = vpop.f32.mrf.mxu0 }
 0x14b   :  { %v1684_v13 = vpop.f32.mrf.mxu1  ;;  %v1632_v33 = vadd.f32 %v1631_v12, %v1579_v31  ;;  %v1681_v56 = vadd.f32 %v1680_v11, %v1628_v48 }
 0x14c   :  { %v1633_v14 = vpop.f32.mrf.mxu0 }
 0x14d   :  { %v1686_v15 = vpop.f32.mrf.mxu1  ;;  %v1634_v43 = vadd.f32 %v1633_v14, %v1581_v35  ;;  %v1685_v46 = vadd.f32 %v1684_v13, %v1632_v33 }
 0x14e   :  { %v1635_v16 = vpop.f32.mrf.mxu0 }
 0x14f   :  { %v1688_v17 = vpop.f32.mrf.mxu1  ;;  %v1636_v47 = vadd.f32 %v1635_v16, %v1583_v39  ;;  %v1687_v55 = vadd.f32 %v1686_v15, %v1634_v43 }
 0x150   :  { %v1637_v18 = vpop.f32.mrf.mxu0 }
 0x151   :  { %v1690_v19 = vpop.f32.mrf.mxu1  ;;  %v1638_v49 = vadd.f32 %v1637_v18, %v1585_v41  ;;  %v1689_v61 = vadd.f32 %v1688_v17, %v1636_v47 }
 0x153   :  { %v1691_v57 = vadd.f32 %v1690_v19, %v1638_v49 }
 0x182   :  { %v1727_v20 = vpop.f32.mrf.mxu0 }
 0x183   :  { %v1780_v21 = vpop.f32.mrf.mxu1  ;;  %v1728_v52 = vadd.f32 %v1727_v20, %v1675_v44 }
 0x184   :  { %v1729_v22 = vpop.f32.mrf.mxu0 }
 0x185   :  { %v1782_v23 = vpop.f32.mrf.mxu1  ;;  %v1730_v58 = vadd.f32 %v1729_v22, %v1677_v54  ;;  %v1781_v0 = vadd.f32 %v1780_v21, %v1728_v52 }
 0x186   :  { %v1731_v24 = vpop.f32.mrf.mxu0 }
 0x187   :  { %v1784_v25 = vpop.f32.mrf.mxu1  ;;  %v1732_v1 = vadd.f32 %v1731_v24, %v1679_v59  ;;  %v1783_v7 = vadd.f32 %v1782_v23, %v1730_v58 }
 0x188   :  { %v1733_v26 = vpop.f32.mrf.mxu0 }
 0x189   :  { %v3302_v27 = vpop.f32.mrf.mxu1  ;;  %v1734_v6 = vadd.f32 %v1733_v26, %v1681_v56  ;;  %v1785_v14 = vadd.f32 %v1784_v25, %v1732_v1 }
 0x18a   :  { %v1737_v28 = vpop.f32.mrf.mxu0 }
 0x18b   :  { %v1790_v29 = vpop.f32.mrf.mxu1  ;;  %v1738_v53 = vadd.f32 %v1737_v28, %v1685_v46  ;;  %v1787_v22 = vadd.f32 %v3302_v27, %v1734_v6 }
 0x18c   :  { %v1739_v36 = vpop.f32.mrf.mxu0 }
 0x18d   :  { %v1792_v37 = vpop.f32.mrf.mxu1  ;;  %v1740_v60 = vadd.f32 %v1739_v36, %v1687_v55  ;;  %v1791_v2 = vadd.f32 %v1790_v29, %v1738_v53 }
 0x18e   :  { %v1741_v50 = vpop.f32.mrf.mxu0 }
 0x18f   :  { %v1794_v51 = vpop.f32.mrf.mxu1  ;;  %v1742_v3 = vadd.f32 %v1741_v50, %v1689_v61  ;;  %v1793_v13 = vadd.f32 %v1792_v37, %v1740_v60 }
 0x190   :  { %v1743_v62 = vpop.f32.mrf.mxu0 }
 0x191   :  { %v1796_v63 = vpop.f32.mrf.mxu1  ;;  %v1744_v8 = vadd.f32 %v1743_v62, %v1691_v57  ;;  %v1795_v15 = vadd.f32 %v1794_v51, %v1742_v3 }
 0x193   :  { %v1797_v24 = vadd.f32 %v1796_v63, %v1744_v8 }
 0x1b2   :  { %v1833_v4 = vpop.f32.mrf.mxu0 }
 0x1b3   :  { %v1843_v5 = vpop.f32.mrf.mxu1  ;;  %v1834_v10 = vadd.f32 %v1833_v4, %v1781_v0 }
 0x1b4   :  { %v1844_v12 = vadd.f32 %v1843_v5, %v1791_v2  ;;  %v1835_v9 = vpop.f32.mrf.mxu0 }
 0x1b5   :  { %v1845_v11 = vpop.f32.mrf.mxu1  ;;  %v1860_v16 = vmul.f32 0.2, %v1834_v10  ;;  %vm1852_vm3 = vcmp.gt.f32.partialorder %v1834_v10, 0.0  ;;  %v1836_v18 = vadd.f32 %v1835_v9, %v1783_v7 }
 0x1b6   :  { %v1864_v17 = vmul.f32 0.2, %v1844_v12  ;;  %vm1856_vm4 = vcmp.gt.f32.partialorder %v1844_v12, 0.0  ;;  %v1846_v19 = vadd.f32 %v1845_v11, %v1793_v13  ;;  %v1837_v20 = vpop.f32.mrf.mxu0 }
 0x1b7   :  { %v1847_v21 = vpop.f32.mrf.mxu1  ;;  %v1838_v26 = vadd.f32 %v1837_v20, %v1785_v14  ;;  %vm1853_vm5 = vcmp.gt.f32.partialorder %v1836_v18, 0.0  ;;  %v1861_v28 = vmul.f32 0.2, %v1836_v18  ;;  %v1868_v31 = vsel %vm1852_vm3, %v1834_v10, %v1860_v16 }
 0x1b8   :  { %v1848_v23 = vadd.f32 %v1847_v21, %v1795_v15  ;;  %vm1857_vm6 = vcmp.gt.f32.partialorder %v1846_v19, 0.0  ;;  %v1865_v29 = vmul.f32 0.2, %v1846_v19  ;;  %v1839_v30 = vpop.f32.mrf.mxu0  ;;  %v1872_v32 = vsel %vm1856_vm4, %v1844_v12, %v1864_v17 }
 0x1b9   :  { %v1849_v25 = vpop.f32.mrf.mxu1  ;;  %v1862_v33 = vmul.f32 0.2, %v1838_v26  ;;  %v1869_v35 = vsel %vm1853_vm5, %v1836_v18, %v1861_v28  ;;  %v1840_v37 = vadd.f32 %v1839_v30, %v1787_v22  ;;  %vm1854_vm8 = vcmp.gt.f32.partialorder %v1838_v26, 0.0 }
 0x1ba   :  { %v1866_v34 = vmul.f32 0.2, %v1848_v23  ;;  %v1873_v36 = vsel %vm1857_vm6, %v1846_v19, %v1865_v29  ;;  %v1850_v38 = vadd.f32 %v1849_v25, %v1797_v24  ;;  %v2161_v39 = vpack.c.bf16 %v1869_v35, %v1868_v31 }
 0x1bb   :  { %v2163_v40 = vpack.c.bf16 %v1873_v36, %v1872_v32  ;;  %vm1858_vm9 = vcmp.gt.f32.partialorder %v1848_v23, 0.0  ;;  %vm1855_vm10 = vcmp.gt.f32.partialorder %v1840_v37, 0.0  ;;  %v1863_v41 = vmul.f32 0.2, %v1840_v37 }
 0x1bc   :  { %vm1859_vm11 = vcmp.gt.f32.partialorder %v1850_v38, 0.0  ;;  %v1867_v42 = vmul.f32 0.2, %v1850_v38  ;;  %1903 = vst.msk [vmem:[%s3335_s2] sm:$0xff] %vm3309_vm7, %v2161_v39  ;;  %v1870_v43 = vsel %vm1854_vm8, %v1838_v26, %v1862_v33  ;;  %v1874_v44 = vsel %vm1858_vm9, %v1848_v23, %v1866_v34 }
 0x1bd   :  { %1905 = vst.msk [vmem:[%s3335_s2 + $0x10] sm:$0xff] %vm3309_vm7, %v2163_v40  ;;  %v1871_v45 = vsel %vm1855_vm10, %v1840_v37, %v1863_v41 }
 0x1be   :  { %v1875_v46 = vsel %vm1859_vm11, %v1850_v38, %v1867_v42  ;;  %v2162_v47 = vpack.c.bf16 %v1871_v45, %v1870_v43 }
 0x1bf   :  { %v2164_v48 = vpack.c.bf16 %v1875_v46, %v1874_v44 }
 0x1c0   :  { %1904 = vst.msk [vmem:[%s3335_s2 + $0x8] sm:$0xff] %vm3309_vm7, %v2162_v47 }
 0x1c1   :  { %1906 = vst.msk [vmem:[%s3335_s2 + $0x18] sm:$0xff] %vm3309_vm7, %v2164_v48 }

// kernel: discriminator_forward.15
= control target key start
LH: loop header
LB: loop body
LE: loop exit
PB: predicated region body
PF: predicated region fallthrough
CT: control target
= control target key end

     0   :  { %12 = vsyncpa [#allocation3], 0  ;;  %vm176_vm0 = vcmask 523264   ;;  %s1117_s0 = inlined_call_operand.vmem [shape: bf16[8,192], index: 0, kind: input, shape index: {}]   ;;  %s1118_s1 = inlined_call_operand.vmem [shape: bf16[192,192], index: 1, kind: input, shape index: {}]   ;;  %s1119_s2 = inlined_call_operand.vmem [shape: bf16[192,192], index: 2, kind: input, shape index: {}]   ;;  %s1120_s3 = inlined_call_operand.vmem [shape: f32[192,10], index: 3, kind: input, shape index: {}]   ;;  %s1121_s4 = inlined_call_operand.vmem [shape: f32[2,8], index: 4, kind: input, shape index: {}]   ;;  %s1122_s5 = inlined_call_operand.hbm [shape: f32[2,192], index: 5, kind: output, shape index: {0}]   ;;  %s1123_s6 = inlined_call_operand.hbm [shape: f32[2,10], index: 6, kind: output, shape index: {1}]  }
   0x1   :  { %v698_v0 = vld [vmem:[%s1118_s1 + $0x74] ss:$8 sps:$4 sm:$0xff]   ;;  %v700_v1 = vld [vmem:[%s1118_s1 + $0x70] ss:$8 sps:$4 sm:$0xff]   ;;  %v701_v2 = vld [vmem:[%s1118_s1 + $0x64] ss:$8 sps:$4 sm:$0xff]  }
   0x2   :  { %180 = vmatprep.subr.bf16.mxu0 %v698_v0  ;;  %v703_v3 = vld [vmem:[%s1118_s1 + $0x60] ss:$8 sps:$4 sm:$0xff]   ;;  %v704_v4 = vld [vmem:[%s1118_s1 + $0x54] ss:$8 sps:$4 sm:$0xff]   ;;  %v706_v5 = vld [vmem:[%s1118_s1 + $0x50] ss:$8 sps:$4 sm:$0xff]  }
   0x3   :  { %181 = vmatpush1.bf16.msra.mxu0 %v700_v1  ;;  %v707_v6 = vld [vmem:[%s1118_s1 + $0x44] ss:$8 sps:$4 sm:$0xff]   ;;  %v709_v7 = vld [vmem:[%s1118_s1 + $0x40] ss:$8 sps:$4 sm:$0xff]   ;;  %v710_v8 = vld [vmem:[%s1118_s1 + $0x34] ss:$8 sps:$4 sm:$0xff]  }
   0x4   :  { %182 = vmatprep.subr.bf16.mxu0 %v701_v2  ;;  %v712_v9 = vld [vmem:[%s1118_s1 + $0x30] ss:$8 sps:$4 sm:$0xff]   ;;  %v713_v10 = vld [vmem:[%s1118_s1 + $0x24] ss:$8 sps:$4 sm:$0xff]   ;;  %v736_v13 = vld [vmem:[%s1119_s2 + $0x74] ss:$8 sps:$4 sm:$0xff]  }
   0x5   :  { %v891_v11 = vld [vmem:[%s1117_s0] sm:$0xff]  ;;  %v738_v14 = vld [vmem:[%s1119_s2 + $0x70] ss:$8 sps:$4 sm:$0xff]   ;;  %v716_v17 = vld [vmem:[%s1118_s1 + $0x14] ss:$8 sps:$4 sm:$0xff]   ;;  %376 = vmatprep.subr.bf16.mxu1 %v736_v13 }
   0x6   :  { %v641_v12 = vcombine.high %v891_v11, %v891_v11  ;;  %v739_v15 = vld [vmem:[%s1119_s2 + $0x64] ss:$8 sps:$4 sm:$0xff]   ;;  %v715_v16 = vld [vmem:[%s1118_s1 + $0x20] ss:$8 sps:$4 sm:$0xff]   ;;  %377 = vmatpush1.bf16.msra.mxu1 %v738_v14  ;;  %v742_v19 = vld [vmem:[%s1119_s2 + $0x54] ss:$8 sps:$4 sm:$0xff]  }
   0x7   :  { %183 = vmatpush1.bf16.msra.mxu0 %v703_v3  ;;  %v741_v18 = vld [vmem:[%s1119_s2 + $0x60] ss:$8 sps:$4 sm:$0xff]   ;;  %378 = vmatprep.subr.bf16.mxu1 %v739_v15  ;;  %v718_v20 = vld [vmem:[%s1118_s1 + $0x10] ss:$8 sps:$4 sm:$0xff]   ;;  %v719_v21 = vld [vmem:[%s1118_s1 + $0x4] ss:$8 sps:$4 sm:$0xff]  }
   0x8   :  { %184 = vmatprep.subr.bf16.mxu0 %v704_v4  ;;  %666 = vmatprep.mubr.msk.bf16.mxu0 %vm176_vm0, %v641_v12  ;;  %v744_v22 = vld [vmem:[%s1119_s2 + $0x50] ss:$8 sps:$4 sm:$0xff]   ;;  %v745_v23 = vld [vmem:[%s1119_s2 + $0x44] ss:$8 sps:$4 sm:$0xff]   ;;  %v721_v24 = vld [vmem:[%s1118_s1] ss:$8 sps:$4 sm:$0xff]  }
   0x9   :  { %v722_v25 = vld [vmem:[%s1118_s1 + $0xb4] ss:$8 sps:$4 sm:$0xff]   ;;  %v747_v26 = vld [vmem:[%s1119_s2 + $0x40] ss:$8 sps:$4 sm:$0xff]   ;;  %v724_v28 = vld [vmem:[%s1118_s1 + $0xb0] ss:$8 sps:$4 sm:$0xff]  }
   0xa   :  { %379 = vmatpush1.bf16.msra.mxu1 %v741_v18  ;;  %v748_v27 = vld [vmem:[%s1119_s2 + $0x34] ss:$8 sps:$4 sm:$0xff]  }
   0xb   :  { %185 = vmatpush1.bf16.msra.mxu0 %v706_v5  ;;  %380 = vmatprep.subr.bf16.mxu1 %v742_v19 }
   0xc   :  { %186 = vmatprep.subr.bf16.mxu0 %v707_v6 }
   0xe   :  { %381 = vmatpush1.bf16.msra.mxu1 %v744_v22 }
   0xf   :  { %187 = vmatpush1.bf16.msra.mxu0 %v709_v7  ;;  %382 = vmatprep.subr.bf16.mxu1 %v745_v23 }
  0x10   :  { %188 = vmatprep.subr.bf16.mxu0 %v710_v8 }
  0x13   :  { %189 = vmatpush1.bf16.msra.mxu0 %v712_v9 }
  0x14   :  { %190 = vmatprep.subr.bf16.mxu0 %v713_v10 }
  0x17   :  { %191 = vmatpush1.bf16.msra.mxu0 %v715_v16 }
  0x18   :  { %192 = vmatprep.subr.bf16.mxu0 %v716_v17 }
  0x1b   :  { %193 = vmatpush1.bf16.msra.mxu0 %v718_v20 }
  0x1c   :  { %194 = vmatprep.subr.bf16.mxu0 %v719_v21 }
  0x1f   :  { %195 = vmatpush1.bf16.msra.mxu0 %v721_v24 }
  0x20   :  { %13 = vsyncpa [#allocation5], 0  ;;  %204 = vmatprep.subr.bf16.mxu0 %v722_v25  ;;  %v725_v29 = vld [vmem:[%s1118_s1 + $0xa4] ss:$8 sps:$4 sm:$0xff]   ;;  %383 = vmatpush1.bf16.msra.mxu1 %v747_v26  ;;  %v750_v30 = vld [vmem:[%s1119_s2 + $0x30] ss:$8 sps:$4 sm:$0xff]   ;;  %v640_v42 = vcombine.low %v891_v11, %v891_v11 }
  0x21   :  { %384 = vmatprep.subr.bf16.mxu1 %v748_v27  ;;  %v751_v31 = vld [vmem:[%s1119_s2 + $0x24] ss:$8 sps:$4 sm:$0xff]   ;;  %v727_v32 = vld [vmem:[%s1118_s1 + $0xa0] ss:$8 sps:$4 sm:$0xff]   ;;  %v728_v33 = vld [vmem:[%s1118_s1 + $0x94] ss:$8 sps:$4 sm:$0xff]  }
  0x22   :  { %v753_v34 = vld [vmem:[%s1119_s2 + $0x20] ss:$8 sps:$4 sm:$0xff]   ;;  %v754_v35 = vld [vmem:[%s1119_s2 + $0x14] ss:$8 sps:$4 sm:$0xff]   ;;  %v730_v36 = vld [vmem:[%s1118_s1 + $0x90] ss:$8 sps:$4 sm:$0xff]  }
  0x23   :  { %205 = vmatpush2.bf16.msra.mxu0 %v724_v28  ;;  %v731_v37 = vld [vmem:[%s1118_s1 + $0x84] ss:$8 sps:$4 sm:$0xff]   ;;  %v756_v38 = vld [vmem:[%s1119_s2 + $0x10] ss:$8 sps:$4 sm:$0xff]   ;;  %v733_v40 = vld [vmem:[%s1118_s1 + $0x80] ss:$8 sps:$4 sm:$0xff]  }
  0x24   :  { %206 = vmatprep.subr.bf16.mxu0 %v725_v29  ;;  %385 = vmatpush1.bf16.msra.mxu1 %v750_v30  ;;  %v757_v39 = vld [vmem:[%s1119_s2 + $0x4] ss:$8 sps:$4 sm:$0xff]   ;;  %v759_v41 = vld [vmem:[%s1119_s2] ss:$8 sps:$4 sm:$0xff]   ;;  %v760_v43 = vld [vmem:[%s1119_s2 + $0xb4] ss:$8 sps:$4 sm:$0xff]  }
  0x25   :  { %386 = vmatprep.subr.bf16.mxu1 %v751_v31  ;;  %v762_v44 = vld [vmem:[%s1119_s2 + $0xb0] ss:$8 sps:$4 sm:$0xff]   ;;  %v763_v45 = vld [vmem:[%s1119_s2 + $0xa4] ss:$8 sps:$4 sm:$0xff]   ;;  %v765_v46 = vld [vmem:[%s1119_s2 + $0xa0] ss:$8 sps:$4 sm:$0xff]  }
  0x26   :  { %v766_v47 = vld [vmem:[%s1119_s2 + $0x94] ss:$8 sps:$4 sm:$0xff]   ;;  %v768_v48 = vld [vmem:[%s1119_s2 + $0x90] ss:$8 sps:$4 sm:$0xff]   ;;  %v769_v49 = vld [vmem:[%s1119_s2 + $0x84] ss:$8 sps:$4 sm:$0xff]  }
  0x27   :  { %207 = vmatpush2.bf16.msra.mxu0 %v727_v32  ;;  %v771_v50 = vld [vmem:[%s1119_s2 + $0x80] ss:$8 sps:$4 sm:$0xff]   ;;  %v816_v61 = vmov 0.0   ;;  %v529_v62 = vld [vmem:[%s1120_s3 + $0x78] sm:$0xff]  ;;  %v528_v63 = vld [vmem:[%s1120_s3 + $0x70] sm:$0xff]  ;;  %vm424_vm5 = vcmask 64512  }
  0x28   :  { %208 = vmatprep.subr.bf16.mxu0 %v728_v33  ;;  %387 = vmatpush1.bf16.msra.mxu1 %v753_v34  ;;  %v527_v0 = vld [vmem:[%s1120_s3 + $0x68] sm:$0xff]  ;;  %v526_v1 = vld [vmem:[%s1120_s3 + $0x60] sm:$0xff]  ;;  %v525_v2 = vld [vmem:[%s1120_s3 + $0x58] sm:$0xff]  ;;  %v817_v31 = vmov 1983009808   ;;  %v505_v33 = vlaneseq  ;;  %vm510_vm6 = vcmask 1041408  }
  0x29   :  { %388 = vmatprep.subr.bf16.mxu1 %v754_v35  ;;  %v524_v3 = vld [vmem:[%s1120_s3 + $0x50] sm:$0xff]  ;;  %v523_v4 = vld [vmem:[%s1120_s3 + $0x48] sm:$0xff]  ;;  %v522_v5 = vld [vmem:[%s1120_s3 + $0x40] sm:$0xff]  ;;  %v503_v32 = vunpack.c.l.s4 %v817_v31  ;;  %vm511_vm7 = vcmask 519170  }
  0x2a   :  { %v521_v6 = vld [vmem:[%s1120_s3 + $0x38] sm:$0xff]  ;;  %v520_v7 = vld [vmem:[%s1120_s3 + $0x30] sm:$0xff]  ;;  %v519_v8 = vld [vmem:[%s1120_s3 + $0x28] sm:$0xff]  ;;  %v506_v35 = vshrl.u32 %v505_v33, 7 }
  0x2b   :  { %209 = vmatpush2.bf16.msra.mxu0 %v730_v36  ;;  %v518_v9 = vld [vmem:[%s1120_s3 + $0x20] sm:$0xff]  ;;  %v517_v10 = vld [vmem:[%s1120_s3 + $0x18] sm:$0xff]  ;;  %v516_v11 = vld [vmem:[%s1120_s3 + $0x10] sm:$0xff]  ;;  %v504_v34 = vunpack.c.0.s8 %v503_v32 }
  0x2c   :  { %210 = vmatprep.subr.bf16.mxu0 %v731_v37  ;;  %389 = vmatpush1.bf16.msra.mxu1 %v756_v38  ;;  %v515_v12 = vld [vmem:[%s1120_s3 + $0x8] sm:$0xff]  ;;  %v514_v13 = vld [vmem:[%s1120_s3] sm:$0xff]  ;;  %v537_v14 = vld [vmem:[%s1120_s3 + $0xb8] sm:$0xff] }
  0x2d   :  { %390 = vmatprep.subr.bf16.mxu1 %v757_v39  ;;  %v536_v15 = vld [vmem:[%s1120_s3 + $0xb0] sm:$0xff]  ;;  %v535_v16 = vld [vmem:[%s1120_s3 + $0xa8] sm:$0xff]  ;;  %v534_v17 = vld [vmem:[%s1120_s3 + $0xa0] sm:$0xff]  ;;  %v507_v37 = vsub.s32 %v504_v34, %v506_v35 }
  0x2e   :  { %v533_v18 = vld [vmem:[%s1120_s3 + $0x98] sm:$0xff]  ;;  %v532_v19 = vld [vmem:[%s1120_s3 + $0x90] sm:$0xff]  ;;  %v423_v26 = vld [vmem:[%s1121_s4] sm:$0x3]  ;;  %s818_s4 = smov [#allocation2]  }
  0x2f   :  { %211 = vmatpush2.bf16.msra.mxu0 %v733_v40  ;;  %v531_v29 = vld [vmem:[%s1120_s3 + $0x88] sm:$0xff]  ;;  %v530_v30 = vld [vmem:[%s1120_s3 + $0x80] sm:$0xff]  ;;  %vm512_vm8 = vmor %vm511_vm7, %vm510_vm6  ;;  %s618_s3 = sshll.u32 %s818_s4, 4  ;;  %s619_s3 = int_to_ptr.vmem [resolvable:$true] %s618_s3 }
  0x30   :  { %391 = vmatpush1.bf16.msra.mxu1 %v759_v41  ;;  %s772_s15 = scalar_lea.vmem %s619_s3, 64  ;;  %p777_p1 = scmp.lt.s32.totalorder %s619_s3, %s619_s3 }
  0x31   :  { %400 = vmatprep.subr.bf16.mxu1 %v760_v43  ;;  %p773_p0 = scmp.ne.s32.totalorder %s619_s3, %s772_s15  ;;  %p778_p2 = scmp.lt.s32.totalorder %s772_s15, %s772_s15 }
  0x32   :  { %213 = vmatmul.mubr.bf16.vlgmr.msra.gmra.mxu0 %v640_v42 }
  0x33   :  { %492 = vmatprep.mubr.f32.mxu0 %v816_v61  ;;  %p779_p3 = por %p778_p2, %p777_p1 }
  0x34   :  { %401 = vmatpush2.bf16.msra.mxu1 %v762_v44 }
  0x35   :  { %402 = vmatprep.subr.bf16.mxu1 %v763_v45  ;;  %p780_p4 = pnand %p779_p3, %p773_p0 }
  0x38   :  { %403 = vmatpush2.bf16.msra.mxu1 %v765_v46 }
  0x39   :  { %404 = vmatprep.subr.bf16.mxu1 %v766_v47 }
  0x3c   :  { %405 = vmatpush2.bf16.msra.mxu1 %v768_v48 }
  0x3d   :  { %406 = vmatprep.subr.bf16.mxu1 %v769_v49 }
  0x40   :  { %407 = vmatpush2.bf16.msra.mxu1 %v771_v50 }
  0x41   :  { %540 = vmatprep.subr.mxu1 %v816_v61 }
  0xf2   :  { %v214_v51 = vpop.f32.mrf.mxu0 }
  0xf3   :  { %vm221_vm1 = vcmp.gt.f32.partialorder %v214_v51, 0.0  ;;  %v223_v52 = vmul.f32 0.2, %v214_v51 }
  0xf4   :  { %v216_v53 = vpop.f32.mrf.mxu0 }
  0xf5   :  { %vm222_vm2 = vcmp.gt.f32.partialorder %v216_v53, 0.0  ;;  %v224_v54 = vmul.f32 0.2, %v216_v53  ;;  %v225_v55 = vsel %vm221_vm1, %v214_v51, %v223_v52 }
  0xf6   :  { %v218_v56 = vpop.f32.mrf.mxu0  ;;  %v227_v60 = vpack.c.bf16 %v225_v55, %v225_v55 }
  0xf7   :  { %v226_v57 = vsel %vm222_vm2, %v216_v53, %v224_v54 }
  0xf8   :  { %v219_v58 = vpop.f32.mrf.mxu0  ;;  %v228_v59 = vpack.c.bf16 %v226_v57, %v226_v57 }
  0xfa   :  { %691 = vmatprep.mubr.msk.bf16.mxu1 %vm176_vm0, %v228_v59 }
  0xfb   :  { %409 = vmatmul.mubr.bf16.vlgmr.msra.gmra.mxu1 %v227_v60 }
  0xfc   :  { %541 = vmatpush1.msra.mxu1 %v529_v62 }
  0xfd   :  { %542 = vmatprep.subr.mxu1 %v816_v61 }
  0xfe   :  { %543 = vmatpush1.msra.mxu1 %v528_v63 }
  0xff   :  { %544 = vmatprep.subr.mxu1 %v816_v61 }
 0x100   :  { %545 = vmatpush1.msra.mxu1 %v527_v0 }
 0x101   :  { %546 = vmatprep.subr.mxu1 %v816_v61 }
 0x102   :  { %547 = vmatpush1.msra.mxu1 %v526_v1 }
 0x103   :  { %548 = vmatprep.subr.mxu1 %v816_v61 }
 0x104   :  { %549 = vmatpush1.msra.mxu1 %v525_v2 }
 0x105   :  { %550 = vmatprep.subr.mxu1 %v816_v61 }
 0x106   :  { %551 = vmatpush1.msra.mxu1 %v524_v3 }
 0x107   :  { %552 = vmatprep.subr.mxu1 %v816_v61 }
 0x108   :  { %553 = vmatpush1.msra.mxu1 %v523_v4 }
 0x109   :  { %554 = vmatprep.subr.mxu1 %v816_v61 }
 0x10a   :  { %555 = vmatpush1.msra.mxu1 %v522_v5 }
 0x10b   :  { %556 = vmatprep.subr.mxu1 %v816_v61 }
 0x10c   :  { %557 = vmatpush1.msra.mxu1 %v521_v6 }
 0x10d   :  { %558 = vmatprep.subr.mxu1 %v816_v61 }
 0x10e   :  { %559 = vmatpush1.msra.mxu1 %v520_v7 }
 0x10f   :  { %560 = vmatprep.subr.mxu1 %v816_v61 }
 0x110   :  { %561 = vmatpush1.msra.mxu1 %v519_v8 }
 0x111   :  { %562 = vmatprep.subr.mxu1 %v816_v61 }
 0x112   :  { %563 = vmatpush1.msra.mxu1 %v518_v9 }
 0x113   :  { %564 = vmatprep.subr.mxu1 %v816_v61 }
 0x114   :  { %565 = vmatpush1.msra.mxu1 %v517_v10 }
 0x115   :  { %566 = vmatprep.subr.mxu1 %v816_v61 }
 0x116   :  { %567 = vmatpush1.msra.mxu1 %v516_v11 }
 0x117   :  { %568 = vmatprep.subr.mxu1 %v816_v61 }
 0x118   :  { %569 = vmatpush1.msra.mxu1 %v515_v12 }
 0x119   :  { %570 = vmatprep.subr.mxu1 %v816_v61 }
 0x11a   :  { %571 = vmatpush1.msra.mxu1 %v514_v13 }
 0x11b   :  { %588 = vmatprep.subr.mxu1 %v816_v61 }
 0x11c   :  { %589 = vmatpush2.msra.mxu1 %v537_v14 }
 0x11d   :  { %590 = vmatprep.subr.mxu1 %v816_v61 }
 0x11e   :  { %591 = vmatpush2.msra.mxu1 %v536_v15 }
 0x11f   :  { %592 = vmatprep.subr.mxu1 %v816_v61 }
 0x120   :  { %593 = vmatpush2.msra.mxu1 %v535_v16 }
 0x121   :  { %594 = vmatprep.subr.mxu1 %v816_v61 }
 0x122   :  { %595 = vmatpush2.msra.mxu1 %v534_v17 }
 0x123   :  { %596 = vmatprep.subr.mxu1 %v816_v61 }
 0x124   :  { %597 = vmatpush2.msra.mxu1 %v533_v18 }
 0x125   :  { %598 = vmatprep.subr.mxu1 %v816_v61 }
 0x126   :  { %599 = vmatpush2.msra.mxu1 %v532_v19 }
 0x127   :  { %600 = vmatprep.subr.mxu1 %v816_v61 }
 0x128   :  { %601 = vmatpush2.msra.mxu1 %v531_v29 }
 0x129   :  { %602 = vmatprep.subr.mxu1 %v816_v61 }
 0x12a   :  { %603 = vmatpush2.msra.mxu1 %v530_v30 }
 0x1bb   :  { %v410_v20 = vpop.f32.mrf.mxu1 }
 0x1bc   :  { %v419_v21 = vmul.f32 0.2, %v410_v20  ;;  %vm417_vm3 = vcmp.gt.f32.partialorder %v410_v20, 0.0 }
 0x1bd   :  { %v412_v22 = vpop.f32.mrf.mxu1 }
 0x1be   :  { %vm418_vm4 = vcmp.gt.f32.partialorder %v412_v22, 0.0  ;;  %v420_v23 = vmul.f32 0.2, %v412_v22  ;;  %v421_v28 = vsel %vm417_vm3, %v410_v20, %v419_v21 }
 0x1bf   :  { %v414_v24 = vpop.f32.mrf.mxu1 }
 0x1c0   :  { %v422_v25 = vsel %vm418_vm4, %v412_v22, %v420_v23 }
 0x1c1   :  { %v415_v27 = vpop.f32.mrf.mxu1  ;;  %458 = vmatprep.subr.mxu0 %v422_v25 }
 0x1c2   :  { %459 = vmatpush1.msra.mxu0 %v421_v28 }
 0x1c3   :  { %692 = vmatmul.mubr.msk.f32.vlgmr.msra.gmra.mxu0 %vm424_vm5, %v423_v26 }
 0x283   :  { %v494_v36 = vpop.f32.mrf.mxu0 }
 0x285   :  { %v496_v38 = vpop.f32.mrf.mxu0 }
 0x286   :  { %v501_v39 = vcombine.low %v494_v36, %v496_v38  ;;  %693 = vmatprep.mubr.msk.f32.mxu1 %vm176_vm0, %v496_v38 }
 0x287   :  { %605 = vmatmul.mubr.f32.vlgmr.msra.gmra.mxu1 %v494_v36 }
 0x288   :  { %v508_v40 = vrot.slane %v501_v39, %v507_v37 }
 0x28a   :  { %513 = vst.msk [vmem:[#allocation2] sm:$0xf] %vm512_vm8, %v508_v40 }
 0x28b   :  { %783 = shalt.err (!%p780_p4)
}
 0x28c   :  { %621 = dma.vmem_to_hbm [thread:$0]  %s619_s3, 64, %s1122_s5, [#allocation3]   ;;  %vm610_vm9 = vcmask 74752  }
 0x28d   :  { %s819_s18 = smov [#allocation4]  }
 0x28e   :  { %s628_s2 = sshll.u32 %s819_s18, 4  ;;  %s629_s2 = int_to_ptr.vmem [resolvable:$true] %s628_s2 }
 0x28f   :  { %s792_s19 = scalar_lea.vmem %s629_s2, 32  ;;  %p797_p6 = scmp.lt.s32.totalorder %s629_s2, %s629_s2 }
 0x290   :  { %p793_p5 = scmp.ne.s32.totalorder %s629_s2, %s792_s19  ;;  %p798_p7 = scmp.lt.s32.totalorder %s792_s19, %s792_s19 }
 0x292   :  { %p799_p8 = por %p798_p7, %p797_p6 }
 0x294   :  { %p800_p9 = pnand %p799_p8, %p793_p5 }
 0x347   :  { %v606_v41 = vpop.f32.mrf.mxu1 }
 0x348   :  { %611 = vst.msk [vmem:[#allocation4] sm:$0x3] %vm610_vm9, %v606_v41 }
 0x349   :  { %v608_v42 = vpop.f32.mrf.mxu1 }
 0x34a   :  { %803 = shalt.err (!%p800_p9)
}
 0x34b   :  { %631 = dma.vmem_to_hbm [thread:$0]  %s629_s2, 32, %s1123_s6, [#allocation5]  }
 0x34c   :  { %812 = dma.done.wait [#allocation3], 64  }
 0x34d   :  { %813 = vsyncadd [#allocation3], 4294967232 }
 0x34e   :  { %814 = dma.done.wait [#allocation5], 32  }
 0x34f   :  { %815 = vsyncadd [#allocation5], 4294967264 }
 0x350   :  { %638 = vsyncpa [#allocation3], 1 }
 0x351   :  { %639 = vsyncpa [#allocation5], 1 }

// kernel: discriminator_forward.14
= control target key start
LH: loop header
LB: loop body
LE: loop exit
PB: predicated region body
PF: predicated region fallthrough
CT: control target
= control target key end

     0   :  { %vm1363_vm0 = vcmask 523264   ;;  %vm1668_vm2 = vcmask 1043456   ;;  %vm1669_vm3 = vcmask 523268   ;;  %s2958_s1 = inlined_call_operand.vmem [shape: bf16[1728,192], index: 1, kind: input, shape index: {}]   ;;  %s2959_s0 = inlined_call_operand.vmem [shape: bf16[8,1728], index: 0, kind: input, shape index: {}]   ;;  %s2960_s2 = inlined_call_operand.vmem [shape: bf16[8,192], index: 2, kind: output, shape index: {}]  }
   0x1   :  { %v1909_v0 = vld [vmem:[%s2958_s1 + $0x74] ss:$8 sps:$4 sm:$0xff]   ;;  %v1913_v2 = vld [vmem:[%s2958_s1 + $0x70] ss:$8 sps:$4 sm:$0xff]   ;;  %v1915_v4 = vld [vmem:[%s2958_s1 + $0x64] ss:$8 sps:$4 sm:$0xff]  }
   0x2   :  { %v1911_v1 = vld [vmem:[%s2958_s1 + $0x174] ss:$8 sps:$4 sm:$0xff]   ;;  %1367 = vmatprep.subr.bf16.mxu0 %v1909_v0  ;;  %v1914_v3 = vld [vmem:[%s2958_s1 + $0x170] ss:$8 sps:$4 sm:$0xff]   ;;  %v1917_v5 = vld [vmem:[%s2958_s1 + $0x164] ss:$8 sps:$4 sm:$0xff]  }
   0x3   :  { %1408 = vmatprep.subr.bf16.mxu1 %v1911_v1  ;;  %1368 = vmatpush1.bf16.msra.mxu0 %v1913_v2  ;;  %v1919_v6 = vld [vmem:[%s2958_s1 + $0x60] ss:$8 sps:$4 sm:$0xff]   ;;  %v1921_v8 = vld [vmem:[%s2958_s1 + $0x54] ss:$8 sps:$4 sm:$0xff]   ;;  %v1925_v10 = vld [vmem:[%s2958_s1 + $0x50] ss:$8 sps:$4 sm:$0xff]  }
   0x4   :  { %1409 = vmatpush1.bf16.msra.mxu1 %v1914_v3  ;;  %1369 = vmatprep.subr.bf16.mxu0 %v1915_v4  ;;  %v1920_v7 = vld [vmem:[%s2958_s1 + $0x160] ss:$8 sps:$4 sm:$0xff]   ;;  %v1923_v9 = vld [vmem:[%s2958_s1 + $0x154] ss:$8 sps:$4 sm:$0xff]   ;;  %v1926_v11 = vld [vmem:[%s2958_s1 + $0x150] ss:$8 sps:$4 sm:$0xff]  }
   0x5   :  { %1410 = vmatprep.subr.bf16.mxu1 %v1917_v5  ;;  %v1927_v12 = vld [vmem:[%s2958_s1 + $0x44] ss:$8 sps:$4 sm:$0xff]   ;;  %v1931_v14 = vld [vmem:[%s2958_s1 + $0x40] ss:$8 sps:$4 sm:$0xff]   ;;  %v1933_v16 = vld [vmem:[%s2958_s1 + $0x34] ss:$8 sps:$4 sm:$0xff]  }
   0x6   :  { %v1929_v13 = vld [vmem:[%s2958_s1 + $0x144] ss:$8 sps:$4 sm:$0xff]   ;;  %v1932_v15 = vld [vmem:[%s2958_s1 + $0x140] ss:$8 sps:$4 sm:$0xff]   ;;  %v1935_v17 = vld [vmem:[%s2958_s1 + $0x134] ss:$8 sps:$4 sm:$0xff]  }
   0x7   :  { %1370 = vmatpush1.bf16.msra.mxu0 %v1919_v6  ;;  %v1937_v18 = vld [vmem:[%s2958_s1 + $0x30] ss:$8 sps:$4 sm:$0xff]   ;;  %v1939_v20 = vld [vmem:[%s2958_s1 + $0x24] ss:$8 sps:$4 sm:$0xff]   ;;  %v1943_v22 = vld [vmem:[%s2958_s1 + $0x20] ss:$8 sps:$4 sm:$0xff]  }
   0x8   :  { %1411 = vmatpush1.bf16.msra.mxu1 %v1920_v7  ;;  %1371 = vmatprep.subr.bf16.mxu0 %v1921_v8  ;;  %v1938_v19 = vld [vmem:[%s2958_s1 + $0x130] ss:$8 sps:$4 sm:$0xff]   ;;  %v1941_v21 = vld [vmem:[%s2958_s1 + $0x124] ss:$8 sps:$4 sm:$0xff]   ;;  %v1944_v23 = vld [vmem:[%s2958_s1 + $0x120] ss:$8 sps:$4 sm:$0xff]  }
   0x9   :  { %1412 = vmatprep.subr.bf16.mxu1 %v1923_v9  ;;  %v1945_v24 = vld [vmem:[%s2958_s1 + $0x14] ss:$8 sps:$4 sm:$0xff]   ;;  %v1949_v26 = vld [vmem:[%s2958_s1 + $0x10] ss:$8 sps:$4 sm:$0xff]   ;;  %v1951_v28 = vld [vmem:[%s2958_s1 + $0x4] ss:$8 sps:$4 sm:$0xff]  }
   0xa   :  { %v1947_v25 = vld [vmem:[%s2958_s1 + $0x114] ss:$8 sps:$4 sm:$0xff]   ;;  %v1950_v27 = vld [vmem:[%s2958_s1 + $0x110] ss:$8 sps:$4 sm:$0xff]   ;;  %v1953_v29 = vld [vmem:[%s2958_s1 + $0x104] ss:$8 sps:$4 sm:$0xff]  }
   0xb   :  { %1372 = vmatpush1.bf16.msra.mxu0 %v1925_v10  ;;  %v1955_v30 = vld [vmem:[%s2958_s1] ss:$8 sps:$4 sm:$0xff]   ;;  %v1957_v32 = vld [vmem:[%s2958_s1 + $0xf4] ss:$8 sps:$4 sm:$0xff]   ;;  %v1961_v34 = vld [vmem:[%s2958_s1 + $0xf0] ss:$8 sps:$4 sm:$0xff]  }
   0xc   :  { %1413 = vmatpush1.bf16.msra.mxu1 %v1926_v11  ;;  %1373 = vmatprep.subr.bf16.mxu0 %v1927_v12  ;;  %v1956_v31 = vld [vmem:[%s2958_s1 + $0x100] ss:$8 sps:$4 sm:$0xff]   ;;  %v1959_v33 = vld [vmem:[%s2958_s1 + $0x1f4] ss:$8 sps:$4 sm:$0xff]   ;;  %v1962_v35 = vld [vmem:[%s2958_s1 + $0x1f0] ss:$8 sps:$4 sm:$0xff]  }
   0xd   :  { %1414 = vmatprep.subr.bf16.mxu1 %v1929_v13  ;;  %v1963_v36 = vld [vmem:[%s2958_s1 + $0xe4] ss:$8 sps:$4 sm:$0xff]   ;;  %v1967_v38 = vld [vmem:[%s2958_s1 + $0xe0] ss:$8 sps:$4 sm:$0xff]   ;;  %v1969_v40 = vld [vmem:[%s2958_s1 + $0xd4] ss:$8 sps:$4 sm:$0xff]  }
   0xe   :  { %v1965_v37 = vld [vmem:[%s2958_s1 + $0x1e4] ss:$8 sps:$4 sm:$0xff]   ;;  %v1968_v39 = vld [vmem:[%s2958_s1 + $0x1e0] ss:$8 sps:$4 sm:$0xff]   ;;  %v1971_v41 = vld [vmem:[%s2958_s1 + $0x1d4] ss:$8 sps:$4 sm:$0xff]  }
   0xf   :  { %1374 = vmatpush1.bf16.msra.mxu0 %v1931_v14  ;;  %v1973_v42 = vld [vmem:[%s2958_s1 + $0xd0] ss:$8 sps:$4 sm:$0xff]   ;;  %v1975_v44 = vld [vmem:[%s2958_s1 + $0xc4] ss:$8 sps:$4 sm:$0xff]   ;;  %v1979_v49 = vld [vmem:[%s2958_s1 + $0xc0] ss:$8 sps:$4 sm:$0xff]  }
  0x10   :  { %1415 = vmatpush1.bf16.msra.mxu1 %v1932_v15  ;;  %1375 = vmatprep.subr.bf16.mxu0 %v1933_v16  ;;  %v1974_v43 = vld [vmem:[%s2958_s1 + $0x1d0] ss:$8 sps:$4 sm:$0xff]   ;;  %v1977_v45 = vld [vmem:[%s2958_s1 + $0x1c4] ss:$8 sps:$4 sm:$0xff]   ;;  %v1980_v50 = vld [vmem:[%s2958_s1 + $0x1c0] ss:$8 sps:$4 sm:$0xff]  }
  0x11   :  { %1416 = vmatprep.subr.bf16.mxu1 %v1935_v17  ;;  %v12_v46 = vld [vmem:[%s2959_s0] sm:$0xff]  ;;  %v13_v48 = vld [vmem:[%s2959_s0 + $0x8] sm:$0xff]  ;;  %v1981_v52 = vld [vmem:[%s2958_s1 + $0xb4] ss:$8 sps:$4 sm:$0xff]  }
  0x12   :  { %v1677_v47 = vcombine.high %v12_v46, %v12_v46  ;;  %v1679_v51 = vcombine.high %v13_v48, %v13_v48  ;;  %v1983_v53 = vld [vmem:[%s2958_s1 + $0x1b4] ss:$8 sps:$4 sm:$0xff]   ;;  %v1985_v54 = vld [vmem:[%s2958_s1 + $0xb0] ss:$8 sps:$4 sm:$0xff]   ;;  %v1987_v56 = vld [vmem:[%s2958_s1 + $0xa4] ss:$8 sps:$4 sm:$0xff]   ;;  %v1676_v6 = vcombine.low %v12_v46, %v12_v46  ;;  %v1678_v7 = vcombine.low %v13_v48, %v13_v48 }
  0x13   :  { %1376 = vmatpush1.bf16.msra.mxu0 %v1937_v18  ;;  %v1986_v55 = vld [vmem:[%s2958_s1 + $0x1b0] ss:$8 sps:$4 sm:$0xff]   ;;  %v1989_v57 = vld [vmem:[%s2958_s1 + $0x1a4] ss:$8 sps:$4 sm:$0xff]   ;;  %v1991_v58 = vld [vmem:[%s2958_s1 + $0xa0] ss:$8 sps:$4 sm:$0xff]  }
  0x14   :  { %1417 = vmatpush1.bf16.msra.mxu1 %v1938_v19  ;;  %1377 = vmatprep.subr.bf16.mxu0 %v1939_v20  ;;  %v1992_v59 = vld [vmem:[%s2958_s1 + $0x1a0] ss:$8 sps:$4 sm:$0xff]   ;;  %v1993_v60 = vld [vmem:[%s2958_s1 + $0x94] ss:$8 sps:$4 sm:$0xff]   ;;  %v1997_v62 = vld [vmem:[%s2958_s1 + $0x90] ss:$8 sps:$4 sm:$0xff]  }
  0x15   :  { %1418 = vmatprep.subr.bf16.mxu1 %v1941_v21  ;;  %1399 = vmatprep.mubr.bf16.mxu0 %v1677_v47  ;;  %v1995_v61 = vld [vmem:[%s2958_s1 + $0x194] ss:$8 sps:$4 sm:$0xff]   ;;  %v1998_v63 = vld [vmem:[%s2958_s1 + $0x190] ss:$8 sps:$4 sm:$0xff]   ;;  %v1999_v0 = vld [vmem:[%s2958_s1 + $0x84] ss:$8 sps:$4 sm:$0xff]  }
  0x16   :  { %1440 = vmatprep.mubr.bf16.mxu1 %v1679_v51  ;;  %v2001_v1 = vld [vmem:[%s2958_s1 + $0x184] ss:$8 sps:$4 sm:$0xff]   ;;  %v2003_v2 = vld [vmem:[%s2958_s1 + $0x80] ss:$8 sps:$4 sm:$0xff]   ;;  %v2011_v4 = vld [vmem:[%s2958_s1 + $0x274] ss:$8 sps:$4 sm:$0xff]  }
  0x17   :  { %1378 = vmatpush1.bf16.msra.mxu0 %v1943_v22  ;;  %v2004_v3 = vld [vmem:[%s2958_s1 + $0x180] ss:$8 sps:$4 sm:$0xff]   ;;  %v2014_v5 = vld [vmem:[%s2958_s1 + $0x374] ss:$8 sps:$4 sm:$0xff]   ;;  %v2009_v8 = vld [vmem:[%s2958_s1 + $0x270] ss:$8 sps:$4 sm:$0xff]  }
  0x18   :  { %1419 = vmatpush1.bf16.msra.mxu1 %v1944_v23  ;;  %1379 = vmatprep.subr.bf16.mxu0 %v1945_v24  ;;  %v2012_v9 = vld [vmem:[%s2958_s1 + $0x370] ss:$8 sps:$4 sm:$0xff]   ;;  %v2017_v10 = vld [vmem:[%s2958_s1 + $0x264] ss:$8 sps:$4 sm:$0xff]   ;;  %v2015_v12 = vld [vmem:[%s2958_s1 + $0x260] ss:$8 sps:$4 sm:$0xff]  }
  0x19   :  { %1420 = vmatprep.subr.bf16.mxu1 %v1947_v25  ;;  %v2020_v11 = vld [vmem:[%s2958_s1 + $0x364] ss:$8 sps:$4 sm:$0xff]   ;;  %v2018_v13 = vld [vmem:[%s2958_s1 + $0x360] ss:$8 sps:$4 sm:$0xff]   ;;  %v2023_v14 = vld [vmem:[%s2958_s1 + $0x254] ss:$8 sps:$4 sm:$0xff]  }
  0x1a   :  { %v2026_v15 = vld [vmem:[%s2958_s1 + $0x354] ss:$8 sps:$4 sm:$0xff]   ;;  %v2021_v16 = vld [vmem:[%s2958_s1 + $0x250] ss:$8 sps:$4 sm:$0xff]   ;;  %v2029_v18 = vld [vmem:[%s2958_s1 + $0x244] ss:$8 sps:$4 sm:$0xff]  }
  0x1b   :  { %1380 = vmatpush1.bf16.msra.mxu0 %v1949_v26  ;;  %v2024_v17 = vld [vmem:[%s2958_s1 + $0x350] ss:$8 sps:$4 sm:$0xff]   ;;  %v2032_v19 = vld [vmem:[%s2958_s1 + $0x344] ss:$8 sps:$4 sm:$0xff]   ;;  %v2027_v20 = vld [vmem:[%s2958_s1 + $0x240] ss:$8 sps:$4 sm:$0xff]  }
  0x1c   :  { %1421 = vmatpush1.bf16.msra.mxu1 %v1950_v27  ;;  %1381 = vmatprep.subr.bf16.mxu0 %v1951_v28  ;;  %v2030_v21 = vld [vmem:[%s2958_s1 + $0x340] ss:$8 sps:$4 sm:$0xff]   ;;  %v2035_v22 = vld [vmem:[%s2958_s1 + $0x234] ss:$8 sps:$4 sm:$0xff]   ;;  %v2033_v24 = vld [vmem:[%s2958_s1 + $0x230] ss:$8 sps:$4 sm:$0xff]  }
  0x1d   :  { %1422 = vmatprep.subr.bf16.mxu1 %v1953_v29  ;;  %v2038_v23 = vld [vmem:[%s2958_s1 + $0x334] ss:$8 sps:$4 sm:$0xff]   ;;  %v2036_v25 = vld [vmem:[%s2958_s1 + $0x330] ss:$8 sps:$4 sm:$0xff]   ;;  %v2041_v26 = vld [vmem:[%s2958_s1 + $0x224] ss:$8 sps:$4 sm:$0xff]  }
  0x1e   :  { %v2044_v27 = vld [vmem:[%s2958_s1 + $0x324] ss:$8 sps:$4 sm:$0xff]   ;;  %v2039_v28 = vld [vmem:[%s2958_s1 + $0x220] ss:$8 sps:$4 sm:$0xff]   ;;  %v2074_v51 = vld [vmem:[%s2958_s1 + $0x3d4] ss:$8 sps:$4 sm:$0xff]  }
  0x1f   :  { %1382 = vmatpush1.bf16.msra.mxu0 %v1955_v30  ;;  %v2042_v29 = vld [vmem:[%s2958_s1 + $0x320] ss:$8 sps:$4 sm:$0xff]   ;;  %v2047_v30 = vld [vmem:[%s2958_s1 + $0x214] ss:$8 sps:$4 sm:$0xff]   ;;  %v2065_v46 = vld [vmem:[%s2958_s1 + $0x2e4] ss:$8 sps:$4 sm:$0xff]  }
  0x20   :  { %1423 = vmatpush1.bf16.msra.mxu1 %v1956_v31  ;;  %1383 = vmatprep.subr.bf16.mxu0 %v1957_v32  ;;  %v2050_v31 = vld [vmem:[%s2958_s1 + $0x314] ss:$8 sps:$4 sm:$0xff]   ;;  %v2068_v47 = vld [vmem:[%s2958_s1 + $0x3e4] ss:$8 sps:$4 sm:$0xff]   ;;  %v2063_v48 = vld [vmem:[%s2958_s1 + $0x2e0] ss:$8 sps:$4 sm:$0xff]  }
  0x21   :  { %1424 = vmatprep.subr.bf16.mxu1 %v1959_v33  ;;  %v2541_v32 = vld [vmem:[%s2959_s0 + $0x10] sm:$0xff]  ;;  %vm1670_vm5 = vmor %vm1669_vm3, %vm1668_vm2 }
  0x22   :  { %v2045_v33 = vld [vmem:[%s2958_s1 + $0x210] ss:$8 sps:$4 sm:$0xff]  }
  0x23   :  { %1384 = vmatpush2.bf16.msra.mxu0 %v1961_v34  ;;  %v2048_v34 = vld [vmem:[%s2958_s1 + $0x310] ss:$8 sps:$4 sm:$0xff]  }
  0x24   :  { %1425 = vmatpush2.bf16.msra.mxu1 %v1962_v35  ;;  %1385 = vmatprep.subr.bf16.mxu0 %v1963_v36  ;;  %v1681_v35 = vcombine.high %v2541_v32, %v2541_v32  ;;  %v2554_v36 = vld [vmem:[%s2959_s0 + $0x18] sm:$0xff] }
  0x25   :  { %1426 = vmatprep.subr.bf16.mxu1 %v1965_v37  ;;  %v2053_v37 = vld [vmem:[%s2958_s1 + $0x204] ss:$8 sps:$4 sm:$0xff]  }
  0x27   :  { %1386 = vmatpush2.bf16.msra.mxu0 %v1967_v38  ;;  %v1683_v38 = vcombine.high %v2554_v36, %v2554_v36 }
  0x28   :  { %1427 = vmatpush2.bf16.msra.mxu1 %v1968_v39  ;;  %1387 = vmatprep.subr.bf16.mxu0 %v1969_v40  ;;  %v2056_v39 = vld [vmem:[%s2958_s1 + $0x304] ss:$8 sps:$4 sm:$0xff]   ;;  %v2051_v40 = vld [vmem:[%s2958_s1 + $0x200] ss:$8 sps:$4 sm:$0xff]  }
  0x29   :  { %1428 = vmatprep.subr.bf16.mxu1 %v1971_v41  ;;  %v2054_v41 = vld [vmem:[%s2958_s1 + $0x300] ss:$8 sps:$4 sm:$0xff]  }
  0x2b   :  { %1388 = vmatpush2.bf16.msra.mxu0 %v1973_v42  ;;  %v2059_v42 = vld [vmem:[%s2958_s1 + $0x2f4] ss:$8 sps:$4 sm:$0xff]  }
  0x2c   :  { %1429 = vmatpush2.bf16.msra.mxu1 %v1974_v43  ;;  %1389 = vmatprep.subr.bf16.mxu0 %v1975_v44  ;;  %v2062_v43 = vld [vmem:[%s2958_s1 + $0x3f4] ss:$8 sps:$4 sm:$0xff]   ;;  %v2057_v44 = vld [vmem:[%s2958_s1 + $0x2f0] ss:$8 sps:$4 sm:$0xff]  }
  0x2d   :  { %1430 = vmatprep.subr.bf16.mxu1 %v1977_v45  ;;  %v2060_v45 = vld [vmem:[%s2958_s1 + $0x3f0] ss:$8 sps:$4 sm:$0xff]  }
  0x2f   :  { %1390 = vmatpush2.bf16.msra.mxu0 %v1979_v49  ;;  %v2066_v49 = vld [vmem:[%s2958_s1 + $0x3e0] ss:$8 sps:$4 sm:$0xff]  }
  0x30   :  { %1431 = vmatpush2.bf16.msra.mxu1 %v1980_v50  ;;  %1391 = vmatprep.subr.bf16.mxu0 %v1981_v52  ;;  %v2071_v50 = vld [vmem:[%s2958_s1 + $0x2d4] ss:$8 sps:$4 sm:$0xff]   ;;  %v2069_v52 = vld [vmem:[%s2958_s1 + $0x2d0] ss:$8 sps:$4 sm:$0xff]  }
  0x31   :  { %1432 = vmatprep.subr.bf16.mxu1 %v1983_v53  ;;  %v2072_v53 = vld [vmem:[%s2958_s1 + $0x3d0] ss:$8 sps:$4 sm:$0xff]  }
  0x33   :  { %1392 = vmatpush2.bf16.msra.mxu0 %v1985_v54  ;;  %v2077_v54 = vld [vmem:[%s2958_s1 + $0x2c4] ss:$8 sps:$4 sm:$0xff]  }
  0x34   :  { %1433 = vmatpush2.bf16.msra.mxu1 %v1986_v55  ;;  %1393 = vmatprep.subr.bf16.mxu0 %v1987_v56  ;;  %v2080_v55 = vld [vmem:[%s2958_s1 + $0x3c4] ss:$8 sps:$4 sm:$0xff]   ;;  %v2075_v56 = vld [vmem:[%s2958_s1 + $0x2c0] ss:$8 sps:$4 sm:$0xff]  }
  0x35   :  { %1434 = vmatprep.subr.bf16.mxu1 %v1989_v57  ;;  %v2078_v57 = vld [vmem:[%s2958_s1 + $0x3c0] ss:$8 sps:$4 sm:$0xff]  }
  0x37   :  { %1394 = vmatpush2.bf16.msra.mxu0 %v1991_v58  ;;  %v2083_v58 = vld [vmem:[%s2958_s1 + $0x2b4] ss:$8 sps:$4 sm:$0xff]  }
  0x38   :  { %1435 = vmatpush2.bf16.msra.mxu1 %v1992_v59  ;;  %1395 = vmatprep.subr.bf16.mxu0 %v1993_v60  ;;  %v2086_v59 = vld [vmem:[%s2958_s1 + $0x3b4] ss:$8 sps:$4 sm:$0xff]   ;;  %v2081_v60 = vld [vmem:[%s2958_s1 + $0x2b0] ss:$8 sps:$4 sm:$0xff]  }
  0x39   :  { %1436 = vmatprep.subr.bf16.mxu1 %v1995_v61  ;;  %v2084_v61 = vld [vmem:[%s2958_s1 + $0x3b0] ss:$8 sps:$4 sm:$0xff]  }
  0x3b   :  { %1396 = vmatpush2.bf16.msra.mxu0 %v1997_v62  ;;  %v2089_v62 = vld [vmem:[%s2958_s1 + $0x2a4] ss:$8 sps:$4 sm:$0xff]  }
  0x3c   :  { %1437 = vmatpush2.bf16.msra.mxu1 %v1998_v63  ;;  %1397 = vmatprep.subr.bf16.mxu0 %v1999_v0  ;;  %v2092_v63 = vld [vmem:[%s2958_s1 + $0x3a4] ss:$8 sps:$4 sm:$0xff]   ;;  %v2087_v0 = vld [vmem:[%s2958_s1 + $0x2a0] ss:$8 sps:$4 sm:$0xff]  }
  0x3d   :  { %1438 = vmatprep.subr.bf16.mxu1 %v2001_v1  ;;  %v2090_v1 = vld [vmem:[%s2958_s1 + $0x3a0] ss:$8 sps:$4 sm:$0xff]  }
  0x3f   :  { %1398 = vmatpush2.bf16.msra.mxu0 %v2003_v2  ;;  %v2095_v2 = vld [vmem:[%s2958_s1 + $0x294] ss:$8 sps:$4 sm:$0xff]  }
  0x40   :  { %1439 = vmatpush2.bf16.msra.mxu1 %v2004_v3  ;;  %1449 = vmatprep.subr.bf16.mxu0 %v2011_v4  ;;  %v2098_v3 = vld [vmem:[%s2958_s1 + $0x394] ss:$8 sps:$4 sm:$0xff]   ;;  %v2093_v4 = vld [vmem:[%s2958_s1 + $0x290] ss:$8 sps:$4 sm:$0xff]  }
  0x41   :  { %1490 = vmatprep.subr.bf16.mxu1 %v2014_v5  ;;  %v2096_v5 = vld [vmem:[%s2958_s1 + $0x390] ss:$8 sps:$4 sm:$0xff]  }
  0x42   :  { %1400 = vmatmul.mubr.bf16.vlgmr.msra.gmra.mxu0 %v1676_v6  ;;  %v2101_v6 = vld [vmem:[%s2958_s1 + $0x284] ss:$8 sps:$4 sm:$0xff]  }
  0x43   :  { %1441 = vmatmul.mubr.bf16.vlgmr.msra.gmra.mxu1 %v1678_v7  ;;  %1450 = vmatpush1.bf16.msra.mxu0 %v2009_v8  ;;  %v2104_v7 = vld [vmem:[%s2958_s1 + $0x384] ss:$8 sps:$4 sm:$0xff]   ;;  %v2099_v8 = vld [vmem:[%s2958_s1 + $0x280] ss:$8 sps:$4 sm:$0xff]  }
  0x44   :  { %1491 = vmatpush1.bf16.msra.mxu1 %v2012_v9  ;;  %1451 = vmatprep.subr.bf16.mxu0 %v2017_v10  ;;  %v2102_v9 = vld [vmem:[%s2958_s1 + $0x380] ss:$8 sps:$4 sm:$0xff]   ;;  %v2109_v10 = vld [vmem:[%s2958_s1 + $0x474] ss:$8 sps:$4 sm:$0xff]  }
  0x45   :  { %1492 = vmatprep.subr.bf16.mxu1 %v2020_v11  ;;  %1481 = vmatprep.mubr.bf16.mxu0 %v1681_v35  ;;  %v2114_v11 = vld [vmem:[%s2958_s1 + $0x574] ss:$8 sps:$4 sm:$0xff]   ;;  %v2136_v35 = vld [vmem:[%s2958_s1 + $0x530] ss:$8 sps:$4 sm:$0xff]  }
  0x46   :  { %1522 = vmatprep.mubr.bf16.mxu1 %v1683_v38  ;;  %v2139_v38 = vld [vmem:[%s2958_s1 + $0x420] ss:$8 sps:$4 sm:$0xff]  }
  0x47   :  { %1452 = vmatpush1.bf16.msra.mxu0 %v2015_v12  ;;  %v1680_v12 = vcombine.low %v2541_v32, %v2541_v32  ;;  %v2135_v32 = vld [vmem:[%s2958_s1 + $0x434] ss:$8 sps:$4 sm:$0xff]  }
  0x48   :  { %1493 = vmatpush1.bf16.msra.mxu1 %v2018_v13  ;;  %1453 = vmatprep.subr.bf16.mxu0 %v2023_v14  ;;  %v2107_v13 = vld [vmem:[%s2958_s1 + $0x470] ss:$8 sps:$4 sm:$0xff]   ;;  %v1682_v14 = vcombine.low %v2554_v36, %v2554_v36  ;;  %v2141_v36 = vld [vmem:[%s2958_s1 + $0x424] ss:$8 sps:$4 sm:$0xff]  }
  0x49   :  { %1494 = vmatprep.subr.bf16.mxu1 %v2026_v15  ;;  %v2112_v15 = vld [vmem:[%s2958_s1 + $0x570] ss:$8 sps:$4 sm:$0xff]  }
  0x4b   :  { %1454 = vmatpush1.bf16.msra.mxu0 %v2021_v16  ;;  %v2117_v16 = vld [vmem:[%s2958_s1 + $0x464] ss:$8 sps:$4 sm:$0xff]  }
  0x4c   :  { %1495 = vmatpush1.bf16.msra.mxu1 %v2024_v17  ;;  %1455 = vmatprep.subr.bf16.mxu0 %v2029_v18  ;;  %v2120_v17 = vld [vmem:[%s2958_s1 + $0x564] ss:$8 sps:$4 sm:$0xff]  }
  0x4d   :  { %1496 = vmatprep.subr.bf16.mxu1 %v2032_v19  ;;  %v2691_v18 = vld [vmem:[%s2959_s0 + $0x20] sm:$0xff] }
  0x4e   :  { %v1685_v19 = vcombine.high %v2691_v18, %v2691_v18 }
  0x4f   :  { %1456 = vmatpush1.bf16.msra.mxu0 %v2027_v20  ;;  %v2698_v20 = vld [vmem:[%s2959_s0 + $0x28] sm:$0xff] }
  0x50   :  { %1497 = vmatpush1.bf16.msra.mxu1 %v2030_v21  ;;  %1457 = vmatprep.subr.bf16.mxu0 %v2035_v22  ;;  %v2115_v21 = vld [vmem:[%s2958_s1 + $0x460] ss:$8 sps:$4 sm:$0xff]  }
  0x51   :  { %1498 = vmatprep.subr.bf16.mxu1 %v2038_v23  ;;  %v2118_v22 = vld [vmem:[%s2958_s1 + $0x560] ss:$8 sps:$4 sm:$0xff]   ;;  %v1687_v23 = vcombine.high %v2698_v20, %v2698_v20 }
  0x53   :  { %1458 = vmatpush1.bf16.msra.mxu0 %v2033_v24  ;;  %v2123_v24 = vld [vmem:[%s2958_s1 + $0x454] ss:$8 sps:$4 sm:$0xff]  }
  0x54   :  { %1499 = vmatpush1.bf16.msra.mxu1 %v2036_v25  ;;  %1459 = vmatprep.subr.bf16.mxu0 %v2041_v26  ;;  %v2126_v25 = vld [vmem:[%s2958_s1 + $0x554] ss:$8 sps:$4 sm:$0xff]   ;;  %v2121_v26 = vld [vmem:[%s2958_s1 + $0x450] ss:$8 sps:$4 sm:$0xff]  }
  0x55   :  { %1500 = vmatprep.subr.bf16.mxu1 %v2044_v27  ;;  %v2124_v27 = vld [vmem:[%s2958_s1 + $0x550] ss:$8 sps:$4 sm:$0xff]  }
  0x57   :  { %1460 = vmatpush1.bf16.msra.mxu0 %v2039_v28  ;;  %v2129_v28 = vld [vmem:[%s2958_s1 + $0x444] ss:$8 sps:$4 sm:$0xff]  }
  0x58   :  { %1501 = vmatpush1.bf16.msra.mxu1 %v2042_v29  ;;  %1461 = vmatprep.subr.bf16.mxu0 %v2047_v30  ;;  %v2132_v29 = vld [vmem:[%s2958_s1 + $0x544] ss:$8 sps:$4 sm:$0xff]   ;;  %v2127_v30 = vld [vmem:[%s2958_s1 + $0x440] ss:$8 sps:$4 sm:$0xff]  }
  0x59   :  { %1502 = vmatprep.subr.bf16.mxu1 %v2050_v31  ;;  %v2130_v31 = vld [vmem:[%s2958_s1 + $0x540] ss:$8 sps:$4 sm:$0xff]  }
  0x5b   :  { %1462 = vmatpush1.bf16.msra.mxu0 %v2045_v33  ;;  %v2138_v33 = vld [vmem:[%s2958_s1 + $0x534] ss:$8 sps:$4 sm:$0xff]  }
  0x5c   :  { %1503 = vmatpush1.bf16.msra.mxu1 %v2048_v34  ;;  %1463 = vmatprep.subr.bf16.mxu0 %v2053_v37  ;;  %v2133_v34 = vld [vmem:[%s2958_s1 + $0x430] ss:$8 sps:$4 sm:$0xff]   ;;  %v2144_v37 = vld [vmem:[%s2958_s1 + $0x524] ss:$8 sps:$4 sm:$0xff]  }
  0x5d   :  { %1504 = vmatprep.subr.bf16.mxu1 %v2056_v39  ;;  %v2142_v39 = vld [vmem:[%s2958_s1 + $0x520] ss:$8 sps:$4 sm:$0xff]  }
  0x5f   :  { %1464 = vmatpush1.bf16.msra.mxu0 %v2051_v40  ;;  %v2147_v40 = vld [vmem:[%s2958_s1 + $0x414] ss:$8 sps:$4 sm:$0xff]  }
  0x60   :  { %1505 = vmatpush1.bf16.msra.mxu1 %v2054_v41  ;;  %1465 = vmatprep.subr.bf16.mxu0 %v2059_v42  ;;  %v2150_v41 = vld [vmem:[%s2958_s1 + $0x514] ss:$8 sps:$4 sm:$0xff]   ;;  %v2145_v42 = vld [vmem:[%s2958_s1 + $0x410] ss:$8 sps:$4 sm:$0xff]  }
  0x61   :  { %1506 = vmatprep.subr.bf16.mxu1 %v2062_v43  ;;  %v2148_v43 = vld [vmem:[%s2958_s1 + $0x510] ss:$8 sps:$4 sm:$0xff]  }
  0x63   :  { %1466 = vmatpush2.bf16.msra.mxu0 %v2057_v44  ;;  %v2153_v44 = vld [vmem:[%s2958_s1 + $0x404] ss:$8 sps:$4 sm:$0xff]  }
  0x64   :  { %1507 = vmatpush2.bf16.msra.mxu1 %v2060_v45  ;;  %1467 = vmatprep.subr.bf16.mxu0 %v2065_v46  ;;  %v2156_v45 = vld [vmem:[%s2958_s1 + $0x504] ss:$8 sps:$4 sm:$0xff]   ;;  %v2151_v46 = vld [vmem:[%s2958_s1 + $0x400] ss:$8 sps:$4 sm:$0xff]  }
  0x65   :  { %1508 = vmatprep.subr.bf16.mxu1 %v2068_v47  ;;  %v2154_v47 = vld [vmem:[%s2958_s1 + $0x500] ss:$8 sps:$4 sm:$0xff]  }
  0x67   :  { %1468 = vmatpush2.bf16.msra.mxu0 %v2063_v48  ;;  %v2159_v48 = vld [vmem:[%s2958_s1 + $0x4f4] ss:$8 sps:$4 sm:$0xff]  }
  0x68   :  { %1509 = vmatpush2.bf16.msra.mxu1 %v2066_v49  ;;  %1469 = vmatprep.subr.bf16.mxu0 %v2071_v50  ;;  %v2162_v49 = vld [vmem:[%s2958_s1 + $0x5f4] ss:$8 sps:$4 sm:$0xff]   ;;  %v2157_v50 = vld [vmem:[%s2958_s1 + $0x4f0] ss:$8 sps:$4 sm:$0xff]  }
  0x69   :  { %1510 = vmatprep.subr.bf16.mxu1 %v2074_v51  ;;  %v2160_v51 = vld [vmem:[%s2958_s1 + $0x5f0] ss:$8 sps:$4 sm:$0xff]  }
  0x6b   :  { %1470 = vmatpush2.bf16.msra.mxu0 %v2069_v52  ;;  %v2165_v52 = vld [vmem:[%s2958_s1 + $0x4e4] ss:$8 sps:$4 sm:$0xff]  }
  0x6c   :  { %1511 = vmatpush2.bf16.msra.mxu1 %v2072_v53  ;;  %1471 = vmatprep.subr.bf16.mxu0 %v2077_v54  ;;  %v2168_v53 = vld [vmem:[%s2958_s1 + $0x5e4] ss:$8 sps:$4 sm:$0xff]   ;;  %v2163_v54 = vld [vmem:[%s2958_s1 + $0x4e0] ss:$8 sps:$4 sm:$0xff]  }
  0x6d   :  { %1512 = vmatprep.subr.bf16.mxu1 %v2080_v55  ;;  %v2166_v55 = vld [vmem:[%s2958_s1 + $0x5e0] ss:$8 sps:$4 sm:$0xff]  }
  0x6f   :  { %1472 = vmatpush2.bf16.msra.mxu0 %v2075_v56  ;;  %v2171_v56 = vld [vmem:[%s2958_s1 + $0x4d4] ss:$8 sps:$4 sm:$0xff]  }
  0x70   :  { %1513 = vmatpush2.bf16.msra.mxu1 %v2078_v57  ;;  %1473 = vmatprep.subr.bf16.mxu0 %v2083_v58  ;;  %v2174_v57 = vld [vmem:[%s2958_s1 + $0x5d4] ss:$8 sps:$4 sm:$0xff]   ;;  %v2169_v58 = vld [vmem:[%s2958_s1 + $0x4d0] ss:$8 sps:$4 sm:$0xff]  }
  0x71   :  { %1514 = vmatprep.subr.bf16.mxu1 %v2086_v59  ;;  %v2172_v59 = vld [vmem:[%s2958_s1 + $0x5d0] ss:$8 sps:$4 sm:$0xff]  }
  0x73   :  { %1474 = vmatpush2.bf16.msra.mxu0 %v2081_v60  ;;  %v2177_v60 = vld [vmem:[%s2958_s1 + $0x4c4] ss:$8 sps:$4 sm:$0xff]  }
  0x74   :  { %1515 = vmatpush2.bf16.msra.mxu1 %v2084_v61  ;;  %1475 = vmatprep.subr.bf16.mxu0 %v2089_v62  ;;  %v2180_v61 = vld [vmem:[%s2958_s1 + $0x5c4] ss:$8 sps:$4 sm:$0xff]   ;;  %v2175_v62 = vld [vmem:[%s2958_s1 + $0x4c0] ss:$8 sps:$4 sm:$0xff]  }
  0x75   :  { %1516 = vmatprep.subr.bf16.mxu1 %v2092_v63  ;;  %v2178_v63 = vld [vmem:[%s2958_s1 + $0x5c0] ss:$8 sps:$4 sm:$0xff]  }
  0x77   :  { %1476 = vmatpush2.bf16.msra.mxu0 %v2087_v0  ;;  %v2183_v0 = vld [vmem:[%s2958_s1 + $0x4b4] ss:$8 sps:$4 sm:$0xff]  }
  0x78   :  { %1517 = vmatpush2.bf16.msra.mxu1 %v2090_v1  ;;  %1477 = vmatprep.subr.bf16.mxu0 %v2095_v2  ;;  %v2186_v1 = vld [vmem:[%s2958_s1 + $0x5b4] ss:$8 sps:$4 sm:$0xff]   ;;  %v2181_v2 = vld [vmem:[%s2958_s1 + $0x4b0] ss:$8 sps:$4 sm:$0xff]  }
  0x79   :  { %1518 = vmatprep.subr.bf16.mxu1 %v2098_v3  ;;  %v2184_v3 = vld [vmem:[%s2958_s1 + $0x5b0] ss:$8 sps:$4 sm:$0xff]  }
  0x7b   :  { %1478 = vmatpush2.bf16.msra.mxu0 %v2093_v4  ;;  %v2189_v4 = vld [vmem:[%s2958_s1 + $0x4a4] ss:$8 sps:$4 sm:$0xff]  }
  0x7c   :  { %1519 = vmatpush2.bf16.msra.mxu1 %v2096_v5  ;;  %1479 = vmatprep.subr.bf16.mxu0 %v2101_v6  ;;  %v2192_v5 = vld [vmem:[%s2958_s1 + $0x5a4] ss:$8 sps:$4 sm:$0xff]   ;;  %v2187_v6 = vld [vmem:[%s2958_s1 + $0x4a0] ss:$8 sps:$4 sm:$0xff]  }
  0x7d   :  { %1520 = vmatprep.subr.bf16.mxu1 %v2104_v7  ;;  %v2190_v7 = vld [vmem:[%s2958_s1 + $0x5a0] ss:$8 sps:$4 sm:$0xff]  }
  0x7f   :  { %1480 = vmatpush2.bf16.msra.mxu0 %v2099_v8  ;;  %v2195_v8 = vld [vmem:[%s2958_s1 + $0x494] ss:$8 sps:$4 sm:$0xff]  }
  0x80   :  { %1521 = vmatpush2.bf16.msra.mxu1 %v2102_v9  ;;  %1531 = vmatprep.subr.bf16.mxu0 %v2109_v10  ;;  %v2198_v9 = vld [vmem:[%s2958_s1 + $0x594] ss:$8 sps:$4 sm:$0xff]   ;;  %v2193_v10 = vld [vmem:[%s2958_s1 + $0x490] ss:$8 sps:$4 sm:$0xff]  }
  0x81   :  { %1572 = vmatprep.subr.bf16.mxu1 %v2114_v11  ;;  %v2196_v11 = vld [vmem:[%s2958_s1 + $0x590] ss:$8 sps:$4 sm:$0xff]  }
  0x82   :  { %1482 = vmatmul.mubr.bf16.vlgmr.msra.gmra.mxu0 %v1680_v12  ;;  %v2201_v12 = vld [vmem:[%s2958_s1 + $0x484] ss:$8 sps:$4 sm:$0xff]  }
  0x83   :  { %1523 = vmatmul.mubr.bf16.vlgmr.msra.gmra.mxu1 %v1682_v14  ;;  %1532 = vmatpush1.bf16.msra.mxu0 %v2107_v13  ;;  %v2204_v13 = vld [vmem:[%s2958_s1 + $0x584] ss:$8 sps:$4 sm:$0xff]   ;;  %v2199_v14 = vld [vmem:[%s2958_s1 + $0x480] ss:$8 sps:$4 sm:$0xff]  }
  0x84   :  { %1573 = vmatpush1.bf16.msra.mxu1 %v2112_v15  ;;  %1533 = vmatprep.subr.bf16.mxu0 %v2117_v16  ;;  %v2202_v15 = vld [vmem:[%s2958_s1 + $0x580] ss:$8 sps:$4 sm:$0xff]   ;;  %v2209_v16 = vld [vmem:[%s2958_s1 + $0x674] ss:$8 sps:$4 sm:$0xff]  }
  0x85   :  { %1574 = vmatprep.subr.bf16.mxu1 %v2120_v17  ;;  %1563 = vmatprep.mubr.bf16.mxu0 %v1685_v19  ;;  %v18_v17 = vld [vmem:[%s2959_s0 + $0x30] sm:$0xff]  ;;  %v1684_v19 = vcombine.low %v2691_v18, %v2691_v18  ;;  %v2212_v18 = vld [vmem:[%s2958_s1 + $0x660] ss:$8 sps:$4 sm:$0xff]  }
  0x86   :  { %1604 = vmatprep.mubr.bf16.mxu1 %v1687_v23  ;;  %v1689_v23 = vcombine.high %v18_v17, %v18_v17 }
  0x87   :  { %1534 = vmatpush1.bf16.msra.mxu0 %v2115_v21  ;;  %v1686_v21 = vcombine.low %v2698_v20, %v2698_v20  ;;  %v2217_v20 = vld [vmem:[%s2958_s1 + $0x654] ss:$8 sps:$4 sm:$0xff]  }
  0x88   :  { %1575 = vmatpush1.bf16.msra.mxu1 %v2118_v22  ;;  %1535 = vmatprep.subr.bf16.mxu0 %v2123_v24  ;;  %v2207_v22 = vld [vmem:[%s2958_s1 + $0x670] ss:$8 sps:$4 sm:$0xff]   ;;  %v2214_v24 = vld [vmem:[%s2958_s1 + $0x664] ss:$8 sps:$4 sm:$0xff]  }
  0x89   :  { %1576 = vmatprep.subr.bf16.mxu1 %v2126_v25  ;;  %v2215_v25 = vld [vmem:[%s2958_s1 + $0x650] ss:$8 sps:$4 sm:$0xff]  }
  0x8b   :  { %1536 = vmatpush1.bf16.msra.mxu0 %v2121_v26  ;;  %v2220_v26 = vld [vmem:[%s2958_s1 + $0x644] ss:$8 sps:$4 sm:$0xff]  }
  0x8c   :  { %1577 = vmatpush1.bf16.msra.mxu1 %v2124_v27  ;;  %1537 = vmatprep.subr.bf16.mxu0 %v2129_v28  ;;  %v2218_v27 = vld [vmem:[%s2958_s1 + $0x640] ss:$8 sps:$4 sm:$0xff]   ;;  %v2223_v28 = vld [vmem:[%s2958_s1 + $0x634] ss:$8 sps:$4 sm:$0xff]  }
  0x8d   :  { %1578 = vmatprep.subr.bf16.mxu1 %v2132_v29  ;;  %v2221_v29 = vld [vmem:[%s2958_s1 + $0x630] ss:$8 sps:$4 sm:$0xff]  }
  0x8f   :  { %1538 = vmatpush1.bf16.msra.mxu0 %v2127_v30  ;;  %v2226_v30 = vld [vmem:[%s2958_s1 + $0x624] ss:$8 sps:$4 sm:$0xff]  }
  0x90   :  { %1579 = vmatpush1.bf16.msra.mxu1 %v2130_v31  ;;  %1539 = vmatprep.subr.bf16.mxu0 %v2135_v32  ;;  %v2224_v31 = vld [vmem:[%s2958_s1 + $0x620] ss:$8 sps:$4 sm:$0xff]   ;;  %v2229_v32 = vld [vmem:[%s2958_s1 + $0x614] ss:$8 sps:$4 sm:$0xff]  }
  0x91   :  { %1580 = vmatprep.subr.bf16.mxu1 %v2138_v33  ;;  %v2227_v33 = vld [vmem:[%s2958_s1 + $0x610] ss:$8 sps:$4 sm:$0xff]  }
  0x93   :  { %1540 = vmatpush1.bf16.msra.mxu0 %v2133_v34  ;;  %v2232_v34 = vld [vmem:[%s2958_s1 + $0x604] ss:$8 sps:$4 sm:$0xff]  }
  0x94   :  { %1581 = vmatpush1.bf16.msra.mxu1 %v2136_v35  ;;  %1541 = vmatprep.subr.bf16.mxu0 %v2141_v36  ;;  %v2230_v35 = vld [vmem:[%s2958_s1 + $0x600] ss:$8 sps:$4 sm:$0xff]   ;;  %v2235_v36 = vld [vmem:[%s2958_s1 + $0x6b4] ss:$8 sps:$4 sm:$0xff]  }
  0x95   :  { %1582 = vmatprep.subr.bf16.mxu1 %v2144_v37  ;;  %v2233_v37 = vld [vmem:[%s2958_s1 + $0x6b0] ss:$8 sps:$4 sm:$0xff]  }
  0x97   :  { %1542 = vmatpush1.bf16.msra.mxu0 %v2139_v38  ;;  %v2238_v38 = vld [vmem:[%s2958_s1 + $0x6a4] ss:$8 sps:$4 sm:$0xff]  }
  0x98   :  { %1583 = vmatpush1.bf16.msra.mxu1 %v2142_v39  ;;  %1543 = vmatprep.subr.bf16.mxu0 %v2147_v40  ;;  %v2236_v39 = vld [vmem:[%s2958_s1 + $0x6a0] ss:$8 sps:$4 sm:$0xff]   ;;  %v2241_v40 = vld [vmem:[%s2958_s1 + $0x694] ss:$8 sps:$4 sm:$0xff]  }
  0x99   :  { %1584 = vmatprep.subr.bf16.mxu1 %v2150_v41  ;;  %v2239_v41 = vld [vmem:[%s2958_s1 + $0x690] ss:$8 sps:$4 sm:$0xff]  }
  0x9b   :  { %1544 = vmatpush1.bf16.msra.mxu0 %v2145_v42  ;;  %v2244_v42 = vld [vmem:[%s2958_s1 + $0x684] ss:$8 sps:$4 sm:$0xff]  }
  0x9c   :  { %1585 = vmatpush1.bf16.msra.mxu1 %v2148_v43  ;;  %1545 = vmatprep.subr.bf16.mxu0 %v2153_v44  ;;  %v2242_v43 = vld [vmem:[%s2958_s1 + $0x680] ss:$8 sps:$4 sm:$0xff]   ;;  %v1688_v44 = vcombine.low %v18_v17, %v18_v17 }
  0x9d   :  { %1586 = vmatprep.subr.bf16.mxu1 %v2156_v45 }
  0x9f   :  { %1546 = vmatpush1.bf16.msra.mxu0 %v2151_v46 }
  0xa0   :  { %1587 = vmatpush1.bf16.msra.mxu1 %v2154_v47  ;;  %1547 = vmatprep.subr.bf16.mxu0 %v2159_v48 }
  0xa1   :  { %1588 = vmatprep.subr.bf16.mxu1 %v2162_v49 }
  0xa3   :  { %1548 = vmatpush2.bf16.msra.mxu0 %v2157_v50 }
  0xa4   :  { %1589 = vmatpush2.bf16.msra.mxu1 %v2160_v51  ;;  %1549 = vmatprep.subr.bf16.mxu0 %v2165_v52 }
  0xa5   :  { %1590 = vmatprep.subr.bf16.mxu1 %v2168_v53 }
  0xa7   :  { %1550 = vmatpush2.bf16.msra.mxu0 %v2163_v54 }
  0xa8   :  { %1591 = vmatpush2.bf16.msra.mxu1 %v2166_v55  ;;  %1551 = vmatprep.subr.bf16.mxu0 %v2171_v56 }
  0xa9   :  { %1592 = vmatprep.subr.bf16.mxu1 %v2174_v57 }
  0xab   :  { %1552 = vmatpush2.bf16.msra.mxu0 %v2169_v58 }
  0xac   :  { %1593 = vmatpush2.bf16.msra.mxu1 %v2172_v59  ;;  %1553 = vmatprep.subr.bf16.mxu0 %v2177_v60 }
  0xad   :  { %1594 = vmatprep.subr.bf16.mxu1 %v2180_v61 }
  0xaf   :  { %1554 = vmatpush2.bf16.msra.mxu0 %v2175_v62 }
  0xb0   :  { %1595 = vmatpush2.bf16.msra.mxu1 %v2178_v63  ;;  %1555 = vmatprep.subr.bf16.mxu0 %v2183_v0 }
  0xb1   :  { %1596 = vmatprep.subr.bf16.mxu1 %v2186_v1 }
  0xb3   :  { %1556 = vmatpush2.bf16.msra.mxu0 %v2181_v2 }
  0xb4   :  { %1597 = vmatpush2.bf16.msra.mxu1 %v2184_v3  ;;  %1557 = vmatprep.subr.bf16.mxu0 %v2189_v4 }
  0xb5   :  { %1598 = vmatprep.subr.bf16.mxu1 %v2192_v5 }
  0xb7   :  { %1558 = vmatpush2.bf16.msra.mxu0 %v2187_v6 }
  0xb8   :  { %1599 = vmatpush2.bf16.msra.mxu1 %v2190_v7  ;;  %1559 = vmatprep.subr.bf16.mxu0 %v2195_v8 }
  0xb9   :  { %1600 = vmatprep.subr.bf16.mxu1 %v2198_v9 }
  0xbb   :  { %1560 = vmatpush2.bf16.msra.mxu0 %v2193_v10 }
  0xbc   :  { %1601 = vmatpush2.bf16.msra.mxu1 %v2196_v11  ;;  %1561 = vmatprep.subr.bf16.mxu0 %v2201_v12 }
  0xbd   :  { %1602 = vmatprep.subr.bf16.mxu1 %v2204_v13 }
  0xbf   :  { %1562 = vmatpush2.bf16.msra.mxu0 %v2199_v14 }
  0xc0   :  { %1603 = vmatpush2.bf16.msra.mxu1 %v2202_v15  ;;  %1613 = vmatprep.subr.bf16.mxu0 %v2209_v16 }
  0xc2   :  { %1564 = vmatmul.mubr.bf16.vlgmr.msra.gmra.mxu0 %v1684_v19 }
  0xc3   :  { %1605 = vmatmul.mubr.bf16.vlgmr.msra.gmra.mxu1 %v1686_v21  ;;  %1614 = vmatpush1.bf16.msra.mxu0 %v2207_v22 }
  0xc4   :  { %1906 = vmatprep.mubr.msk.bf16.mxu0 %vm1363_vm0, %v1689_v23  ;;  %1615 = vmatprep.subr.bf16.mxu0 %v2214_v24 }
  0xc7   :  { %1616 = vmatpush1.bf16.msra.mxu0 %v2212_v18 }
  0xc8   :  { %1617 = vmatprep.subr.bf16.mxu0 %v2217_v20 }
  0xcb   :  { %1618 = vmatpush1.bf16.msra.mxu0 %v2215_v25 }
  0xcc   :  { %1619 = vmatprep.subr.bf16.mxu0 %v2220_v26 }
  0xcf   :  { %1620 = vmatpush1.bf16.msra.mxu0 %v2218_v27 }
  0xd0   :  { %1621 = vmatprep.subr.bf16.mxu0 %v2223_v28 }
  0xd3   :  { %1622 = vmatpush1.bf16.msra.mxu0 %v2221_v29 }
  0xd4   :  { %1623 = vmatprep.subr.bf16.mxu0 %v2226_v30 }
  0xd7   :  { %1624 = vmatpush1.bf16.msra.mxu0 %v2224_v31 }
  0xd8   :  { %1625 = vmatprep.subr.bf16.mxu0 %v2229_v32 }
  0xdb   :  { %1626 = vmatpush1.bf16.msra.mxu0 %v2227_v33 }
  0xdc   :  { %1627 = vmatprep.subr.bf16.mxu0 %v2232_v34 }
  0xdf   :  { %1628 = vmatpush1.bf16.msra.mxu0 %v2230_v35 }
  0xe0   :  { %1637 = vmatprep.subr.bf16.mxu0 %v2235_v36 }
  0xe3   :  { %1638 = vmatpush2.bf16.msra.mxu0 %v2233_v37 }
  0xe4   :  { %1639 = vmatprep.subr.bf16.mxu0 %v2238_v38 }
  0xe7   :  { %1640 = vmatpush2.bf16.msra.mxu0 %v2236_v39 }
  0xe8   :  { %1641 = vmatprep.subr.bf16.mxu0 %v2241_v40 }
  0xeb   :  { %1642 = vmatpush2.bf16.msra.mxu0 %v2239_v41 }
  0xec   :  { %1643 = vmatprep.subr.bf16.mxu0 %v2244_v42 }
  0xef   :  { %1644 = vmatpush2.bf16.msra.mxu0 %v2242_v43 }
  0xf2   :  { %1646 = vmatmul.mubr.bf16.vlgmr.msra.gmra.mxu0 %v1688_v44 }
 0x102   :  { %v1401_v45 = vpop.f32.mrf.mxu0 }
 0x103   :  { %v1442_v46 = vpop.f32.mrf.mxu1 }
 0x104   :  { %v1443_v47 = vadd.f32 %v1442_v46, %v1401_v45  ;;  %v1403_v48 = vpop.f32.mrf.mxu0 }
 0x105   :  { %v1444_v49 = vpop.f32.mrf.mxu1 }
 0x106   :  { %v1445_v50 = vadd.f32 %v1444_v49, %v1403_v48  ;;  %v1405_v51 = vpop.f32.mrf.mxu0 }
 0x107   :  { %v1446_v52 = vpop.f32.mrf.mxu1 }
 0x108   :  { %v1406_v53 = vpop.f32.mrf.mxu0 }
 0x109   :  { %v1447_v54 = vpop.f32.mrf.mxu1 }
 0x142   :  { %v1483_v55 = vpop.f32.mrf.mxu0 }
 0x143   :  { %v1524_v56 = vpop.f32.mrf.mxu1  ;;  %v1484_v57 = vadd.f32 %v1483_v55, %v1443_v47 }
 0x144   :  { %v1485_v58 = vpop.f32.mrf.mxu0 }
 0x145   :  { %v1526_v59 = vpop.f32.mrf.mxu1  ;;  %v1486_v60 = vadd.f32 %v1485_v58, %v1445_v50  ;;  %v1525_v61 = vadd.f32 %v1524_v56, %v1484_v57 }
 0x146   :  { %v1487_v62 = vpop.f32.mrf.mxu0 }
 0x147   :  { %v1528_v63 = vpop.f32.mrf.mxu1  ;;  %v1527_v0 = vadd.f32 %v1526_v59, %v1486_v60 }
 0x148   :  { %v1488_v1 = vpop.f32.mrf.mxu0 }
 0x149   :  { %v1529_v2 = vpop.f32.mrf.mxu1 }
 0x182   :  { %v1565_v3 = vpop.f32.mrf.mxu0 }
 0x183   :  { %v1606_v4 = vpop.f32.mrf.mxu1  ;;  %v1566_v11 = vadd.f32 %v1565_v3, %v1525_v61 }
 0x184   :  { %v1567_v5 = vpop.f32.mrf.mxu0 }
 0x185   :  { %v1608_v6 = vpop.f32.mrf.mxu1  ;;  %v1568_v12 = vadd.f32 %v1567_v5, %v1527_v0  ;;  %v1607_v13 = vadd.f32 %v1606_v4, %v1566_v11 }
 0x186   :  { %v1569_v7 = vpop.f32.mrf.mxu0 }
 0x187   :  { %v1610_v8 = vpop.f32.mrf.mxu1  ;;  %v1609_v15 = vadd.f32 %v1608_v6, %v1568_v12 }
 0x188   :  { %v1570_v9 = vpop.f32.mrf.mxu0 }
 0x189   :  { %v1611_v10 = vpop.f32.mrf.mxu1 }
 0x1b2   :  { %v1647_v14 = vpop.f32.mrf.mxu0 }
 0x1b3   :  { %v1648_v16 = vadd.f32 %v1647_v14, %v1607_v13 }
 0x1b4   :  { %v1649_v17 = vpop.f32.mrf.mxu0 }
 0x1b5   :  { %v1656_v19 = vmul.f32 0.2, %v1648_v16  ;;  %v1650_v21 = vadd.f32 %v1649_v17, %v1609_v15  ;;  %vm1654_vm1 = vcmp.gt.f32.partialorder %v1648_v16, 0.0 }
 0x1b6   :  { %v1651_v22 = vpop.f32.mrf.mxu0 }
 0x1b7   :  { %vm1655_vm4 = vcmp.gt.f32.partialorder %v1650_v21, 0.0  ;;  %v1657_v23 = vmul.f32 0.2, %v1650_v21  ;;  %v1658_v18 = vsel %vm1654_vm1, %v1648_v16, %v1656_v19 }
 0x1b8   :  { %v1652_v24 = vpop.f32.mrf.mxu0 }
 0x1b9   :  { %v1659_v20 = vsel %vm1655_vm4, %v1650_v21, %v1657_v23 }
 0x1ba   :  { %v1908_v25 = vpack.c.bf16 %v1659_v20, %v1658_v18 }
 0x1bc   :  { %1671 = vst.msk [vmem:[%s2960_s2] sm:$0xff] %vm1670_vm5, %v1908_v25 }

</bundles_post_ra>
